<compile_context>
chip_gen: v6e
topology: v6e:2x2x1
jax: 0.10.0
libtpu: 0.0.40
codegen_flags: <defaults>
</compile_context>

<pallas_src>
import jax
import jax.numpy as jnp
from jax.experimental import pallas as pl
from jax.experimental.pallas import tpu as pltpu


# ---------------------------------------------------------------------------
# Kernels
# ---------------------------------------------------------------------------
def _softplus_f32(z):
    # Numerically stable softplus: max(z, 0) + log1p(exp(-|z|)).
    return jnp.maximum(z, 0.0) + jnp.log1p(jnp.exp(-jnp.abs(z)))


def _sae_resident_kernel(x_ref, we_ref, be_ref, wd_ref, bd_ref,
                         rec_ref, feat_ref):
    # x_ref:  (TB, D)  fp32    we_ref: (D, F)  bf16   be_ref: (1, F) fp32
    # wd_ref: (F, D)   bf16    bd_ref: (1, D)  fp32
    # rec_ref:(TB, D)  fp32    feat_ref:(TB, F) bf16
    x = x_ref[...].astype(jnp.bfloat16)
    pre = jnp.dot(x, we_ref[...], preferred_element_type=jnp.float32)
    z = pre + be_ref[...] - 4.0
    feat = _softplus_f32(z).astype(jnp.bfloat16)
    feat_ref[...] = feat
    rec = jnp.dot(feat, wd_ref[...], preferred_element_type=jnp.float32)
    rec_ref[...] = rec + bd_ref[...]


def _sae_tiled_kernel(x_ref, we_ref, be_ref, wd_ref, bd_ref,
                      rec_ref, feat_ref):
    # Grid: (batch tiles b [parallel], feature tiles f [arbitrary/innermost]).
    # rec_ref's block index is (b, 0) -> it stays VMEM-resident across f and
    # acts as the fp32 accumulator directly (no scratch).
    f = pl.program_id(1)

    x = x_ref[...].astype(jnp.bfloat16)
    pre = jnp.dot(x, we_ref[...], preferred_element_type=jnp.float32)
    z = pre + be_ref[...] - 4.0
    feat = _softplus_f32(z).astype(jnp.bfloat16)
    feat_ref[...] = feat

    partial = jnp.dot(feat, wd_ref[...], preferred_element_type=jnp.float32)

    @pl.when(f == 0)
    def _():
        rec_ref[...] = partial + bd_ref[...]

    @pl.when(f > 0)
    def _():
        rec_ref[...] += partial


# ---------------------------------------------------------------------------
# Helpers
# ---------------------------------------------------------------------------
def _round_up(x, m):
    return ((x + m - 1) // m) * m


def _pad_2d(a, rows, cols, value=0.0):
    pr, pc = rows - a.shape[0], cols - a.shape[1]
    if pr or pc:
        a = jnp.pad(a, ((0, pr), (0, pc)), constant_values=value)
    return a


def _vmem_limit_bytes():
    cap = 64 * 2 ** 20  # conservative fallback = v7x per-TC physical VMEM
    try:
        cap = int(pltpu.get_tpu_info().vmem_capacity_bytes)
    except Exception:
        pass
    return int(cap * 0.85)  # ~15% headroom for compiler scratch / semaphores


def _fits_resident(tb, d_pad, f_pad, budget):
    # Conservative: assume every BlockSpec is double-buffered.
    w = 2 * (d_pad * f_pad * 2 + f_pad * d_pad * 2)        # bf16 enc + dec weights
    io = 2 * (tb * d_pad * 4)                              # x tile (fp32)
    io += 2 * (tb * f_pad * 2) + 2 * (tb * d_pad * 4)      # feat (bf16) + rec (fp32)
    io += 2 * (f_pad + d_pad) * 4                          # biases
    return w + io <= budget


def prepare_sae_weights(w_enc_t, b_enc, w_dec_eff_t, b_dec):
    """Pad + cast the (static) weights once, outside the per-call hot path."""
    D, F = w_enc_t.shape
    d_pad = _round_up(D, 128)
    f_pad = _round_up(F, 128)
    we = _pad_2d(w_enc_t.astype(jnp.float32), d_pad, f_pad).astype(jnp.bfloat16)
    wd = _pad_2d(w_dec_eff_t.astype(jnp.float32), f_pad, d_pad).astype(jnp.bfloat16)
    # Pad b_enc with a large negative value so padded feature columns are ~0.
    be = jnp.pad(b_enc.reshape(1, F).astype(jnp.float32),
                 ((0, 0), (0, f_pad - F)), constant_values=-30.0)
    bd = _pad_2d(b_dec.reshape(1, D).astype(jnp.float32), 1, d_pad)
    return {"we": we, "be": be, "wd": wd, "bd": bd,
            "D": D, "F": F, "D_pad": d_pad, "F_pad": f_pad}


# ---------------------------------------------------------------------------
# Forward wrapper
# ---------------------------------------------------------------------------
def sae_forward_pallas(img, prepped, *, tb=None, tf=None,
                       force_tiled=False, weight_buffers=2):
    """Fused encoder -> softplus -> decoder.  Returns (rec fp32, feat bf16)."""
    B, D = img.shape
    assert D == prepped["D"]
    F, D_pad, F_pad = prepped["F"], prepped["D_pad"], prepped["F_pad"]

    # Batch tile: MXU-filling, but split >= 2 ways when B allows (v7x megacore).
    if tb is None:
        tb = 256
        while tb > 16 and _round_up(B, tb) // tb < 2:
            tb //= 2
    tb = max(16, tb)
    B_pad = _round_up(B, tb)
    nb = B_pad // tb

    x_p = _pad_2d(img.astype(jnp.float32), B_pad, D_pad)

    vmem_limit = _vmem_limit_bytes()
    resident = (not force_tiled) and _fits_resident(
        tb, D_pad, F_pad, int(0.75 * vmem_limit))

    out_shape = (
        jax.ShapeDtypeStruct((B_pad, D_pad), jnp.float32),   # rec
        jax.ShapeDtypeStruct((B_pad, F_pad), jnp.bfloat16),  # feat (bf16 writeback)
    )

    if resident:
        grid_spec = pltpu.PrefetchScalarGridSpec(
            num_scalar_prefetch=0,
            grid=(nb,),
            in_specs=[
                pl.BlockSpec((tb, D_pad), lambda b: (b, 0)),       # x
                pl.BlockSpec((D_pad, F_pad), lambda b: (0, 0)),    # W_enc (resident)
                pl.BlockSpec((1, F_pad), lambda b: (0, 0)),        # b_enc
                pl.BlockSpec((F_pad, D_pad), lambda b: (0, 0)),    # W_dec (resident)
                pl.BlockSpec((1, D_pad), lambda b: (0, 0)),        # b_dec
            ],
            out_specs=(
                pl.BlockSpec((tb, D_pad), lambda b: (b, 0)),       # rec
                pl.BlockSpec((tb, F_pad), lambda b: (b, 0)),       # feat
            ),
        )
        kernel = _sae_resident_kernel
        semantics = ("parallel",)
    else:
        if tf is None:
            tf = min(512, F_pad)
        while F_pad % tf:       # tf must divide F_pad (both multiples of 128)
            tf -= 128
        tf = max(128, tf)
        nf = F_pad // tf
        w_kw = {} if weight_buffers == 2 else {
            "pipeline_mode": pl.Buffered(weight_buffers)}
        grid_spec = pltpu.PrefetchScalarGridSpec(
            num_scalar_prefetch=0,
            grid=(nb, nf),
            in_specs=[
                pl.BlockSpec((tb, D_pad), lambda b, f: (b, 0)),          # x (resident over f)
                pl.BlockSpec((D_pad, tf), lambda b, f: (0, f), **w_kw),  # W_enc col tile
                pl.BlockSpec((1, tf), lambda b, f: (0, f)),              # b_enc tile
                pl.BlockSpec((tf, D_pad), lambda b, f: (f, 0), **w_kw),  # W_dec row tile
                pl.BlockSpec((1, D_pad), lambda b, f: (0, 0)),           # b_dec
            ],
            out_specs=(
                pl.BlockSpec((tb, D_pad), lambda b, f: (b, 0)),          # rec (accumulator)
                pl.BlockSpec((tb, tf), lambda b, f: (b, f)),             # feat
            ),
        )
        kernel = _sae_tiled_kernel
        semantics = ("parallel", "arbitrary")

    rec_p, feat_p = pl.pallas_call(
        kernel,
        out_shape=out_shape,
        grid_spec=grid_spec,
        compiler_params=pltpu.CompilerParams(
            dimension_semantics=semantics,
            vmem_limit_bytes=vmem_limit,
        ),
    )(x_p, prepped["we"], prepped["be"], prepped["wd"], prepped["bd"])

    return rec_p[:B, :D], feat_p[:B, :F]


def partially_supervised_sae_net(img, prepped, reg_dim):
    """Mirror of PartiallySupervisedSAENet.forward."""
    rec, feat = sae_forward_pallas(img, prepped)
    return {
        "reconstructed": rec,
        "reg": feat[:, :reg_dim],
        "features": feat[:, reg_dim:],
    }


def init_params(key, activation_output_dim, n_features):
    """Deterministic synthetic init matching the PyTorch __init__ semantics."""
    D, F = activation_output_dim, n_features
    (k_dec,) = jax.random.split(key, 1)
    # nn.Linear(width, input_dim): weight shape (D, F), init U(-1/sqrt(F), 1/sqrt(F))
    bound = 1.0 / jnp.sqrt(jnp.float32(F))
    dec_v = jax.random.uniform(k_dec, (D, F), jnp.float32, -bound, bound)
    # enc.weight = dec.weight.t()  -> enc weight is (F, D); kernel wants (D, F) = dec_v
    w_enc_t = dec_v
    b_enc = jnp.zeros((F,), jnp.float32)
    b_dec = jnp.zeros((D,), jnp.float32)
    # weight_norm(dec, 'weight'): W = g * v / ||v||_row, g init = ||v||_row,
    # so at init the effective decoder weight equals dec_v.
    row_norm = jnp.sqrt(jnp.sum(dec_v * dec_v, axis=1, keepdims=True))
    w_dec_eff = row_norm * dec_v / row_norm   # (D, F)
    return {
        "w_enc_t": w_enc_t,
        "b_enc": b_enc,
        "w_dec_eff_t": w_dec_eff.T,           # (F, D) — kernel layout (in, out)
        "b_dec": b_dec,
    }


if __name__ == "__main__":
    # Small but tiling-exercising shapes: 2 batch tiles; 2 feature tiles in the
    # forced-tiled path. Weights (1 MiB bf16) fit resident in the default path.
    B = 512        # batch
    D = 256        # activation_output_dim
    F = 1024       # n_features
    REG_DIM = 128  # reg_output_dim (multiple of 128 -> aligned slice)

    key = jax.random.PRNGKey(0)
    k_x, k_p = jax.random.split(key)
    img = jax.random.normal(k_x, (B, D), jnp.float32)
    params = init_params(k_p, D, F)
    prepped = prepare_sae_weights(params["w_enc_t"], params["b_enc"],
                                  params["w_dec_eff_t"], params["b_dec"])

    # Default (resident-weights) path.
    out = partially_supervised_sae_net(img, prepped, REG_DIM)
    jax.block_until_ready(out)

    # Also exercise the f-tiled accumulation path explicitly.
    rec_t, feat_t = sae_forward_pallas(img, prepped, force_tiled=True)
    jax.block_until_ready((rec_t, feat_t))

    # Pure-fp32 JAX reference of the same forward.  bf16 matmul inputs
    # (fp32 accumulation) + bf16 feat output -> loosened tolerances.
    pre_ref = img @ params["w_enc_t"] + params["b_enc"]
    feat_ref = jax.nn.softplus(pre_ref - 4.0)
    rec_ref = feat_ref @ params["w_dec_eff_t"] + params["b_dec"]

    assert out["reconstructed"].shape == (B, D)
    assert out["reg"].shape == (B, REG_DIM)
    assert out["features"].shape == (B, F - REG_DIM)

    feat_full = jnp.concatenate([out["reg"], out["features"]], axis=1)
    assert jnp.allclose(out["reconstructed"], rec_ref, atol=3e-3, rtol=3e-2)
    assert jnp.allclose(feat_full.astype(jnp.float32), feat_ref,
                        atol=2e-3, rtol=3e-2)
    assert jnp.allclose(rec_t, rec_ref, atol=3e-3, rtol=3e-2)
    assert jnp.allclose(feat_t.astype(jnp.float32), feat_ref,
                        atol=2e-3, rtol=3e-2)
    # Both paths agree with each other.
    assert jnp.allclose(rec_t, out["reconstructed"], atol=2e-3, rtol=2e-2)

    print("KERNEL_OK")
</pallas_src>

<mosaic_0001>
module attributes {stable_mosaic.version = 11 : i64} {
  func.func @_sae_resident_kernel(%arg0: i32, %arg1: memref<256x256xf32, #tpu.memory_space<vmem>>, %arg2: memref<256x1024xbf16, #tpu.memory_space<vmem>>, %arg3: memref<1x1024xf32, #tpu.memory_space<vmem>>, %arg4: memref<1024x256xbf16, #tpu.memory_space<vmem>>, %arg5: memref<1x256xf32, #tpu.memory_space<vmem>>, %arg6: memref<256x256xf32, #tpu.memory_space<vmem>>, %arg7: memref<256x1024xbf16, #tpu.memory_space<vmem>>) attributes {dimension_semantics = [#tpu.dimension_semantics<parallel>], iteration_bounds = array<i64: 2>, scalar_prefetch = 0 : i64, scratch_operands = 0 : i64, tpu.core_type = #tpu.core_type<tc>, window_params = [{transform_indices = @transform_0, window_bounds = array<i64: 256, 256>}, {pipeline_mode = #tpu.pipeline_mode<synchronous>, transform_indices = @transform_1, window_bounds = array<i64: 256, 1024>}, {pipeline_mode = #tpu.pipeline_mode<synchronous>, transform_indices = @transform_2, window_bounds = array<i64: 1, 1024>}, {pipeline_mode = #tpu.pipeline_mode<synchronous>, transform_indices = @transform_3, window_bounds = array<i64: 1024, 256>}, {pipeline_mode = #tpu.pipeline_mode<synchronous>, transform_indices = @transform_4, window_bounds = array<i64: 1, 256>}, {transform_indices = @transform_5, window_bounds = array<i64: 256, 256>}, {transform_indices = @transform_6, window_bounds = array<i64: 256, 1024>}]} {
    %c0 = arith.constant 0 : index
    %c0_0 = arith.constant 0 : index
    %0 = vector.load %arg1[%c0, %c0_0] : memref<256x256xf32, #tpu.memory_space<vmem>>, vector<256x256xf32>
    %1 = arith.truncf %0 : vector<256x256xf32> to vector<256x256xbf16>
    %c0_1 = arith.constant 0 : index
    %c0_2 = arith.constant 0 : index
    %2 = vector.load %arg2[%c0_1, %c0_2] : memref<256x1024xbf16, #tpu.memory_space<vmem>>, vector<256x1024xbf16>
    %cst = arith.constant dense<0.000000e+00> : vector<256x1024xf32>
    %3 = tpu.matmul %1, %2, %cst {dimension_numbers = #tpu.dot_dimension_numbers<[1], [0], [0], [1], [0, 0, 1, 1], [], []>} : vector<256x256xbf16>, vector<256x1024xbf16>, vector<256x1024xf32> -> vector<256x1024xf32>
    %c0_3 = arith.constant 0 : index
    %c0_4 = arith.constant 0 : index
    %4 = vector.load %arg3[%c0_3, %c0_4] : memref<1x1024xf32, #tpu.memory_space<vmem>>, vector<1x1024xf32>
    %5 = vector.broadcast %4 : vector<1x1024xf32> to vector<256x1024xf32>
    %6 = arith.addf %3, %5 : vector<256x1024xf32>
    %cst_5 = arith.constant 4.000000e+00 : f32
    %7 = vector.broadcast %cst_5 : f32 to vector<256x1024xf32>
    %8 = arith.subf %6, %7 : vector<256x1024xf32>
    %cst_6 = arith.constant 0.000000e+00 : f32
    %9 = vector.broadcast %cst_6 : f32 to vector<256x1024xf32>
    %10 = arith.maximumf %8, %9 : vector<256x1024xf32>
    %11 = math.absf %8 : vector<256x1024xf32>
    %cst_7 = arith.constant 0.000000e+00 : f32
    %12 = vector.broadcast %cst_7 : f32 to vector<256x1024xf32>
    %13 = arith.subf %12, %11 : vector<256x1024xf32>
    %14 = math.exp %13 : vector<256x1024xf32>
    %15 = math.log1p %14 : vector<256x1024xf32>
    %16 = arith.addf %10, %15 : vector<256x1024xf32>
    %17 = arith.truncf %16 : vector<256x1024xf32> to vector<256x1024xbf16>
    %c0_8 = arith.constant 0 : index
    %c0_9 = arith.constant 0 : index
    %18 = vector.load %arg7[%c0_8, %c0_9] : memref<256x1024xbf16, #tpu.memory_space<vmem>>, vector<256x1024xbf16>
    tpu.vector_store %arg7[%c0_8, %c0_9], %17 {strides = array<i32>} : memref<256x1024xbf16, #tpu.memory_space<vmem>>, vector<256x1024xbf16>,
    %c0_10 = arith.constant 0 : index
    %c0_11 = arith.constant 0 : index
    %19 = vector.load %arg4[%c0_10, %c0_11] : memref<1024x256xbf16, #tpu.memory_space<vmem>>, vector<1024x256xbf16>
    %cst_12 = arith.constant dense<0.000000e+00> : vector<256x256xf32>
    %20 = tpu.matmul %17, %19, %cst_12 {dimension_numbers = #tpu.dot_dimension_numbers<[1], [0], [0], [1], [0, 0, 1, 1], [], []>} : vector<256x1024xbf16>, vector<1024x256xbf16>, vector<256x256xf32> -> vector<256x256xf32>
    %c0_13 = arith.constant 0 : index
    %c0_14 = arith.constant 0 : index
    %21 = vector.load %arg5[%c0_13, %c0_14] : memref<1x256xf32, #tpu.memory_space<vmem>>, vector<1x256xf32>
    %22 = vector.broadcast %21 : vector<1x256xf32> to vector<256x256xf32>
    %23 = arith.addf %20, %22 : vector<256x256xf32>
    %c0_15 = arith.constant 0 : index
    %c0_16 = arith.constant 0 : index
    %24 = vector.load %arg6[%c0_15, %c0_16] : memref<256x256xf32, #tpu.memory_space<vmem>>, vector<256x256xf32>
    tpu.vector_store %arg6[%c0_15, %c0_16], %23 {strides = array<i32>} : memref<256x256xf32, #tpu.memory_space<vmem>>, vector<256x256xf32>,
    return
  }
  func.func @transform_0(%arg0: i32) -> (i32, i32) {
    %c0_i32 = arith.constant 0 : i32
    %c0_i32_0 = arith.constant 0 : i32
    return %arg0, %c0_i32 : i32, i32
  }
  func.func @transform_1(%arg0: i32) -> (i32, i32) {
    %c0_i32 = arith.constant 0 : i32
    %c0_i32_0 = arith.constant 0 : i32
    %c0_i32_1 = arith.constant 0 : i32
    return %c0_i32, %c0_i32_0 : i32, i32
  }
  func.func @transform_2(%arg0: i32) -> (i32, i32) {
    %c0_i32 = arith.constant 0 : i32
    %c0_i32_0 = arith.constant 0 : i32
    %c0_i32_1 = arith.constant 0 : i32
    return %c0_i32, %c0_i32_0 : i32, i32
  }
  func.func @transform_3(%arg0: i32) -> (i32, i32) {
    %c0_i32 = arith.constant 0 : i32
    %c0_i32_0 = arith.constant 0 : i32
    %c0_i32_1 = arith.constant 0 : i32
    return %c0_i32, %c0_i32_0 : i32, i32
  }
  func.func @transform_4(%arg0: i32) -> (i32, i32) {
    %c0_i32 = arith.constant 0 : i32
    %c0_i32_0 = arith.constant 0 : i32
    %c0_i32_1 = arith.constant 0 : i32
    return %c0_i32, %c0_i32_0 : i32, i32
  }
  func.func @transform_5(%arg0: i32) -> (i32, i32) {
    %c0_i32 = arith.constant 0 : i32
    %c0_i32_0 = arith.constant 0 : i32
    return %arg0, %c0_i32 : i32, i32
  }
  func.func @transform_6(%arg0: i32) -> (i32, i32) {
    %c0_i32 = arith.constant 0 : i32
    %c0_i32_0 = arith.constant 0 : i32
    return %arg0, %c0_i32 : i32, i32
  }
}

</mosaic_0001>

<bundles_post_ra>
// kernel: tpu_custom_call.1
= control target key start
LH: loop header
LB: loop body
LE: loop exit
PB: predicated region body
PF: predicated region fallthrough
CT: control target
= control target key end

     0   :  { %12 = vsyncpa [#allocation3], 0  ;;  %s18520_s0 = inlined_call_operand.hbm [shape: f32[512,256], index: 0, kind: input, shape index: {}]   ;;  %s18521_s1 = inlined_call_operand.hbm [shape: bf16[256,1024], index: 1, kind: input, shape index: {}]   ;;  %s18522_s2 = inlined_call_operand.hbm [shape: f32[1,1024], index: 2, kind: input, shape index: {}]   ;;  %s18523_s3 = inlined_call_operand.hbm [shape: bf16[1024,256], index: 3, kind: input, shape index: {}]   ;;  %s18524_s4 = inlined_call_operand.vmem [shape: f32[1,256], index: 4, kind: input, shape index: {}]   ;;  %s18525_s5 = inlined_call_operand.hbm [shape: f32[512,256], index: 5, kind: output, shape index: {0}]   ;;  %s18526_s6 = inlined_call_operand.hbm [shape: bf16[512,1024], index: 6, kind: output, shape index: {1}]  }
   0x1   :  { %14 = vsyncpa [#allocation3 + $0x1], 0 }
   0x2   :  { %15 = vsyncpa [#allocation6], 0 }
   0x3   :  { %16 = vsyncpa [#allocation9], 0 }
   0x4   :  { %17 = vsyncpa [#allocation4], 0 }
   0x5   :  { %19 = vsyncpa [#allocation4 + $0x1], 0 }
   0x6   :  { %20 = vsyncpa [#allocation12], 0 }
   0x7   :  { %22 = vsyncpa [#allocation12 + $0x1], 0  ;;  %s11155_s21 = smov 0   ;;  %s11157_s22 = smov 0  }
   0x8   :  { %s11159_s23 = smov 0   ;;  %s11161_s24 = smov 0  }
   0x9 LB: > { %s11176_s25 = sadd.s32 4294967295, %s11102_s24   ;;  %s8784_s26 = sadd.s32 4294967294, %s11102_s24   ;;  %s11102_s24 = sphi %s11161_s24, %s20422_s24   ;;  %s11098_s23 = sphi %s11159_s23, %s20421_s23   ;;  %s11094_s22 = sphi %s11157_s22, %s20420_s22   ;;  %s11090_s21 = sphi %s11155_s21, %s20419_s21  }
   0xa   : > { %p48_p0 = scmp.ne.s32.totalorder %s11094_s22, %s11090_s21  ;;  %p18527_p1 = scmp.eq.s32.totalorder %s11176_s25, 0 }
   0xb   : > { %p162_p3 = scmp.eq.s32.totalorder %s8784_s26, 1  ;;  %p8785_p5 = scmp.ge.s32.totalorder %s11102_s24, 1 }
   0xc   : > { %p11185_p4 = por %p18527_p1, %p48_p0  ;;  %p195_p7 = scmp.lt.s32.totalorder %s11102_s24, 3 }
   0xd   : > { %p11190_p6 = por %p162_p3, %p48_p0  ;;  %s11104_s30 = smov [#allocation5]  }
   0xe   : > { %s18886_s27 = scalar_select %p11185_p4, 1, 0 }
   0xf   : > { %s18887_s28 = scalar_select %p11190_p6, 1, 0 }
  0x10   : > { %p11195_p8 = pnand %p8785_p5, %p195_p7  ;;  %s207_s7 = sshll.u32 %s11104_s30, 4  ;;  %s208_s7 = int_to_ptr.vmem [resolvable:$true] %s207_s7 }
  0x11   : > { %s11105_s9 = smov [#allocation7]   ;;  %s11106_s11 = smov [#allocation8]  }
  0x12   : > { %s18888_s29 = scalar_select %p11195_p8, 1, 0 }
  0x13   : > { %p9603_p9 = pneg %p11195_p8  ;;  %s221_s10 = sshll.u32 %s11105_s9, 4  ;;  %s222_s10 = int_to_ptr.vmem [resolvable:$true] %s221_s10 }
  0x14   : > { %s231_s12 = sshll.u32 %s11106_s11, 4  ;;  %s10905_s13 = scalar_lea.vmem %s208_s7, 16384  ;;  %s232_s12 = int_to_ptr.vmem [resolvable:$true] %s231_s12 }
  0x15   : > { %p11204_p11 = pnand %p9603_p9, %p18527_p1  ;;  %p10906_p13 = scmp.ne.s32.totalorder %s208_s7, %s10905_s13 }
  0x16   : > { %p10913_p5 = scmp.lt.s32.totalorder %s208_s7, %s208_s7  ;;  %p10914_p7 = scmp.lt.s32.totalorder %s10905_s13, %s10905_s13 }
  0x17   : > { %p10896_p12 = pneg %p11204_p11 }
  0x18   : > { %p10915_p9 = por %p10914_p7, %p10913_p5 }
  0x19   : > { %p10908_p0 = pnand %p10906_p13, %p10896_p12 }
  0x1b   : > { %p10909_p3 = pneg %p10908_p0 }
  0x1d   : > { %p10916_p10 = pnand %p10915_p9, %p10909_p3 }
  0x1f   : > { %10919 = shalt.err (!%p10916_p10)
}
  0x20   : > { %s11107_s14 = smov 512   ;;  %s11108_s15 = smov 32  }
  0x21   : > { %9606 = dma.hbm_to_vmem [thread:$0]  (!%p11204_p11), %s18521_s1, 16384, %s208_s7, [#allocation6], %s11107_s14, %s11107_s14, %s11108_s15  }
  0x22   : > { %s10931_s18 = scalar_lea.vmem %s222_s10, 128  ;;  %p10939_p2 = scmp.lt.s32.totalorder %s222_s10, %s222_s10 }
  0x23   : > { %p10932_p1 = scmp.ne.s32.totalorder %s222_s10, %s10931_s18  ;;  %p10940_p6 = scmp.lt.s32.totalorder %s10931_s18, %s10931_s18 }
  0x25   : > { %p10934_p13 = pnand %p10932_p1, %p10896_p12  ;;  %p10941_p5 = por %p10940_p6, %p10939_p2 }
  0x27   : > { %p10935_p0 = pneg %p10934_p13 }
  0x29   : > { %p10942_p3 = pnand %p10941_p5, %p10935_p0 }
  0x2b   : > { %10945 = shalt.err (!%p10942_p3)
}
  0x2c   : > { %9609 = dma.hbm_to_vmem [thread:$0]  (!%p11204_p11), %s18522_s2, 128, %s222_s10, [#allocation6]  }
  0x2d   : > { %s10957_s26 = scalar_lea.vmem %s232_s12, 16384  ;;  %p10965_p9 = scmp.lt.s32.totalorder %s232_s12, %s232_s12 }
  0x2e   : > { %p10958_p10 = scmp.ne.s32.totalorder %s232_s12, %s10957_s26  ;;  %p10966_p13 = scmp.lt.s32.totalorder %s10957_s26, %s10957_s26 }
  0x30   : > { %p10960_p7 = pnand %p10958_p10, %p10896_p12  ;;  %p10967_p4 = por %p10966_p13, %p10965_p9 }
  0x32   : > { %p10961_p1 = pneg %p10960_p7 }
  0x34   : > { %p10968_p2 = pnand %p10967_p4, %p10961_p1 }
  0x36   : > { %10971 = shalt.err (!%p10968_p2)
}
  0x37   : > { %s11109_s30 = smov 128   ;;  %s11110_s7 = smov 8  }
  0x38   : > { %9612 = dma.hbm_to_vmem [thread:$0]  (!%p11204_p11), %s18523_s3, 16384, %s232_s12, [#allocation9], %s11109_s30, %s11109_s30, %s11110_s7  }
  0x39   : > { %s11235_s11 = sadd.s32 1, %s11102_s24   ;;  %s35_s14 = sadd.s32 1, %s11098_s23 }
  0x3a   : > { %s32_s13 = ssub.s32 %s11102_s24, %s11235_s11  ;;  %p42_p6 = scmp.ne.s32.totalorder %s11098_s23, %s11094_s22 }
  0x3b   : > { %p33_p4 = scmp.eq.s32.totalorder %s32_s13, 0  ;;  %p43_p12 = scmp.eq.s32.totalorder %s11102_s24, 0 }
  0x3c   : > { %p9627_p0 = scmp.lt.s32.totalorder %s11102_s24, 2  ;;  %p18890_p3 = scmp.eq.s32.totalorder %s11176_s25, 1 }
  0x3d   : > { %s11245_s15 = scalar_select %p33_p4, %s11098_s23, %s35_s14  }
  0x3e   : > { %p44_p5 = por %p43_p12, %p42_p6  ;;  %p11249_p10 = por %p18890_p3, %p42_p6 }
  0x3f   : > { %s248_s8 = sand.u32 1, %s11098_s23   ;;  %s9452_s17 = sshll.u32 %s11102_s24, 13 }
  0x40   : > { %s18891_s16 = scalar_select %p11249_p10, 1, 0 }
  0x41   : > { %s8790_s12 = sshll.u32 %s248_s8, 9  ;;  %s11258_s20 = scalar_lea.hbm %s18520_s0, %s9452_s17 }
  0x42   : > { %s252_s26 = scalar_lea.vmem [#allocation2], %s8790_s12  ;;  %p11260_p11 = pnand %p9627_p0, %p44_p5 }
  0x43   : > { %s260_s30 = sshll.u32 %s252_s26, 4  ;;  %s11266_s9 = scalar_lea.sflag [#allocation3], %s248_s8  ;;  %s11264_s30 = int_to_ptr.vmem [resolvable:$true] %s260_s30 }
  0x44   : > { %s10972_s10 = scalar_lea.hbm %s11258_s20, 8192  ;;  %p10974_p1 = pneg %p11260_p11 }
  0x45   : > { %p10973_p7 = scmp.ne.s32.totalorder %s11258_s20, %s10972_s10  ;;  %s10977_s17 = scalar_lea.hbm %s18520_s0, 16384 }
  0x46   : > { %p10978_p2 = scmp.lt.s32.totalorder %s11258_s20, %s18520_s0  ;;  %p10979_p4 = scmp.lt.s32.totalorder %s10977_s17, %s10972_s10 }
  0x47   : > { %p10975_p9 = pnand %p10974_p1, %p10973_p7 }
  0x48   : > { %p10980_p6 = por %p10979_p4, %p10978_p2 }
  0x49   : > { %p10976_p13 = pneg %p10975_p9 }
  0x4b   : > { %p10981_p12 = pnand %p10980_p6, %p10976_p13 }
  0x4d   : > { %10984 = shalt.err (!%p10981_p12)
}
  0x4e   : > { %s10985_s8 = scalar_lea.vmem %s11264_s30, 8192  ;;  %s11111_s19 = smov [#allocation2]  }
  0x4f   : > { %p10986_p0 = scmp.ne.s32.totalorder %s11264_s30, %s10985_s8  ;;  %s10990_s26 = sshll.u32 %s11111_s19, 4  ;;  %s10991_s26 = int_to_ptr.vmem [resolvable:$false] %s10990_s26 }
  0x50   : > { %s10992_s13 = scalar_lea.vmem %s10991_s26, 16384  ;;  %p10993_p7 = scmp.lt.s32.totalorder %s11264_s30, %s10991_s26 }
  0x51   : > { %p10988_p5 = pnand %p10986_p0, %p10974_p1  ;;  %p10994_p9 = scmp.lt.s32.totalorder %s10992_s13, %s10985_s8 }
  0x53   : > { %p10989_p3 = pneg %p10988_p5  ;;  %p10995_p10 = por %p10994_p9, %p10993_p7 }
  0x55   : > { %p10996_p8 = pnand %p10995_p10, %p10989_p3 }
  0x57   : > { %10999 = shalt.err (!%p10996_p8)
}
  0x58   : > { %s11112_s10 = smov 256   ;;  %s11113_s14 = smov 16  }
  0x59   : > { %9616 = dma.hbm_to_vmem [thread:$0]  (!%p11260_p11), %s11258_s20, 8192, %s11264_s30, %s11266_s9, %s11112_s10, %s11112_s10, %s11113_s14  }
  0x5a   : > { %p18893_p1 = scmp.ne.s32.totalorder %s18888_s29, 0 }
  0x5c   : > { %272 = sbr.rel (%p18893_p1) target bundleno = 1770 (0x6ea), region = 40 }
  0x61   : > { %s11290_s17 = sand.u32 1, %s11094_s22   ;;  %p18894_p8 = scmp.ne.s32.totalorder %s18886_s27, 0 }
  0x62   : > { %s8795_s12 = sshll.u32 %s11290_s17, 9  ;;  %s275_s18 = scalar_lea.sflag [#allocation3], %s11290_s17 }
  0x63   : > { %s11296_s8 = scalar_lea.vmem [#allocation2], %s8795_s12 }
  0x64   : > { %11069 = dma.done.wait (%p18894_p8), %s275_s18, 8192  }
  0x65   : > { %11071 = vsyncadd (%p18894_p8), %s275_s18, 4294959104  ;;  %p18895_p10 = scmp.eq.s32.totalorder %s11176_s25, 0 }
  0x67   : > { %11073 = dma.done.wait (%p18895_p10), [#allocation6], 16512   ;;  %p18896_p11 = pmov %p18895_p10 }
  0x68   : > { %p18897_p13 = pmov %p18895_p10 }
  0x69   : > { %11075 = vsyncadd (%p18896_p11), [#allocation6], 4294950784 }
  0x6a   : > { %11077 = dma.done.wait (%p18897_p13), [#allocation9], 16384   ;;  %p18898_p2 = pmov %p18895_p10 }
  0x6b   : > { %v479_v0 = vld [vmem:[#allocation5 + $0x1c0] sm:$0xff]  ;;  %v480_v2 = vld [vmem:[#allocation5 + $0x1c8] sm:$0xff]  ;;  %v330_v54 = vld [vmem:[%s11296_s8 + $0x18] sm:$0xff]  ;;  %s8800_s27 = sshll.u32 %s11290_s17, 10  ;;  %s18221_s7 = scalar_lea.vmem [#allocation10], %s8795_s12 }
  0x6c   : > { %11079 = vsyncadd (%p18898_p2), [#allocation9], 4294950912  ;;  %v483_v1 = vld [vmem:[#allocation5 + $0x1e0] sm:$0xff]  ;;  %v484_v4 = vld [vmem:[#allocation5 + $0x1e8] sm:$0xff]  ;;  %s11758_s29 = scalar_lea.vmem [#allocation11], %s8800_s27  ;;  %s9584_s9 = sshll.u32 %s11176_s25, 14 }
  0x6d   : > { %v8858_v3 = vcombine.high %v479_v0, %v483_v1  ;;  %v8857_v5 = vcombine.low %v479_v0, %v483_v1  ;;  %v471_v6 = vld [vmem:[#allocation5 + $0x180] sm:$0xff]  ;;  %v8860_v8 = vcombine.high %v480_v2, %v484_v4  ;;  %v8859_v9 = vcombine.low %v480_v2, %v484_v4  ;;  %v472_v11 = vld [vmem:[#allocation5 + $0x188] sm:$0xff]  ;;  %s8650_s19 = sshll.u32 %s11758_s29, 4  ;;  %s18326_s10 = scalar_lea.hbm %s18526_s6, %s9584_s9  ;;  %s18328_s19 = int_to_ptr.vmem [resolvable:$true] %s8650_s19 }
  0x6e   : > { %v475_v7 = vld [vmem:[#allocation5 + $0x1a0] sm:$0xff]  ;;  %v476_v12 = vld [vmem:[#allocation5 + $0x1a8] sm:$0xff]  ;;  %s8619_s14 = scalar_lea.sflag [#allocation12], %s11290_s17  ;;  %s11000_s12 = scalar_lea.vmem %s18328_s19, 16384 }
  0x6f   : > { %v8850_v10 = vcombine.high %v471_v6, %v475_v7  ;;  %v463_v13 = vld [vmem:[#allocation5 + $0x140] sm:$0xff]  ;;  %1233 = vmatprep.subr.bf16.mxu0 %v8858_v3  ;;  %v8852_v14 = vcombine.high %v472_v11, %v476_v12  ;;  %v464_v16 = vld [vmem:[#allocation5 + $0x148] sm:$0xff]  ;;  %1426 = vmatprep.subr.bf16.mxu1 %v8860_v8  ;;  %v8849_v18 = vcombine.low %v471_v6, %v475_v7  ;;  %p11001_p4 = scmp.ne.s32.totalorder %s18328_s19, %s11000_s12  ;;  %p20364_p6 = scmp.ne.s32.totalorder %s18891_s16, 0 }
  0x70   : > { %v467_v15 = vld [vmem:[#allocation5 + $0x160] sm:$0xff]  ;;  %v468_v17 = vld [vmem:[#allocation5 + $0x168] sm:$0xff]  ;;  %1234 = vmatpush1.bf16.msra.mxu0 %v8857_v5  ;;  %1427 = vmatpush1.bf16.msra.mxu1 %v8859_v9  ;;  %v8851_v19 = vcombine.low %v472_v11, %v476_v12  ;;  %s11114_s18 = smov [#allocation11]  }
  0x71   : > { %1235 = vmatprep.subr.bf16.mxu0 %v8850_v10  ;;  %v8842_v20 = vcombine.high %v463_v13, %v467_v15  ;;  %1428 = vmatprep.subr.bf16.mxu1 %v8852_v14  ;;  %v8844_v21 = vcombine.high %v464_v16, %v468_v17  ;;  %v455_v22 = vld [vmem:[#allocation5 + $0x100] sm:$0xff]  ;;  %v456_v24 = vld [vmem:[#allocation5 + $0x108] sm:$0xff]  ;;  %v8841_v26 = vcombine.low %v463_v13, %v467_v15  ;;  %p11002_p12 = pnand %p11001_p4, %p20364_p6 }
  0x72   : > { %v459_v23 = vld [vmem:[#allocation5 + $0x120] sm:$0xff]  ;;  %v460_v25 = vld [vmem:[#allocation5 + $0x128] sm:$0xff]  ;;  %v8843_v27 = vcombine.low %v464_v16, %v468_v17 }
  0x73   : > { %v8834_v28 = vcombine.high %v455_v22, %v459_v23  ;;  %v8836_v29 = vcombine.high %v456_v24, %v460_v25  ;;  %v447_v30 = vld [vmem:[#allocation5 + $0xc0] sm:$0xff]  ;;  %v448_v32 = vld [vmem:[#allocation5 + $0xc8] sm:$0xff]  ;;  %v8833_v34 = vcombine.low %v455_v22, %v459_v23  ;;  %v8835_v35 = vcombine.low %v456_v24, %v460_v25  ;;  %p11003_p0 = pneg %p11002_p12 }
  0x74   : > { %1236 = vmatpush1.bf16.msra.mxu0 %v8849_v18  ;;  %1429 = vmatpush1.bf16.msra.mxu1 %v8851_v19  ;;  %v451_v31 = vld [vmem:[#allocation5 + $0xe0] sm:$0xff]  ;;  %v452_v33 = vld [vmem:[#allocation5 + $0xe8] sm:$0xff] }
  0x75   : > { %1237 = vmatprep.subr.bf16.mxu0 %v8842_v20  ;;  %1430 = vmatprep.subr.bf16.mxu1 %v8844_v21  ;;  %v8826_v36 = vcombine.high %v447_v30, %v451_v31  ;;  %v8828_v37 = vcombine.high %v448_v32, %v452_v33  ;;  %v439_v38 = vld [vmem:[#allocation5 + $0x80] sm:$0xff]  ;;  %v440_v40 = vld [vmem:[#allocation5 + $0x88] sm:$0xff]  ;;  %v8825_v42 = vcombine.low %v447_v30, %v451_v31 }
  0x76   : > { %v443_v39 = vld [vmem:[#allocation5 + $0xa0] sm:$0xff]  ;;  %v444_v41 = vld [vmem:[#allocation5 + $0xa8] sm:$0xff]  ;;  %v8827_v43 = vcombine.low %v448_v32, %v452_v33 }
  0x77   : > { %v8818_v44 = vcombine.high %v439_v38, %v443_v39  ;;  %v8820_v45 = vcombine.high %v440_v40, %v444_v41  ;;  %v431_v46 = vld [vmem:[#allocation5 + $0x40] sm:$0xff]  ;;  %v432_v48 = vld [vmem:[#allocation5 + $0x48] sm:$0xff]  ;;  %v8817_v50 = vcombine.low %v439_v38, %v443_v39  ;;  %v8819_v51 = vcombine.low %v440_v40, %v444_v41 }
  0x78   : > { %1238 = vmatpush1.bf16.msra.mxu0 %v8841_v26  ;;  %1431 = vmatpush1.bf16.msra.mxu1 %v8843_v27  ;;  %v435_v47 = vld [vmem:[#allocation5 + $0x60] sm:$0xff]  ;;  %v436_v49 = vld [vmem:[#allocation5 + $0x68] sm:$0xff] }
  0x79   : > { %1239 = vmatprep.subr.bf16.mxu0 %v8834_v28  ;;  %1432 = vmatprep.subr.bf16.mxu1 %v8836_v29  ;;  %v8810_v52 = vcombine.high %v431_v46, %v435_v47  ;;  %v328_v53 = vld [vmem:[%s11296_s8 + $0x8] sm:$0xff]  ;;  %v8812_v55 = vcombine.high %v432_v48, %v436_v49  ;;  %v423_v56 = vld [vmem:[#allocation5] sm:$0xff]  ;;  %v8809_v61 = vcombine.low %v431_v46, %v435_v47 }
  0x7a   : > { %v427_v57 = vld [vmem:[#allocation5 + $0x20] sm:$0xff]  ;;  %v11312_v58 = vpack.c.bf16 %v330_v54, %v328_v53  ;;  %v424_v59 = vld [vmem:[#allocation5 + $0x8] sm:$0xff]  ;;  %v8811_v62 = vcombine.low %v432_v48, %v436_v49 }
  0x7b   : > { %v428_v60 = vld [vmem:[#allocation5 + $0x28] sm:$0xff]  ;;  %v8802_v63 = vcombine.high %v423_v56, %v427_v57  ;;  %v543_v1 = vld [vmem:[#allocation5 + $0x3c0] sm:$0xff]  ;;  %v8801_v5 = vcombine.low %v423_v56, %v427_v57 }
  0x7c   : > { %1240 = vmatpush1.bf16.msra.mxu0 %v8833_v34  ;;  %1433 = vmatpush1.bf16.msra.mxu1 %v8835_v35  ;;  %v8804_v0 = vcombine.high %v424_v59, %v428_v60  ;;  %v547_v2 = vld [vmem:[#allocation5 + $0x3e0] sm:$0xff]  ;;  %v544_v3 = vld [vmem:[#allocation5 + $0x3c8] sm:$0xff]  ;;  %v8803_v6 = vcombine.low %v424_v59, %v428_v60 }
  0x7d   : > { %1241 = vmatprep.subr.bf16.mxu0 %v8826_v36  ;;  %1434 = vmatprep.subr.bf16.mxu1 %v8828_v37  ;;  %v548_v4 = vld [vmem:[#allocation5 + $0x3e8] sm:$0xff]  ;;  %v8922_v7 = vcombine.high %v543_v1, %v547_v2  ;;  %v535_v9 = vld [vmem:[#allocation5 + $0x380] sm:$0xff]  ;;  %v8921_v13 = vcombine.low %v543_v1, %v547_v2  ;;  %v481_v2 = vld [vmem:[#allocation5 + $0x1d0] sm:$0xff] }
  0x7e   : > { %1265 = vmatprep.mubr.bf16.mxu0 %v11312_v58  ;;  %1458 = vmatprep.mubr.bf16.mxu1 %v11312_v58  ;;  %v8924_v8 = vcombine.high %v544_v3, %v548_v4  ;;  %v539_v10 = vld [vmem:[#allocation5 + $0x3a0] sm:$0xff]  ;;  %v536_v11 = vld [vmem:[#allocation5 + $0x388] sm:$0xff]  ;;  %v8923_v14 = vcombine.low %v544_v3, %v548_v4  ;;  %v485_v3 = vld [vmem:[#allocation5 + $0x1f0] sm:$0xff] }
  0x7f   : > { %v540_v12 = vld [vmem:[#allocation5 + $0x3a8] sm:$0xff]  ;;  %v8914_v15 = vcombine.high %v535_v9, %v539_v10  ;;  %v527_v17 = vld [vmem:[#allocation5 + $0x340] sm:$0xff]  ;;  %v8913_v21 = vcombine.low %v535_v9, %v539_v10  ;;  %v482_v4 = vld [vmem:[#allocation5 + $0x1d8] sm:$0xff]  ;;  %v8862_v10 = vcombine.high %v481_v2, %v485_v3 }
  0x80   : > { %1242 = vmatpush1.bf16.msra.mxu0 %v8825_v42  ;;  %1435 = vmatpush1.bf16.msra.mxu1 %v8827_v43  ;;  %v8916_v16 = vcombine.high %v536_v11, %v540_v12  ;;  %v531_v18 = vld [vmem:[#allocation5 + $0x360] sm:$0xff]  ;;  %v528_v19 = vld [vmem:[#allocation5 + $0x348] sm:$0xff]  ;;  %v8915_v22 = vcombine.low %v536_v11, %v540_v12 }
  0x81   : > { %1243 = vmatprep.subr.bf16.mxu0 %v8818_v44  ;;  %1436 = vmatprep.subr.bf16.mxu1 %v8820_v45  ;;  %v532_v20 = vld [vmem:[#allocation5 + $0x368] sm:$0xff]  ;;  %v8906_v23 = vcombine.high %v527_v17, %v531_v18  ;;  %v519_v25 = vld [vmem:[#allocation5 + $0x300] sm:$0xff]  ;;  %v8905_v29 = vcombine.low %v527_v17, %v531_v18  ;;  %v474_v17 = vld [vmem:[#allocation5 + $0x198] sm:$0xff] }
  0x82   : > { %v8908_v24 = vcombine.high %v528_v19, %v532_v20  ;;  %v523_v26 = vld [vmem:[#allocation5 + $0x320] sm:$0xff]  ;;  %v520_v27 = vld [vmem:[#allocation5 + $0x308] sm:$0xff]  ;;  %v8907_v30 = vcombine.low %v528_v19, %v532_v20  ;;  %v478_v18 = vld [vmem:[#allocation5 + $0x1b8] sm:$0xff]  ;;  %v8861_v19 = vcombine.low %v481_v2, %v485_v3 }
  0x83   : > { %v524_v28 = vld [vmem:[#allocation5 + $0x328] sm:$0xff]  ;;  %v8898_v31 = vcombine.high %v519_v25, %v523_v26  ;;  %v511_v33 = vld [vmem:[#allocation5 + $0x2c0] sm:$0xff]  ;;  %v8897_v37 = vcombine.low %v519_v25, %v523_v26  ;;  %v465_v20 = vld [vmem:[#allocation5 + $0x150] sm:$0xff] }
  0x84   : > { %1244 = vmatpush1.bf16.msra.mxu0 %v8817_v50  ;;  %1437 = vmatpush1.bf16.msra.mxu1 %v8819_v51  ;;  %v8900_v32 = vcombine.high %v520_v27, %v524_v28  ;;  %v515_v34 = vld [vmem:[#allocation5 + $0x2e0] sm:$0xff]  ;;  %v512_v35 = vld [vmem:[#allocation5 + $0x2c8] sm:$0xff]  ;;  %v8899_v38 = vcombine.low %v520_v27, %v524_v28  ;;  %v470_v25 = vld [vmem:[#allocation5 + $0x178] sm:$0xff]  ;;  %v8856_v28 = vcombine.high %v474_v17, %v478_v18 }
  0x85   : > { %1245 = vmatprep.subr.bf16.mxu0 %v8810_v52  ;;  %1438 = vmatprep.subr.bf16.mxu1 %v8812_v55  ;;  %v516_v36 = vld [vmem:[#allocation5 + $0x2e8] sm:$0xff]  ;;  %v8890_v39 = vcombine.high %v511_v33, %v515_v34  ;;  %v503_v41 = vld [vmem:[#allocation5 + $0x280] sm:$0xff]  ;;  %v8889_v45 = vcombine.low %v511_v33, %v515_v34  ;;  %v8855_v33 = vcombine.low %v474_v17, %v478_v18  ;;  %v433_v2 = vld [vmem:[#allocation5 + $0x50] sm:$0xff] }
  0x86   : > { %v8892_v40 = vcombine.high %v512_v35, %v516_v36  ;;  %v507_v42 = vld [vmem:[#allocation5 + $0x2a0] sm:$0xff]  ;;  %v504_v43 = vld [vmem:[#allocation5 + $0x288] sm:$0xff]  ;;  %v8891_v46 = vcombine.low %v512_v35, %v516_v36  ;;  %v457_v35 = vld [vmem:[#allocation5 + $0x110] sm:$0xff] }
  0x87   : > { %v508_v44 = vld [vmem:[#allocation5 + $0x2a8] sm:$0xff]  ;;  %v8882_v47 = vcombine.high %v503_v41, %v507_v42  ;;  %v495_v49 = vld [vmem:[#allocation5 + $0x240] sm:$0xff]  ;;  %v8881_v53 = vcombine.low %v503_v41, %v507_v42  ;;  %v461_v36 = vld [vmem:[#allocation5 + $0x130] sm:$0xff] }
  0x88   : > { %1246 = vmatpush1.bf16.msra.mxu0 %v8809_v61  ;;  %1439 = vmatpush1.bf16.msra.mxu1 %v8811_v62  ;;  %v8884_v48 = vcombine.high %v504_v43, %v508_v44  ;;  %v499_v50 = vld [vmem:[#allocation5 + $0x260] sm:$0xff]  ;;  %v496_v51 = vld [vmem:[#allocation5 + $0x248] sm:$0xff]  ;;  %v8883_v54 = vcombine.low %v504_v43, %v508_v44  ;;  %v449_v43 = vld [vmem:[#allocation5 + $0xd0] sm:$0xff] }
  0x89   : > { %1247 = vmatprep.subr.bf16.mxu0 %v8802_v63  ;;  %1440 = vmatprep.subr.bf16.mxu1 %v8804_v0  ;;  %v500_v52 = vld [vmem:[#allocation5 + $0x268] sm:$0xff]  ;;  %v8874_v55 = vcombine.high %v495_v49, %v499_v50  ;;  %v487_v57 = vld [vmem:[#allocation5 + $0x200] sm:$0xff]  ;;  %v8873_v62 = vcombine.low %v495_v49, %v499_v50  ;;  %v453_v44 = vld [vmem:[#allocation5 + $0xf0] sm:$0xff] }
  0x8a   : > { %v8876_v56 = vcombine.high %v496_v51, %v500_v52  ;;  %v491_v59 = vld [vmem:[#allocation5 + $0x220] sm:$0xff]  ;;  %v488_v60 = vld [vmem:[#allocation5 + $0x208] sm:$0xff]  ;;  %v8875_v63 = vcombine.low %v496_v51, %v500_v52  ;;  %v342_v51 = vld [vmem:[%s11296_s8 + $0x78] sm:$0xff] }
  0x8b   : > { %v492_v61 = vld [vmem:[#allocation5 + $0x228] sm:$0xff]  ;;  %v8866_v0 = vcombine.high %v487_v57, %v491_v59  ;;  %v331_v26 = vld [vmem:[%s11296_s8 + $0x20] sm:$0xff]  ;;  %v450_v52 = vld [vmem:[#allocation5 + $0xd8] sm:$0xff] }
  0x8c   : > { %1248 = vmatpush1.bf16.msra.mxu0 %v8801_v5  ;;  %1441 = vmatpush1.bf16.msra.mxu1 %v8803_v6  ;;  %v8868_v1 = vcombine.high %v488_v60, %v492_v61  ;;  %v486_v5 = vld [vmem:[#allocation5 + $0x1f8] sm:$0xff]  ;;  %v8865_v6 = vcombine.low %v487_v57, %v491_v59  ;;  %v8867_v9 = vcombine.low %v488_v60, %v492_v61  ;;  %v332_v12 = vld [vmem:[%s11296_s8 + $0x28] sm:$0xff]  ;;  %v437_v3 = vld [vmem:[#allocation5 + $0x70] sm:$0xff] }
  0x8d   : > { %1249 = vmatprep.subr.bf16.mxu0 %v8922_v7  ;;  %1442 = vmatprep.subr.bf16.mxu1 %v8924_v8  ;;  %v327_v7 = vld [vmem:[%s11296_s8] sm:$0xff]  ;;  %v329_v8 = vld [vmem:[%s11296_s8 + $0x10] sm:$0xff]  ;;  %v8864_v11 = vcombine.high %v482_v4, %v486_v5  ;;  %v340_v49 = vld [vmem:[%s11296_s8 + $0x68] sm:$0xff]  ;;  %v8830_v59 = vcombine.high %v449_v43, %v453_v44  ;;  %v8814_v18 = vcombine.high %v433_v2, %v437_v3 }
  0x8e   : > { %v442_v60 = vld [vmem:[#allocation5 + $0x98] sm:$0xff] }
  0x8f   : > { %v446_v61 = vld [vmem:[#allocation5 + $0xb8] sm:$0xff] }
  0x90   : > { %1250 = vmatpush2.bf16.msra.mxu0 %v8921_v13  ;;  %1443 = vmatpush2.bf16.msra.mxu1 %v8923_v14  ;;  %v334_v13 = vld [vmem:[%s11296_s8 + $0x38] sm:$0xff]  ;;  %v473_v14 = vld [vmem:[#allocation5 + $0x190] sm:$0xff]  ;;  %v8823_v17 = vcombine.low %v442_v60, %v446_v61 }
  0x91   : > { %1251 = vmatprep.subr.bf16.mxu0 %v8914_v15  ;;  %1444 = vmatprep.subr.bf16.mxu1 %v8916_v16  ;;  %v11320_v15 = vpack.c.bf16 %v329_v8, %v327_v7  ;;  %v477_v16 = vld [vmem:[#allocation5 + $0x1b0] sm:$0xff]  ;;  %v344_v8 = vld [vmem:[%s11296_s8 + $0x88] sm:$0xff] }
  0x92   : > { %v8854_v27 = vcombine.high %v473_v14, %v477_v16 }
  0x94   : > { %1252 = vmatpush2.bf16.msra.mxu0 %v8913_v21  ;;  %1445 = vmatpush2.bf16.msra.mxu1 %v8915_v22  ;;  %v469_v21 = vld [vmem:[#allocation5 + $0x170] sm:$0xff]  ;;  %v8863_v22 = vcombine.low %v482_v4, %v486_v5  ;;  %v339_v4 = vld [vmem:[%s11296_s8 + $0x60] sm:$0xff] }
  0x95   : > { %1253 = vmatprep.subr.bf16.mxu0 %v8906_v23  ;;  %1446 = vmatprep.subr.bf16.mxu1 %v8908_v24  ;;  %v11322_v23 = vpack.c.bf16 %v334_v13, %v332_v12  ;;  %v466_v24 = vld [vmem:[#allocation5 + $0x158] sm:$0xff]  ;;  %v8846_v34 = vcombine.high %v465_v20, %v469_v21  ;;  %v8845_v42 = vcombine.low %v465_v20, %v469_v21  ;;  %v341_v5 = vld [vmem:[%s11296_s8 + $0x70] sm:$0xff] }
  0x96   : > { %v438_v12 = vld [vmem:[#allocation5 + $0x78] sm:$0xff]  ;;  %v11356_v21 = vpack.c.bf16 %v341_v5, %v339_v4 }
  0x97   : > { %v430_v20 = vld [vmem:[#allocation5 + $0x38] sm:$0xff] }
  0x98   : > { %1254 = vmatpush2.bf16.msra.mxu0 %v8905_v29  ;;  %1447 = vmatpush2.bf16.msra.mxu1 %v8907_v30  ;;  %v333_v29 = vld [vmem:[%s11296_s8 + $0x30] sm:$0xff]  ;;  %v8853_v30 = vcombine.low %v473_v14, %v477_v16  ;;  %v522_v5 = vld [vmem:[#allocation5 + $0x318] sm:$0xff] }
  0x99   : > { %1255 = vmatprep.subr.bf16.mxu0 %v8898_v31  ;;  %1448 = vmatprep.subr.bf16.mxu1 %v8900_v32  ;;  %v336_v31 = vld [vmem:[%s11296_s8 + $0x48] sm:$0xff]  ;;  %v338_v32 = vld [vmem:[%s11296_s8 + $0x58] sm:$0xff]  ;;  %v425_v14 = vld [vmem:[#allocation5 + $0x10] sm:$0xff] }
  0x9a   : > { %v11334_v41 = vpack.c.bf16 %v338_v32, %v336_v31  ;;  %v429_v16 = vld [vmem:[#allocation5 + $0x30] sm:$0xff]  ;;  %v348_v32 = vld [vmem:[%s11296_s8 + $0xa8] sm:$0xff] }
  0x9b   : > { %v8806_v31 = vcombine.high %v425_v14, %v429_v16 }
  0x9c   : > { %1256 = vmatpush2.bf16.msra.mxu0 %v8897_v37  ;;  %1449 = vmatpush2.bf16.msra.mxu1 %v8899_v38  ;;  %v8848_v37 = vcombine.high %v466_v24, %v470_v25  ;;  %v458_v38 = vld [vmem:[#allocation5 + $0x118] sm:$0xff] }
  0x9d   : > { %1257 = vmatprep.subr.bf16.mxu0 %v8890_v39  ;;  %1450 = vmatprep.subr.bf16.mxu1 %v8892_v40  ;;  %v462_v39 = vld [vmem:[#allocation5 + $0x138] sm:$0xff]  ;;  %v11332_v40 = vpack.c.bf16 %v333_v29, %v331_v26  ;;  %v545_v26 = vld [vmem:[#allocation5 + $0x3d0] sm:$0xff] }
  0x9e   : > { %v8840_v50 = vcombine.high %v458_v38, %v462_v39  ;;  %v8839_v57 = vcombine.low %v458_v38, %v462_v39  ;;  %v345_v29 = vld [vmem:[%s11296_s8 + $0x90] sm:$0xff] }
  0x9f   : > { %v537_v38 = vld [vmem:[#allocation5 + $0x390] sm:$0xff] }
  0xa0   : > { %1258 = vmatpush2.bf16.msra.mxu0 %v8889_v45  ;;  %1451 = vmatpush2.bf16.msra.mxu1 %v8891_v46  ;;  %v335_v45 = vld [vmem:[%s11296_s8 + $0x40] sm:$0xff]  ;;  %v337_v46 = vld [vmem:[%s11296_s8 + $0x50] sm:$0xff] }
  0xa1   : > { %1259 = vmatprep.subr.bf16.mxu0 %v8882_v47  ;;  %1452 = vmatprep.subr.bf16.mxu1 %v8884_v48  ;;  %v8847_v47 = vcombine.low %v466_v24, %v470_v25  ;;  %v8838_v48 = vcombine.high %v457_v35, %v461_v36  ;;  %v8813_v25 = vcombine.low %v433_v2, %v437_v3  ;;  %v541_v39 = vld [vmem:[#allocation5 + $0x3b0] sm:$0xff] }
  0xa2   : > { %v525_v2 = vld [vmem:[#allocation5 + $0x330] sm:$0xff] }
  0xa4   : > { %1260 = vmatpush2.bf16.msra.mxu0 %v8881_v53  ;;  %1453 = vmatpush2.bf16.msra.mxu1 %v8883_v54  ;;  %v454_v53 = vld [vmem:[#allocation5 + $0xf8] sm:$0xff]  ;;  %v8837_v54 = vcombine.low %v457_v35, %v461_v36 }
  0xa5   : > { %1261 = vmatprep.subr.bf16.mxu0 %v8874_v55  ;;  %1454 = vmatprep.subr.bf16.mxu1 %v8876_v56  ;;  %v441_v55 = vld [vmem:[#allocation5 + $0x90] sm:$0xff]  ;;  %v546_v35 = vld [vmem:[#allocation5 + $0x3d8] sm:$0xff] }
  0xa6   : > { %v445_v56 = vld [vmem:[#allocation5 + $0xb0] sm:$0xff]  ;;  %v550_v36 = vld [vmem:[#allocation5 + $0x3f8] sm:$0xff] }
  0xa7   : > { %v8822_v7 = vcombine.high %v441_v55, %v445_v56  ;;  %v8821_v13 = vcombine.low %v441_v55, %v445_v56  ;;  %v8918_v55 = vcombine.high %v537_v38, %v541_v39  ;;  %v352_v56 = vld [vmem:[%s11296_s8 + $0xc8] sm:$0xff] }
  0xa8   : > { %1262 = vmatpush2.bf16.msra.mxu0 %v8873_v62  ;;  %1455 = vmatpush2.bf16.msra.mxu1 %v8875_v63  ;;  %v11344_v62 = vpack.c.bf16 %v337_v46, %v335_v45  ;;  %v8832_v63 = vcombine.high %v450_v52, %v454_v53  ;;  %v542_v45 = vld [vmem:[#allocation5 + $0x3b8] sm:$0xff] }
  0xa9   : > { %1263 = vmatprep.subr.bf16.mxu0 %v8866_v0  ;;  %1456 = vmatprep.subr.bf16.mxu1 %v8868_v1  ;;  %v11346_v0 = vpack.c.bf16 %v342_v51, %v340_v49  ;;  %v8829_v1 = vcombine.low %v449_v43, %v453_v44  ;;  %v538_v44 = vld [vmem:[#allocation5 + $0x398] sm:$0xff]  ;;  %v533_v51 = vld [vmem:[#allocation5 + $0x370] sm:$0xff] }
  0xaa   : > { %v8919_v3 = vcombine.low %v538_v44, %v542_v45 }
  0xac   : > { %1264 = vmatpush2.bf16.msra.mxu0 %v8865_v6  ;;  %1457 = vmatpush2.bf16.msra.mxu1 %v8867_v9  ;;  %v8831_v6 = vcombine.low %v450_v52, %v454_v53  ;;  %v8824_v9 = vcombine.high %v442_v60, %v446_v61  ;;  %v347_v52 = vld [vmem:[%s11296_s8 + $0xa0] sm:$0xff]  ;;  %v349_v53 = vld [vmem:[%s11296_s8 + $0xb0] sm:$0xff]  ;;  %v530_v60 = vld [vmem:[#allocation5 + $0x358] sm:$0xff] }
  0xad   : > { %1619 = vmatprep.subr.bf16.mxu0 %v8862_v10  ;;  %1812 = vmatprep.subr.bf16.mxu1 %v8864_v11  ;;  %v346_v10 = vld [vmem:[%s11296_s8 + $0x98] sm:$0xff] }
  0xae   : > { %v434_v11 = vld [vmem:[#allocation5 + $0x58] sm:$0xff]  ;;  %v11358_v24 = vpack.c.bf16 %v346_v10, %v344_v8 }
  0xaf   : > { %1266 = vmatmul.mubr.bf16.vlgmr.msra.gmra.mxu0 %v11320_v15  ;;  %1459 = vmatmul.mubr.bf16.vlgmr.msra.gmra.mxu1 %v11320_v15  ;;  %v534_v61 = vld [vmem:[#allocation5 + $0x378] sm:$0xff] }
  0xb0   : > { %1620 = vmatpush1.bf16.msra.mxu0 %v8861_v19  ;;  %1813 = vmatpush1.bf16.msra.mxu1 %v8863_v22  ;;  %v426_v19 = vld [vmem:[#allocation5 + $0x18] sm:$0xff]  ;;  %v8816_v22 = vcombine.high %v434_v11, %v438_v12  ;;  %v8912_v8 = vcombine.high %v530_v60, %v534_v61 }
  0xb1   : > { %1275 = vmatprep.mubr.bf16.mxu0 %v11322_v23  ;;  %1468 = vmatprep.mubr.bf16.mxu1 %v11322_v23 }
  0xb2   : > { %1621 = vmatprep.subr.bf16.mxu0 %v8854_v27  ;;  %1814 = vmatprep.subr.bf16.mxu1 %v8856_v28  ;;  %v549_v27 = vld [vmem:[#allocation5 + $0x3f0] sm:$0xff]  ;;  %v343_v28 = vld [vmem:[%s11296_s8 + $0x80] sm:$0xff] }
  0xb3   : > { %v8926_v43 = vcombine.high %v545_v26, %v549_v27  ;;  %v11368_v46 = vpack.c.bf16 %v345_v29, %v343_v28  ;;  %v8925_v49 = vcombine.low %v545_v26, %v549_v27  ;;  %v505_v27 = vld [vmem:[#allocation5 + $0x290] sm:$0xff] }
  0xb4   : > { %1622 = vmatpush1.bf16.msra.mxu0 %v8853_v30  ;;  %1815 = vmatpush1.bf16.msra.mxu1 %v8855_v33  ;;  %v8815_v30 = vcombine.low %v434_v11, %v438_v12  ;;  %v8808_v33 = vcombine.high %v426_v19, %v430_v20  ;;  %v513_v11 = vld [vmem:[#allocation5 + $0x2d0] sm:$0xff] }
  0xb5   : > { %1623 = vmatprep.subr.bf16.mxu0 %v8846_v34  ;;  %1816 = vmatprep.subr.bf16.mxu1 %v8848_v37  ;;  %v350_v34 = vld [vmem:[%s11296_s8 + $0xb8] sm:$0xff]  ;;  %v8805_v37 = vcombine.low %v425_v14, %v429_v16  ;;  %v517_v12 = vld [vmem:[#allocation5 + $0x2f0] sm:$0xff]  ;;  %v8911_v16 = vcombine.low %v530_v60, %v534_v61 }
  0xb6   : > { %v353_v14 = vld [vmem:[%s11296_s8 + $0xd0] sm:$0xff]  ;;  %v490_v61 = vld [vmem:[#allocation5 + $0x218] sm:$0xff] }
  0xb7   : > { %1276 = vmatmul.mubr.bf16.gmra.mxu0 %v11332_v40  ;;  %1469 = vmatmul.mubr.bf16.gmra.mxu1 %v11332_v40  ;;  %v509_v28 = vld [vmem:[#allocation5 + $0x2b0] sm:$0xff] }
  0xb8   : > { %1285 = vmatprep.mubr.bf16.mxu0 %v11334_v41  ;;  %1478 = vmatprep.mubr.bf16.mxu1 %v11334_v41 }
  0xb9   : > { %1624 = vmatpush1.bf16.msra.mxu0 %v8845_v42  ;;  %1817 = vmatpush1.bf16.msra.mxu1 %v8847_v47  ;;  %v8807_v42 = vcombine.low %v426_v19, %v430_v20  ;;  %v8928_v47 = vcombine.high %v546_v35, %v550_v36  ;;  %v358_v20 = vld [vmem:[%s11296_s8 + $0xf8] sm:$0xff] }
  0xba   : > { %1625 = vmatprep.subr.bf16.mxu0 %v8838_v48  ;;  %1818 = vmatprep.subr.bf16.mxu1 %v8840_v50  ;;  %v11370_v48 = vpack.c.bf16 %v350_v34, %v348_v32  ;;  %v529_v50 = vld [vmem:[#allocation5 + $0x350] sm:$0xff]  ;;  %v510_v32 = vld [vmem:[#allocation5 + $0x2b8] sm:$0xff] }
  0xbb   : > { %v8910_v4 = vcombine.high %v529_v50, %v533_v51  ;;  %v8909_v10 = vcombine.low %v529_v50, %v533_v51  ;;  %v360_v50 = vld [vmem:[%s11296_s8 + $0x108] sm:$0xff]  ;;  %v362_v51 = vld [vmem:[%s11296_s8 + $0x118] sm:$0xff] }
  0xbc   : > { %v11406_v60 = vpack.c.bf16 %v362_v51, %v360_v50  ;;  %v379_v51 = vld [vmem:[%s11296_s8 + $0x1a0] sm:$0xff] }
  0xbd   : > { %1626 = vmatpush1.bf16.msra.mxu0 %v8837_v54  ;;  %1819 = vmatpush1.bf16.msra.mxu1 %v8839_v57  ;;  %v8927_v54 = vcombine.low %v546_v35, %v550_v36  ;;  %v8920_v57 = vcombine.high %v538_v44, %v542_v45  ;;  %v8893_v36 = vcombine.low %v513_v11, %v517_v12  ;;  %v501_v44 = vld [vmem:[#allocation5 + $0x270] sm:$0xff] }
  0xbe   : > { %1627 = vmatprep.subr.bf16.mxu0 %v8830_v59  ;;  %1820 = vmatprep.subr.bf16.mxu1 %v8832_v63  ;;  %v354_v59 = vld [vmem:[%s11296_s8 + $0xd8] sm:$0xff]  ;;  %v8917_v63 = vcombine.low %v537_v38, %v541_v39  ;;  %v8886_v38 = vcombine.high %v505_v27, %v509_v28  ;;  %v355_v39 = vld [vmem:[%s11296_s8 + $0xe0] sm:$0xff]  ;;  %v357_v45 = vld [vmem:[%s11296_s8 + $0xf0] sm:$0xff] }
  0xbf   : > { %1286 = vmatmul.mubr.bf16.gmra.mxu0 %v11344_v62  ;;  %1479 = vmatmul.mubr.bf16.gmra.mxu1 %v11344_v62 }
  0xc0   : > { %1295 = vmatprep.mubr.bf16.mxu0 %v11346_v0  ;;  %1488 = vmatprep.mubr.bf16.mxu1 %v11346_v0 }
  0xc1   : > { %1628 = vmatpush1.bf16.msra.mxu0 %v8829_v1  ;;  %1821 = vmatpush1.bf16.msra.mxu1 %v8831_v6  ;;  %v521_v1 = vld [vmem:[#allocation5 + $0x310] sm:$0xff]  ;;  %v526_v6 = vld [vmem:[#allocation5 + $0x338] sm:$0xff] }
  0xc2   : > { %1629 = vmatprep.subr.bf16.mxu0 %v8822_v7  ;;  %1822 = vmatprep.subr.bf16.mxu1 %v8824_v9  ;;  %v11380_v7 = vpack.c.bf16 %v349_v53, %v347_v52  ;;  %v11382_v9 = vpack.c.bf16 %v354_v59, %v352_v56  ;;  %v8904_v19 = vcombine.high %v522_v5, %v526_v6  ;;  %v493_v59 = vld [vmem:[#allocation5 + $0x230] sm:$0xff] }
  0xc3   : > { %v8901_v26 = vcombine.low %v521_v1, %v525_v2  ;;  %v8903_v29 = vcombine.low %v522_v5, %v526_v6  ;;  %v8885_v52 = vcombine.low %v505_v27, %v509_v28  ;;  %v359_v5 = vld [vmem:[%s11296_s8 + $0x100] sm:$0xff]  ;;  %v361_v6 = vld [vmem:[%s11296_s8 + $0x110] sm:$0xff] }
  0xc4   : > { %v367_v27 = vld [vmem:[%s11296_s8 + $0x140] sm:$0xff]  ;;  %v369_v28 = vld [vmem:[%s11296_s8 + $0x150] sm:$0xff] }
  0xc5   : > { %1630 = vmatpush1.bf16.msra.mxu0 %v8821_v13  ;;  %1823 = vmatpush1.bf16.msra.mxu1 %v8823_v17  ;;  %v351_v13 = vld [vmem:[%s11296_s8 + $0xc0] sm:$0xff]  ;;  %v8902_v17 = vcombine.high %v521_v1, %v525_v2 }
  0xc6   : > { %1631 = vmatprep.subr.bf16.mxu0 %v8814_v18  ;;  %1824 = vmatprep.subr.bf16.mxu1 %v8816_v22  ;;  %v356_v18 = vld [vmem:[%s11296_s8 + $0xe8] sm:$0xff]  ;;  %v514_v22 = vld [vmem:[#allocation5 + $0x2d8] sm:$0xff] }
  0xc7   : > { %1296 = vmatmul.mubr.bf16.gmra.mxu0 %v11356_v21  ;;  %1489 = vmatmul.mubr.bf16.gmra.mxu1 %v11356_v21  ;;  %v11394_v35 = vpack.c.bf16 %v358_v20, %v356_v18  ;;  %v363_v18 = vld [vmem:[%s11296_s8 + $0x120] sm:$0xff]  ;;  %v368_v20 = vld [vmem:[%s11296_s8 + $0x148] sm:$0xff] }
  0xc8   : > { %1305 = vmatprep.mubr.bf16.mxu0 %v11358_v24  ;;  %1498 = vmatprep.mubr.bf16.mxu1 %v11358_v24 }
  0xc9   : > { %1632 = vmatpush1.bf16.msra.mxu0 %v8813_v25  ;;  %1825 = vmatpush1.bf16.msra.mxu1 %v8815_v30  ;;  %v518_v25 = vld [vmem:[#allocation5 + $0x2f8] sm:$0xff]  ;;  %v8894_v30 = vcombine.high %v513_v11, %v517_v12 }
  0xca   : > { %1633 = vmatprep.subr.bf16.mxu0 %v8806_v31  ;;  %1826 = vmatprep.subr.bf16.mxu1 %v8808_v33  ;;  %v506_v31 = vld [vmem:[#allocation5 + $0x298] sm:$0xff]  ;;  %v11392_v33 = vpack.c.bf16 %v353_v14, %v351_v13  ;;  %v8896_v34 = vcombine.high %v514_v22, %v518_v25  ;;  %v11416_v14 = vpack.c.bf16 %v361_v6, %v359_v5  ;;  %v389_v5 = vld [vmem:[%s11296_s8 + $0x1f0] sm:$0xff] }
  0xcb   : > { %v8887_v53 = vcombine.low %v506_v31, %v510_v32  ;;  %v9679_v13 = vld [vmem:[#allocation8 + $0x74] ss:$8 sps:$4 sm:$0xff]  }
  0xcd   : > { %1634 = vmatpush1.bf16.msra.mxu0 %v8805_v37  ;;  %1827 = vmatpush1.bf16.msra.mxu1 %v8807_v42  ;;  %v8895_v37 = vcombine.low %v514_v22, %v518_v25  ;;  %v8888_v42 = vcombine.high %v506_v31, %v510_v32  ;;  %v370_v22 = vld [vmem:[%s11296_s8 + $0x158] sm:$0xff]  ;;  %v11440_v31 = vpack.c.bf16 %v369_v28, %v367_v27  ;;  %v9698_v27 = vld [vmem:[#allocation8 + $0x140] ss:$8 sps:$4 sm:$0xff]  }
  0xce   : > { %1635 = vmatprep.subr.bf16.mxu0 %v8926_v43  ;;  %1828 = vmatprep.subr.bf16.mxu1 %v8928_v47  ;;  %v497_v43 = vld [vmem:[#allocation5 + $0x250] sm:$0xff]  ;;  %v498_v47 = vld [vmem:[#allocation5 + $0x258] sm:$0xff] }
  0xcf   : > { %1306 = vmatmul.mubr.bf16.gmra.mxu0 %v11368_v46  ;;  %1499 = vmatmul.mubr.bf16.gmra.mxu1 %v11368_v46  ;;  %v8877_v1 = vcombine.low %v497_v43, %v501_v44  ;;  %v9703_v28 = vld [vmem:[#allocation8 + $0x34] ss:$8 sps:$4 sm:$0xff]  }
  0xd0   : > { %1315 = vmatprep.mubr.bf16.mxu0 %v11370_v48  ;;  %1508 = vmatprep.mubr.bf16.mxu1 %v11370_v48 }
  0xd1   : > { %1636 = vmatpush2.bf16.msra.mxu0 %v8925_v49  ;;  %1829 = vmatpush2.bf16.msra.mxu1 %v8927_v54  ;;  %v502_v49 = vld [vmem:[#allocation5 + $0x278] sm:$0xff]  ;;  %v8878_v54 = vcombine.high %v497_v43, %v501_v44  ;;  %v375_v43 = vld [vmem:[%s11296_s8 + $0x180] sm:$0xff]  ;;  %v377_v44 = vld [vmem:[%s11296_s8 + $0x190] sm:$0xff] }
  0xd2   : > { %1637 = vmatprep.subr.bf16.mxu0 %v8918_v55  ;;  %1830 = vmatprep.subr.bf16.mxu1 %v8920_v57  ;;  %v11404_v55 = vpack.c.bf16 %v357_v45, %v355_v39  ;;  %v8880_v56 = vcombine.high %v498_v47, %v502_v49  ;;  %v489_v57 = vld [vmem:[#allocation5 + $0x210] sm:$0xff]  ;;  %v8879_v2 = vcombine.low %v498_v47, %v502_v49  ;;  %v380_v45 = vld [vmem:[%s11296_s8 + $0x1a8] sm:$0xff]  ;;  %v382_v47 = vld [vmem:[%s11296_s8 + $0x1b8] sm:$0xff] }
  0xd3   : > { %v8869_v11 = vcombine.low %v489_v57, %v493_v59  ;;  %v11464_v49 = vpack.c.bf16 %v377_v44, %v375_v43  ;;  %v11466_v50 = vpack.c.bf16 %v382_v47, %v380_v45  ;;  %v9718_v43 = vld [vmem:[#allocation8 + $0x114] ss:$8 sps:$4 sm:$0xff]   ;;  %v9713_v44 = vld [vmem:[#allocation8 + $0x10] ss:$8 sps:$4 sm:$0xff]   ;;  %v9721_v47 = vld [vmem:[#allocation8 + $0x4] ss:$8 sps:$4 sm:$0xff]  }
  0xd4   : > { %v9716_v45 = vld [vmem:[#allocation8 + $0x110] ss:$8 sps:$4 sm:$0xff]  }
  0xd5   : > { %1638 = vmatpush2.bf16.msra.mxu0 %v8917_v63  ;;  %1831 = vmatpush2.bf16.msra.mxu1 %v8919_v3  ;;  %v494_v63 = vld [vmem:[#allocation5 + $0x238] sm:$0xff]  ;;  %v8870_v3 = vcombine.high %v489_v57, %v493_v59  ;;  %v383_v59 = vld [vmem:[%s11296_s8 + $0x1c0] sm:$0xff] }
  0xd6   : > { %1639 = vmatprep.subr.bf16.mxu0 %v8910_v4  ;;  %1832 = vmatprep.subr.bf16.mxu1 %v8912_v8  ;;  %v8872_v4 = vcombine.high %v490_v61, %v494_v63  ;;  %v364_v8 = vld [vmem:[%s11296_s8 + $0x128] sm:$0xff]  ;;  %v8871_v12 = vcombine.low %v490_v61, %v494_v63  ;;  %v385_v61 = vld [vmem:[%s11296_s8 + $0x1d0] sm:$0xff] }
  0xd7   : > { %1316 = vmatmul.mubr.bf16.gmra.mxu0 %v11380_v7  ;;  %1509 = vmatmul.mubr.bf16.gmra.mxu1 %v11380_v7  ;;  %v388_v63 = vld [vmem:[%s11296_s8 + $0x1e8] sm:$0xff] }
  0xd8   : > { %1325 = vmatprep.mubr.bf16.mxu0 %v11382_v9  ;;  %1518 = vmatprep.mubr.bf16.mxu1 %v11382_v9 }
  0xd9   : > { %1640 = vmatpush2.bf16.msra.mxu0 %v8909_v10  ;;  %1833 = vmatpush2.bf16.msra.mxu1 %v8911_v16  ;;  %v366_v10 = vld [vmem:[%s11296_s8 + $0x138] sm:$0xff] }
  0xda   : > { %1641 = vmatprep.subr.bf16.mxu0 %v8902_v17  ;;  %1834 = vmatprep.subr.bf16.mxu1 %v8904_v19  ;;  %v9682_v16 = vld [vmem:[#allocation8 + $0x174] ss:$8 sps:$4 sm:$0xff]   ;;  %v11418_v17 = vpack.c.bf16 %v366_v10, %v364_v8  ;;  %v365_v19 = vld [vmem:[%s11296_s8 + $0x130] sm:$0xff]  ;;  %v9677_v8 = vld [vmem:[#allocation8 + $0x70] ss:$8 sps:$4 sm:$0xff]  }
  0xdb   : > { %v11428_v25 = vpack.c.bf16 %v365_v19, %v363_v18  ;;  %v9680_v10 = vld [vmem:[#allocation8 + $0x170] ss:$8 sps:$4 sm:$0xff]   ;;  %v9691_v18 = vld [vmem:[#allocation8 + $0x54] ss:$8 sps:$4 sm:$0xff]  }
  0xdc   : > { %v9694_v19 = vld [vmem:[#allocation8 + $0x154] ss:$8 sps:$4 sm:$0xff]  }
  0xdd   : > { %1642 = vmatpush2.bf16.msra.mxu0 %v8901_v26  ;;  %1835 = vmatpush2.bf16.msra.mxu1 %v8903_v29  ;;  %v11430_v26 = vpack.c.bf16 %v370_v22, %v368_v20  ;;  %v372_v29 = vld [vmem:[%s11296_s8 + $0x168] sm:$0xff]  ;;  %v9692_v20 = vld [vmem:[#allocation8 + $0x150] ss:$8 sps:$4 sm:$0xff]  }
  0xde   : > { %1643 = vmatprep.subr.bf16.mxu0 %v8894_v30  ;;  %1836 = vmatprep.subr.bf16.mxu1 %v8896_v34  ;;  %v374_v30 = vld [vmem:[%s11296_s8 + $0x178] sm:$0xff]  ;;  %v371_v34 = vld [vmem:[%s11296_s8 + $0x160] sm:$0xff]  ;;  %v9697_v22 = vld [vmem:[#allocation8 + $0x44] ss:$8 sps:$4 sm:$0xff]  }
  0xdf   : > { %1326 = vmatmul.mubr.bf16.gmra.mxu0 %v11392_v33  ;;  %1519 = vmatmul.mubr.bf16.gmra.mxu1 %v11392_v33  ;;  %v11442_v32 = vpack.c.bf16 %v374_v30, %v372_v29  ;;  %v9706_v29 = vld [vmem:[#allocation8 + $0x134] ss:$8 sps:$4 sm:$0xff]   ;;  %v9701_v30 = vld [vmem:[#allocation8 + $0x30] ss:$8 sps:$4 sm:$0xff]  }
  0xe0   : > { %1335 = vmatprep.mubr.bf16.mxu0 %v11394_v35  ;;  %1528 = vmatprep.mubr.bf16.mxu1 %v11394_v35 }
  0xe1   : > { %1644 = vmatpush2.bf16.msra.mxu0 %v8893_v36  ;;  %1837 = vmatpush2.bf16.msra.mxu1 %v8895_v37  ;;  %v373_v36 = vld [vmem:[%s11296_s8 + $0x170] sm:$0xff]  ;;  %v376_v37 = vld [vmem:[%s11296_s8 + $0x188] sm:$0xff] }
  0xe2   : > { %1645 = vmatprep.subr.bf16.mxu0 %v8886_v38  ;;  %1838 = vmatprep.subr.bf16.mxu1 %v8888_v42  ;;  %v378_v38 = vld [vmem:[%s11296_s8 + $0x198] sm:$0xff]  ;;  %v11452_v39 = vpack.c.bf16 %v373_v36, %v371_v34  ;;  %v9709_v36 = vld [vmem:[#allocation8 + $0x24] ss:$8 sps:$4 sm:$0xff]  }
  0xe3   : > { %v11454_v42 = vpack.c.bf16 %v378_v38, %v376_v37  ;;  %v9704_v34 = vld [vmem:[#allocation8 + $0x130] ss:$8 sps:$4 sm:$0xff]   ;;  %v9710_v37 = vld [vmem:[#allocation8 + $0x120] ss:$8 sps:$4 sm:$0xff]   ;;  %v9715_v38 = vld [vmem:[#allocation8 + $0x14] ss:$8 sps:$4 sm:$0xff]  }
  0xe5   : > { %1646 = vmatpush2.bf16.msra.mxu0 %v8885_v52  ;;  %1839 = vmatpush2.bf16.msra.mxu1 %v8887_v53  ;;  %v381_v52 = vld [vmem:[%s11296_s8 + $0x1b0] sm:$0xff]  ;;  %v384_v53 = vld [vmem:[%s11296_s8 + $0x1c8] sm:$0xff] }
  0xe6   : > { %1647 = vmatprep.subr.bf16.mxu0 %v8878_v54  ;;  %1840 = vmatprep.subr.bf16.mxu1 %v8880_v56  ;;  %v386_v54 = vld [vmem:[%s11296_s8 + $0x1d8] sm:$0xff]  ;;  %v11476_v56 = vpack.c.bf16 %v381_v52, %v379_v51  ;;  %v9722_v51 = vld [vmem:[#allocation8 + $0x100] ss:$8 sps:$4 sm:$0xff]  }
  0xe7   : > { %1336 = vmatmul.mubr.bf16.gmra.mxu0 %v11404_v55  ;;  %1529 = vmatmul.mubr.bf16.gmra.mxu1 %v11404_v55  ;;  %v11478_v57 = vpack.c.bf16 %v386_v54, %v384_v53  ;;  %v9727_v52 = vld [vmem:[#allocation8 + $0xf4] ss:$8 sps:$4 sm:$0xff]   ;;  %v9725_v54 = vld [vmem:[#allocation8 + $0xf0] ss:$8 sps:$4 sm:$0xff]  }
  0xe8   : > { %1345 = vmatprep.mubr.bf16.mxu0 %v11406_v60  ;;  %1538 = vmatprep.mubr.bf16.mxu1 %v11406_v60  ;;  %v9730_v53 = vld [vmem:[#allocation8 + $0x1f4] ss:$8 sps:$4 sm:$0xff]  }
  0xe9   : > { %1648 = vmatpush2.bf16.msra.mxu0 %v8877_v1  ;;  %1841 = vmatpush2.bf16.msra.mxu1 %v8879_v2  ;;  %v390_v1 = vld [vmem:[%s11296_s8 + $0x1f8] sm:$0xff]  ;;  %v11488_v2 = vpack.c.bf16 %v385_v61, %v383_v59  ;;  %v9733_v61 = vld [vmem:[#allocation8 + $0xe4] ss:$8 sps:$4 sm:$0xff]  }
  0xea   : > { %1649 = vmatprep.subr.bf16.mxu0 %v8870_v3  ;;  %1842 = vmatprep.subr.bf16.mxu1 %v8872_v4  ;;  %v11490_v3 = vpack.c.bf16 %v390_v1, %v388_v63  ;;  %v387_v4 = vld [vmem:[%s11296_s8 + $0x1e0] sm:$0xff]  ;;  %v9734_v63 = vld [vmem:[#allocation8 + $0x1e0] ss:$8 sps:$4 sm:$0xff]   ;;  %s11004_s8 = sshll.u32 %s11114_s18, 4  ;;  %s11005_s8 = int_to_ptr.vmem [resolvable:$false] %s11004_s8 }
  0xeb   : > { %v11498_v6 = vpack.c.bf16 %v389_v5, %v387_v4  ;;  %v9728_v59 = vld [vmem:[#allocation8 + $0x1f0] ss:$8 sps:$4 sm:$0xff]   ;;  %v9739_v1 = vld [vmem:[#allocation8 + $0xd4] ss:$8 sps:$4 sm:$0xff]   ;;  %s11006_s27 = scalar_lea.vmem %s11005_s8, 32768  ;;  %p11007_p5 = scmp.lt.s32.totalorder %s18328_s19, %s11005_s8 }
  0xec   : > { %v9742_v4 = vld [vmem:[#allocation8 + $0x1d4] ss:$8 sps:$4 sm:$0xff]   ;;  %v9737_v5 = vld [vmem:[#allocation8 + $0xd0] ss:$8 sps:$4 sm:$0xff]   ;;  %p11008_p3 = scmp.lt.s32.totalorder %s11006_s27, %s11000_s12 }
  0xed   : > { %1650 = vmatpush2.bf16.msra.mxu0 %v8869_v11  ;;  %1843 = vmatpush2.bf16.msra.mxu1 %v8871_v12  ;;  %v9685_v11 = vld [vmem:[#allocation8 + $0x64] ss:$8 sps:$4 sm:$0xff]  }
  0xee   : > { %7777 = vmatprep.subr.bf16.mxu0 %v9679_v13  ;;  %7970 = vmatprep.subr.bf16.mxu1 %v9682_v16  ;;  %v9688_v12 = vld [vmem:[#allocation8 + $0x164] ss:$8 sps:$4 sm:$0xff]   ;;  %v9683_v13 = vld [vmem:[#allocation8 + $0x60] ss:$8 sps:$4 sm:$0xff]   ;;  %p11009_p7 = por %p11008_p3, %p11007_p5 }
  0xef   : > { %1346 = vmatmul.mubr.bf16.gmra.mxu0 %v11416_v14  ;;  %1539 = vmatmul.mubr.bf16.gmra.mxu1 %v11416_v14  ;;  %v9686_v16 = vld [vmem:[#allocation8 + $0x160] ss:$8 sps:$4 sm:$0xff]  }
  0xf0   : > { %1355 = vmatprep.mubr.bf16.mxu0 %v11418_v17  ;;  %1548 = vmatprep.mubr.bf16.mxu1 %v11418_v17  ;;  %p11010_p9 = pnand %p11009_p7, %p11003_p0 }
  0xf7   : > { %1356 = vmatmul.mubr.bf16.gmra.mxu0 %v11428_v25  ;;  %1549 = vmatmul.mubr.bf16.gmra.mxu1 %v11428_v25 }
  0xf8   : > { %1365 = vmatprep.mubr.bf16.mxu0 %v11430_v26  ;;  %1558 = vmatprep.mubr.bf16.mxu1 %v11430_v26 }
  0xff   : > { %1366 = vmatmul.mubr.bf16.gmra.mxu0 %v11440_v31  ;;  %1559 = vmatmul.mubr.bf16.gmra.mxu1 %v11440_v31 }
 0x100   : > { %1375 = vmatprep.mubr.bf16.mxu0 %v11442_v32  ;;  %1568 = vmatprep.mubr.bf16.mxu1 %v11442_v32 }
 0x107   : > { %1376 = vmatmul.mubr.bf16.gmra.mxu0 %v11452_v39  ;;  %1569 = vmatmul.mubr.bf16.gmra.mxu1 %v11452_v39 }
 0x108   : > { %1385 = vmatprep.mubr.bf16.mxu0 %v11454_v42  ;;  %1578 = vmatprep.mubr.bf16.mxu1 %v11454_v42 }
 0x10f   : > { %1386 = vmatmul.mubr.bf16.gmra.mxu0 %v11464_v49  ;;  %1579 = vmatmul.mubr.bf16.gmra.mxu1 %v11464_v49 }
 0x110   : > { %1395 = vmatprep.mubr.bf16.mxu0 %v11466_v50  ;;  %1588 = vmatprep.mubr.bf16.mxu1 %v11466_v50 }
 0x117   : > { %1396 = vmatmul.mubr.bf16.gmra.mxu0 %v11476_v56  ;;  %1589 = vmatmul.mubr.bf16.gmra.mxu1 %v11476_v56 }
 0x118   : > { %1405 = vmatprep.mubr.bf16.mxu0 %v11478_v57  ;;  %1598 = vmatprep.mubr.bf16.mxu1 %v11478_v57 }
 0x11f   : > { %1406 = vmatmul.mubr.bf16.gmra.mxu0 %v11488_v2  ;;  %1599 = vmatmul.mubr.bf16.gmra.mxu1 %v11488_v2 }
 0x120   : > { %1415 = vmatprep.mubr.bf16.mxu0 %v11490_v3  ;;  %1608 = vmatprep.mubr.bf16.mxu1 %v11490_v3 }
 0x127   : > { %1416 = vmatmul.mubr.bf16.gmra.mxu0 %v11498_v6  ;;  %1609 = vmatmul.mubr.bf16.gmra.mxu1 %v11498_v6 }
 0x128   : > { %1651 = vmatprep.mubr.bf16.mxu0 %v11312_v58  ;;  %1844 = vmatprep.mubr.bf16.mxu1 %v11312_v58  ;;  %v9689_v58 = vld [vmem:[#allocation8 + $0x50] ss:$8 sps:$4 sm:$0xff]  }
 0x12f   : > { %1652 = vmatmul.mubr.bf16.vlgmr.msra.gmra.mxu0 %v11320_v15  ;;  %1845 = vmatmul.mubr.bf16.vlgmr.msra.gmra.mxu1 %v11320_v15  ;;  %v9700_v15 = vld [vmem:[#allocation8 + $0x144] ss:$8 sps:$4 sm:$0xff]  }
 0x130   : > { %7778 = vmatpush1.bf16.msra.mxu0 %v9677_v8  ;;  %7971 = vmatpush1.bf16.msra.mxu1 %v9680_v10  ;;  %v9740_v8 = vld [vmem:[#allocation8 + $0x1d0] ss:$8 sps:$4 sm:$0xff]   ;;  %v9745_v10 = vld [vmem:[#allocation8 + $0xc4] ss:$8 sps:$4 sm:$0xff]  }
 0x131   : > { %1661 = vmatprep.mubr.bf16.mxu0 %v11322_v23  ;;  %1854 = vmatprep.mubr.bf16.mxu1 %v11322_v23  ;;  %v9695_v23 = vld [vmem:[#allocation8 + $0x40] ss:$8 sps:$4 sm:$0xff]  }
 0x132   : > { %7779 = vmatprep.subr.bf16.mxu0 %v9685_v11  ;;  %7972 = vmatprep.subr.bf16.mxu1 %v9688_v12  ;;  %v9746_v11 = vld [vmem:[#allocation8 + $0x1c0] ss:$8 sps:$4 sm:$0xff]  }
 0x134   : > { %7780 = vmatpush1.bf16.msra.mxu0 %v9683_v13  ;;  %7973 = vmatpush1.bf16.msra.mxu1 %v9686_v16  ;;  %v551_v13 = vld [vmem:[#allocation7] sm:$0xff] }
 0x135   : > { %7781 = vmatprep.subr.bf16.mxu0 %v9691_v18  ;;  %7974 = vmatprep.subr.bf16.mxu1 %v9694_v19 }
 0x137   : > { %1662 = vmatmul.mubr.bf16.gmra.mxu0 %v11332_v40  ;;  %1855 = vmatmul.mubr.bf16.gmra.mxu1 %v11332_v40  ;;  %v9712_v40 = vld [vmem:[#allocation8 + $0x124] ss:$8 sps:$4 sm:$0xff]  }
 0x138   : > { %1671 = vmatprep.mubr.bf16.mxu0 %v11334_v41  ;;  %1864 = vmatprep.mubr.bf16.mxu1 %v11334_v41  ;;  %v9707_v41 = vld [vmem:[#allocation8 + $0x20] ss:$8 sps:$4 sm:$0xff]  }
 0x139   : > { %7782 = vmatpush1.bf16.msra.mxu0 %v9689_v58  ;;  %7975 = vmatpush1.bf16.msra.mxu1 %v9692_v20  ;;  %v9749_v20 = vld [vmem:[#allocation8 + $0xb0] ss:$8 sps:$4 sm:$0xff]  }
 0x13a   : > { %7783 = vmatprep.subr.bf16.mxu0 %v9697_v22  ;;  %7976 = vmatprep.subr.bf16.mxu1 %v9700_v15 }
 0x13d   : > { %7784 = vmatpush1.bf16.msra.mxu0 %v9695_v23  ;;  %7977 = vmatpush1.bf16.msra.mxu1 %v9698_v27 }
 0x13e   : > { %7785 = vmatprep.subr.bf16.mxu0 %v9703_v28  ;;  %7978 = vmatprep.subr.bf16.mxu1 %v9706_v29 }
 0x13f   : > { %1672 = vmatmul.mubr.bf16.gmra.mxu0 %v11344_v62  ;;  %1865 = vmatmul.mubr.bf16.gmra.mxu1 %v11344_v62  ;;  %v9724_v62 = vld [vmem:[#allocation8 + $0x104] ss:$8 sps:$4 sm:$0xff]  }
 0x140   : > { %1681 = vmatprep.mubr.bf16.mxu0 %v11346_v0  ;;  %1874 = vmatprep.mubr.bf16.mxu1 %v11346_v0  ;;  %v9719_v0 = vld [vmem:[#allocation8] ss:$8 sps:$4 sm:$0xff]  }
 0x141   : > { %7786 = vmatpush1.bf16.msra.mxu0 %v9701_v30  ;;  %7979 = vmatpush1.bf16.msra.mxu1 %v9704_v34 }
 0x142   : > { %7787 = vmatprep.subr.bf16.mxu0 %v9709_v36  ;;  %7980 = vmatprep.subr.bf16.mxu1 %v9712_v40 }
 0x145   : > { %7788 = vmatpush1.bf16.msra.mxu0 %v9707_v41  ;;  %7981 = vmatpush1.bf16.msra.mxu1 %v9710_v37 }
 0x146   : > { %7789 = vmatprep.subr.bf16.mxu0 %v9715_v38  ;;  %7982 = vmatprep.subr.bf16.mxu1 %v9718_v43 }
 0x147   : > { %1682 = vmatmul.mubr.bf16.gmra.mxu0 %v11356_v21  ;;  %1875 = vmatmul.mubr.bf16.gmra.mxu1 %v11356_v21  ;;  %v9736_v21 = vld [vmem:[#allocation8 + $0x1e4] ss:$8 sps:$4 sm:$0xff]  }
 0x148   : > { %1691 = vmatprep.mubr.bf16.mxu0 %v11358_v24  ;;  %1884 = vmatprep.mubr.bf16.mxu1 %v11358_v24  ;;  %v9731_v24 = vld [vmem:[#allocation8 + $0xe0] ss:$8 sps:$4 sm:$0xff]  }
 0x149   : > { %7790 = vmatpush1.bf16.msra.mxu0 %v9713_v44  ;;  %7983 = vmatpush1.bf16.msra.mxu1 %v9716_v45  ;;  %v9754_v44 = vld [vmem:[#allocation8 + $0x1b4] ss:$8 sps:$4 sm:$0xff]  }
 0x14a   : > { %7791 = vmatprep.subr.bf16.mxu0 %v9721_v47  ;;  %7984 = vmatprep.subr.bf16.mxu1 %v9724_v62 }
 0x14d   : > { %7792 = vmatpush1.bf16.msra.mxu0 %v9719_v0  ;;  %7985 = vmatpush1.bf16.msra.mxu1 %v9722_v51  ;;  %v9752_v0 = vld [vmem:[#allocation8 + $0x1b0] ss:$8 sps:$4 sm:$0xff]  }
 0x14e   : > { %7793 = vmatprep.subr.bf16.mxu0 %v9727_v52  ;;  %7986 = vmatprep.subr.bf16.mxu1 %v9730_v53 }
 0x14f   : > { %1692 = vmatmul.mubr.bf16.gmra.mxu0 %v11368_v46  ;;  %1885 = vmatmul.mubr.bf16.gmra.mxu1 %v11368_v46  ;;  %v9748_v46 = vld [vmem:[#allocation8 + $0x1c4] ss:$8 sps:$4 sm:$0xff]  }
 0x150   : > { %1701 = vmatprep.mubr.bf16.mxu0 %v11370_v48  ;;  %1894 = vmatprep.mubr.bf16.mxu1 %v11370_v48  ;;  %v9743_v48 = vld [vmem:[#allocation8 + $0xc0] ss:$8 sps:$4 sm:$0xff]  }
 0x151   : > { %7794 = vmatpush2.bf16.msra.mxu0 %v9725_v54  ;;  %7987 = vmatpush2.bf16.msra.mxu1 %v9728_v59 }
 0x152   : > { %7795 = vmatprep.subr.bf16.mxu0 %v9733_v61  ;;  %7988 = vmatprep.subr.bf16.mxu1 %v9736_v21 }
 0x155   : > { %7796 = vmatpush2.bf16.msra.mxu0 %v9731_v24  ;;  %7989 = vmatpush2.bf16.msra.mxu1 %v9734_v63 }
 0x156   : > { %7797 = vmatprep.subr.bf16.mxu0 %v9739_v1  ;;  %7990 = vmatprep.subr.bf16.mxu1 %v9742_v4 }
 0x157   : > { %1702 = vmatmul.mubr.bf16.gmra.mxu0 %v11380_v7  ;;  %1895 = vmatmul.mubr.bf16.gmra.mxu1 %v11380_v7  ;;  %v553_v7 = vlaneseq }
 0x158   : > { %1711 = vmatprep.mubr.bf16.mxu0 %v11382_v9  ;;  %1904 = vmatprep.mubr.bf16.mxu1 %v11382_v9 }
 0x159   : > { %7798 = vmatpush2.bf16.msra.mxu0 %v9737_v5  ;;  %7991 = vmatpush2.bf16.msra.mxu1 %v9740_v8  ;;  %v11532_v12 = vshrl.u32 %v553_v7, 7 }
 0x15a   : > { %7799 = vmatprep.subr.bf16.mxu0 %v9745_v10  ;;  %7992 = vmatprep.subr.bf16.mxu1 %v9748_v46 }
 0x15b   : > { %18899 = vst [vmem:[#allocation18_spill] sm:$0xff] %v11532_v12  ;;  %v18532_v9 = vsub.s32 0, %v11532_v12  ;;  %v18531_v16 = vsub.s32 1, %v11532_v12  ;;  %v567_v18 = vsub.s32 3, %v11532_v12 }
 0x15d   : > { %7800 = vmatpush2.bf16.msra.mxu0 %v9743_v48  ;;  %7993 = vmatpush2.bf16.msra.mxu1 %v9746_v11  ;;  %v11550_v58 = vrot.slane %v551_v13, %v18531_v16  ;;  %v11553_v22 = vrot.slane %v551_v13, %v567_v18 }
 0x15e   : > { %7994 = vmatprep.subr.bf16.mxu1 %v9754_v44 }
 0x15f   : > { %1712 = vmatmul.mubr.bf16.gmra.mxu0 %v11392_v33  ;;  %1905 = vmatmul.mubr.bf16.gmra.mxu1 %v11392_v33  ;;  %v563_v33 = vsub.s32 2, %v11532_v12 }
 0x160   : > { %1721 = vmatprep.mubr.bf16.mxu0 %v11394_v35  ;;  %1914 = vmatprep.mubr.bf16.mxu1 %v11394_v35  ;;  %v11544_v35 = vrot.slane %v551_v13, %v18532_v9 }
 0x161   : > { %v11546_v19 = vrot.slane %v551_v13, %v563_v33  ;;  %7995 = vmatpush2.bf16.msra.mxu1 %v9752_v0 }
 0x163   : > { %18900 = vst [vmem:[#allocation19_spill] sm:$0xff] %v11546_v19 }
 0x167   : > { %1722 = vmatmul.mubr.bf16.gmra.mxu0 %v11404_v55  ;;  %1915 = vmatmul.mubr.bf16.gmra.mxu1 %v11404_v55  ;;  %v9751_v55 = vld [vmem:[#allocation8 + $0xb4] ss:$8 sps:$4 sm:$0xff]  }
 0x168   : > { %1731 = vmatprep.mubr.bf16.mxu0 %v11406_v60  ;;  %1924 = vmatprep.mubr.bf16.mxu1 %v11406_v60 }
 0x169   : > { %7801 = vmatprep.subr.bf16.mxu0 %v9751_v55 }
 0x16a   : > { %7802 = vmatpush2.bf16.msra.mxu0 %v9749_v20 }
 0x16f   : > { %v1267_v60 = vpop.f32.mrf.mxu0  ;;  %1732 = vmatmul.mubr.bf16.gmra.mxu0 %v11416_v14  ;;  %v1460_v23 = vpop.f32.mrf.mxu1  ;;  %1925 = vmatmul.mubr.bf16.gmra.mxu1 %v11416_v14 }
 0x170   : > { %v1268_v15 = vadd.f32 %v1267_v60, %v11544_v35  ;;  %1741 = vmatprep.mubr.bf16.mxu0 %v11418_v17  ;;  %v1461_v27 = vadd.f32 %v1460_v23, %v11546_v19  ;;  %1934 = vmatprep.mubr.bf16.mxu1 %v11418_v17 }
 0x171   : > { %v1269_v28 = vpop.f32.mrf.mxu0  ;;  %v1462_v34 = vpop.f32.mrf.mxu1 }
 0x172   : > { %v11560_v29 = vadd.f32 -4.0, %v1268_v15  ;;  %v1270_v30 = vadd.f32 %v1269_v28, %v11550_v58  ;;  %v11563_v36 = vadd.f32 -4.0, %v1461_v27  ;;  %v1463_v40 = vadd.f32 %v1462_v34, %v11553_v22 }
 0x173   : > { %v1271_v41 = vpop.f32.mrf.mxu0  ;;  %v1464_v43 = vpop.f32.mrf.mxu1 }
 0x174   : > { %v2517_v14 = vand.u32 2147483647, %v11560_v29  ;;  %v11567_v37 = vadd.f32 -4.0, %v1270_v30  ;;  %v1272_v38 = vadd.f32 %v1271_v41, %v11544_v35  ;;  %v2519_v17 = vand.u32 2147483647, %v11563_v36 }
 0x175   : > { %v11571_v45 = vadd.f32 -4.0, %v1463_v40  ;;  %v1465_v47 = vadd.f32 %v1464_v43, %v11546_v19  ;;  %v11574_v62 = vpop.f32.mrf.mxu0  ;;  %v11579_v54 = vpop.f32.mrf.mxu1 }
 0x176   : > { %v2773_v51 = vsub.f32 0.0, %v2517_v14  ;;  %v2518_v52 = vand.u32 2147483647, %v11567_v37  ;;  %v11577_v53 = vadd.f32 -4.0, %v1272_v38  ;;  %v2775_v59 = vsub.f32 0.0, %v2519_v17 }
 0x177   : > { %v2520_v61 = vand.u32 2147483647, %v11571_v45  ;;  %v11582_v21 = vadd.f32 -4.0, %v1465_v47  ;;  %1742 = vmatmul.mubr.bf16.gmra.mxu0 %v11428_v25  ;;  %1935 = vmatmul.mubr.bf16.gmra.mxu1 %v11428_v25  ;;  %v1277_v10 = vpop.f32.mrf.mxu0  ;;  %v1470_v11 = vpop.f32.mrf.mxu1  ;;  %v9757_v47 = vld [vmem:[#allocation8 + $0xa4] ss:$8 sps:$4 sm:$0xff]  }
 0x178   : > { %v3029_v24 = vmul.f32 1.442695, %v2773_v51  ;;  %v2774_v63 = vsub.f32 0.0, %v2518_v52  ;;  %v2525_v1 = vand.u32 2147483647, %v11577_v53  ;;  %1751 = vmatprep.mubr.bf16.mxu0 %v11430_v26  ;;  %1944 = vmatprep.mubr.bf16.mxu1 %v11430_v26  ;;  %v1278_v25 = vadd.f32 %v1277_v10, %v11544_v35 }
 0x179   : > { %v3033_v4 = vmul.f32 1.442695, %v2775_v59  ;;  %v2776_v5 = vsub.f32 0.0, %v2520_v61  ;;  %v2527_v8 = vand.u32 2147483647, %v11582_v21  ;;  %v1471_v55 = vadd.f32 %v1470_v11, %v11546_v19  ;;  %v1279_v20 = vpop.f32.mrf.mxu0  ;;  %v1472_v26 = vpop.f32.mrf.mxu1  ;;  %7803 = vmatprep.subr.bf16.mxu0 %v9757_v47 }
 0x17a   : > { %9869 = vpow2.f32 %v3029_v24  ;;  %v3031_v46 = vmul.f32 1.442695, %v2774_v63  ;;  %v2781_v48 = vsub.f32 0.0, %v2525_v1  ;;  %v11592_v60 = vadd.f32 -4.0, %v1278_v25  ;;  %v9755_v52 = vld [vmem:[#allocation8 + $0xa0] ss:$8 sps:$4 sm:$0xff]  }
 0x17b   : > { %9871 = vpow2.f32 %v3033_v4  ;;  %v3035_v7 = vmul.f32 1.442695, %v2776_v5  ;;  %v2783_v13 = vsub.f32 0.0, %v2527_v8  ;;  %v11594_v15 = vadd.f32 -4.0, %v1471_v55  ;;  %v1281_v38 = vpop.f32.mrf.mxu0  ;;  %v1474_v44 = vpop.f32.mrf.mxu1  ;;  %7804 = vmatpush2.bf16.msra.mxu0 %v9755_v52 }
 0x17c   : > { %9873 = vpow2.f32 %v3031_v46  ;;  %v3045_v33 = vmul.f32 1.442695, %v2781_v48  ;;  %v2533_v23 = vand.u32 2147483647, %v11592_v60  ;;  %v1280_v27 = vadd.f32 %v1279_v20, %v11550_v58  ;;  %v9760_v20 = vld [vmem:[#allocation8 + $0x1a4] ss:$8 sps:$4 sm:$0xff]  }
 0x17d   : > { %9875 = vpow2.f32 %v3035_v7  ;;  %v3049_v18 = vmul.f32 1.442695, %v2783_v13  ;;  %v2535_v28 = vand.u32 2147483647, %v11594_v15  ;;  %v1473_v30 = vadd.f32 %v1472_v26, %v11553_v22  ;;  %v11618_v24 = vpop.f32.mrf.mxu1  ;;  %7996 = vmatprep.subr.bf16.mxu1 %v9760_v20 }
 0x17e   : > { %9877 = vpow2.f32 %v3045_v33  ;;  %v2789_v34 = vsub.f32 0.0, %v2533_v23  ;;  %v11604_v40 = vadd.f32 -4.0, %v1280_v27  ;;  %v1282_v46 = vadd.f32 %v1281_v38, %v11544_v35 }
 0x17f   : > { %1752 = vmatmul.mubr.bf16.gmra.mxu0 %v11440_v31  ;;  %9879 = vpow2.f32 %v3049_v18  ;;  %1945 = vmatmul.mubr.bf16.gmra.mxu1 %v11440_v31  ;;  %v2791_v41 = vsub.f32 0.0, %v2535_v28  ;;  %v11606_v14 = vadd.f32 -4.0, %v1473_v30  ;;  %v11635_v7 = vpop.f32.mrf.mxu1  ;;  %v1475_v55 = vadd.f32 %v1474_v44, %v11546_v19  ;;  %v9758_v44 = vld [vmem:[#allocation8 + $0x1a0] ss:$8 sps:$4 sm:$0xff]  }
 0x180   : > { %1761 = vmatprep.mubr.bf16.mxu0 %v11442_v32  ;;  %1954 = vmatprep.mubr.bf16.mxu1 %v11442_v32  ;;  %v3061_v43 = vmul.f32 1.442695, %v2789_v34  ;;  %v2534_v31 = vand.u32 2147483647, %v11604_v40  ;;  %v11612_v32 = vpop.f32.mrf.mxu0  ;;  %v11645_v28 = vadd.f32 -4.0, %v1282_v46 }
 0x181   : > { %v3065_v17 = vmul.f32 1.442695, %v2791_v41  ;;  %v2536_v51 = vand.u32 2147483647, %v11606_v14  ;;  %7997 = vmatpush2.bf16.msra.mxu1 %v9758_v44 }
 0x182   : > { %9881 = vpow2.f32 %v3061_v43  ;;  %v2790_v4 = vsub.f32 0.0, %v2534_v31  ;;  %v11632_v48 = vpop.f32.mrf.mxu0  ;;  %v11653_v43 = vpop.f32.mrf.mxu1 }
 0x183   : > { %9883 = vpow2.f32 %v3065_v17 }
 0x184   : > { %v3063_v33 = vmul.f32 1.442695, %v2790_v4  ;;  %v11647_v30 = vpop.f32.mrf.mxu0 }
 0x187   : > { %v11609_v0 = vpop.eup %9869  ;;  %1762 = vmatmul.mubr.bf16.gmra.mxu0 %v11452_v39  ;;  %1955 = vmatmul.mubr.bf16.gmra.mxu1 %v11452_v39  ;;  %v2792_v39 = vsub.f32 0.0, %v2536_v51 }
 0x188   : > { %v11615_v59 = vpop.eup %9871  ;;  %v3541_v61 = vadd.f32 1.0, %v11609_v0  ;;  %1771 = vmatprep.mubr.bf16.mxu0 %v11454_v42  ;;  %1964 = vmatprep.mubr.bf16.mxu1 %v11454_v42  ;;  %v3544_v13 = vmul.f32 -0.5, %v11609_v0  ;;  %v3547_v34 = vand.u32 2147483647, %v11609_v0 }
 0x189   : > { %v11622_v63 = vpop.eup %9873  ;;  %v3559_v1 = vadd.f32 1.0, %v11615_v59  ;;  %v3562_v25 = vmul.f32 -0.5, %v11615_v59  ;;  %v3067_v27 = vmul.f32 1.442695, %v2792_v39  ;;  %v3565_v31 = vand.u32 2147483647, %v11615_v59  ;;  %v11668_v39 = vpop.f32.mrf.mxu0 }
 0x18a   : > { %v11626_v5 = vpop.eup %9875  ;;  %9885 = vlog2.f32 %v3541_v61  ;;  %v3550_v8 = vadd.f32 1.0, %v11622_v63  ;;  %v3553_v41 = vmul.f32 -0.5, %v11622_v63  ;;  %v3545_v17 = vadd.f32 1.0, %v3544_v13 }
 0x18b   : > { %v11629_v10 = vpop.eup %9877  ;;  %9887 = vlog2.f32 %v3559_v1  ;;  %v3568_v11 = vadd.f32 1.0, %v11626_v5  ;;  %v3563_v51 = vadd.f32 1.0, %v3562_v25  ;;  %v3571_v52 = vmul.f32 -0.5, %v11626_v5  ;;  %v11678_v25 = vpop.f32.mrf.mxu1 }
 0x18c   : > { %9889 = vlog2.f32 %v3550_v8  ;;  %v11637_v42 = vpop.eup %9879  ;;  %v3613_v18 = vadd.f32 1.0, %v11629_v10  ;;  %v11661_v61 = vadd.f32 -4.0, %v1475_v55  ;;  %v2541_v8 = vand.u32 2147483647, %v11645_v28 }
 0x18d   : > { %9891 = vlog2.f32 %v3568_v11  ;;  %v3631_v38 = vadd.f32 1.0, %v11637_v42  ;;  %vm11672_vm0 = vcmp.lt.f32.partialorder %v3547_v34, 0.0004427343  ;;  %v3554_v11 = vadd.f32 1.0, %v3553_v41  ;;  %v11696_v4 = vpop.f32.mrf.mxu1 }
 0x18e   : > { %9893 = vlog2.f32 %v3613_v18  ;;  %v3546_v18 = vmul.f32 %v11609_v0, %v3545_v17  ;;  %vm11681_vm1 = vcmp.lt.f32.partialorder %v3565_v31, 0.0004427343  ;;  %v3616_v20 = vmul.f32 -0.5, %v11629_v10  ;;  %v11691_v31 = vpop.f32.mrf.mxu0 }
 0x18f   : > { %1772 = vmatmul.mubr.bf16.gmra.mxu0 %v11464_v49  ;;  %1965 = vmatmul.mubr.bf16.gmra.mxu1 %v11464_v49  ;;  %9895 = vpow2.f32 %v3063_v33  ;;  %v11663_v49 = vpop.eup %9881  ;;  %v3564_v34 = vmul.f32 %v11615_v59, %v3563_v51  ;;  %v3572_v41 = vadd.f32 1.0, %v3571_v52  ;;  %v2543_v44 = vand.u32 2147483647, %v11661_v61  ;;  %v11711_v46 = vpop.f32.mrf.mxu1 }
 0x190   : > { %1781 = vmatprep.mubr.bf16.mxu0 %v11466_v50  ;;  %1974 = vmatprep.mubr.bf16.mxu1 %v11466_v50  ;;  %9897 = vlog2.f32 %v3631_v38  ;;  %v11670_v50 = vpop.eup %9883  ;;  %v3685_v33 = vadd.f32 1.0, %v11663_v49  ;;  %v3556_v38 = vand.u32 2147483647, %v11622_v63  ;;  %v3634_v9 = vmul.f32 -0.5, %v11637_v42 }
 0x191   : > { %9899 = vpow2.f32 %v3067_v27  ;;  %v2797_v27 = vsub.f32 0.0, %v2541_v8  ;;  %v3703_v0 = vadd.f32 1.0, %v11670_v50  ;;  %v3555_v59 = vmul.f32 %v11622_v63, %v3554_v11 }
 0x192   : > { %9901 = vlog2.f32 %v3685_v33  ;;  %v3574_v51 = vand.u32 2147483647, %v11626_v5  ;;  %v2799_v52 = vsub.f32 0.0, %v2543_v44  ;;  %v3617_v1 = vadd.f32 1.0, %v3616_v20 }
 0x193   : > { %v3077_v17 = vmul.f32 1.442695, %v2797_v27  ;;  %v3619_v23 = vand.u32 2147483647, %v11629_v10  ;;  %v3637_v11 = vand.u32 2147483647, %v11637_v42 }
 0x194   : > { %v3081_v44 = vmul.f32 1.442695, %v2799_v52  ;;  %vm3557_vm2 = vcmp.lt.f32.partialorder %v3556_v38, 0.0004427343  ;;  %v3635_v26 = vadd.f32 1.0, %v3634_v9  ;;  %v18907_v38 = vmax.f32 %v11567_v37, 0.0 }
 0x195   : > { %9903 = vpow2.f32 %v3077_v17  ;;  %vm3575_vm3 = vcmp.lt.f32.partialorder %v3574_v51, 0.0004427343  ;;  %vm11721_vm4 = vcmp.lt.f32.partialorder %v3619_v23, 0.0004427343  ;;  %vm11728_vm5 = vcmp.lt.f32.partialorder %v3637_v11, 0.0004427343 }
 0x196   : > { %9905 = vlog2.f32 %v3703_v0  ;;  %v18912_v37 = vmax.f32 %v11563_v36, 0.0  ;;  %v18914_v51 = vmax.f32 %v11571_v45, 0.0  ;;  %v3688_v11 = vmul.f32 -0.5, %v11663_v49 }
 0x197   : > { %v9886_v16 = vpop.eup %9885  ;;  %1782 = vmatmul.mubr.bf16.gmra.mxu0 %v11476_v56  ;;  %1975 = vmatmul.mubr.bf16.gmra.mxu1 %v11476_v56  ;;  %v3573_v56 = vmul.f32 %v11626_v5, %v3572_v41  ;;  %9907 = vpow2.f32 %v3081_v44  ;;  %v3618_v41 = vmul.f32 %v11629_v10, %v3617_v1  ;;  %v11752_v44 = vpop.f32.mrf.mxu1 }
 0x198   : > { %v9888_v13 = vpop.eup %9887  ;;  %v3543_v8 = vmul.f32 0.6931472, %v9886_v16  ;;  %1791 = vmatprep.mubr.bf16.mxu0 %v11478_v57  ;;  %1984 = vmatprep.mubr.bf16.mxu1 %v11478_v57 }
 0x199   : > { %v9890_v33 = vpop.eup %9889  ;;  %v3561_v27 = vmul.f32 0.6931472, %v9888_v13  ;;  %v11707_v13 = vpop.f32.mrf.mxu0 }
 0x19a   : > { %v3549_v16 = vsel %vm11672_vm0, %v3546_v18, %v3543_v8  ;;  %v3552_v63 = vmul.f32 0.6931472, %v9890_v33  ;;  %v9892_v47 = vpop.eup %9891  ;;  %v18905_v8 = vmax.f32 %v11560_v29, 0.0 }
 0x19b   : > { %v3567_v20 = vsel %vm11681_vm1, %v3564_v34, %v3561_v27  ;;  %v3570_v17 = vmul.f32 0.6931472, %v9892_v47  ;;  %v9894_v18 = vpop.eup %9893  ;;  %v11743_v10 = vpop.f32.mrf.mxu0 }
 0x19c   : > { %v3558_v57 = vsel %vm3557_vm2, %v3555_v59, %v3552_v63  ;;  %v11715_v52 = vadd.f32 %v3549_v16, %v18905_v8  ;;  %v11725_v55 = vpop.eup %9895  ;;  %v3615_v34 = vmul.f32 0.6931472, %v9894_v18  ;;  %v11734_v59 = vadd.f32 %v3567_v20, %v18912_v37  ;;  %v9761_v37 = vld [vmem:[#allocation8 + $0x90] ss:$8 sps:$4 sm:$0xff]  }
 0x19d   : > { %v11719_v5 = vadd.f32 %v3558_v57, %v18907_v38  ;;  %v3576_v47 = vsel %vm3575_vm3, %v3573_v56, %v3570_v17  ;;  %v9898_v29 = vpop.eup %9897  ;;  %v3694_v27 = vadd.f32 1.0, %v11725_v55  ;;  %v3636_v63 = vmul.f32 %v11637_v42, %v3635_v26  ;;  %v11784_v9 = vpop.f32.mrf.mxu0 }
 0x19e   : > { %18906 = vst [vmem:[#allocation20_spill] sm:$0xff] %v11715_v52  ;;  %18913 = vst [vmem:[#allocation21_spill] sm:$0xff] %v11734_v59  ;;  %v11740_v33 = vadd.f32 %v3576_v47, %v18914_v51  ;;  %v11746_v1 = vpop.eup %9899  ;;  %v3621_v36 = vsel %vm11721_vm4, %v3618_v41, %v3615_v34  ;;  %v3633_v16 = vmul.f32 0.6931472, %v9898_v29  ;;  %v18915_v56 = vmax.f32 %v11577_v53, 0.0  ;;  %v11788_v29 = vpop.f32.mrf.mxu1 }
 0x19f   : > { %v9453_v23 = vpack.c.bf16 %v11719_v5, %v11715_v52  ;;  %1792 = vmatmul.mubr.bf16.gmra.mxu0 %v11488_v2  ;;  %1985 = vmatmul.mubr.bf16.gmra.mxu1 %v11488_v2  ;;  %v3706_v26 = vmul.f32 -0.5, %v11670_v50  ;;  %9909 = vlog2.f32 %v3694_v27  ;;  %v3697_v20 = vmul.f32 -0.5, %v11725_v55  ;;  %v9763_v47 = vld [vmem:[#allocation8 + $0x94] ss:$8 sps:$4 sm:$0xff]   ;;  %v9902_v34 = vpop.eup %9901 }
 0x1a0   : > { %1801 = vmatprep.mubr.bf16.mxu0 %v11490_v3  ;;  %v9454_v45 = vpack.c.bf16 %v11740_v33, %v11734_v59  ;;  %v11765_v42 = vadd.f32 %v3621_v36, %v18915_v56  ;;  %1994 = vmatprep.mubr.bf16.mxu1 %v11490_v3  ;;  %v3639_v2 = vsel %vm11728_vm5, %v3636_v63, %v3633_v16  ;;  %v3712_v57 = vadd.f32 1.0, %v11746_v1 }
 0x1a1   : > { %6869 = vst [vmem:[%s11758_s29] sm:$0xff] %v9453_v23  ;;  %v1288_v17 = vadd.f32 %v11632_v48, %v11544_v35  ;;  %v18916_v18 = vmax.f32 %v11582_v21, 0.0  ;;  %v2277_v3 = vmax.f32 %v11592_v60, 0.0  ;;  %v3691_v38 = vand.u32 2147483647, %v11663_v49  ;;  %7805 = vmatprep.subr.bf16.mxu0 %v9763_v47  ;;  %v11818_v47 = vpop.f32.mrf.mxu1 }
 0x1a2   : > { %6870 = vst [vmem:[%s11758_s29 + $0x8] sm:$0xff] %v9454_v45  ;;  %v3689_v41 = vadd.f32 1.0, %v3688_v11  ;;  %v3709_v48 = vand.u32 2147483647, %v11670_v50  ;;  %9911 = vlog2.f32 %v3712_v57  ;;  %v3707_v23 = vadd.f32 1.0, %v3706_v26  ;;  %v11795_v27 = vpop.eup %9903  ;;  %7806 = vmatpush2.bf16.msra.mxu0 %v9761_v37 }
 0x1a3   : > { %v11780_v8 = vadd.f32 %v3639_v2, %v18916_v18  ;;  %v2278_v60 = vmax.f32 %v11604_v40, 0.0  ;;  %v1481_v51 = vadd.f32 %v11635_v7, %v11546_v19  ;;  %v3698_v36 = vadd.f32 1.0, %v3697_v20  ;;  %v11807_v2 = vpop.f32.mrf.mxu0  ;;  %v9906_v20 = vpop.eup %9905 }
 0x1a4   : > { %v3700_v16 = vand.u32 2147483647, %v11725_v55  ;;  %v3715_v63 = vmul.f32 -0.5, %v11746_v1  ;;  %v11799_v11 = vadd.f32 -4.0, %v1288_v17  ;;  %v3687_v45 = vmul.f32 0.6931472, %v9902_v34  ;;  %v11821_v37 = vpop.eup %9907 }
 0x1a5   : > { %vm11801_vm6 = vcmp.lt.f32.partialorder %v3691_v38, 0.0004427343  ;;  %v3757_v7 = vadd.f32 1.0, %v11795_v27  ;;  %v3690_v57 = vmul.f32 %v11663_v49, %v3689_v41  ;;  %vm11811_vm7 = vcmp.lt.f32.partialorder %v3709_v48, 0.0004427343 }
 0x1a6   : > { %v3718_v18 = vand.u32 2147483647, %v11746_v1  ;;  %v1290_v38 = vadd.f32 %v11647_v30, %v11550_v58  ;;  %v9766_v34 = vld [vmem:[#allocation8 + $0x194] ss:$8 sps:$4 sm:$0xff]   ;;  %v3708_v21 = vmul.f32 %v11670_v50, %v3707_v23  ;;  %v2549_v49 = vand.u32 2147483647, %v11799_v11 }
 0x1a7   : > { %1802 = vmatmul.mubr.bf16.gmra.mxu0 %v11498_v6  ;;  %1995 = vmatmul.mubr.bf16.gmra.mxu1 %v11498_v6  ;;  %9913 = vlog2.f32 %v3757_v7  ;;  %v11825_v41 = vadd.f32 -4.0, %v1481_v51  ;;  %v9764_v48 = vld [vmem:[#allocation8 + $0x190] ss:$8 sps:$4 sm:$0xff]   ;;  %v3699_v53 = vmul.f32 %v11725_v55, %v3698_v36  ;;  %vm11828_vm8 = vcmp.lt.f32.partialorder %v3700_v16, 0.0004427343 }
 0x1a8   : > { %v3716_v30 = vadd.f32 1.0, %v3715_v63  ;;  %v3775_v0 = vadd.f32 1.0, %v11821_v37  ;;  %7998 = vmatprep.subr.bf16.mxu1 %v9766_v34  ;;  %v3693_v6 = vsel %vm11801_vm6, %v3690_v57, %v3687_v45  ;;  %v3705_v50 = vmul.f32 0.6931472, %v9906_v20 }
 0x1a9   : > { %v2805_v23 = vsub.f32 0.0, %v2549_v49  ;;  %v2551_v7 = vand.u32 2147483647, %v11825_v41  ;;  %7999 = vmatpush2.bf16.msra.mxu1 %v9764_v48  ;;  %vm11836_vm9 = vcmp.lt.f32.partialorder %v3718_v18, 0.0004427343  ;;  %v3760_v55 = vmul.f32 -0.5, %v11795_v27 }
 0x1aa   : > { %9915 = vlog2.f32 %v3775_v0  ;;  %v11841_v36 = vadd.f32 -4.0, %v1290_v38  ;;  %v1483_v56 = vadd.f32 %v11653_v43, %v11553_v22  ;;  %v1292_v45 = vadd.f32 %v11668_v39, %v11544_v35 }
 0x1ab   : > { %v3093_v16 = vmul.f32 1.442695, %v2805_v23  ;;  %v2807_v63 = vsub.f32 0.0, %v2551_v7  ;;  %v11847_v57 = vadd.f32 %v3693_v6, %v2277_v3  ;;  %v3717_v18 = vmul.f32 %v11746_v1, %v3716_v30 }
 0x1ac   : > { %v9910_v20 = vpop.eup %9909  ;;  %v2550_v34 = vand.u32 2147483647, %v11841_v36  ;;  %v1485_v0 = vadd.f32 %v11678_v25, %v11546_v19  ;;  %v11853_v48 = vadd.f32 -4.0, %v1483_v56  ;;  %v3711_v43 = vsel %vm11811_vm7, %v3708_v21, %v3705_v50 }
 0x1ad   : > { %18925 = vst [vmem:[#allocation22_spill] sm:$0xff] %v11847_v57  ;;  %v3696_v38 = vmul.f32 0.6931472, %v9910_v20  ;;  %9917 = vpow2.f32 %v3093_v16  ;;  %v3097_v49 = vmul.f32 1.442695, %v2807_v63  ;;  %v11857_v39 = vadd.f32 -4.0, %v1292_v45 }
 0x1ae   : > { %v2806_v23 = vsub.f32 0.0, %v2550_v34  ;;  %v11859_v3 = vadd.f32 -4.0, %v1485_v0  ;;  %v3761_v30 = vadd.f32 1.0, %v3760_v55  ;;  %v2552_v25 = vand.u32 2147483647, %v11853_v48 }
 0x1af   : > { %v9912_v6 = vpop.eup %9911  ;;  %v3702_v1 = vsel %vm11828_vm8, %v3699_v53, %v3696_v38  ;;  %9919 = vpow2.f32 %v3097_v49  ;;  %v3778_v21 = vmul.f32 -0.5, %v11821_v37  ;;  %v18927_v50 = vmax.f32 %v11594_v15, 0.0 }
 0x1b0   : > { %v11866_v7 = vadd.f32 %v3702_v1, %v2278_v60  ;;  %v3714_v16 = vmul.f32 0.6931472, %v9912_v6  ;;  %v3095_v17 = vmul.f32 1.442695, %v2806_v23  ;;  %v2808_v56 = vsub.f32 0.0, %v2552_v25 }
 0x1b1   : > { %v11871_v63 = vadd.f32 %v3711_v43, %v18927_v50  ;;  %v2557_v53 = vand.u32 2147483647, %v11857_v39  ;;  %v2559_v26 = vand.u32 2147483647, %v11859_v3  ;;  %v3763_v60 = vand.u32 2147483647, %v11795_v27 }
 0x1b2   : > { %18926 = vst [vmem:[#allocation23_spill] sm:$0xff] %v11866_v7  ;;  %v9461_v55 = vpack.c.bf16 %v11866_v7, %v11847_v57  ;;  %v3720_v40 = vsel %vm11836_vm9, %v3717_v18, %v3714_v16  ;;  %9921 = vpow2.f32 %v3095_v17  ;;  %v18929_v45 = vmax.f32 %v11606_v14, 0.0 }
 0x1b3   : > { %18928 = vst [vmem:[#allocation24_spill] sm:$0xff] %v11871_v63  ;;  %v3099_v15 = vmul.f32 1.442695, %v2808_v56  ;;  %v2813_v34 = vsub.f32 0.0, %v2557_v53  ;;  %v2815_v0 = vsub.f32 0.0, %v2559_v26  ;;  %v3762_v49 = vmul.f32 %v11795_v27, %v3761_v30 }
 0x1b4   : > { %v11882_v20 = vadd.f32 %v3720_v40, %v18929_v45  ;;  %v9914_v38 = vpop.eup %9913  ;;  %6877 = vst [vmem:[%s11758_s29 + $0x40] sm:$0xff] %v9461_v55  ;;  %v3779_v43 = vadd.f32 1.0, %v3778_v21  ;;  %v3781_v23 = vand.u32 2147483647, %v11821_v37  ;;  %v1298_v51 = vadd.f32 %v11707_v13, %v11544_v35 }
 0x1b5   : > { %v3759_v14 = vmul.f32 0.6931472, %v9914_v38  ;;  %9923 = vpow2.f32 %v3099_v15  ;;  %v3109_v6 = vmul.f32 1.442695, %v2813_v34  ;;  %v2285_v1 = vmax.f32 %v11645_v28, 0.0 }
 0x1b6   : > { %18930 = vst [vmem:[#allocation25_spill] sm:$0xff] %v11882_v20  ;;  %v9462_v18 = vpack.c.bf16 %v11882_v20, %v11871_v63  ;;  %vm3764_vm10 = vcmp.lt.f32.partialorder %v3763_v60, 0.0004427343  ;;  %v3113_v25 = vmul.f32 1.442695, %v2815_v0  ;;  %v11892_v16 = vadd.f32 -4.0, %v1298_v51 }
 0x1b7   : > { %v9916_v17 = vpop.eup %9915  ;;  %v3765_v27 = vsel %vm3764_vm10, %v3762_v49, %v3759_v14  ;;  %9925 = vpow2.f32 %v3109_v6  ;;  %v1491_v30 = vadd.f32 %v11711_v46, %v11546_v19  ;;  %v3780_v50 = vmul.f32 %v11821_v37, %v3779_v43  ;;  %v9769_v46 = vld [vmem:[#allocation8 + $0x84] ss:$8 sps:$4 sm:$0xff]  }
 0x1b8   : > { %6878 = vst [vmem:[%s11758_s29 + $0x48] sm:$0xff] %v9462_v18  ;;  %v11897_v13 = vadd.f32 %v3765_v27, %v2285_v1  ;;  %v3777_v21 = vmul.f32 0.6931472, %v9916_v17  ;;  %9927 = vpow2.f32 %v3113_v25  ;;  %v2287_v56 = vmax.f32 %v11661_v61, 0.0  ;;  %v9767_v61 = vld [vmem:[#allocation8 + $0x80] ss:$8 sps:$4 sm:$0xff]   ;;  %7807 = vmatprep.subr.bf16.mxu0 %v9769_v46 }
 0x1b9   : > { %vm3782_vm11 = vcmp.lt.f32.partialorder %v3781_v23, 0.0004427343  ;;  %v2565_v28 = vand.u32 2147483647, %v11892_v16  ;;  %v11906_v40 = vadd.f32 -4.0, %v1491_v30  ;;  %v1300_v37 = vadd.f32 %v11743_v10, %v11550_v58  ;;  %7808 = vmatpush2.bf16.msra.mxu0 %v9767_v61 }
 0x1ba   : > { %18931 = vst [vmem:[#allocation26_spill] sm:$0xff] %v11897_v13  ;;  %v11902_v53 = vpop.eup %9917  ;;  %v3783_v55 = vsel %vm3782_vm11, %v3780_v50, %v3777_v21  ;;  %v1493_v61 = vadd.f32 %v11752_v44, %v11553_v22 }
 0x1bb   : > { %v11908_v60 = vadd.f32 %v3783_v55, %v2287_v56  ;;  %v3829_v45 = vadd.f32 1.0, %v11902_v53  ;;  %v2821_v34 = vsub.f32 0.0, %v2565_v28  ;;  %v2567_v38 = vand.u32 2147483647, %v11906_v40 }
 0x1bc   : > { %v11913_v15 = vpop.eup %9919  ;;  %v11919_v23 = vadd.f32 -4.0, %v1300_v37  ;;  %v3832_v17 = vmul.f32 -0.5, %v11902_v53  ;;  %v3835_v27 = vand.u32 2147483647, %v11902_v53 }
 0x1bd   : > { %18932 = vst [vmem:[#allocation27_spill] sm:$0xff] %v11908_v60  ;;  %9929 = vlog2.f32 %v3829_v45  ;;  %v3847_v49 = vadd.f32 1.0, %v11913_v15  ;;  %v3125_v10 = vmul.f32 1.442695, %v2821_v34  ;;  %v2823_v18 = vsub.f32 0.0, %v2567_v38 }
 0x1be   : > { %v2566_v25 = vand.u32 2147483647, %v11919_v23  ;;  %v3850_v56 = vmul.f32 -0.5, %v11913_v15  ;;  %v3833_v0 = vadd.f32 1.0, %v3832_v17  ;;  %vm11942_vm12 = vcmp.lt.f32.partialorder %v3835_v27, 0.0004427343 }
 0x1bf   : > { %v9922_v43 = vpop.eup %9921  ;;  %9931 = vlog2.f32 %v3847_v49  ;;  %v3129_v37 = vmul.f32 1.442695, %v2823_v18  ;;  %v11948_v38 = vadd.f32 -4.0, %v1493_v61  ;;  %v1302_v27 = vadd.f32 %v11784_v9, %v11544_v35 }
 0x1c0   : > { %v3838_v51 = vadd.f32 1.0, %v9922_v43  ;;  %v3841_v28 = vmul.f32 -0.5, %v9922_v43  ;;  %v2822_v55 = vsub.f32 0.0, %v2566_v25  ;;  %v3853_v25 = vand.u32 2147483647, %v11913_v15 }
 0x1c1   : > { %v3851_v18 = vadd.f32 1.0, %v3850_v56 }
 0x1c2   : > { %v11921_v14 = vpop.eup %9923  ;;  %9933 = vlog2.f32 %v3838_v51  ;;  %v3127_v44 = vmul.f32 1.442695, %v2822_v55  ;;  %v3842_v26 = vadd.f32 1.0, %v3841_v28  ;;  %vm11956_vm13 = vcmp.lt.f32.partialorder %v3853_v25, 0.0004427343 }
 0x1c3   : > { %v3856_v21 = vadd.f32 1.0, %v11921_v14  ;;  %9935 = vpow2.f32 %v3125_v10  ;;  %v3859_v34 = vmul.f32 -0.5, %v11921_v14  ;;  %v3862_v17 = vand.u32 2147483647, %v11921_v14 }
 0x1c4   : > { %v11930_v50 = vpop.eup %9925  ;;  %v2568_v55 = vand.u32 2147483647, %v11948_v38  ;;  %v3843_v30 = vmul.f32 %v9922_v43, %v3842_v26  ;;  %v18941_v10 = vmax.f32 %v11799_v11, 0.0 }
 0x1c5   : > { %v11933_v46 = vpop.eup %9927  ;;  %9937 = vlog2.f32 %v3856_v21  ;;  %v3901_v45 = vadd.f32 1.0, %v11930_v50  ;;  %v3844_v21 = vand.u32 2147483647, %v9922_v43  ;;  %vm11972_vm15 = vcmp.lt.f32.partialorder %v3862_v17, 0.0004427343 }
 0x1c6   : > { %v3919_v51 = vadd.f32 1.0, %v11933_v46  ;;  %v3922_v61 = vmul.f32 -0.5, %v11933_v46  ;;  %v3925_v17 = vand.u32 2147483647, %v11933_v46 }
 0x1c7   : > { %9939 = vlog2.f32 %v3901_v45  ;;  %v1495_v45 = vadd.f32 %v11788_v29, %v11546_v19  ;;  %v3852_v29 = vmul.f32 %v11913_v15, %v3851_v18  ;;  %vm11968_vm14 = vcmp.lt.f32.partialorder %v3844_v21, 0.0004427343 }
 0x1c8   : > { %9941 = vlog2.f32 %v3919_v51  ;;  %v3834_v51 = vmul.f32 %v11902_v53, %v3833_v0  ;;  %v3860_v53 = vadd.f32 1.0, %v3859_v34  ;;  %v2824_v0 = vsub.f32 0.0, %v2568_v55 }
 0x1c9   : > { %9943 = vpow2.f32 %v3129_v37  ;;  %v3904_v37 = vmul.f32 -0.5, %v11930_v50  ;;  %v11965_v1 = vadd.f32 -4.0, %v1495_v45  ;;  %v3907_v15 = vand.u32 2147483647, %v11930_v50 }
 0x1ca   : > { %v9930_v49 = vpop.eup %9929  ;;  %9945 = vpow2.f32 %v3127_v44  ;;  %v11963_v44 = vadd.f32 -4.0, %v1302_v27  ;;  %v3131_v18 = vmul.f32 1.442695, %v2824_v0  ;;  %v3923_v55 = vadd.f32 1.0, %v3922_v61 }
 0x1cb   : > { %v3831_v56 = vmul.f32 0.6931472, %v9930_v49  ;;  %v2575_v21 = vand.u32 2147483647, %v11965_v1  ;;  %v3905_v34 = vadd.f32 1.0, %v3904_v37  ;;  %v3861_v43 = vmul.f32 %v11921_v14, %v3860_v53 }
 0x1cc   : > { %v9932_v9 = vpop.eup %9931  ;;  %v2573_v27 = vand.u32 2147483647, %v11963_v44  ;;  %9947 = vpow2.f32 %v3131_v18  ;;  %v18943_v61 = vmax.f32 %v11841_v36, 0.0  ;;  %vm11999_vm0 = vcmp.lt.f32.partialorder %v3907_v15, 0.0004427343 }
 0x1cd   : > { %v3849_v25 = vmul.f32 0.6931472, %v9932_v9  ;;  %v3837_v45 = vsel %vm11942_vm12, %v3834_v51, %v3831_v56  ;;  %v2831_v60 = vsub.f32 0.0, %v2575_v21  ;;  %v3906_v11 = vmul.f32 %v11930_v50, %v3905_v34  ;;  %v1500_v21 = vpop.f32.mrf.mxu1 }
 0x1ce   : > { %v2829_v9 = vsub.f32 0.0, %v2573_v27  ;;  %v11987_v56 = vadd.f32 %v3837_v45, %v18941_v10  ;;  %v3924_v28 = vmul.f32 %v11933_v46, %v3923_v55  ;;  %v18947_v50 = vmax.f32 %v11825_v41, 0.0 }
 0x1cf   : > { %v9934_v12 = vpop.eup %9933  ;;  %v3855_v51 = vsel %vm11956_vm13, %v3852_v29, %v3849_v25  ;;  %v3145_v27 = vmul.f32 1.442695, %v2831_v60  ;;  %v18949_v25 = vmax.f32 %v11853_v48, 0.0  ;;  %vm3926_vm1 = vcmp.lt.f32.partialorder %v3925_v17, 0.0004427343 }
 0x1d0   : > { %v3840_v63 = vmul.f32 0.6931472, %v9934_v12  ;;  %v11981_v26 = vpop.eup %9935  ;;  %18942 = vst [vmem:[#allocation28_spill] sm:$0xff] %v11987_v56  ;;  %v3141_v0 = vmul.f32 1.442695, %v2829_v9  ;;  %v12012_v49 = vadd.f32 %v3855_v51, %v18947_v50  ;;  %v18951_v9 = vmax.f32 %v11857_v39, 0.0 }
 0x1d1   : > { %v3973_v37 = vadd.f32 1.0, %v11981_v26  ;;  %v1501_v17 = vadd.f32 %v1500_v21, %v11546_v19 }
 0x1d2   : > { %v9938_v20 = vpop.eup %9937  ;;  %v3846_v12 = vsel %vm11968_vm14, %v3843_v30, %v3840_v63  ;;  %v1307_v63 = vpop.f32.mrf.mxu0  ;;  %18948 = vst [vmem:[#allocation30_spill] sm:$0xff] %v12012_v49 }
 0x1d3   : > { %v11996_v14 = vadd.f32 %v3846_v12, %v18943_v61  ;;  %v3858_v53 = vmul.f32 0.6931472, %v9938_v20  ;;  %9949 = vlog2.f32 %v3973_v37  ;;  %v1308_v41 = vadd.f32 %v1307_v63, %v11544_v35 }
 0x1d4   : > { %v9940_v18 = vpop.eup %9939  ;;  %9951 = vpow2.f32 %v3141_v0  ;;  %v18953_v12 = vmax.f32 %v11859_v3, 0.0  ;;  %v1274_v61 = vadd.f32 %v11574_v62, %v11550_v58  ;;  %v1309_v3 = vpop.f32.mrf.mxu0  ;;  %v3976_v62 = vmul.f32 -0.5, %v11981_v26 }
 0x1d5   : > { %18944 = vst [vmem:[#allocation29_spill] sm:$0xff] %v11996_v14  ;;  %v9942_v30 = vpop.eup %9941  ;;  %v9469_v36 = vpack.c.bf16 %v11996_v14, %v11987_v56  ;;  %v3864_v20 = vsel %vm11972_vm15, %v3861_v43, %v3858_v53  ;;  %v3903_v60 = vmul.f32 0.6931472, %v9940_v18  ;;  %9953 = vpow2.f32 %v3145_v27 }
 0x1d6   : > { %v12008_v29 = vpop.eup %9943  ;;  %v12016_v46 = vadd.f32 %v3864_v20, %v18949_v25  ;;  %v3921_v15 = vmul.f32 0.6931472, %v9942_v30  ;;  %v12044_v0 = vadd.f32 -4.0, %v1308_v41  ;;  %v12046_v27 = vadd.f32 -4.0, %v1501_v17  ;;  %v12082_v39 = vpop.f32.mrf.mxu0 }
 0x1d7   : > { %v12018_v34 = vpop.eup %9945  ;;  %6885 = vst [vmem:[%s11758_s29 + $0x80] sm:$0xff] %v9469_v36  ;;  %v3909_v6 = vsel %vm11999_vm0, %v3906_v11, %v3903_v60  ;;  %v3991_v55 = vadd.f32 1.0, %v12008_v29  ;;  %v12050_v11 = vadd.f32 -4.0, %v1274_v61  ;;  %v9770_v36 = vld [vmem:[#allocation8 + $0x180] ss:$8 sps:$4 sm:$0xff]   ;;  %v1310_v50 = vadd.f32 %v1309_v3, %v11550_v58 }
 0x1d8   : > { %18950 = vst [vmem:[#allocation31_spill] sm:$0xff] %v12016_v46  ;;  %v9470_v48 = vpack.c.bf16 %v12016_v46, %v12012_v49  ;;  %v12029_v43 = vadd.f32 %v3909_v6, %v18951_v9  ;;  %v3927_v10 = vsel %vm3926_vm1, %v3924_v28, %v3921_v15  ;;  %v3982_v51 = vadd.f32 1.0, %v12018_v34  ;;  %v9772_v28 = vld [vmem:[#allocation8 + $0x184] ss:$8 sps:$4 sm:$0xff]  }
 0x1d9   : > { %v12034_v37 = vadd.f32 %v3927_v10, %v18953_v12  ;;  %v12048_v18 = vpop.eup %9947  ;;  %v2581_v45 = vand.u32 2147483647, %v12044_v0  ;;  %v3985_v63 = vmul.f32 -0.5, %v12018_v34  ;;  %v2583_v60 = vand.u32 2147483647, %v12046_v27  ;;  %8000 = vmatprep.subr.bf16.mxu1 %v9772_v28 }
 0x1da   : > { %18952 = vst [vmem:[#allocation32_spill] sm:$0xff] %v12029_v43  ;;  %6886 = vst [vmem:[%s11758_s29 + $0x88] sm:$0xff] %v9470_v48  ;;  %9955 = vlog2.f32 %v3982_v51  ;;  %v4000_v30 = vadd.f32 1.0, %v12048_v18  ;;  %8001 = vmatpush2.bf16.msra.mxu1 %v9770_v36  ;;  %v1467_v6 = vadd.f32 %v11579_v54, %v11553_v22  ;;  %v1502_v48 = vpop.f32.mrf.mxu1  ;;  %v3979_v10 = vand.u32 2147483647, %v11981_v26 }
 0x1db   : > { %18954 = vst [vmem:[#allocation33_spill] sm:$0xff] %v12034_v37  ;;  %9957 = vlog2.f32 %v3991_v55  ;;  %v2837_v20 = vsub.f32 0.0, %v2581_v45  ;;  %v3977_v55 = vadd.f32 1.0, %v3976_v62  ;;  %v2839_v41 = vsub.f32 0.0, %v2583_v60 }
 0x1dc   : > { %9959 = vlog2.f32 %v4000_v30  ;;  %v3986_v51 = vadd.f32 1.0, %v3985_v63  ;;  %v2309_v61 = vmax.f32 %v11892_v16, 0.0  ;;  %v12069_v28 = vadd.f32 -4.0, %v1310_v50 }
 0x1dd   : > { %v3157_v17 = vmul.f32 1.442695, %v2837_v20  ;;  %v3994_v54 = vmul.f32 -0.5, %v12008_v29  ;;  %v3988_v62 = vand.u32 2147483647, %v12018_v34  ;;  %v1503_v30 = vadd.f32 %v1502_v48, %v11553_v22  ;;  %v12087_v48 = vpop.f32.mrf.mxu1 }
 0x1de   : > { %v3978_v36 = vmul.f32 %v11981_v26, %v3977_v55  ;;  %v4003_v63 = vmul.f32 -0.5, %v12048_v18  ;;  %v3161_v20 = vmul.f32 1.442695, %v2839_v41  ;;  %vm12076_vm2 = vcmp.lt.f32.partialorder %v3979_v10, 0.0004427343 }
 0x1df   : > { %v2310_v50 = vmax.f32 %v11919_v23, 0.0  ;;  %v2582_v41 = vand.u32 2147483647, %v12069_v28  ;;  %v3995_v10 = vadd.f32 1.0, %v3994_v54  ;;  %vm3989_vm3 = vcmp.lt.f32.partialorder %v3988_v62, 0.0004427343  ;;  %v12104_v16 = vpop.f32.mrf.mxu1 }
 0x1e0   : > { %v9950_v25 = vpop.eup %9949  ;;  %v12090_v23 = vadd.f32 -4.0, %v1503_v30  ;;  %v12100_v54 = vadd.f32 -4.0, %v1467_v6  ;;  %v4006_v62 = vand.u32 2147483647, %v12048_v18  ;;  %v2311_v6 = vmax.f32 %v11906_v40, 0.0 }
 0x1e1   : > { %v12058_v15 = vpop.eup %9951  ;;  %v3975_v3 = vmul.f32 0.6931472, %v9950_v25  ;;  %v3987_v25 = vmul.f32 %v12018_v34, %v3986_v51  ;;  %v4004_v51 = vadd.f32 1.0, %v4003_v63  ;;  %v2838_v53 = vsub.f32 0.0, %v2582_v41 }
 0x1e2   : > { %v12063_v9 = vpop.eup %9953  ;;  %v4045_v12 = vadd.f32 1.0, %v12058_v15  ;;  %vm4007_vm5 = vcmp.lt.f32.partialorder %v4006_v62, 0.0004427343  ;;  %v4051_v40 = vand.u32 2147483647, %v12058_v15  ;;  %v1477_v49 = vadd.f32 %v11618_v24, %v11553_v22 }
 0x1e3   : > { %v4063_v45 = vadd.f32 1.0, %v12063_v9  ;;  %v3981_v26 = vsel %vm12076_vm2, %v3978_v36, %v3975_v3  ;;  %v4066_v30 = vmul.f32 -0.5, %v12063_v9  ;;  %v3159_v63 = vmul.f32 1.442695, %v2838_v53 }
 0x1e4   : > { %9961 = vlog2.f32 %v4045_v12  ;;  %v12093_v21 = vadd.f32 %v3981_v26, %v2309_v61  ;;  %v1284_v61 = vadd.f32 %v11612_v32, %v11550_v58  ;;  %v4005_v53 = vmul.f32 %v12048_v18, %v4004_v51 }
 0x1e5   : > { %9963 = vlog2.f32 %v4063_v45  ;;  %v3997_v45 = vand.u32 2147483647, %v12008_v29  ;;  %v4069_v51 = vand.u32 2147483647, %v12063_v9  ;;  %vm4052_vm6 = vcmp.lt.f32.partialorder %v4051_v40, 0.0004427343 }
 0x1e6   : > { %9965 = vpow2.f32 %v3157_v17  ;;  %v4048_v17 = vmul.f32 -0.5, %v12058_v15  ;;  %18957 = vst [vmem:[#allocation34_spill] sm:$0xff] %v12093_v21  ;;  %v1312_v40 = vadd.f32 %v12082_v39, %v11544_v35  ;;  %v1505_v39 = vadd.f32 %v12087_v48, %v11546_v19 }
 0x1e7   : > { %v9956_v60 = vpop.eup %9955  ;;  %9967 = vpow2.f32 %v3161_v20  ;;  %v2584_v20 = vand.u32 2147483647, %v12090_v23  ;;  %vm12112_vm4 = vcmp.lt.f32.partialorder %v3997_v45, 0.0004427343  ;;  %v4067_v45 = vadd.f32 1.0, %v4066_v30 }
 0x1e8   : > { %v9958_v12 = vpop.eup %9957  ;;  %v3984_v55 = vmul.f32 0.6931472, %v9956_v60  ;;  %v12098_v60 = vpop.f32.mrf.mxu0  ;;  %9969 = vpow2.f32 %v3159_v63  ;;  %v12125_v63 = vadd.f32 -4.0, %v1284_v61  ;;  %v2317_v30 = vmax.f32 %v11963_v44, 0.0 }
 0x1e9   : > { %v3993_v3 = vmul.f32 0.6931472, %v9958_v12  ;;  %v2840_v12 = vsub.f32 0.0, %v2584_v20  ;;  %v9960_v26 = vpop.eup %9959  ;;  %v2312_v20 = vmax.f32 %v11948_v38, 0.0  ;;  %vm4070_vm7 = vcmp.lt.f32.partialorder %v4069_v51, 0.0004427343 }
 0x1ea   : > { %v3990_v34 = vsel %vm3989_vm3, %v3987_v25, %v3984_v55  ;;  %v4002_v32 = vmul.f32 0.6931472, %v9960_v26  ;;  %18961 = vst [vmem:[#allocation36_spill] sm:$0xff] %v12125_v63  ;;  %v4068_v55 = vmul.f32 %v12063_v9, %v4067_v45  ;;  %v2542_v51 = vand.u32 2147483647, %v12125_v63 }
 0x1eb   : > { %v12095_v36 = vadd.f32 %v3990_v34, %v2310_v50  ;;  %v3996_v50 = vmul.f32 %v12008_v29, %v3995_v10  ;;  %v4049_v29 = vadd.f32 1.0, %v4048_v17  ;;  %v3163_v10 = vmul.f32 1.442695, %v2840_v12  ;;  %v1317_v34 = vpop.f32.mrf.mxu0 }
 0x1ec   : > { %v4008_v18 = vsel %vm4007_vm5, %v4005_v53, %v4002_v32  ;;  %v1318_v38 = vadd.f32 %v1317_v34, %v11544_v35  ;;  %v2319_v32 = vmax.f32 %v11965_v1, 0.0  ;;  %v1294_v1 = vadd.f32 %v11691_v31, %v11550_v58 }
 0x1ed   : > { %18958 = vst [vmem:[#allocation35_spill] sm:$0xff] %v12095_v36  ;;  %v9477_v25 = vpack.c.bf16 %v12095_v36, %v12093_v21  ;;  %v3999_v41 = vsel %vm12112_vm4, %v3996_v50, %v3993_v3  ;;  %v1510_v36 = vpop.f32.mrf.mxu1  ;;  %9971 = vpow2.f32 %v3163_v10  ;;  %v12129_v50 = vadd.f32 %v4008_v18, %v2312_v20  ;;  %v1319_v45 = vpop.f32.mrf.mxu0 }
 0x1ee   : > { %v12127_v17 = vadd.f32 %v3999_v41, %v2311_v6  ;;  %v4050_v24 = vmul.f32 %v12058_v15, %v4049_v29  ;;  %v1511_v12 = vadd.f32 %v1510_v36, %v11546_v19  ;;  %v12144_v15 = vadd.f32 -4.0, %v1477_v49 }
 0x1ef   : > { %6893 = vst [vmem:[%s11758_s29 + $0xc0] sm:$0xff] %v9477_v25  ;;  %18963 = vst [vmem:[#allocation38_spill] sm:$0xff] %v12129_v50  ;;  %v12149_v10 = vadd.f32 -4.0, %v1318_v38  ;;  %v2528_v18 = vand.u32 2147483647, %v12100_v54  ;;  %v1487_v31 = vadd.f32 %v11696_v4, %v11553_v22  ;;  %v1304_v48 = vadd.f32 %v11807_v2, %v11550_v58 }
 0x1f0   : > { %18962 = vst [vmem:[#allocation37_spill] sm:$0xff] %v12127_v17  ;;  %v9478_v61 = vpack.c.bf16 %v12129_v50, %v12127_v17  ;;  %18964 = vst [vmem:[#allocation39_spill] sm:$0xff] %v12144_v15  ;;  %v12154_v20 = vadd.f32 -4.0, %v1511_v12  ;;  %v18967_v38 = vand.u32 2147483647, %v12050_v11  ;;  %v12192_v17 = vadd.f32 -4.0, %v1505_v39 }
 0x1f1   : > { %v9962_v3 = vpop.eup %9961  ;;  %v2784_v4 = vsub.f32 0.0, %v2528_v18  ;;  %v12189_v49 = vadd.f32 -4.0, %v1487_v31  ;;  %v1512_v18 = vpop.f32.mrf.mxu1  ;;  %v12204_v39 = vadd.f32 -4.0, %v1304_v48 }
 0x1f2   : > { %v9964_v62 = vpop.eup %9963  ;;  %v4047_v25 = vmul.f32 0.6931472, %v9962_v3  ;;  %6894 = vst [vmem:[%s11758_s29 + $0xc8] sm:$0xff] %v9478_v61  ;;  %v2599_v12 = vand.u32 2147483647, %v12154_v20  ;;  %v1320_v61 = vadd.f32 %v1319_v45, %v11550_v58 }
 0x1f3   : > { %v12135_v26 = vpop.eup %9965  ;;  %v4065_v6 = vmul.f32 0.6931472, %v9964_v62  ;;  %v2782_v62 = vsub.f32 0.0, %v18967_v38  ;;  %18969 = vst [vmem:[#allocation43_spill] sm:$0xff] %v12189_v49  ;;  %18970 = vst [vmem:[#allocation44_spill] sm:$0xff] %v12204_v39 }
 0x1f4   : > { %v12140_v53 = vpop.eup %9967  ;;  %v4053_v41 = vsel %vm4052_vm6, %v4050_v24, %v4047_v25  ;;  %v4117_v44 = vadd.f32 1.0, %v12135_v26  ;;  %v2597_v25 = vand.u32 2147483647, %v12149_v10  ;;  %v12183_v38 = vadd.f32 -4.0, %v1320_v61 }
 0x1f5   : > { %v12147_v36 = vadd.f32 %v4053_v41, %v2317_v30  ;;  %v4071_v29 = vsel %vm4070_vm7, %v4068_v55, %v4065_v6  ;;  %v4135_v9 = vadd.f32 1.0, %v12140_v53  ;;  %v2544_v30 = vand.u32 2147483647, %v12144_v15  ;;  %v12172_v24 = vpop.eup %9969 }
 0x1f6   : > { %v12151_v34 = vadd.f32 %v4071_v29, %v2319_v32  ;;  %9973 = vlog2.f32 %v4117_v44  ;;  %v12178_v6 = vadd.f32 -4.0, %v1294_v1  ;;  %v4126_v55 = vadd.f32 1.0, %v12172_v24 }
 0x1f7   : > { %18965 = vst [vmem:[#allocation40_spill] sm:$0xff] %v12147_v36  ;;  %9975 = vlog2.f32 %v4135_v9  ;;  %v12181_v41 = vadd.f32 -4.0, %v1312_v40  ;;  %v2853_v32 = vsub.f32 0.0, %v2597_v25  ;;  %v2798_v44 = vsub.f32 0.0, %v2542_v51 }
 0x1f8   : > { %18966 = vst [vmem:[#allocation41_spill] sm:$0xff] %v12151_v34  ;;  %18968 = vst [vmem:[#allocation42_spill] sm:$0xff] %v12178_v6  ;;  %v2855_v29 = vsub.f32 0.0, %v2599_v12  ;;  %v2800_v3 = vsub.f32 0.0, %v2544_v30  ;;  %9977 = vlog2.f32 %v4126_v55  ;;  %v3047_v1 = vmul.f32 1.442695, %v2782_v62 }
 0x1f9   : > { %v3189_v45 = vmul.f32 1.442695, %v2853_v32  ;;  %v2558_v51 = vand.u32 2147483647, %v12178_v6  ;;  %v2589_v25 = vand.u32 2147483647, %v12181_v41  ;;  %v1513_v55 = vadd.f32 %v1512_v18, %v11553_v22 }
 0x1fa   : > { %v12185_v9 = vpop.eup %9971  ;;  %v2598_v30 = vand.u32 2147483647, %v12183_v38  ;;  %v12197_v12 = vmul.f32 1.442695, %v2784_v4  ;;  %v4120_v2 = vmul.f32 -0.5, %v12135_v26  ;;  %v4138_v48 = vmul.f32 -0.5, %v12140_v53 }
 0x1fb   : > { %v4144_v40 = vadd.f32 1.0, %v12185_v9  ;;  %9979 = vpow2.f32 %v3189_v45  ;;  %v3193_v62 = vmul.f32 1.442695, %v2855_v29  ;;  %v12200_v31 = vmul.f32 1.442695, %v2798_v44 }
 0x1fc   : > { %v12202_v61 = vmul.f32 1.442695, %v2800_v3  ;;  %v2560_v32 = vand.u32 2147483647, %v12189_v49  ;;  %v2591_v45 = vand.u32 2147483647, %v12192_v17  ;;  %v1497_v29 = vadd.f32 %v11818_v47, %v11553_v22 }
 0x1fd   : > { %9981 = vlog2.f32 %v4144_v40  ;;  %v2854_v34 = vsub.f32 0.0, %v2598_v30  ;;  %v12209_v50 = vsub.f32 0.0, %v2558_v51  ;;  %v4129_v44 = vmul.f32 -0.5, %v12172_v24  ;;  %v12220_v51 = vpop.f32.mrf.mxu0 }
 0x1fe   : > { %9983 = vpow2.f32 %v3047_v1  ;;  %v2845_v3 = vsub.f32 0.0, %v2589_v25  ;;  %v4121_v40 = vadd.f32 1.0, %v4120_v2  ;;  %v4123_v21 = vand.u32 2147483647, %v12135_v26  ;;  %v12224_v25 = vpop.f32.mrf.mxu1  ;;  %v9775_v2 = vld [vmem:[#allocation8 + $0x274] ss:$8 sps:$4 sm:$0xff]  }
 0x1ff   : > { %9985 = vpow2.f32 %v3193_v62  ;;  %v3191_v18 = vmul.f32 1.442695, %v2854_v34  ;;  %v4147_v30 = vmul.f32 -0.5, %v12185_v9  ;;  %v12218_v36 = vadd.f32 -4.0, %v1513_v55  ;;  %8163 = vmatprep.subr.bf16.mxu0 %v9775_v2 }
 0x200   : > { %v12222_v37 = vsub.f32 0.0, %v2560_v32  ;;  %v2847_v46 = vsub.f32 0.0, %v2591_v45  ;;  %v12226_v34 = vadd.f32 -4.0, %v1497_v29  ;;  %v4130_v1 = vadd.f32 1.0, %v4129_v44  ;;  %v12237_v44 = vpop.f32.mrf.mxu0  ;;  %v12242_v7 = vpop.f32.mrf.mxu1 }
 0x201   : > { %9987 = vpow2.f32 %v3191_v18  ;;  %v3173_v56 = vmul.f32 1.442695, %v2845_v3  ;;  %v2600_v43 = vand.u32 2147483647, %v12218_v36  ;;  %v4122_v55 = vmul.f32 %v12135_v26, %v4121_v40 }
 0x202   : > { %18971 = vst [vmem:[#allocation45_spill] sm:$0xff] %v12226_v34  ;;  %v4139_v14 = vadd.f32 1.0, %v4138_v48  ;;  %v4141_v57 = vand.u32 2147483647, %v12140_v53  ;;  %v4132_v32 = vand.u32 2147483647, %v12172_v24 }
 0x203   : > { %v9974_v4 = vpop.eup %9973  ;;  %v2325_v45 = vmax.f32 %v12044_v0, 0.0  ;;  %vm12233_vm8 = vcmp.lt.f32.partialorder %v4123_v21, 0.0004427343  ;;  %v4148_v29 = vadd.f32 1.0, %v4147_v30  ;;  %v2856_v18 = vsub.f32 0.0, %v2600_v43 }
 0x204   : > { %v4119_v47 = vmul.f32 0.6931472, %v9974_v4  ;;  %v9976_v62 = vpop.eup %9975  ;;  %v2326_v48 = vmax.f32 %v12069_v28, 0.0  ;;  %v3177_v13 = vmul.f32 1.442695, %v2847_v46  ;;  %v4131_v0 = vmul.f32 %v12172_v24, %v4130_v1  ;;  %v1327_v1 = vpop.f32.mrf.mxu0 }
 0x205   : > { %v9978_v3 = vpop.eup %9977  ;;  %v4137_v40 = vmul.f32 0.6931472, %v9976_v62  ;;  %v4150_v21 = vand.u32 2147483647, %v12185_v9  ;;  %v3195_v59 = vmul.f32 1.442695, %v2856_v18  ;;  %v4140_v43 = vmul.f32 %v12140_v53, %v4139_v14  ;;  %v1520_v14 = vpop.f32.mrf.mxu1 }
 0x206   : > { %v4125_v26 = vsel %vm12233_vm8, %v4122_v55, %v4119_v47  ;;  %v4128_v2 = vmul.f32 0.6931472, %v9978_v3  ;;  %vm12249_vm9 = vcmp.lt.f32.partialorder %v4141_v57, 0.0004427343  ;;  %vm4133_vm10 = vcmp.lt.f32.partialorder %v4132_v32, 0.0004427343 }
 0x207   : > { %9989 = vpow2.f32 %v3173_v56  ;;  %v12253_v46 = vadd.f32 %v4125_v26, %v2325_v45  ;;  %v4149_v62 = vmul.f32 %v12185_v9, %v4148_v29  ;;  %v4143_v55 = vsel %vm12249_vm9, %v4140_v43, %v4137_v40 }
 0x208   : > { %v12246_v30 = vpop.eup %9979  ;;  %v4134_v47 = vsel %vm4133_vm10, %v4131_v0, %v4128_v2  ;;  %9991 = vpow2.f32 %v3195_v59  ;;  %v2576_v56 = vand.u32 2147483647, %v12226_v34  ;;  %v2327_v32 = vmax.f32 %v12046_v27, 0.0 }
 0x209   : > { %18976 = vst [vmem:[#allocation46_spill] sm:$0xff] %v12253_v46  ;;  %v4261_v24 = vadd.f32 1.0, %v12246_v30  ;;  %v12259_v4 = vadd.f32 %v4134_v47, %v2326_v48  ;;  %v2328_v9 = vmax.f32 %v12090_v23, 0.0  ;;  %vm4151_vm11 = vcmp.lt.f32.partialorder %v4150_v21, 0.0004427343 }
 0x20a   : > { %v9982_v28 = vpop.eup %9981  ;;  %9993 = vpow2.f32 %v3177_v13  ;;  %v1328_v29 = vadd.f32 %v1327_v1, %v11544_v35  ;;  %v12271_v59 = vadd.f32 %v4143_v55, %v2327_v32  ;;  %v1521_v26 = vadd.f32 %v1520_v14, %v11546_v19 }
 0x20b   : > { %18977 = vst [vmem:[#allocation47_spill] sm:$0xff] %v12259_v4  ;;  %v4146_v57 = vmul.f32 0.6931472, %v9982_v28  ;;  %v12261_v53 = vpop.eup %9983  ;;  %v9485_v45 = vpack.c.bf16 %v12259_v4, %v12253_v46  ;;  %9995 = vlog2.f32 %v4261_v24  ;;  %v3111_v23 = vmul.f32 1.442695, %v12209_v50 }
 0x20c   : > { %v12269_v18 = vpop.eup %9985  ;;  %18978 = vst [vmem:[#allocation48_spill] sm:$0xff] %v12271_v59  ;;  %9997 = vpow2.f32 %v12197_v12  ;;  %v18980_v48 = vand.u32 2147483647, %v12204_v39  ;;  %v2832_v21 = vsub.f32 0.0, %v2576_v56  ;;  %v1322_v12 = vadd.f32 %v12220_v51, %v11544_v35  ;;  %v1329_v56 = vpop.f32.mrf.mxu0 }
 0x20d   : > { %v4152_v52 = vsel %vm4151_vm11, %v4149_v62, %v4146_v57  ;;  %6901 = vst [vmem:[%s11758_s29 + $0x100] sm:$0xff] %v9485_v45  ;;  %9999 = vpow2.f32 %v12200_v31  ;;  %v4279_v43 = vadd.f32 1.0, %v12269_v18  ;;  %v12291_v50 = vadd.f32 -4.0, %v1328_v29 }
 0x20e   : > { %v12273_v3 = vadd.f32 %v4152_v52, %v2328_v9  ;;  %v12280_v13 = vpop.eup %9987  ;;  %v2830_v2 = vsub.f32 0.0, %v18980_v48  ;;  %10001 = vpow2.f32 %v12202_v61  ;;  %v3115_v28 = vmul.f32 1.442695, %v12222_v37  ;;  %v9778_v48 = vld [vmem:[#allocation8 + $0x374] ss:$8 sps:$4 sm:$0xff]  }
 0x20f   : > { %v4270_v31 = vadd.f32 1.0, %v12280_v13  ;;  %v12297_v47 = vadd.f32 -4.0, %v1521_v26  ;;  %10003 = vpow2.f32 %v3111_v23  ;;  %v1314_v1 = vadd.f32 %v12098_v60, %v11550_v58  ;;  %8356 = vmatprep.subr.bf16.mxu1 %v9778_v48 }
 0x210   : > { %18979 = vst [vmem:[#allocation49_spill] sm:$0xff] %v12273_v3  ;;  %v9486_v0 = vpack.c.bf16 %v12273_v3, %v12271_v59  ;;  %v3143_v61 = vmul.f32 1.442695, %v2830_v2  ;;  %v3147_v37 = vmul.f32 1.442695, %v2832_v21  ;;  %v12305_v57 = vadd.f32 -4.0, %v1322_v12 }
 0x211   : > { %10005 = vlog2.f32 %v4270_v31  ;;  %v2613_v14 = vand.u32 2147483647, %v12291_v50  ;;  %v1507_v60 = vadd.f32 %v12104_v16, %v11553_v22  ;;  %v2615_v45 = vand.u32 2147483647, %v12297_v47 }
 0x212   : > { %6902 = vst [vmem:[%s11758_s29 + $0x108] sm:$0xff] %v9486_v0  ;;  %10007 = vlog2.f32 %v4279_v43  ;;  %v12315_v29 = vadd.f32 -4.0, %v1314_v1  ;;  %v1515_v26 = vadd.f32 %v12224_v25, %v11546_v19  ;;  %v4264_v0 = vmul.f32 -0.5, %v12246_v30 }
 0x213   : > { %10009 = vpow2.f32 %v3115_v28  ;;  %v2869_v23 = vsub.f32 0.0, %v2613_v14  ;;  %v2871_v21 = vsub.f32 0.0, %v2615_v45  ;;  %v1330_v43 = vadd.f32 %v1329_v56, %v11550_v58  ;;  %v1522_v45 = vpop.f32.mrf.mxu1 }
 0x214   : > { %v12308_v32 = vpop.eup %9989  ;;  %18981 = vst [vmem:[#allocation50_spill] sm:$0xff] %v12315_v29  ;;  %10011 = vpow2.f32 %v3143_v61  ;;  %v2605_v28 = vand.u32 2147483647, %v12305_v57  ;;  %v12330_v61 = vadd.f32 -4.0, %v1507_v60  ;;  %v4273_v14 = vmul.f32 -0.5, %v12280_v13  ;;  %v12341_v60 = vpop.f32.mrf.mxu0 }
 0x215   : > { %v12319_v2 = vpop.eup %9991  ;;  %10013 = vpow2.f32 %v3147_v37  ;;  %v4189_v25 = vadd.f32 1.0, %v12308_v32  ;;  %v2590_v37 = vand.u32 2147483647, %v12315_v29  ;;  %v12334_v52 = vadd.f32 -4.0, %v1515_v26 }
 0x216   : > { %v4288_v12 = vadd.f32 1.0, %v12319_v2  ;;  %18982 = vst [vmem:[#allocation51_spill] sm:$0xff] %v12330_v61  ;;  %v3221_v9 = vmul.f32 1.442695, %v2869_v23  ;;  %v2341_v48 = vmax.f32 %v12149_v10, 0.0  ;;  %v4265_v51 = vadd.f32 1.0, %v4264_v0 }
 0x217   : > { %v12326_v31 = vpop.eup %9993  ;;  %18983 = vst [vmem:[#allocation52_spill] sm:$0xff] %v12334_v52  ;;  %v3225_v24 = vmul.f32 1.442695, %v2871_v21  ;;  %v12339_v62 = vadd.f32 -4.0, %v1330_v43  ;;  %v4267_v1 = vand.u32 2147483647, %v12246_v30  ;;  %v1523_v26 = vadd.f32 %v1522_v45, %v11553_v22 }
 0x218   : > { %v9996_v56 = vpop.eup %9995  ;;  %10015 = vlog2.f32 %v4288_v12  ;;  %v4207_v27 = vadd.f32 1.0, %v12326_v31  ;;  %v2861_v12 = vsub.f32 0.0, %v2605_v28  ;;  %v2342_v16 = vmax.f32 %v12183_v38, 0.0  ;;  %v12359_v38 = vpop.f32.mrf.mxu0 }
 0x219   : > { %v12336_v55 = vpop.eup %9997  ;;  %10017 = vlog2.f32 %v4189_v25  ;;  %v4263_v23 = vmul.f32 0.6931472, %v9996_v56  ;;  %v4274_v10 = vadd.f32 1.0, %v4273_v14  ;;  %v4282_v21 = vmul.f32 -0.5, %v12269_v18 }
 0x21a   : > { %v12343_v40 = vpop.eup %9999  ;;  %v4276_v43 = vand.u32 2147483647, %v12280_v13  ;;  %v2607_v3 = vand.u32 2147483647, %v12334_v52  ;;  %10019 = vpow2.f32 %v3221_v9  ;;  %v4266_v28 = vmul.f32 %v12246_v30, %v4265_v51 }
 0x21b   : > { %18984 = vst [vmem:[#allocation53_spill] sm:$0xff] %v12343_v40  ;;  %v12349_v0 = vpop.eup %10001  ;;  %v4291_v45 = vmul.f32 -0.5, %v12319_v2  ;;  %10021 = vpow2.f32 %v3225_v24  ;;  %v2614_v25 = vand.u32 2147483647, %v12339_v62  ;;  %vm12361_vm12 = vcmp.lt.f32.partialorder %v4267_v1, 0.0004427343  ;;  %v1337_v40 = vpop.f32.mrf.mxu0 }
 0x21c   : > { %18985 = vst [vmem:[#allocation54_spill] sm:$0xff] %v12349_v0  ;;  %v12354_v4 = vpop.eup %10003  ;;  %10023 = vlog2.f32 %v4207_v27  ;;  %v3205_v34 = vmul.f32 1.442695, %v2861_v12  ;;  %v12365_v39 = vadd.f32 -4.0, %v1523_v26  ;;  %v4269_v30 = vsel %vm12361_vm12, %v4266_v28, %v4263_v23  ;;  %v1524_v0 = vpop.f32.mrf.mxu1 }
 0x21d   : > { %18986 = vst [vmem:[#allocation55_spill] sm:$0xff] %v12354_v4  ;;  %v4275_v24 = vmul.f32 %v12280_v13, %v4274_v10  ;;  %v2870_v49 = vsub.f32 0.0, %v2614_v25  ;;  %v4283_v4 = vadd.f32 1.0, %v4282_v21  ;;  %vm4277_vm13 = vcmp.lt.f32.partialorder %v4276_v43, 0.0004427343 }
 0x21e   : > { %v10006_v14 = vpop.eup %10005  ;;  %v2863_v27 = vsub.f32 0.0, %v2607_v3  ;;  %v2616_v1 = vand.u32 2147483647, %v12365_v39  ;;  %v4285_v15 = vand.u32 2147483647, %v12269_v18  ;;  %v4292_v26 = vadd.f32 1.0, %v4291_v45 }
 0x21f   : > { %v10008_v9 = vpop.eup %10007  ;;  %v4272_v51 = vmul.f32 0.6931472, %v10006_v14  ;;  %v3223_v63 = vmul.f32 1.442695, %v2870_v49  ;;  %v12376_v23 = vadd.f32 %v4269_v30, %v2341_v48  ;;  %v2846_v3 = vsub.f32 0.0, %v2590_v37 }
 0x220   : > { %v12370_v6 = vpop.eup %10009  ;;  %v4281_v13 = vmul.f32 0.6931472, %v10008_v9  ;;  %v2872_v28 = vsub.f32 0.0, %v2616_v1  ;;  %v2592_v43 = vand.u32 2147483647, %v12330_v61  ;;  %v4284_v49 = vmul.f32 %v12269_v18, %v4283_v4 }
 0x221   : > { %18989 = vst [vmem:[#allocation56_spill] sm:$0xff] %v12370_v6  ;;  %v4278_v12 = vsel %vm4277_vm13, %v4275_v24, %v4272_v51  ;;  %v12374_v56 = vpop.eup %10011  ;;  %18991 = vst [vmem:[#allocation58_spill] sm:$0xff] %v12376_v23  ;;  %v4294_v25 = vand.u32 2147483647, %v12319_v2  ;;  %10025 = vpow2.f32 %v3223_v63  ;;  %v1338_v14 = vadd.f32 %v1337_v40, %v11544_v35  ;;  %v12393_v51 = vpop.f32.mrf.mxu1 }
 0x222   : > { %18990 = vst [vmem:[#allocation57_spill] sm:$0xff] %v12374_v56  ;;  %v12378_v10 = vadd.f32 %v4278_v12, %v2342_v16  ;;  %v12380_v21 = vpop.eup %10013  ;;  %v3227_v48 = vmul.f32 1.442695, %v2872_v28  ;;  %v2343_v9 = vmax.f32 %v12154_v20, 0.0  ;;  %vm12389_vm14 = vcmp.lt.f32.partialorder %v4285_v15, 0.0004427343 }
 0x223   : > { %18993 = vst [vmem:[#allocation60_spill] sm:$0xff] %v12380_v21  ;;  %10027 = vpow2.f32 %v3205_v34  ;;  %v3209_v37 = vmul.f32 1.442695, %v2863_v27  ;;  %v4287_v63 = vsel %vm12389_vm14, %v4284_v49, %v4281_v13  ;;  %v4293_v18 = vmul.f32 %v12319_v2, %v4292_v26  ;;  %v1530_v28 = vpop.f32.mrf.mxu1 }
 0x224   : > { %18992 = vst [vmem:[#allocation59_spill] sm:$0xff] %v12378_v10  ;;  %v9493_v45 = vpack.c.bf16 %v12378_v10, %v12376_v23  ;;  %10029 = vpow2.f32 %v3227_v48  ;;  %v2344_v40 = vmax.f32 %v12218_v36, 0.0  ;;  %vm4295_vm15 = vcmp.lt.f32.partialorder %v4294_v25, 0.0004427343 }
 0x225   : > { %v10016_v16 = vpop.eup %10015  ;;  %v1332_v15 = vadd.f32 %v12341_v60, %v11544_v35  ;;  %v1525_v20 = vadd.f32 %v1524_v0, %v11546_v19  ;;  %v4192_v24 = vmul.f32 -0.5, %v12308_v32  ;;  %v12405_v12 = vadd.f32 -4.0, %v1338_v14  ;;  %v1532_v21 = vpop.f32.mrf.mxu1 }
 0x226   : > { %6909 = vst [vmem:[%s11758_s29 + $0x140] sm:$0xff] %v9493_v45  ;;  %v4290_v4 = vmul.f32 0.6931472, %v10016_v16  ;;  %v10018_v34 = vpop.eup %10017  ;;  %v2848_v2 = vsub.f32 0.0, %v2592_v43  ;;  %v12409_v26 = vadd.f32 %v4287_v63, %v2343_v9  ;;  %10031 = vpow2.f32 %v3209_v37 }
 0x227   : > { %v12407_v13 = vpop.eup %10019  ;;  %v4210_v0 = vmul.f32 -0.5, %v12326_v31  ;;  %v3175_v25 = vmul.f32 1.442695, %v2846_v3  ;;  %v1324_v49 = vadd.f32 %v12237_v44, %v11550_v58  ;;  %v12422_v16 = vadd.f32 -4.0, %v1332_v15 }
 0x228   : > { %v4296_v1 = vsel %vm4295_vm15, %v4293_v18, %v4290_v4  ;;  %18996 = vst [vmem:[#allocation61_spill] sm:$0xff] %v12409_v26  ;;  %v12413_v60 = vpop.eup %10021  ;;  %v4405_v45 = vadd.f32 1.0, %v12407_v13  ;;  %v12424_v9 = vadd.f32 -4.0, %v1525_v20  ;;  %v4193_v30 = vadd.f32 1.0, %v4192_v24 }
 0x229   : > { %v12411_v36 = vadd.f32 %v4296_v1, %v2344_v40  ;;  %v10024_v48 = vpop.eup %10023  ;;  %v4423_v14 = vadd.f32 1.0, %v12413_v60  ;;  %v4195_v37 = vand.u32 2147483647, %v12308_v32  ;;  %v2629_v3 = vand.u32 2147483647, %v12405_v12 }
 0x22a   : > { %v1531_v63 = vadd.f32 %v1530_v28, %v11546_v19  ;;  %v4213_v44 = vand.u32 2147483647, %v12326_v31  ;;  %v3179_v18 = vmul.f32 1.442695, %v2848_v2  ;;  %10033 = vlog2.f32 %v4405_v45 }
 0x22b   : > { %18997 = vst [vmem:[#allocation62_spill] sm:$0xff] %v12411_v36  ;;  %v9494_v43 = vpack.c.bf16 %v12411_v36, %v12409_v26  ;;  %v4191_v40 = vmul.f32 0.6931472, %v10018_v34  ;;  %v4211_v1 = vadd.f32 1.0, %v4210_v0  ;;  %10035 = vpow2.f32 %v3175_v25 }
 0x22c   : > { %v1517_v15 = vadd.f32 %v12242_v7, %v11553_v22  ;;  %v12434_v20 = vadd.f32 -4.0, %v1324_v49  ;;  %10037 = vlog2.f32 %v4423_v14  ;;  %v2621_v24 = vand.u32 2147483647, %v12422_v16  ;;  %v9788_v7 = vld [vmem:[#allocation8 + $0x350] ss:$8 sps:$4 sm:$0xff]  }
 0x22d   : > { %6910 = vst [vmem:[%s11758_s29 + $0x148] sm:$0xff] %v9494_v43  ;;  %v2623_v28 = vand.u32 2147483647, %v12424_v9  ;;  %v4194_v4 = vmul.f32 %v12308_v32, %v4193_v30  ;;  %vm12441_vm0 = vcmp.lt.f32.partialorder %v4195_v37, 0.0004427343  ;;  %v2885_v34 = vsub.f32 0.0, %v2629_v3 }
 0x22e   : > { %18998 = vst [vmem:[#allocation63_spill] sm:$0xff] %v12434_v20  ;;  %v12438_v27 = vpop.eup %10025  ;;  %v12445_v0 = vadd.f32 -4.0, %v1531_v63  ;;  %v12447_v25 = vmul.f32 0.6931472, %v10024_v48  ;;  %vm12449_vm1 = vcmp.lt.f32.partialorder %v4213_v44, 0.0004427343  ;;  %10039 = vpow2.f32 %v3179_v18 }
 0x22f   : > { %v4414_v49 = vadd.f32 1.0, %v12438_v27  ;;  %v4197_v32 = vsel %vm12441_vm0, %v4194_v4, %v4191_v40  ;;  %v12459_v43 = vmul.f32 %v12326_v31, %v4211_v1  ;;  %v12462_v30 = vadd.f32 -4.0, %v1517_v15  ;;  %v1339_v1 = vpop.f32.mrf.mxu0 }
 0x230   : > { %v12454_v45 = vpop.eup %10027  ;;  %v2606_v37 = vand.u32 2147483647, %v12434_v20  ;;  %v2877_v3 = vsub.f32 0.0, %v2621_v24  ;;  %v2879_v63 = vsub.f32 0.0, %v2623_v28  ;;  %v3253_v2 = vmul.f32 1.442695, %v2885_v34 }
 0x231   : > { %19003 = vst [vmem:[#allocation64_spill] sm:$0xff] %v12462_v30  ;;  %v12464_v48 = vpop.eup %10029  ;;  %10041 = vlog2.f32 %v4414_v49  ;;  %v2631_v4 = vand.u32 2147483647, %v12445_v0  ;;  %v19004_v31 = vmax.f32 %v12181_v41, 0.0  ;;  %v3622_v24 = vadd.f32 1.0, %v12261_v53 }
 0x232   : > { %v4432_v18 = vadd.f32 1.0, %v12464_v48  ;;  %v4333_v49 = vadd.f32 1.0, %v12454_v45  ;;  %v4408_v44 = vmul.f32 -0.5, %v12407_v13  ;;  %v12485_v41 = vsub.f32 0.0, %v2606_v37 }
 0x233   : > { %v12472_v40 = vadd.f32 %v4197_v32, %v19004_v31  ;;  %v12480_v28 = vpop.eup %10031  ;;  %v2357_v32 = vmax.f32 %v12291_v50, 0.0  ;;  %v3237_v31 = vmul.f32 1.442695, %v2877_v3  ;;  %v3241_v14 = vmul.f32 1.442695, %v2879_v63 }
 0x234   : > { %10043 = vlog2.f32 %v4432_v18  ;;  %v4411_v15 = vand.u32 2147483647, %v12407_v13  ;;  %v4426_v36 = vmul.f32 -0.5, %v12413_v60  ;;  %v2887_v10 = vsub.f32 0.0, %v2631_v4 }
 0x235   : > { %10045 = vpow2.f32 %v3253_v2  ;;  %v12491_v20 = vadd.f32 1.0, %v12480_v28  ;;  %v2359_v34 = vmax.f32 %v12297_v47, 0.0  ;;  %v4417_v18 = vmul.f32 -0.5, %v12438_v27 }
 0x236   : > { %10047 = vlog2.f32 %v3622_v24  ;;  %v4409_v50 = vadd.f32 1.0, %v4408_v44  ;;  %v2358_v3 = vmax.f32 %v12339_v62, 0.0  ;;  %v1340_v63 = vadd.f32 %v1339_v1, %v11550_v58 }
 0x237   : > { %v10034_v37 = vpop.eup %10033  ;;  %10049 = vlog2.f32 %v4333_v49  ;;  %v4429_v2 = vand.u32 2147483647, %v12413_v60  ;;  %v3257_v4 = vmul.f32 1.442695, %v2887_v10  ;;  %v3640_v29 = vadd.f32 1.0, %v12336_v55 }
 0x238   : > { %v12497_v61 = vpop.eup %10035  ;;  %10051 = vpow2.f32 %v3237_v31  ;;  %vm12501_vm2 = vcmp.lt.f32.partialorder %v4411_v15, 0.0004427343  ;;  %v4427_v24 = vadd.f32 1.0, %v4426_v36  ;;  %v4435_v44 = vmul.f32 -0.5, %v12464_v48  ;;  %v12541_v36 = vpop.f32.mrf.mxu1 }
 0x239   : > { %19005 = vst [vmem:[#allocation65_spill] sm:$0xff] %v12497_v61  ;;  %v10038_v47 = vpop.eup %10037  ;;  %10053 = vpow2.f32 %v3241_v14  ;;  %v4407_v62 = vmul.f32 0.6931472, %v10034_v37  ;;  %v4418_v1 = vadd.f32 1.0, %v4417_v18  ;;  %v12506_v49 = vadd.f32 -4.0, %v1340_v63 }
 0x23a   : > { %10055 = vlog2.f32 %v3640_v29  ;;  %v4410_v10 = vmul.f32 %v12407_v13, %v4409_v50  ;;  %v4420_v31 = vand.u32 2147483647, %v12438_v27  ;;  %v3625_v15 = vmul.f32 -0.5, %v12261_v53 }
 0x23b   : > { %v12508_v61 = vpop.eup %10039  ;;  %v1533_v6 = vadd.f32 %v1532_v21, %v11553_v22  ;;  %v4425_v26 = vmul.f32 0.6931472, %v10038_v47  ;;  %vm12514_vm3 = vcmp.lt.f32.partialorder %v4429_v2, 0.0004427343  ;;  %10057 = vpow2.f32 %v3257_v4 }
 0x23c   : > { %19008 = vst [vmem:[#allocation66_spill] sm:$0xff] %v12508_v61  ;;  %v2630_v29 = vand.u32 2147483647, %v12506_v49  ;;  %v4428_v18 = vmul.f32 %v12413_v60, %v4427_v24  ;;  %v4436_v37 = vadd.f32 1.0, %v4435_v44  ;;  %v4438_v13 = vand.u32 2147483647, %v12464_v48 }
 0x23d   : > { %v12521_v50 = vadd.f32 -4.0, %v1533_v6  ;;  %v4413_v63 = vsel %vm12501_vm2, %v4410_v10, %v4407_v62  ;;  %v4419_v2 = vmul.f32 %v12438_v27, %v4418_v1  ;;  %vm4421_vm4 = vcmp.lt.f32.partialorder %v4420_v31, 0.0004427343  ;;  %v12536_v10 = vpop.f32.mrf.mxu0 }
 0x23e   : > { %v10042_v14 = vpop.eup %10041  ;;  %v2886_v47 = vsub.f32 0.0, %v2630_v29  ;;  %v3626_v61 = vadd.f32 1.0, %v3625_v15  ;;  %v3628_v4 = vand.u32 2147483647, %v12261_v53  ;;  %v3643_v52 = vmul.f32 -0.5, %v12336_v55 }
 0x23f   : > { %v4416_v21 = vmul.f32 0.6931472, %v10042_v14  ;;  %v4431_v60 = vsel %vm12514_vm3, %v4428_v18, %v4425_v26  ;;  %v2632_v44 = vand.u32 2147483647, %v12521_v50  ;;  %v12531_v56 = vadd.f32 %v4413_v63, %v2357_v32 }
 0x240   : > { %v3255_v6 = vmul.f32 1.442695, %v2886_v47  ;;  %v4437_v1 = vmul.f32 %v12464_v48, %v4436_v37  ;;  %v2360_v15 = vmax.f32 %v12365_v39, 0.0  ;;  %vm4439_vm5 = vcmp.lt.f32.partialorder %v4438_v13, 0.0004427343 }
 0x241   : > { %v10044_v23 = vpop.eup %10043  ;;  %v4422_v24 = vsel %vm4421_vm4, %v4419_v2, %v4416_v21  ;;  %19011 = vst [vmem:[#allocation67_spill] sm:$0xff] %v12531_v56  ;;  %v2888_v26 = vsub.f32 0.0, %v2632_v44  ;;  %v12543_v32 = vadd.f32 %v4431_v60, %v2359_v34  ;;  %v3627_v48 = vmul.f32 %v12261_v53, %v3626_v61  ;;  %v12563_v61 = vpop.f32.mrf.mxu0 }
 0x242   : > { %v12533_v62 = vadd.f32 %v4422_v24, %v2358_v3  ;;  %v4434_v27 = vmul.f32 0.6931472, %v10044_v23  ;;  %v12538_v31 = vpop.eup %10045  ;;  %10059 = vpow2.f32 %v3255_v6  ;;  %v3644_v37 = vadd.f32 1.0, %v3643_v52  ;;  %v12572_v24 = vpop.f32.mrf.mxu1 }
 0x243   : > { %v10048_v29 = vpop.eup %10047  ;;  %19013 = vst [vmem:[#allocation69_spill] sm:$0xff] %v12543_v32  ;;  %v3259_v13 = vmul.f32 1.442695, %v2888_v26  ;;  %10061 = vlog2.f32 %v12491_v20  ;;  %v19015_v34 = vand.u32 2147483647, %v12462_v30  ;;  %v4549_v20 = vadd.f32 1.0, %v12538_v31 }
 0x244   : > { %19012 = vst [vmem:[#allocation68_spill] sm:$0xff] %v12533_v62  ;;  %v9501_v23 = vpack.c.bf16 %v12533_v62, %v12531_v56  ;;  %v4440_v3 = vsel %vm4439_vm5, %v4437_v1, %v4434_v27  ;;  %v12548_v14 = vpop.eup %10049  ;;  %v3624_v39 = vmul.f32 0.6931472, %v10048_v29  ;;  %vm12558_vm6 = vcmp.lt.f32.partialorder %v3628_v4, 0.0004427343  ;;  %v1540_v2 = vpop.f32.mrf.mxu1 }
 0x245   : > { %v12550_v18 = vadd.f32 %v4440_v3, %v2360_v15  ;;  %v12552_v63 = vpop.eup %10051  ;;  %v2864_v21 = vsub.f32 0.0, %v19015_v34  ;;  %v3646_v53 = vand.u32 2147483647, %v12336_v55  ;;  %10063 = vpow2.f32 %v3259_v13  ;;  %v1347_v13 = vpop.f32.mrf.mxu0 }
 0x246   : > { %6917 = vst [vmem:[%s11758_s29 + $0x180] sm:$0xff] %v9501_v23  ;;  %v12565_v47 = vpop.eup %10053  ;;  %v3630_v60 = vsel %vm12558_vm6, %v3627_v48, %v3624_v39  ;;  %v19018_v44 = vmax.f32 %v12192_v17, 0.0  ;;  %v19019_v27 = vsel %vm12449_vm1, %v12459_v43, %v12447_v25  ;;  %v4336_v15 = vmul.f32 -0.5, %v12454_v45 }
 0x247   : > { %19014 = vst [vmem:[#allocation70_spill] sm:$0xff] %v12550_v18  ;;  %v9502_v52 = vpack.c.bf16 %v12550_v18, %v12543_v32  ;;  %v10056_v4 = vpop.eup %10055  ;;  %v4354_v26 = vmul.f32 -0.5, %v12480_v28  ;;  %v3207_v29 = vmul.f32 1.442695, %v12485_v41  ;;  %v19021_v23 = vmax.f32 %v12050_v11, 0.0 }
 0x248   : > { %v12583_v1 = vadd.f32 %v19019_v27, %v19018_v44  ;;  %v3642_v48 = vmul.f32 0.6931472, %v10056_v4  ;;  %v3645_v17 = vmul.f32 %v12336_v55, %v3644_v37  ;;  %v12592_v39 = vpop.eup %10057  ;;  %v3211_v25 = vmul.f32 1.442695, %v2864_v21  ;;  %v9790_v18 = vld [vmem:[#allocation8 + $0x354] ss:$8 sps:$4 sm:$0xff]  }
 0x249   : > { %6918 = vst [vmem:[%s11758_s29 + $0x188] sm:$0xff] %v9502_v52  ;;  %v5854_v3 = vadd.f32 %v3630_v60, %v19021_v23  ;;  %v1334_v43 = vadd.f32 %v12359_v38, %v11550_v58  ;;  %vm3647_vm7 = vcmp.lt.f32.partialorder %v3646_v53, 0.0004427343  ;;  %10065 = vlog2.f32 %v4549_v20  ;;  %v9773_v52 = vld [vmem:[#allocation8 + $0x270] ss:$8 sps:$4 sm:$0xff]  }
 0x24a   : > { %19020 = vst [vmem:[#allocation71_spill] sm:$0xff] %v12583_v1  ;;  %v3648_v34 = vsel %vm3647_vm7, %v3645_v17, %v3642_v48  ;;  %v4337_v55 = vadd.f32 1.0, %v4336_v15  ;;  %v4355_v37 = vadd.f32 1.0, %v4354_v26  ;;  %v1527_v60 = vadd.f32 %v12393_v51, %v11553_v22  ;;  %v9781_v38 = vld [vmem:[#allocation8 + $0x264] ss:$8 sps:$4 sm:$0xff]   ;;  %v19023_v15 = vld [vmem:[#allocation20_spill] sm:$0xff] }
 0x24b   : > { %v6102_v41 = vpack.c.bf16 %v5854_v3, %v11719_v5  ;;  %v9457_v11 = vpack.c.bf16 %v5854_v3, %v11765_v42  ;;  %v19022_v21 = vmax.f32 %v12100_v54, 0.0  ;;  %v4339_v53 = vand.u32 2147483647, %v12454_v45  ;;  %v9779_v48 = vld [vmem:[#allocation8 + $0x260] ss:$8 sps:$4 sm:$0xff]  }
 0x24c   : > { %10067 = vpow2.f32 %v3207_v29  ;;  %v4567_v20 = vadd.f32 1.0, %v12592_v39  ;;  %v1348_v5 = vadd.f32 %v1347_v13, %v11544_v35  ;;  %v1342_v51 = vadd.f32 %v12536_v10, %v11544_v35  ;;  %v9776_v29 = vld [vmem:[#allocation8 + $0x370] ss:$8 sps:$4 sm:$0xff]   ;;  %v9784_v17 = vld [vmem:[#allocation8 + $0x364] ss:$8 sps:$4 sm:$0xff]  }
 0x24d   : > { %v5856_v4 = vadd.f32 %v3648_v34, %v19022_v21  ;;  %6873 = vst [vmem:[%s11758_s29 + $0x20] sm:$0xff] %v9457_v11  ;;  %7809 = vmatprep.mubr.bf16.mxu0 %v6102_v41  ;;  %v1541_v54 = vadd.f32 %v1540_v2, %v11546_v19  ;;  %v19024_v26 = vpack.c.bf16 %v11765_v42, %v19023_v15  ;;  %10069 = vpow2.f32 %v3211_v25  ;;  %v9787_v25 = vld [vmem:[#allocation8 + $0x254] ss:$8 sps:$4 sm:$0xff]   ;;  %v1542_v15 = vpop.f32.mrf.mxu1 }
 0x24e   : > { %v12617_v3 = vadd.f32 -4.0, %v1334_v43  ;;  %v12624_v13 = vmul.f32 %v12454_v45, %v4337_v55  ;;  %v12627_v42 = vmul.f32 %v12480_v28, %v4355_v37  ;;  %v12630_v11 = vadd.f32 -4.0, %v1527_v60  ;;  %v19027_v45 = vld [vmem:[#allocation21_spill] sm:$0xff]  ;;  %v9782_v55 = vld [vmem:[#allocation8 + $0x360] ss:$8 sps:$4 sm:$0xff]  }
 0x24f   : > { %v6104_v44 = vpack.c.bf16 %v5856_v4, %v11740_v33  ;;  %v9458_v27 = vpack.c.bf16 %v5856_v4, %v11780_v8  ;;  %7810 = vmatmul.mubr.bf16.vlgmr.msra.gmra.mxu0 %v19024_v26  ;;  %v12619_v33 = vadd.f32 -4.0, %v1348_v5  ;;  %v12621_v10 = vpop.eup %10059  ;;  %10071 = vlog2.f32 %v4567_v20 }
 0x250   : > { %19025 = vst [vmem:[#allocation20_spill] sm:$0xff] %v12617_v3  ;;  %8164 = vmatpush1.bf16.msra.mxu0 %v9773_v52  ;;  %19026 = vst [vmem:[#allocation72_spill] sm:$0xff] %v12630_v11  ;;  %v4558_v2 = vadd.f32 1.0, %v12621_v10  ;;  %v19028_v52 = vpack.c.bf16 %v11780_v8, %v19027_v45  ;;  %vm12639_vm8 = vcmp.lt.f32.partialorder %v4339_v53, 0.0004427343  ;;  %v4477_v60 = vadd.f32 1.0, %v12552_v63  ;;  %v10062_v20 = vpop.eup %10061 }
 0x251   : > { %6874 = vst [vmem:[%s11758_s29 + $0x28] sm:$0xff] %v9458_v27  ;;  %8002 = vmatprep.mubr.bf16.mxu1 %v6104_v44  ;;  %8165 = vmatprep.subr.bf16.mxu0 %v9781_v38  ;;  %v12644_v21 = vadd.f32 -4.0, %v1342_v51  ;;  %v2645_v4 = vand.u32 2147483647, %v12619_v33  ;;  %v12647_v38 = vadd.f32 -4.0, %v1541_v54  ;;  %v1535_v53 = vadd.f32 %v12541_v36, %v11546_v19 }
 0x252   : > { %8003 = vmatmul.mubr.bf16.vlgmr.msra.gmra.mxu1 %v19028_v52  ;;  %10073 = vlog2.f32 %v4558_v2  ;;  %v9785_v44 = vld [vmem:[#allocation8 + $0x250] ss:$8 sps:$4 sm:$0xff]   ;;  %v12653_v27 = vpop.eup %10063  ;;  %v4495_v51 = vadd.f32 1.0, %v12565_v47  ;;  %v4552_v36 = vmul.f32 -0.5, %v12538_v31  ;;  %v12667_v5 = vmul.f32 0.6931472, %v10062_v20  ;;  %v1349_v20 = vpop.f32.mrf.mxu0 }
 0x253   : > { %8357 = vmatpush1.bf16.msra.mxu1 %v9776_v29  ;;  %v2901_v26 = vsub.f32 0.0, %v2645_v4  ;;  %v12659_v29 = vmul.f32 0.6931472, %v12548_v14  ;;  %10075 = vlog2.f32 %v4477_v60  ;;  %v2647_v45 = vand.u32 2147483647, %v12647_v38  ;;  %v19031_v52 = vld [vmem:[#allocation53_spill] sm:$0xff] }
 0x254   : > { %8166 = vmatpush1.bf16.msra.mxu0 %v9779_v48  ;;  %8358 = vmatprep.subr.bf16.mxu1 %v9784_v17  ;;  %v4576_v48 = vadd.f32 1.0, %v12653_v27  ;;  %v2637_v17 = vand.u32 2147483647, %v12644_v21  ;;  %v3766_v54 = vadd.f32 1.0, %v19031_v52  ;;  %v2374_v60 = vmax.f32 %v12506_v49, 0.0 }
 0x255   : > { %8167 = vmatprep.subr.bf16.mxu0 %v9787_v25  ;;  %v12669_v25 = vadd.f32 -4.0, %v1535_v53  ;;  %v3285_v14 = vmul.f32 1.442695, %v2901_v26  ;;  %v2903_v23 = vsub.f32 0.0, %v2647_v45  ;;  %v4553_v6 = vadd.f32 1.0, %v4552_v36 }
 0x256   : > { %10077 = vlog2.f32 %v4576_v48  ;;  %v10066_v4 = vpop.eup %10065  ;;  %v4555_v34 = vand.u32 2147483647, %v12538_v31  ;;  %v4570_v43 = vmul.f32 -0.5, %v12592_v39  ;;  %v4573_v53 = vand.u32 2147483647, %v12592_v39 }
 0x257   : > { %8359 = vmatpush1.bf16.msra.mxu1 %v9782_v55  ;;  %10079 = vlog2.f32 %v4495_v51  ;;  %v4561_v55 = vmul.f32 -0.5, %v12621_v10  ;;  %v19033_v51 = vld [vmem:[#allocation54_spill] sm:$0xff]  ;;  %v4341_v49 = vsel %vm12639_vm8, %v12624_v13, %v12659_v29  ;;  %v4551_v36 = vmul.f32 0.6931472, %v10066_v4 }
 0x258   : > { %8168 = vmatpush1.bf16.msra.mxu0 %v9785_v44  ;;  %v2893_v44 = vsub.f32 0.0, %v2637_v17  ;;  %10081 = vlog2.f32 %v3766_v54  ;;  %v3784_v26 = vadd.f32 1.0, %v19033_v51  ;;  %v2639_v45 = vand.u32 2147483647, %v12669_v25  ;;  %8360 = vmatprep.subr.bf16.mxu1 %v9790_v18 }
 0x259   : > { %v12676_v48 = vpop.eup %10067  ;;  %10083 = vpow2.f32 %v3285_v14  ;;  %v2376_v2 = vmax.f32 %v12521_v50, 0.0  ;;  %v4579_v17 = vmul.f32 -0.5, %v12653_v27  ;;  %v3289_v54 = vmul.f32 1.442695, %v2903_v23 }
 0x25a   : > { %19032 = vst [vmem:[#allocation21_spill] sm:$0xff] %v12676_v48  ;;  %v12685_v8 = vpop.eup %10069  ;;  %v1350_v41 = vadd.f32 %v1349_v20, %v11550_v58  ;;  %v4554_v62 = vmul.f32 %v12538_v31, %v4553_v6  ;;  %vm12691_vm9 = vcmp.lt.f32.partialorder %v4555_v34, 0.0004427343  ;;  %v4562_v13 = vadd.f32 1.0, %v4561_v55 }
 0x25b   : > { %19034 = vst [vmem:[#allocation53_spill] sm:$0xff] %v12685_v8  ;;  %v1543_v29 = vadd.f32 %v1542_v15, %v11553_v22  ;;  %v4571_v4 = vadd.f32 1.0, %v4570_v43  ;;  %vm12696_vm10 = vcmp.lt.f32.partialorder %v4573_v53, 0.0004427343  ;;  %v4564_v50 = vand.u32 2147483647, %v12621_v10  ;;  %8361 = vmatpush1.bf16.msra.mxu1 %v9788_v7 }
 0x25c   : > { %v10072_v14 = vpop.eup %10071  ;;  %10085 = vlog2.f32 %v3784_v26  ;;  %v4557_v31 = vsel %vm12691_vm9, %v4554_v62, %v4551_v36  ;;  %v3269_v6 = vmul.f32 1.442695, %v2893_v44  ;;  %v2895_v23 = vsub.f32 0.0, %v2639_v45 }
 0x25d   : > { %v12703_v34 = vadd.f32 -4.0, %v1350_v41  ;;  %v19039_v15 = vand.u32 2147483647, %v12480_v28  ;;  %v4580_v20 = vadd.f32 1.0, %v4579_v17  ;;  %10087 = vpow2.f32 %v3289_v54 }
 0x25e   : > { %v3769_v53 = vmul.f32 -0.5, %v19031_v52  ;;  %v12712_v18 = vadd.f32 -4.0, %v1543_v29  ;;  %v4569_v26 = vmul.f32 0.6931472, %v10072_v14  ;;  %v4563_v44 = vmul.f32 %v12621_v10, %v4562_v13 }
 0x25f   : > { %v10074_v55 = vpop.eup %10073  ;;  %vm12707_vm11 = vcmp.lt.f32.partialorder %v19039_v15, 0.0004427343  ;;  %v2646_v41 = vand.u32 2147483647, %v12703_v34  ;;  %v4572_v7 = vmul.f32 %v12592_v39, %v4571_v4  ;;  %vm4565_vm12 = vcmp.lt.f32.partialorder %v4564_v50, 0.0004427343 }
 0x260   : > { %v4560_v62 = vmul.f32 0.6931472, %v10074_v55  ;;  %v4582_v28 = vand.u32 2147483647, %v12653_v27  ;;  %v2648_v36 = vand.u32 2147483647, %v12712_v18  ;;  %v12719_v45 = vpop.eup %10075  ;;  %v4581_v13 = vmul.f32 %v12653_v27, %v4580_v20 }
 0x261   : > { %v19042_v17 = vmax.f32 %v12405_v12, 0.0  ;;  %v3273_v29 = vmul.f32 1.442695, %v2895_v23  ;;  %v2902_v14 = vsub.f32 0.0, %v2646_v41  ;;  %v3770_v39 = vadd.f32 1.0, %v3769_v53  ;;  %v1351_v41 = vpop.f32.mrf.mxu0 }
 0x262   : > { %v4566_v37 = vsel %vm4565_vm12, %v4563_v44, %v4560_v62  ;;  %v2904_v4 = vsub.f32 0.0, %v2648_v36  ;;  %v4575_v15 = vsel %vm12696_vm10, %v4572_v7, %v4569_v26  ;;  %v3787_v12 = vmul.f32 -0.5, %v19033_v51 }
 0x263   : > { %v12723_v54 = vadd.f32 %v4557_v31, %v19042_v17  ;;  %v10078_v55 = vpop.eup %10077  ;;  %v12725_v10 = vadd.f32 %v4566_v37, %v2374_v60  ;;  %v3287_v31 = vmul.f32 1.442695, %v2902_v14  ;;  %vm4583_vm13 = vcmp.lt.f32.partialorder %v4582_v28, 0.0004427343  ;;  %v12756_v37 = vpop.f32.mrf.mxu1 }
 0x264   : > { %v12728_v50 = vpop.eup %10079  ;;  %v4578_v8 = vmul.f32 0.6931472, %v10078_v55  ;;  %10089 = vpow2.f32 %v3269_v6  ;;  %v3772_v60 = vand.u32 2147483647, %v19031_v52  ;;  %v19045_v20 = vmax.f32 %v12305_v57, 0.0 }
 0x265   : > { %19043 = vst [vmem:[#allocation54_spill] sm:$0xff] %v12723_v54  ;;  %19044 = vst [vmem:[#allocation73_spill] sm:$0xff] %v12725_v10  ;;  %v9509_v23 = vpack.c.bf16 %v12725_v10, %v12723_v54  ;;  %v10082_v27 = vpop.eup %10081  ;;  %v19047_v30 = vand.u32 2147483647, %v12617_v3  ;;  %v3291_v44 = vmul.f32 1.442695, %v2904_v4  ;;  %10091 = vpow2.f32 %v3287_v31 }
 0x266   : > { %v12738_v53 = vadd.f32 %v4341_v49, %v19045_v20  ;;  %v4584_v62 = vsel %vm4583_vm13, %v4581_v13, %v4578_v8  ;;  %v12742_v7 = vpop.eup %10083  ;;  %v19048_v36 = vmax.f32 %v12445_v0, 0.0  ;;  %v3768_v28 = vmul.f32 0.6931472, %v10082_v27  ;;  %v19056_v27 = vld [vmem:[#allocation36_spill] sm:$0xff] }
 0x267   : > { %v2878_v26 = vsub.f32 0.0, %v19047_v30  ;;  %6925 = vst [vmem:[%s11758_s29 + $0x1c0] sm:$0xff] %v9509_v23  ;;  %v12749_v6 = vadd.f32 %v4584_v62, %v2376_v2  ;;  %v4359_v57 = vsel %vm12707_vm11, %v12627_v42, %v12667_v5  ;;  %10093 = vpow2.f32 %v3273_v29  ;;  %v9791_v29 = vld [vmem:[#allocation8 + $0x240] ss:$8 sps:$4 sm:$0xff]  }
 0x268   : > { %19046 = vst [vmem:[#allocation74_spill] sm:$0xff] %v12738_v53  ;;  %v12746_v17 = vadd.f32 %v4575_v15, %v19048_v36  ;;  %v3771_v8 = vmul.f32 %v19031_v52, %v3770_v39  ;;  %v3788_v49 = vadd.f32 1.0, %v3787_v12  ;;  %v19051_v0 = vand.u32 2147483647, %v12630_v11  ;;  %v12765_v52 = vpop.f32.mrf.mxu0  ;;  %v9793_v39 = vld [vmem:[#allocation8 + $0x244] ss:$8 sps:$4 sm:$0xff]  }
 0x269   : > { %19050 = vst [vmem:[#allocation76_spill] sm:$0xff] %v12749_v6  ;;  %vm3773_vm14 = vcmp.lt.f32.partialorder %v3772_v60, 0.0004427343  ;;  %v3790_v55 = vand.u32 2147483647, %v19033_v51  ;;  %v10086_v13 = vpop.eup %10085  ;;  %v4480_v43 = vmul.f32 -0.5, %v12552_v63  ;;  %10095 = vpow2.f32 %v3291_v44  ;;  %8169 = vmatprep.subr.bf16.mxu0 %v9793_v39 }
 0x26a   : > { %19049 = vst [vmem:[#allocation75_spill] sm:$0xff] %v12746_v17  ;;  %v2880_v14 = vsub.f32 0.0, %v19051_v0  ;;  %v9510_v2 = vpack.c.bf16 %v12749_v6, %v12746_v17  ;;  %v4693_v42 = vadd.f32 1.0, %v12742_v7  ;;  %v3774_v5 = vsel %vm3773_vm14, %v3771_v8, %v3768_v28  ;;  %v19053_v12 = vld [vmem:[#allocation52_spill] sm:$0xff]  ;;  %v12776_v62 = vpop.eup %10087  ;;  %v12782_v0 = vpop.f32.mrf.mxu1  ;;  %8170 = vmatpush1.bf16.msra.mxu0 %v9791_v29 }
 0x26b   : > { %v19054_v31 = vmax.f32 %v19053_v12, 0.0  ;;  %v3239_v60 = vmul.f32 1.442695, %v2878_v26  ;;  %v19057_v20 = vmax.f32 %v19056_v27, 0.0  ;;  %v4498_v44 = vmul.f32 -0.5, %v12565_v47  ;;  %v19082_v53 = vld [vmem:[#allocation56_spill] sm:$0xff] }
 0x26c   : > { %6926 = vst [vmem:[%s11758_s29 + $0x1c8] sm:$0xff] %v9510_v2  ;;  %v1344_v36 = vadd.f32 %v12563_v61, %v11550_v58  ;;  %v3786_v28 = vmul.f32 0.6931472, %v10086_v13  ;;  %v3789_v8 = vmul.f32 %v19033_v51, %v3788_v49  ;;  %v3243_v26 = vmul.f32 1.442695, %v2880_v14  ;;  %v19058_v2 = vld [vmem:[#allocation23_spill] sm:$0xff]  ;;  %v1357_v61 = vpop.f32.mrf.mxu0 }
 0x26d   : > { %v12771_v23 = vadd.f32 %v4359_v57, %v19054_v31  ;;  %v5870_v30 = vadd.f32 %v3774_v5, %v19057_v20  ;;  %v4483_v57 = vand.u32 2147483647, %v12552_v63  ;;  %vm3791_vm15 = vcmp.lt.f32.partialorder %v3790_v55, 0.0004427343  ;;  %v19059_v31 = vld [vmem:[#allocation26_spill] sm:$0xff]  ;;  %v19060_v14 = vld [vmem:[#allocation39_spill] sm:$0xff] }
 0x26e   : > { %v4481_v5 = vadd.f32 1.0, %v4480_v43  ;;  %10097 = vlog2.f32 %v4693_v42  ;;  %v3792_v20 = vsel %vm3791_vm15, %v3789_v8, %v3786_v28  ;;  %v4501_v13 = vand.u32 2147483647, %v12565_v47  ;;  %v19064_v28 = vld [vmem:[#allocation22_spill] sm:$0xff]  ;;  %v1359_v55 = vpop.f32.mrf.mxu0 }
 0x26f   : > { %19055 = vst [vmem:[#allocation52_spill] sm:$0xff] %v12771_v23  ;;  %v6110_v12 = vpack.c.bf16 %v5870_v30, %v19058_v2  ;;  %v9465_v27 = vpack.c.bf16 %v5870_v30, %v19059_v31  ;;  %v1537_v51 = vadd.f32 %v12572_v24, %v11553_v22  ;;  %v4711_v49 = vadd.f32 1.0, %v12776_v62  ;;  %v1550_v30 = vpop.f32.mrf.mxu1  ;;  %v19066_v24 = vld [vmem:[#allocation25_spill] sm:$0xff] }
 0x270   : > { %v19061_v39 = vmax.f32 %v19060_v14, 0.0  ;;  %v4499_v43 = vadd.f32 1.0, %v4498_v44  ;;  %10099 = vpow2.f32 %v3239_v60  ;;  %v12795_v42 = vadd.f32 -4.0, %v1344_v36 }
 0x271   : > { %7819 = vmatprep.mubr.bf16.mxu0 %v6110_v12  ;;  %6881 = vst [vmem:[%s11758_s29 + $0x60] sm:$0xff] %v9465_v27  ;;  %v19065_v8 = vpack.c.bf16 %v19059_v31, %v19064_v28  ;;  %v19067_v12 = vld [vmem:[#allocation27_spill] sm:$0xff]  ;;  %v1358_v14 = vadd.f32 %v1357_v61, %v11544_v35  ;;  %v4479_v60 = vmul.f32 0.6931472, %v12719_v45  ;;  %v4482_v44 = vmul.f32 %v12552_v63, %v4481_v5 }
 0x272   : > { %v5872_v2 = vadd.f32 %v3792_v20, %v19061_v39  ;;  %19063 = vst [vmem:[#allocation36_spill] sm:$0xff] %v12795_v42  ;;  %v1352_v20 = vadd.f32 %v1351_v41, %v11544_v35  ;;  %v12805_v39 = vpop.eup %10089  ;;  %vm12809_vm0 = vcmp.lt.f32.partialorder %v4483_v57, 0.0004427343  ;;  %10101 = vpow2.f32 %v3243_v26 }
 0x273   : > { %7820 = vmatmul.mubr.bf16.gmra.mxu0 %v19065_v8  ;;  %vm12813_vm1 = vcmp.lt.f32.partialorder %v4501_v13, 0.0004427343  ;;  %v12817_v27 = vadd.f32 -4.0, %v1537_v51  ;;  %10103 = vlog2.f32 %v4711_v49  ;;  %v12820_v41 = vadd.f32 -4.0, %v1358_v14  ;;  %v12823_v61 = vpop.eup %10091  ;;  %v19073_v13 = vld [vmem:[#allocation24_spill] sm:$0xff] }
 0x274   : > { %v6112_v15 = vpack.c.bf16 %v5872_v2, %v19066_v24  ;;  %v9466_v6 = vpack.c.bf16 %v5872_v2, %v19067_v12  ;;  %v1551_v45 = vadd.f32 %v1550_v30, %v11546_v19  ;;  %v12826_v63 = vmul.f32 %v12565_v47, %v4499_v43 }
 0x275   : > { %19072 = vst [vmem:[#allocation23_spill] sm:$0xff] %v12817_v27  ;;  %v2638_v26 = vand.u32 2147483647, %v12795_v42  ;;  %v1545_v5 = vadd.f32 %v12756_v37, %v11546_v19  ;;  %v12838_v51 = vmul.f32 0.6931472, %v12728_v50  ;;  %v4621_v49 = vadd.f32 1.0, %v12805_v39 }
 0x276   : > { %6882 = vst [vmem:[%s11758_s29 + $0x68] sm:$0xff] %v9466_v6  ;;  %8012 = vmatprep.mubr.bf16.mxu1 %v6112_v15  ;;  %v19074_v6 = vpack.c.bf16 %v19067_v12, %v19073_v13  ;;  %v12835_v15 = vpop.eup %10093  ;;  %v4702_v47 = vadd.f32 1.0, %v12823_v61  ;;  %v12842_v2 = vadd.f32 -4.0, %v1352_v20  ;;  %v4485_v43 = vsel %vm12809_vm0, %v4482_v44, %v4479_v60  ;;  %v19075_v12 = vld [vmem:[#allocation55_spill] sm:$0xff] }
 0x277   : > { %v4696_v30 = vmul.f32 -0.5, %v12742_v7  ;;  %v2661_v28 = vand.u32 2147483647, %v12820_v41  ;;  %v12849_v8 = vpop.eup %10095  ;;  %v12852_v24 = vadd.f32 -4.0, %v1551_v45  ;;  %v3910_v14 = vadd.f32 1.0, %v19075_v12 }
 0x278   : > { %8013 = vmatmul.mubr.bf16.gmra.mxu1 %v19074_v6  ;;  %10105 = vlog2.f32 %v4702_v47  ;;  %v4639_v20 = vadd.f32 1.0, %v12835_v15  ;;  %v12856_v13 = vsub.f32 0.0, %v2638_v26  ;;  %v4720_v60 = vadd.f32 1.0, %v12849_v8  ;;  %v9796_v6 = vld [vmem:[#allocation8 + $0x344] ss:$8 sps:$4 sm:$0xff]  }
 0x279   : > { %v12859_v44 = vadd.f32 -4.0, %v1545_v5  ;;  %10107 = vlog2.f32 %v4621_v49  ;;  %v2653_v29 = vand.u32 2147483647, %v12842_v2  ;;  %v4697_v47 = vadd.f32 1.0, %v4696_v30  ;;  %8362 = vmatprep.subr.bf16.mxu1 %v9796_v6 }
 0x27a   : > { %v4699_v45 = vand.u32 2147483647, %v12742_v7  ;;  %10109 = vlog2.f32 %v4720_v60  ;;  %v2917_v37 = vsub.f32 0.0, %v2661_v28  ;;  %v4714_v26 = vmul.f32 -0.5, %v12776_v62  ;;  %v9794_v60 = vld [vmem:[#allocation8 + $0x340] ss:$8 sps:$4 sm:$0xff]  }
 0x27b   : > { %v10098_v57 = vpop.eup %10097  ;;  %v4717_v50 = vand.u32 2147483647, %v12776_v62  ;;  %v2663_v5 = vand.u32 2147483647, %v12852_v24  ;;  %10111 = vlog2.f32 %v3910_v14  ;;  %v19076_v49 = vmax.f32 %v12422_v16, 0.0  ;;  %8363 = vmatpush1.bf16.msra.mxu1 %v9794_v60 }
 0x27c   : > { %10113 = vlog2.f32 %v4639_v20  ;;  %v2655_v28 = vand.u32 2147483647, %v12859_v44  ;;  %v2390_v11 = vmax.f32 %v12703_v34, 0.0  ;;  %v4705_v14 = vmul.f32 -0.5, %v12823_v61 }
 0x27d   : > { %v12870_v36 = vadd.f32 %v4485_v43, %v19076_v49  ;;  %v12877_v10 = vpop.eup %10099  ;;  %v3317_v3 = vmul.f32 1.442695, %v2917_v37  ;;  %v2919_v16 = vsub.f32 0.0, %v2663_v5  ;;  %v4695_v43 = vmul.f32 0.6931472, %v10098_v57  ;;  %v1552_v5 = vpop.f32.mrf.mxu1 }
 0x27e   : > { %19078 = vst [vmem:[#allocation39_spill] sm:$0xff] %v12877_v10  ;;  %vm12881_vm2 = vcmp.lt.f32.partialorder %v4699_v45, 0.0004427343  ;;  %v2909_v20 = vsub.f32 0.0, %v2653_v29  ;;  %v4698_v10 = vmul.f32 %v12742_v7, %v4697_v47  ;;  %v4723_v34 = vmul.f32 -0.5, %v12849_v8 }
 0x27f   : > { %19077 = vst [vmem:[#allocation26_spill] sm:$0xff] %v12870_v36  ;;  %v12886_v23 = vpop.eup %10101  ;;  %v3321_v4 = vmul.f32 1.442695, %v2919_v16  ;;  %v3928_v37 = vadd.f32 1.0, %v19082_v53  ;;  %v4715_v45 = vadd.f32 1.0, %v4714_v26  ;;  %v2911_v29 = vsub.f32 0.0, %v2655_v28 }
 0x280   : > { %19081 = vst [vmem:[#allocation22_spill] sm:$0xff] %v12886_v23  ;;  %v10104_v57 = vpop.eup %10103  ;;  %vm12891_vm3 = vcmp.lt.f32.partialorder %v4717_v50, 0.0004427343  ;;  %10115 = vpow2.f32 %v3317_v3  ;;  %v4706_v6 = vadd.f32 1.0, %v4705_v14  ;;  %v3913_v30 = vmul.f32 -0.5, %v19075_v12 }
 0x281   : > { %10117 = vpow2.f32 %v3321_v4  ;;  %v1360_v7 = vadd.f32 %v1359_v55, %v11550_v58  ;;  %v4701_v47 = vsel %vm12881_vm2, %v4698_v10, %v4695_v43  ;;  %v4708_v16 = vand.u32 2147483647, %v12823_v61 }
 0x282   : > { %v3301_v60 = vmul.f32 1.442695, %v2909_v20  ;;  %v1553_v26 = vadd.f32 %v1552_v5, %v11553_v22  ;;  %v4713_v50 = vmul.f32 0.6931472, %v10104_v57  ;;  %v4724_v23 = vadd.f32 1.0, %v4723_v34 }
 0x283   : > { %10119 = vlog2.f32 %v3928_v37  ;;  %v12901_v48 = vadd.f32 -4.0, %v1360_v7  ;;  %v4716_v4 = vmul.f32 %v12776_v62, %v4715_v45  ;;  %v4726_v28 = vand.u32 2147483647, %v12849_v8  ;;  %v1361_v45 = vpop.f32.mrf.mxu0 }
 0x284   : > { %v3305_v14 = vmul.f32 1.442695, %v2911_v29  ;;  %v12905_v55 = vadd.f32 -4.0, %v1553_v26  ;;  %v4707_v10 = vmul.f32 %v12823_v61, %v4706_v6  ;;  %v3914_v43 = vadd.f32 1.0, %v3913_v30 }
 0x285   : > { %v10106_v3 = vpop.eup %10105  ;;  %v2662_v20 = vand.u32 2147483647, %v12901_v48  ;;  %v19085_v34 = vmax.f32 %v12619_v33, 0.0  ;;  %vm4709_vm4 = vcmp.lt.f32.partialorder %v4708_v16, 0.0004427343  ;;  %v4719_v7 = vsel %vm12891_vm3, %v4716_v4, %v4713_v50 }
 0x286   : > { %v4704_v49 = vmul.f32 0.6931472, %v10106_v3  ;;  %v12909_v5 = vpop.eup %10107  ;;  %v3916_v62 = vand.u32 2147483647, %v19075_v12  ;;  %v2664_v57 = vand.u32 2147483647, %v12905_v55  ;;  %v4725_v30 = vmul.f32 %v12849_v8, %v4724_v23 }
 0x287   : > { %v12913_v37 = vadd.f32 %v4701_v47, %v19085_v34  ;;  %v10110_v29 = vpop.eup %10109  ;;  %v2918_v6 = vsub.f32 0.0, %v2662_v20  ;;  %v3931_v47 = vmul.f32 -0.5, %v19082_v53  ;;  %vm4727_vm5 = vcmp.lt.f32.partialorder %v4726_v28, 0.0004427343 }
 0x288   : > { %v4710_v61 = vsel %vm4709_vm4, %v4707_v10, %v4704_v49  ;;  %v10112_v26 = vpop.eup %10111  ;;  %v4722_v33 = vmul.f32 0.6931472, %v10110_v29  ;;  %v2920_v16 = vsub.f32 0.0, %v2664_v57  ;;  %v3915_v46 = vmul.f32 %v19075_v12, %v3914_v43  ;;  %v12938_v12 = vpop.f32.mrf.mxu1  ;;  %v19091_v57 = vld [vmem:[#allocation42_spill] sm:$0xff] }
 0x289   : > { %v12920_v3 = vadd.f32 %v4710_v61, %v2390_v11  ;;  %v12923_v34 = vpop.eup %10113  ;;  %v3912_v1 = vmul.f32 0.6931472, %v10112_v26  ;;  %v3319_v59 = vmul.f32 1.442695, %v2918_v6  ;;  %vm3917_vm6 = vcmp.lt.f32.partialorder %v3916_v62, 0.0004427343  ;;  %v12928_v11 = vpop.f32.mrf.mxu0 }
 0x28a   : > { %v4728_v23 = vsel %vm4727_vm5, %v4725_v30, %v4722_v33  ;;  %v3323_v8 = vmul.f32 1.442695, %v2920_v16  ;;  %v19087_v4 = vmax.f32 %v12647_v38, 0.0  ;;  %v19089_v10 = vmax.f32 %v12712_v18, 0.0  ;;  %v9797_v30 = vld [vmem:[#allocation8 + $0x230] ss:$8 sps:$4 sm:$0xff]  }
 0x28b   : > { %19086 = vst [vmem:[#allocation25_spill] sm:$0xff] %v12920_v3  ;;  %v9517_v50 = vpack.c.bf16 %v12920_v3, %v12913_v37  ;;  %v3918_v28 = vsel %vm3917_vm6, %v3915_v46, %v3912_v1  ;;  %10121 = vpow2.f32 %v3319_v59  ;;  %v4624_v43 = vmul.f32 -0.5, %v12805_v39  ;;  %v9799_v26 = vld [vmem:[#allocation8 + $0x234] ss:$8 sps:$4 sm:$0xff]  }
 0x28c   : > { %v12932_v49 = vadd.f32 %v4719_v7, %v19087_v4  ;;  %v12936_v20 = vadd.f32 %v4728_v23, %v19089_v10  ;;  %v19092_v62 = vmax.f32 %v19091_v57, 0.0  ;;  %v3932_v61 = vadd.f32 1.0, %v3931_v47  ;;  %v19097_v59 = vld [vmem:[#allocation29_spill] sm:$0xff]  ;;  %v12970_v4 = vpop.f32.mrf.mxu1  ;;  %8171 = vmatprep.subr.bf16.mxu0 %v9799_v26  ;;  %v19118_v18 = vld [vmem:[#allocation60_spill] sm:$0xff] }
 0x28d   : > { %6933 = vst [vmem:[%s11758_s29 + $0x200] sm:$0xff] %v9517_v50  ;;  %10123 = vpow2.f32 %v3323_v8  ;;  %v12944_v38 = vpop.eup %10115  ;;  %v19093_v46 = vmax.f32 %v12424_v9, 0.0  ;;  %v19094_v1 = vsel %vm12813_vm1, %v12826_v63, %v12838_v51  ;;  %v19096_v47 = vand.u32 2147483647, %v12817_v27  ;;  %v19098_v50 = vld [vmem:[#allocation32_spill] sm:$0xff]  ;;  %v1367_v63 = vpop.f32.mrf.mxu0  ;;  %8172 = vmatpush1.bf16.msra.mxu0 %v9797_v30 }
 0x28e   : > { %19088 = vst [vmem:[#allocation27_spill] sm:$0xff] %v12932_v49  ;;  %19090 = vst [vmem:[#allocation24_spill] sm:$0xff] %v12936_v20  ;;  %v5886_v29 = vadd.f32 %v3918_v28, %v19092_v62  ;;  %v9518_v6 = vpack.c.bf16 %v12936_v20, %v12932_v49  ;;  %10125 = vpow2.f32 %v3301_v60  ;;  %v12959_v33 = vpop.eup %10117  ;;  %v3934_v23 = vand.u32 2147483647, %v19082_v53  ;;  %v9802_v27 = vld [vmem:[#allocation8 + $0x334] ss:$8 sps:$4 sm:$0xff]  }
 0x28f   : > { %v12955_v7 = vadd.f32 %v19094_v1, %v19093_v46  ;;  %v2896_v16 = vsub.f32 0.0, %v19096_v47  ;;  %v3271_v8 = vmul.f32 1.442695, %v12856_v13  ;;  %10127 = vpow2.f32 %v3305_v14  ;;  %8364 = vmatprep.subr.bf16.mxu1 %v9802_v27 }
 0x290   : > { %v6118_v9 = vpack.c.bf16 %v5886_v29, %v19097_v59  ;;  %v9473_v31 = vpack.c.bf16 %v5886_v29, %v19098_v50  ;;  %6934 = vst [vmem:[%s11758_s29 + $0x208] sm:$0xff] %v9518_v6  ;;  %v10120_v10 = vpop.eup %10119  ;;  %v4625_v28 = vadd.f32 1.0, %v4624_v43  ;;  %v4642_v57 = vmul.f32 -0.5, %v12835_v15  ;;  %v19099_v6 = vld [vmem:[#allocation28_spill] sm:$0xff] }
 0x291   : > { %19095 = vst [vmem:[#allocation55_spill] sm:$0xff] %v12955_v7  ;;  %v4837_v62 = vadd.f32 1.0, %v12944_v38  ;;  %v3933_v29 = vmul.f32 %v19082_v53, %v3932_v61  ;;  %v4855_v13 = vadd.f32 1.0, %v12959_v33  ;;  %v3930_v46 = vmul.f32 0.6931472, %v10120_v10 }
 0x292   : > { %6889 = vst [vmem:[%s11758_s29 + $0xa0] sm:$0xff] %v9473_v31  ;;  %7829 = vmatprep.mubr.bf16.mxu0 %v6118_v9  ;;  %v1362_v1 = vadd.f32 %v1361_v45, %v11544_v35  ;;  %v1368_v14 = vadd.f32 %v1367_v63, %v11544_v35  ;;  %v19100_v26 = vpack.c.bf16 %v19098_v50, %v19099_v6  ;;  %v4627_v47 = vand.u32 2147483647, %v12805_v39  ;;  %v1560_v9 = vpop.f32.mrf.mxu1  ;;  %v19101_v63 = vld [vmem:[#allocation43_spill] sm:$0xff] }
 0x293   : > { %v3275_v59 = vmul.f32 1.442695, %v2896_v16  ;;  %vm3935_vm7 = vcmp.lt.f32.partialorder %v3934_v23, 0.0004427343  ;;  %v4623_v53 = vmul.f32 0.6931472, %v12909_v5  ;;  %v1354_v61 = vadd.f32 %v12765_v52, %v11550_v58 }
 0x294   : > { %7830 = vmatmul.mubr.bf16.gmra.mxu0 %v19100_v26  ;;  %v1547_v45 = vadd.f32 %v12782_v0, %v11553_v22  ;;  %v3936_v30 = vsel %vm3935_vm7, %v3933_v29, %v3930_v46  ;;  %v4643_v31 = vadd.f32 1.0, %v4642_v57  ;;  %v4645_v50 = vand.u32 2147483647, %v12835_v15  ;;  %v19105_v0 = vld [vmem:[#allocation31_spill] sm:$0xff]  ;;  %v19106_v29 = vld [vmem:[#allocation33_spill] sm:$0xff] }
 0x295   : > { %10129 = vlog2.f32 %v4837_v62  ;;  %v19102_v10 = vmax.f32 %v19101_v63, 0.0  ;;  %v4626_v16 = vmul.f32 %v12805_v39, %v4625_v28  ;;  %v12994_v5 = vadd.f32 -4.0, %v1362_v1 }
 0x296   : > { %10131 = vlog2.f32 %v4855_v13  ;;  %v12996_v23 = vadd.f32 -4.0, %v1368_v14  ;;  %vm12998_vm8 = vcmp.lt.f32.partialorder %v4627_v47, 0.0004427343  ;;  %v1561_v62 = vadd.f32 %v1560_v9, %v11546_v19 }
 0x297   : > { %v5888_v6 = vadd.f32 %v3936_v30, %v19102_v10  ;;  %v4629_v26 = vsel %vm12998_vm8, %v4626_v16, %v4623_v53  ;;  %10133 = vpow2.f32 %v3271_v8  ;;  %v13007_v39 = vadd.f32 -4.0, %v1354_v61  ;;  %v19111_v30 = vld [vmem:[#allocation30_spill] sm:$0xff] }
 0x298   : > { %v13009_v28 = vadd.f32 -4.0, %v1547_v45  ;;  %v13011_v13 = vpop.eup %10121  ;;  %v13014_v1 = vmul.f32 %v12835_v15, %v4643_v31  ;;  %vm13016_vm9 = vcmp.lt.f32.partialorder %v4645_v50, 0.0004427343  ;;  %10135 = vpow2.f32 %v3275_v59 }
 0x299   : > { %v6120_v57 = vpack.c.bf16 %v5888_v6, %v19105_v0  ;;  %v9474_v46 = vpack.c.bf16 %v5888_v6, %v19106_v29  ;;  %19107 = vst [vmem:[#allocation56_spill] sm:$0xff] %v13007_v39  ;;  %v2677_v47 = vand.u32 2147483647, %v12996_v23  ;;  %v4846_v61 = vadd.f32 1.0, %v13011_v13  ;;  %v19115_v6 = vld [vmem:[#allocation57_spill] sm:$0xff] }
 0x29a   : > { %19108 = vst [vmem:[#allocation42_spill] sm:$0xff] %v13009_v28  ;;  %v13022_v53 = vpop.eup %10123  ;;  %v2669_v45 = vand.u32 2147483647, %v12994_v5  ;;  %v1555_v15 = vadd.f32 %v12938_v12, %v11546_v19  ;;  %v19112_v9 = vpack.c.bf16 %v19106_v29, %v19111_v30  ;;  %v19113_v31 = vmax.f32 %v12644_v21, 0.0  ;;  %v1369_v12 = vpop.f32.mrf.mxu0  ;;  %v9800_v21 = vld [vmem:[#allocation8 + $0x330] ss:$8 sps:$4 sm:$0xff]  }
 0x29b   : > { %6890 = vst [vmem:[%s11758_s29 + $0xa8] sm:$0xff] %v9474_v46  ;;  %8022 = vmatprep.mubr.bf16.mxu1 %v6120_v57  ;;  %v13032_v59 = vpop.eup %10125  ;;  %v4864_v63 = vadd.f32 1.0, %v13022_v53  ;;  %v13039_v10 = vadd.f32 -4.0, %v1561_v62  ;;  %v4054_v16 = vadd.f32 1.0, %v19115_v6  ;;  %v13043_v52 = vmul.f32 0.6931472, %v12923_v34  ;;  %8365 = vmatpush1.bf16.msra.mxu1 %v9800_v21 }
 0x29c   : > { %8023 = vmatmul.mubr.bf16.gmra.mxu1 %v19112_v9  ;;  %v13036_v50 = vadd.f32 %v4629_v26, %v19113_v31  ;;  %10137 = vlog2.f32 %v4846_v61  ;;  %v13047_v57 = vpop.eup %10127  ;;  %v4840_v29 = vmul.f32 -0.5, %v12944_v38  ;;  %v2933_v46 = vsub.f32 0.0, %v2677_v47 }
 0x29d   : > { %10139 = vlog2.f32 %v4864_v63  ;;  %v4765_v62 = vadd.f32 1.0, %v13032_v59  ;;  %v2925_v30 = vsub.f32 0.0, %v2669_v45  ;;  %v13053_v34 = vadd.f32 -4.0, %v1555_v15 }
 0x29e   : > { %19114 = vst [vmem:[#allocation29_spill] sm:$0xff] %v13036_v50  ;;  %v4843_v9 = vand.u32 2147483647, %v12944_v38  ;;  %v3349_v31 = vmul.f32 1.442695, %v2933_v46  ;;  %10141 = vlog2.f32 %v4054_v16  ;;  %v4783_v60 = vadd.f32 1.0, %v13047_v57 }
 0x29f   : > { %v2679_v61 = vand.u32 2147483647, %v13039_v10  ;;  %v4858_v51 = vmul.f32 -0.5, %v12959_v33  ;;  %v4849_v47 = vmul.f32 -0.5, %v13011_v13  ;;  %v4841_v43 = vadd.f32 1.0, %v4840_v29 }
 0x2a0   : > { %v4867_v45 = vmul.f32 -0.5, %v13022_v53  ;;  %10143 = vpow2.f32 %v3349_v31  ;;  %v4861_v46 = vand.u32 2147483647, %v12959_v33  ;;  %v13068_v8 = vmul.f32 1.442695, %v2925_v30  ;;  %v1562_v30 = vpop.f32.mrf.mxu1 }
 0x2a1   : > { %v2671_v0 = vand.u32 2147483647, %v13053_v34  ;;  %10145 = vlog2.f32 %v4765_v62  ;;  %vm13071_vm10 = vcmp.lt.f32.partialorder %v4843_v9, 0.0004427343  ;;  %v2935_v31 = vsub.f32 0.0, %v2679_v61 }
 0x2a2   : > { %v10130_v15 = vpop.eup %10129  ;;  %v4072_v63 = vadd.f32 1.0, %v19118_v18  ;;  %10147 = vlog2.f32 %v4783_v60  ;;  %v4859_v20 = vadd.f32 1.0, %v4858_v51  ;;  %v4850_v16 = vadd.f32 1.0, %v4849_v47 }
 0x2a3   : > { %v10132_v26 = vpop.eup %10131  ;;  %v4852_v3 = vand.u32 2147483647, %v13011_v13  ;;  %v4839_v32 = vmul.f32 0.6931472, %v10130_v15  ;;  %v4842_v62 = vmul.f32 %v12944_v38, %v4841_v43  ;;  %v4868_v9 = vadd.f32 1.0, %v4867_v45 }
 0x2a4   : > { %v13077_v42 = vpop.eup %10133  ;;  %v1370_v7 = vadd.f32 %v1369_v12, %v11550_v58  ;;  %v4857_v61 = vmul.f32 0.6931472, %v10132_v26  ;;  %vm13083_vm11 = vcmp.lt.f32.partialorder %v4861_v46, 0.0004427343  ;;  %v4057_v51 = vmul.f32 -0.5, %v19115_v6 }
 0x2a5   : > { %19119 = vst [vmem:[#allocation32_spill] sm:$0xff] %v13077_v42  ;;  %v13081_v56 = vpop.eup %10135  ;;  %10149 = vlog2.f32 %v4072_v63  ;;  %v2927_v60 = vsub.f32 0.0, %v2671_v0  ;;  %v3353_v47 = vmul.f32 1.442695, %v2935_v31  ;;  %v1563_v38 = vadd.f32 %v1562_v30, %v11553_v22 }
 0x2a6   : > { %v13088_v42 = vadd.f32 -4.0, %v1370_v7  ;;  %v4860_v43 = vmul.f32 %v12959_v33, %v4859_v20  ;;  %v4851_v12 = vmul.f32 %v13011_v13, %v4850_v16  ;;  %vm13093_vm12 = vcmp.lt.f32.partialorder %v4852_v3, 0.0004427343 }
 0x2a7   : > { %v4870_v45 = vand.u32 2147483647, %v13022_v53  ;;  %v4845_v27 = vsel %vm13071_vm10, %v4842_v62, %v4839_v32  ;;  %v4869_v7 = vmul.f32 %v13022_v53, %v4868_v9  ;;  %v13102_v63 = vadd.f32 -4.0, %v1563_v38  ;;  %v1371_v38 = vpop.f32.mrf.mxu0 }
 0x2a8   : > { %v2678_v0 = vand.u32 2147483647, %v13088_v42  ;;  %v4863_v20 = vsel %vm13083_vm11, %v4860_v43, %v4857_v61  ;;  %v4058_v33 = vadd.f32 1.0, %v4057_v51  ;;  %v4060_v13 = vand.u32 2147483647, %v19115_v6 }
 0x2a9   : > { %v10138_v15 = vpop.eup %10137  ;;  %10151 = vpow2.f32 %v3353_v47  ;;  %v2680_v29 = vand.u32 2147483647, %v13102_v63  ;;  %v19124_v53 = vmax.f32 %v12820_v41, 0.0  ;;  %vm4871_vm13 = vcmp.lt.f32.partialorder %v4870_v45, 0.0004427343 }
 0x2aa   : > { %v10140_v21 = vpop.eup %10139  ;;  %v4848_v3 = vmul.f32 0.6931472, %v10138_v15  ;;  %v2934_v46 = vsub.f32 0.0, %v2678_v0  ;;  %v4075_v36 = vmul.f32 -0.5, %v19118_v18  ;;  %v19126_v62 = vmax.f32 %v12901_v48, 0.0  ;;  %v13133_v0 = vpop.f32.mrf.mxu1 }
 0x2ab   : > { %v4866_v16 = vmul.f32 0.6931472, %v10140_v21  ;;  %v10142_v32 = vpop.eup %10141  ;;  %v13110_v31 = vadd.f32 %v4845_v27, %v19124_v53  ;;  %v19128_v41 = vmax.f32 %v12852_v24, 0.0  ;;  %v19130_v26 = vmax.f32 %v12905_v55, 0.0  ;;  %v13146_v53 = vpop.f32.mrf.mxu0 }
 0x2ac   : > { %v4854_v30 = vsel %vm13093_vm12, %v4851_v12, %v4848_v3  ;;  %v4056_v51 = vmul.f32 0.6931472, %v10142_v32  ;;  %v3351_v47 = vmul.f32 1.442695, %v2934_v46  ;;  %v4059_v45 = vmul.f32 %v19115_v6, %v4058_v33  ;;  %v9803_v6 = vld [vmem:[#allocation8 + $0x220] ss:$8 sps:$4 sm:$0xff]   ;;  %v13165_v14 = vpop.f32.mrf.mxu1 }
 0x2ad   : > { %19125 = vst [vmem:[#allocation28_spill] sm:$0xff] %v13110_v31  ;;  %v13117_v9 = vadd.f32 %v4854_v30, %v19126_v62  ;;  %v4872_v61 = vsel %vm4871_vm13, %v4869_v7, %v4866_v16  ;;  %v13119_v43 = vpop.eup %10143  ;;  %v13123_v15 = vadd.f32 %v4863_v20, %v19128_v41  ;;  %v2936_v48 = vsub.f32 0.0, %v2680_v29  ;;  %v9805_v3 = vld [vmem:[#allocation8 + $0x224] ss:$8 sps:$4 sm:$0xff]  }
 0x2ae   : > { %v13127_v12 = vadd.f32 %v4872_v61, %v19130_v26  ;;  %10153 = vpow2.f32 %v13068_v8  ;;  %v3337_v7 = vmul.f32 1.442695, %v2927_v60  ;;  %vm4061_vm14 = vcmp.lt.f32.partialorder %v4060_v13, 0.0004427343  ;;  %v10146_v24 = vpop.eup %10145  ;;  %v19133_v60 = vld [vmem:[#allocation44_spill] sm:$0xff]  ;;  %8173 = vmatprep.subr.bf16.mxu0 %v9805_v3 }
 0x2af   : > { %19127 = vst [vmem:[#allocation43_spill] sm:$0xff] %v13117_v9  ;;  %19129 = vst [vmem:[#allocation31_spill] sm:$0xff] %v13123_v15  ;;  %v9525_v27 = vpack.c.bf16 %v13117_v9, %v13110_v31  ;;  %v4062_v55 = vsel %vm4061_vm14, %v4059_v45, %v4056_v51  ;;  %v4076_v20 = vadd.f32 1.0, %v4075_v36  ;;  %10155 = vpow2.f32 %v3351_v47  ;;  %v13137_v33 = vpop.eup %10147  ;;  %8174 = vmatpush1.bf16.msra.mxu0 %v9803_v6 }
 0x2b0   : > { %19131 = vst [vmem:[#allocation33_spill] sm:$0xff] %v13127_v12  ;;  %v9526_v21 = vpack.c.bf16 %v13127_v12, %v13123_v15  ;;  %v19132_v16 = vand.u32 2147483647, %v13007_v39  ;;  %v4981_v8 = vadd.f32 1.0, %v13119_v43  ;;  %v19134_v13 = vmax.f32 %v19133_v60, 0.0 }
 0x2b1   : > { %6941 = vst [vmem:[%s11758_s29 + $0x240] sm:$0xff] %v9525_v27  ;;  %v4078_v32 = vand.u32 2147483647, %v19118_v18  ;;  %v19135_v36 = vmax.f32 %v12669_v25, 0.0  ;;  %v19136_v62 = vsel %vm13016_vm9, %v13014_v1, %v13043_v52  ;;  %v3355_v47 = vmul.f32 1.442695, %v2936_v48 }
 0x2b2   : > { %v2910_v46 = vsub.f32 0.0, %v19132_v16  ;;  %v5902_v29 = vadd.f32 %v4062_v55, %v19134_v13  ;;  %6942 = vst [vmem:[%s11758_s29 + $0x248] sm:$0xff] %v9526_v21  ;;  %v10150_v41 = vpop.eup %10149  ;;  %v4768_v26 = vmul.f32 -0.5, %v13032_v59  ;;  %v19138_v27 = vand.u32 2147483647, %v13009_v28  ;;  %v19139_v1 = vld [vmem:[#allocation35_spill] sm:$0xff]  ;;  %v1377_v13 = vpop.f32.mrf.mxu0 }
 0x2b3   : > { %v13157_v61 = vadd.f32 %v19136_v62, %v19135_v36  ;;  %10157 = vpow2.f32 %v3337_v7  ;;  %v19140_v55 = vld [vmem:[#allocation40_spill] sm:$0xff]  ;;  %v4074_v21 = vmul.f32 0.6931472, %v10150_v41  ;;  %v4077_v48 = vmul.f32 %v19118_v18, %v4076_v20 }
 0x2b4   : > { %v2912_v25 = vsub.f32 0.0, %v19138_v27  ;;  %v6126_v52 = vpack.c.bf16 %v5902_v29, %v19139_v1  ;;  %v9481_v16 = vpack.c.bf16 %v5902_v29, %v19140_v55  ;;  %v3303_v3 = vmul.f32 1.442695, %v2910_v46  ;;  %v19141_v46 = vld [vmem:[#allocation45_spill] sm:$0xff] }
 0x2b5   : > { %19137 = vst [vmem:[#allocation30_spill] sm:$0xff] %v13157_v61  ;;  %v1364_v60 = vadd.f32 %v12928_v11, %v11550_v58  ;;  %10159 = vlog2.f32 %v4981_v8  ;;  %vm4079_vm15 = vcmp.lt.f32.partialorder %v4078_v32, 0.0004427343  ;;  %v4786_v36 = vmul.f32 -0.5, %v13047_v57  ;;  %v1570_v8 = vpop.f32.mrf.mxu1  ;;  %v19143_v32 = vld [vmem:[#allocation34_spill] sm:$0xff] }
 0x2b6   : > { %6897 = vst [vmem:[%s11758_s29 + $0xe0] sm:$0xff] %v9481_v16  ;;  %7839 = vmatprep.mubr.bf16.mxu0 %v6126_v52  ;;  %v4080_v6 = vsel %vm4079_vm15, %v4077_v48, %v4074_v21  ;;  %10161 = vpow2.f32 %v3355_v47  ;;  %v4771_v29 = vand.u32 2147483647, %v13032_v59  ;;  %v3307_v20 = vmul.f32 1.442695, %v2912_v25  ;;  %v13183_v27 = vpop.eup %10151  ;;  %v19146_v21 = vld [vmem:[#allocation38_spill] sm:$0xff] }
 0x2b7   : > { %v19142_v62 = vmax.f32 %v19141_v46, 0.0  ;;  %v19144_v41 = vpack.c.bf16 %v19140_v55, %v19143_v32  ;;  %v4769_v1 = vadd.f32 1.0, %v4768_v26  ;;  %v4789_v52 = vand.u32 2147483647, %v13047_v57  ;;  %v1572_v17 = vpop.f32.mrf.mxu1 }
 0x2b8   : > { %v1372_v47 = vadd.f32 %v1371_v38, %v11544_v35  ;;  %v1378_v16 = vadd.f32 %v1377_v13, %v11544_v35  ;;  %10163 = vpow2.f32 %v3303_v3  ;;  %v13188_v25 = vadd.f32 -4.0, %v1364_v60  ;;  %v19148_v3 = vld [vmem:[#allocation65_spill] sm:$0xff] }
 0x2b9   : > { %v5904_v11 = vadd.f32 %v4080_v6, %v19142_v62  ;;  %7840 = vmatmul.mubr.bf16.gmra.mxu0 %v19144_v41  ;;  %v19147_v6 = vld [vmem:[#allocation41_spill] sm:$0xff]  ;;  %v4787_v62 = vadd.f32 1.0, %v4786_v36  ;;  %v1557_v55 = vadd.f32 %v12970_v4, %v11553_v22  ;;  %v1571_v26 = vadd.f32 %v1570_v8, %v11546_v19 }
 0x2ba   : > { %19145 = vst [vmem:[#allocation57_spill] sm:$0xff] %v13188_v25  ;;  %v13194_v32 = vadd.f32 -4.0, %v1378_v16  ;;  %v4767_v41 = vmul.f32 0.6931472, %v10146_v24  ;;  %10165 = vpow2.f32 %v3307_v20  ;;  %v4999_v38 = vadd.f32 1.0, %v13183_v27  ;;  %v19153_v20 = vld [vmem:[#allocation37_spill] sm:$0xff] }
 0x2bb   : > { %v6128_v48 = vpack.c.bf16 %v5904_v11, %v19146_v21  ;;  %v9482_v46 = vpack.c.bf16 %v5904_v11, %v19147_v6  ;;  %v4198_v60 = vadd.f32 1.0, %v19148_v3  ;;  %v13200_v13 = vpop.eup %10153  ;;  %v4770_v11 = vmul.f32 %v13032_v59, %v4769_v1 }
 0x2bc   : > { %vm13203_vm0 = vcmp.lt.f32.partialorder %v4771_v29, 0.0004427343  ;;  %vm13207_vm1 = vcmp.lt.f32.partialorder %v4789_v52, 0.0004427343  ;;  %v13211_v24 = vadd.f32 -4.0, %v1372_v47  ;;  %v19154_v8 = vpack.c.bf16 %v19147_v6, %v19153_v20  ;;  %v13216_v16 = vpop.eup %10155 }
 0x2bd   : > { %6898 = vst [vmem:[%s11758_s29 + $0xe8] sm:$0xff] %v9482_v46  ;;  %8032 = vmatprep.mubr.bf16.mxu1 %v6128_v48  ;;  %v2670_v21 = vand.u32 2147483647, %v13188_v25  ;;  %v2693_v59 = vand.u32 2147483647, %v13194_v32  ;;  %v13220_v29 = vadd.f32 -4.0, %v1571_v26  ;;  %10167 = vlog2.f32 %v4198_v60 }
 0x2be   : > { %8033 = vmatmul.mubr.bf16.gmra.mxu1 %v19154_v8  ;;  %v13223_v1 = vmul.f32 0.6931472, %v13137_v33  ;;  %v13226_v52 = vmul.f32 %v13047_v57, %v4787_v62  ;;  %v13228_v47 = vadd.f32 -4.0, %v1557_v55  ;;  %v4990_v48 = vadd.f32 1.0, %v13216_v16 }
 0x2bf   : > { %v4773_v6 = vsel %vm13203_vm0, %v4770_v11, %v4767_v41  ;;  %v4909_v46 = vadd.f32 1.0, %v13200_v13  ;;  %10169 = vlog2.f32 %v4999_v38  ;;  %v2949_v20 = vsub.f32 0.0, %v2693_v59 }
 0x2c0   : > { %19155 = vst [vmem:[#allocation60_spill] sm:$0xff] %v13228_v47  ;;  %v13234_v26 = vpop.eup %10157  ;;  %v4984_v33 = vmul.f32 -0.5, %v13119_v43  ;;  %10171 = vlog2.f32 %v4990_v48  ;;  %v2685_v57 = vand.u32 2147483647, %v13211_v24  ;;  %v2926_v62 = vsub.f32 0.0, %v2670_v21 }
 0x2c1   : > { %v1565_v55 = vadd.f32 %v13133_v0, %v11546_v19  ;;  %v3381_v8 = vmul.f32 1.442695, %v2949_v20  ;;  %v2695_v41 = vand.u32 2147483647, %v13220_v29  ;;  %v19156_v38 = vmax.f32 %v12842_v2, 0.0 }
 0x2c2   : > { %v10160_v11 = vpop.eup %10159  ;;  %v2421_v21 = vmax.f32 %v12996_v23, 0.0  ;;  %10173 = vlog2.f32 %v4909_v46  ;;  %v4927_v0 = vadd.f32 1.0, %v13234_v26  ;;  %v4987_v20 = vand.u32 2147483647, %v13119_v43 }
 0x2c3   : > { %v13244_v36 = vadd.f32 %v4773_v6, %v19156_v38  ;;  %v13252_v18 = vpop.eup %10161  ;;  %v4201_v2 = vmul.f32 -0.5, %v19148_v3  ;;  %v4985_v6 = vadd.f32 1.0, %v4984_v33  ;;  %v2941_v45 = vsub.f32 0.0, %v2685_v57  ;;  %v9806_v33 = vld [vmem:[#allocation8 + $0x320] ss:$8 sps:$4 sm:$0xff]  }
 0x2c4   : > { %v5008_v38 = vadd.f32 1.0, %v13252_v18  ;;  %v2951_v7 = vsub.f32 0.0, %v2695_v41  ;;  %v13258_v30 = vmul.f32 1.442695, %v2926_v62  ;;  %v13261_v48 = vadd.f32 -4.0, %v1565_v55 }
 0x2c5   : > { %10175 = vpow2.f32 %v3381_v8  ;;  %v13263_v23 = vpop.eup %10163  ;;  %v4983_v46 = vmul.f32 0.6931472, %v10160_v11  ;;  %v5002_v59 = vmul.f32 -0.5, %v13183_v27  ;;  %v4993_v51 = vmul.f32 -0.5, %v13216_v16  ;;  %v9808_v55 = vld [vmem:[#allocation8 + $0x324] ss:$8 sps:$4 sm:$0xff]  }
 0x2c6   : > { %19157 = vst [vmem:[#allocation44_spill] sm:$0xff] %v13263_v23  ;;  %10177 = vlog2.f32 %v5008_v38  ;;  %v13268_v12 = vmul.f32 -0.5, %v13200_v13  ;;  %vm13270_vm2 = vcmp.lt.f32.partialorder %v4987_v20, 0.0004427343  ;;  %v4202_v62 = vadd.f32 1.0, %v4201_v2  ;;  %v1379_v38 = vpop.f32.mrf.mxu0  ;;  %v19161_v20 = vld [vmem:[#allocation66_spill] sm:$0xff]  ;;  %8366 = vmatprep.subr.bf16.mxu1 %v9808_v55 }
 0x2c7   : > { %10179 = vlog2.f32 %v4927_v0  ;;  %v13274_v8 = vpop.eup %10165  ;;  %v4986_v41 = vmul.f32 %v13119_v43, %v4985_v6  ;;  %v3365_v11 = vmul.f32 1.442695, %v2941_v45  ;;  %v3385_v60 = vmul.f32 1.442695, %v2951_v7  ;;  %8367 = vmatpush1.bf16.msra.mxu1 %v9806_v33 }
 0x2c8   : > { %19160 = vst [vmem:[#allocation35_spill] sm:$0xff] %v13274_v8  ;;  %v4204_v9 = vand.u32 2147483647, %v19148_v3  ;;  %v2422_v28 = vmax.f32 %v13088_v42, 0.0  ;;  %v4996_v39 = vand.u32 2147483647, %v13216_v16  ;;  %v4203_v42 = vmul.f32 %v19148_v3, %v4202_v62 }
 0x2c9   : > { %v2687_v0 = vand.u32 2147483647, %v13261_v48  ;;  %v4216_v23 = vadd.f32 1.0, %v19161_v20  ;;  %v4989_v8 = vsel %vm13270_vm2, %v4986_v41, %v4983_v46  ;;  %v5003_v43 = vadd.f32 1.0, %v5002_v59  ;;  %v19164_v62 = vld [vmem:[#allocation50_spill] sm:$0xff] }
 0x2ca   : > { %v10168_v2 = vpop.eup %10167  ;;  %v5005_v45 = vand.u32 2147483647, %v13183_v27  ;;  %v4994_v7 = vadd.f32 1.0, %v4993_v51  ;;  %v1380_v61 = vadd.f32 %v1379_v38, %v11550_v58  ;;  %v5011_v50 = vmul.f32 -0.5, %v13252_v18 }
 0x2cb   : > { %v4200_v6 = vmul.f32 0.6931472, %v10168_v2  ;;  %10181 = vlog2.f32 %v4216_v23  ;;  %vm4205_vm3 = vcmp.lt.f32.partialorder %v4204_v9, 0.0004427343  ;;  %v1573_v55 = vadd.f32 %v1572_v17, %v11553_v22 }
 0x2cc   : > { %v10170_v54 = vpop.eup %10169  ;;  %10183 = vpow2.f32 %v3385_v60  ;;  %vm13289_vm4 = vcmp.lt.f32.partialorder %v4996_v39, 0.0004427343  ;;  %v2943_v51 = vsub.f32 0.0, %v2687_v0  ;;  %v13293_v33 = vadd.f32 -4.0, %v1380_v61 }
 0x2cd   : > { %v10172_v57 = vpop.eup %10171  ;;  %v4206_v46 = vsel %vm4205_vm3, %v4203_v42, %v4200_v6  ;;  %v4995_v23 = vmul.f32 %v13216_v16, %v4994_v7  ;;  %v19165_v41 = vmax.f32 %v19164_v62, 0.0  ;;  %v13298_v2 = vadd.f32 -4.0, %v1573_v55  ;;  %v19167_v16 = vld [vmem:[#allocation47_spill] sm:$0xff] }
 0x2ce   : > { %v4992_v3 = vmul.f32 0.6931472, %v10172_v57  ;;  %v13300_v9 = vadd.f32 %v4989_v8, %v2421_v21  ;;  %v5001_v17 = vmul.f32 0.6931472, %v10170_v54  ;;  %v5014_v39 = vand.u32 2147483647, %v13252_v18 }
 0x2cf   : > { %v5918_v38 = vadd.f32 %v4206_v46, %v19165_v41  ;;  %v2694_v60 = vand.u32 2147483647, %v13293_v33  ;;  %v13304_v0 = vpop.eup %10173  ;;  %v5012_v6 = vadd.f32 1.0, %v5011_v50  ;;  %v4219_v21 = vmul.f32 -0.5, %v19161_v20 }
 0x2d0   : > { %19166 = vst [vmem:[#allocation40_spill] sm:$0xff] %v13300_v9  ;;  %v4998_v61 = vsel %vm13289_vm4, %v4995_v23, %v4992_v3  ;;  %v2696_v8 = vand.u32 2147483647, %v13298_v2  ;;  %v5004_v46 = vmul.f32 %v13183_v27, %v5003_v43  ;;  %vm13317_vm5 = vcmp.lt.f32.partialorder %v5005_v45, 0.0004427343  ;;  %v13323_v3 = vpop.f32.mrf.mxu1  ;;  %v19171_v43 = vld [vmem:[#allocation46_spill] sm:$0xff] }
 0x2d1   : > { %v6134_v7 = vpack.c.bf16 %v5918_v38, %v19167_v16  ;;  %v9489_v42 = vpack.c.bf16 %v5918_v38, %v12472_v40  ;;  %v13310_v55 = vadd.f32 %v4998_v61, %v2422_v28  ;;  %v2950_v54 = vsub.f32 0.0, %v2694_v60  ;;  %v1381_v28 = vpop.f32.mrf.mxu0 }
 0x2d2   : > { %v13314_v57 = vpop.eup %10175  ;;  %v2424_v50 = vmax.f32 %v13102_v63, 0.0  ;;  %v3369_v59 = vmul.f32 1.442695, %v2943_v51  ;;  %10185 = vpow2.f32 %v3365_v11  ;;  %v2952_v27 = vsub.f32 0.0, %v2696_v8  ;;  %v9809_v8 = vld [vmem:[#allocation8 + $0x210] ss:$8 sps:$4 sm:$0xff]  }
 0x2d3   : > { %19168 = vst [vmem:[#allocation45_spill] sm:$0xff] %v13310_v55  ;;  %6905 = vst [vmem:[%s11758_s29 + $0x120] sm:$0xff] %v9489_v42  ;;  %7849 = vmatprep.mubr.bf16.mxu0 %v6134_v7  ;;  %v10178_v23 = vpop.eup %10177  ;;  %v9533_v41 = vpack.c.bf16 %v13310_v55, %v13300_v9  ;;  %v3383_v38 = vmul.f32 1.442695, %v2950_v54  ;;  %v19172_v45 = vpack.c.bf16 %v12472_v40, %v19171_v43  ;;  %vm13333_vm6 = vcmp.lt.f32.partialorder %v5014_v39, 0.0004427343 }
 0x2d4   : > { %v10180_v60 = vpop.eup %10179  ;;  %v5007_v63 = vsel %vm13317_vm5, %v5004_v46, %v5001_v17  ;;  %v5010_v51 = vmul.f32 0.6931472, %v10178_v23  ;;  %v5013_v61 = vmul.f32 %v13252_v18, %v5012_v6  ;;  %v4220_v7 = vadd.f32 1.0, %v4219_v21  ;;  %v13351_v6 = vpop.f32.mrf.mxu0  ;;  %v9811_v46 = vld [vmem:[#allocation8 + $0x214] ss:$8 sps:$4 sm:$0xff]  }
 0x2d5   : > { %7850 = vmatmul.mubr.bf16.gmra.mxu0 %v19172_v45  ;;  %6949 = vst [vmem:[%s11758_s29 + $0x280] sm:$0xff] %v9533_v41  ;;  %v4222_v11 = vand.u32 2147483647, %v19161_v20  ;;  %10187 = vpow2.f32 %v3383_v38  ;;  %v3387_v42 = vmul.f32 1.442695, %v2952_v27  ;;  %v19175_v40 = vmax.f32 %v12859_v44, 0.0  ;;  %v13353_v21 = vpop.f32.mrf.mxu1  ;;  %8175 = vmatprep.subr.bf16.mxu0 %v9811_v46 }
 0x2d6   : > { %v19176_v17 = vsel %vm13207_vm1, %v13226_v52, %v13223_v1  ;;  %v5016_v18 = vsel %vm13333_vm6, %v5013_v61, %v5010_v51  ;;  %10189 = vpow2.f32 %v3369_v59  ;;  %v5125_v39 = vadd.f32 1.0, %v13314_v57  ;;  %8176 = vmatpush1.bf16.msra.mxu0 %v9809_v8  ;;  %v1387_v16 = vpop.f32.mrf.mxu0 }
 0x2d7   : > { %v13346_v54 = vadd.f32 %v19176_v17, %v19175_v40  ;;  %v19178_v44 = vand.u32 2147483647, %v13228_v47  ;;  %v19179_v62 = vmax.f32 %v13039_v10, 0.0  ;;  %v13361_v52 = vadd.f32 %v5016_v18, %v2424_v50  ;;  %v19189_v18 = vld [vmem:[#allocation48_spill] sm:$0xff] }
 0x2d8   : > { %10191 = vpow2.f32 %v3387_v42  ;;  %v10182_v23 = vpop.eup %10181  ;;  %v4915_v41 = vand.u32 2147483647, %v13200_v13  ;;  %v4913_v10 = vadd.f32 1.0, %v13268_v12  ;;  %v4930_v61 = vmul.f32 -0.5, %v13234_v26  ;;  %v1580_v42 = vpop.f32.mrf.mxu1 }
 0x2d9   : > { %19177 = vst [vmem:[#allocation34_spill] sm:$0xff] %v13346_v54  ;;  %v2928_v4 = vsub.f32 0.0, %v19178_v44  ;;  %v13359_v1 = vadd.f32 %v5007_v63, %v19179_v62  ;;  %19181 = vst [vmem:[#allocation41_spill] sm:$0xff] %v13361_v52  ;;  %v13368_v43 = vpop.eup %10183  ;;  %v4218_v45 = vmul.f32 0.6931472, %v10182_v23  ;;  %v4221_v63 = vmul.f32 %v19161_v20, %v4220_v7  ;;  %v19184_v7 = vld [vmem:[#allocation51_spill] sm:$0xff] }
 0x2da   : > { %10193 = vlog2.f32 %v5125_v39  ;;  %vm4223_vm7 = vcmp.lt.f32.partialorder %v4222_v11, 0.0004427343  ;;  %v4911_v40 = vmul.f32 0.6931472, %v13304_v0  ;;  %vm13380_vm8 = vcmp.lt.f32.partialorder %v4915_v41, 0.0004427343 }
 0x2db   : > { %19180 = vst [vmem:[#allocation38_spill] sm:$0xff] %v13359_v1  ;;  %v9534_v50 = vpack.c.bf16 %v13361_v52, %v13359_v1  ;;  %10195 = vpow2.f32 %v13258_v30  ;;  %v3339_v12 = vmul.f32 1.442695, %v2928_v4  ;;  %v4224_v17 = vsel %vm4223_vm7, %v4221_v63, %v4218_v45  ;;  %v19186_v23 = vld [vmem:[#allocation49_spill] sm:$0xff] }
 0x2dc   : > { %v5143_v20 = vadd.f32 1.0, %v13368_v43  ;;  %v19185_v8 = vmax.f32 %v19184_v7, 0.0  ;;  %v1382_v11 = vadd.f32 %v1381_v28, %v11544_v35  ;;  %v4914_v39 = vmul.f32 %v13200_v13, %v4913_v10 }
 0x2dd   : > { %6950 = vst [vmem:[%s11758_s29 + $0x288] sm:$0xff] %v9534_v50  ;;  %v4933_v0 = vand.u32 2147483647, %v13234_v26  ;;  %v1388_v30 = vadd.f32 %v1387_v16, %v11544_v35  ;;  %v1581_v44 = vadd.f32 %v1580_v42, %v11546_v19  ;;  %v4931_v4 = vadd.f32 1.0, %v4930_v61  ;;  %v19187_v50 = vld [vmem:[#allocation71_spill] sm:$0xff]  ;;  %v19188_v42 = vld [vmem:[#allocation21_spill] sm:$0xff] }
 0x2de   : > { %v5920_v46 = vadd.f32 %v4224_v17, %v19185_v8  ;;  %v1374_v62 = vadd.f32 %v13146_v53, %v11550_v58  ;;  %v4917_v28 = vsel %vm13380_vm8, %v4914_v39, %v4911_v40  ;;  %v13398_v63 = vmul.f32 0.6931472, %v10180_v60 }
 0x2df   : > { %v1575_v13 = vadd.f32 %v13323_v3, %v11546_v19  ;;  %v13402_v10 = vadd.f32 -4.0, %v1388_v30  ;;  %v13404_v16 = vpop.eup %10185  ;;  %v1567_v61 = vadd.f32 %v13165_v14, %v11553_v22  ;;  %10197 = vlog2.f32 %v5143_v20 }
 0x2e0   : > { %v6136_v41 = vpack.c.bf16 %v5920_v46, %v19186_v23  ;;  %v9490_v45 = vpack.c.bf16 %v5920_v46, %v19187_v50  ;;  %v13409_v53 = vadd.f32 -4.0, %v1382_v11  ;;  %v4342_v17 = vadd.f32 1.0, %v19188_v42 }
 0x2e1   : > { %10199 = vpow2.f32 %v3339_v12  ;;  %v2709_v40 = vand.u32 2147483647, %v13402_v10  ;;  %v13414_v3 = vadd.f32 -4.0, %v1581_v44  ;;  %v19190_v7 = vpack.c.bf16 %v19187_v50, %v19189_v18 }
 0x2e2   : > { %6906 = vst [vmem:[%s11758_s29 + $0x128] sm:$0xff] %v9490_v45  ;;  %8042 = vmatprep.mubr.bf16.mxu1 %v6136_v41  ;;  %v13419_v8 = vpop.eup %10187  ;;  %v13422_v14 = vmul.f32 %v13234_v26, %v4931_v4  ;;  %vm13424_vm9 = vcmp.lt.f32.partialorder %v4933_v0, 0.0004427343  ;;  %v13428_v46 = vadd.f32 -4.0, %v1374_v62  ;;  %10201 = vlog2.f32 %v4342_v17 }
 0x2e3   : > { %8043 = vmatmul.mubr.bf16.gmra.mxu1 %v19190_v7  ;;  %v13430_v12 = vpop.eup %10189  ;;  %v19194_v11 = vmax.f32 %v12994_v5, 0.0  ;;  %v5128_v30 = vmul.f32 -0.5, %v13314_v57  ;;  %v5134_v44 = vadd.f32 1.0, %v13419_v8  ;;  %v13438_v23 = vadd.f32 -4.0, %v1575_v13  ;;  %v9812_v13 = vld [vmem:[#allocation8 + $0x310] ss:$8 sps:$4 sm:$0xff]  }
 0x2e4   : > { %19193 = vst [vmem:[#allocation65_spill] sm:$0xff] %v13428_v46  ;;  %v5053_v4 = vadd.f32 1.0, %v13404_v16  ;;  %v13447_v62 = vadd.f32 -4.0, %v1567_v61  ;;  %v2701_v5 = vand.u32 2147483647, %v13409_v53  ;;  %v5146_v41 = vmul.f32 -0.5, %v13368_v43 }
 0x2e5   : > { %v13434_v39 = vadd.f32 %v4917_v28, %v19194_v11  ;;  %v13440_v26 = vpop.eup %10191  ;;  %10203 = vlog2.f32 %v5134_v44  ;;  %v2965_v50 = vsub.f32 0.0, %v2709_v40  ;;  %v2711_v45 = vand.u32 2147483647, %v13414_v3 }
 0x2e6   : > { %19196 = vst [vmem:[#allocation66_spill] sm:$0xff] %v13447_v62  ;;  %v5071_v28 = vadd.f32 1.0, %v13430_v12  ;;  %v2437_v17 = vmax.f32 %v13194_v32, 0.0  ;;  %v5152_v18 = vadd.f32 1.0, %v13440_v26  ;;  %v5129_v11 = vadd.f32 1.0, %v5128_v30 }
 0x2e7   : > { %19195 = vst [vmem:[#allocation37_spill] sm:$0xff] %v13434_v39  ;;  %v10194_v7 = vpop.eup %10193  ;;  %v5131_v61 = vand.u32 2147483647, %v13314_v57  ;;  %v2703_v27 = vand.u32 2147483647, %v13438_v23  ;;  %v2957_v51 = vsub.f32 0.0, %v2701_v5 }
 0x2e8   : > { %v13459_v44 = vpop.eup %10195  ;;  %v5149_v40 = vand.u32 2147483647, %v13368_v43  ;;  %10205 = vlog2.f32 %v5152_v18  ;;  %v4345_v59 = vmul.f32 -0.5, %v19188_v42  ;;  %v5147_v32 = vadd.f32 1.0, %v5146_v41  ;;  %v9814_v30 = vld [vmem:[#allocation8 + $0x314] ss:$8 sps:$4 sm:$0xff]   ;;  %v1389_v41 = vpop.f32.mrf.mxu0 }
 0x2e9   : > { %19197 = vst [vmem:[#allocation50_spill] sm:$0xff] %v13459_v44  ;;  %10207 = vlog2.f32 %v5053_v4  ;;  %v3413_v0 = vmul.f32 1.442695, %v2965_v50  ;;  %v2967_v38 = vsub.f32 0.0, %v2711_v45  ;;  %v13464_v52 = vmul.f32 -0.5, %v13404_v16  ;;  %8368 = vmatprep.subr.bf16.mxu1 %v9814_v30 }
 0x2ea   : > { %10209 = vlog2.f32 %v5071_v28  ;;  %v5127_v60 = vmul.f32 0.6931472, %v10194_v7  ;;  %v2438_v55 = vmax.f32 %v13293_v33, 0.0  ;;  %v5130_v47 = vmul.f32 %v13314_v57, %v5129_v11  ;;  %v19202_v7 = vld [vmem:[#allocation53_spill] sm:$0xff]  ;;  %v1582_v33 = vpop.f32.mrf.mxu1  ;;  %8369 = vmatpush1.bf16.msra.mxu1 %v9812_v13 }
 0x2eb   : > { %vm13468_vm10 = vcmp.lt.f32.partialorder %v5131_v61, 0.0004427343  ;;  %v5137_v5 = vmul.f32 -0.5, %v13419_v8  ;;  %v2959_v4 = vsub.f32 0.0, %v2703_v27  ;;  %vm13473_vm11 = vcmp.lt.f32.partialorder %v5149_v40, 0.0004427343 }
 0x2ec   : > { %v3397_v45 = vmul.f32 1.442695, %v2957_v51  ;;  %v4346_v28 = vadd.f32 1.0, %v4345_v59  ;;  %v4360_v25 = vadd.f32 1.0, %v19202_v7  ;;  %v10198_v57 = vpop.eup %10197  ;;  %v5148_v11 = vmul.f32 %v13368_v43, %v5147_v32 }
 0x2ed   : > { %10211 = vpow2.f32 %v3413_v0  ;;  %v3417_v61 = vmul.f32 1.442695, %v2967_v38  ;;  %v4348_v44 = vand.u32 2147483647, %v19188_v42  ;;  %v5133_v40 = vsel %vm13468_vm10, %v5130_v47, %v5127_v60 }
 0x2ee   : > { %v13480_v27 = vpop.eup %10199  ;;  %v5155_v30 = vmul.f32 -0.5, %v13440_v26  ;;  %10213 = vlog2.f32 %v4360_v25  ;;  %v1390_v59 = vadd.f32 %v1389_v41, %v11550_v58  ;;  %v5138_v49 = vadd.f32 1.0, %v5137_v5 }
 0x2ef   : > { %19203 = vst [vmem:[#allocation47_spill] sm:$0xff] %v13480_v27  ;;  %v10202_v51 = vpop.eup %10201  ;;  %v5140_v13 = vand.u32 2147483647, %v13419_v8  ;;  %v3401_v54 = vmul.f32 1.442695, %v2959_v4  ;;  %v1583_v43 = vadd.f32 %v1582_v33, %v11553_v22  ;;  %v4347_v32 = vmul.f32 %v19188_v42, %v4346_v28 }
 0x2f0   : > { %v5145_v38 = vmul.f32 0.6931472, %v10198_v57  ;;  %v4344_v0 = vmul.f32 0.6931472, %v10202_v51  ;;  %v13489_v27 = vadd.f32 -4.0, %v1390_v59  ;;  %v13491_v18 = vadd.f32 %v5133_v40, %v2437_v17  ;;  %v19205_v51 = vld [vmem:[#allocation63_spill] sm:$0xff] }
 0x2f1   : > { %10215 = vpow2.f32 %v3417_v61  ;;  %vm4349_vm12 = vcmp.lt.f32.partialorder %v4348_v44, 0.0004427343  ;;  %v13493_v25 = vadd.f32 -4.0, %v1583_v43  ;;  %v5156_v60 = vadd.f32 1.0, %v5155_v30  ;;  %v19207_v43 = vld [vmem:[#allocation59_spill] sm:$0xff] }
 0x2f2   : > { %19204 = vst [vmem:[#allocation46_spill] sm:$0xff] %v13491_v18  ;;  %v10204_v47 = vpop.eup %10203  ;;  %v5158_v5 = vand.u32 2147483647, %v13440_v26  ;;  %v4350_v41 = vsel %vm4349_vm12, %v4347_v32, %v4344_v0  ;;  %v2710_v4 = vand.u32 2147483647, %v13489_v27  ;;  %v5139_v57 = vmul.f32 %v13419_v8, %v5138_v49  ;;  %v19208_v32 = vld [vmem:[#allocation74_spill] sm:$0xff] }
 0x2f3   : > { %v5136_v33 = vmul.f32 0.6931472, %v10204_v47  ;;  %v19206_v42 = vmax.f32 %v19205_v51, 0.0  ;;  %v2712_v17 = vand.u32 2147483647, %v13493_v25  ;;  %v5151_v44 = vsel %vm13473_vm11, %v5148_v11, %v5145_v38  ;;  %v13509_v11 = vpop.f32.mrf.mxu0 }
 0x2f4   : > { %vm5141_vm13 = vcmp.lt.f32.partialorder %v5140_v13, 0.0004427343  ;;  %v4363_v61 = vmul.f32 -0.5, %v19202_v7  ;;  %v2966_v40 = vsub.f32 0.0, %v2710_v4  ;;  %v13511_v13 = vpop.f32.mrf.mxu1  ;;  %v2688_v4 = vand.u32 2147483647, %v13447_v62 }
 0x2f5   : > { %v5934_v28 = vadd.f32 %v4350_v41, %v19206_v42  ;;  %v10206_v30 = vpop.eup %10205  ;;  %v5142_v59 = vsel %vm5141_vm13, %v5139_v57, %v5136_v33  ;;  %v2968_v49 = vsub.f32 0.0, %v2712_v17  ;;  %v5157_v42 = vmul.f32 %v13440_v26, %v5156_v60 }
 0x2f6   : > { %v10208_v8 = vpop.eup %10207  ;;  %v13506_v51 = vadd.f32 %v5142_v59, %v2438_v55  ;;  %v5154_v41 = vmul.f32 0.6931472, %v10206_v30  ;;  %v3415_v50 = vmul.f32 1.442695, %v2966_v40  ;;  %v2440_v33 = vmax.f32 %v13298_v2, 0.0 }
 0x2f7   : > { %v6142_v0 = vpack.c.bf16 %v5934_v28, %v19207_v43  ;;  %v9497_v47 = vpack.c.bf16 %v5934_v28, %v19208_v32  ;;  %v13513_v38 = vpop.eup %10209  ;;  %vm5159_vm14 = vcmp.lt.f32.partialorder %v5158_v5, 0.0004427343  ;;  %10217 = vpow2.f32 %v3397_v45  ;;  %v19212_v28 = vld [vmem:[#allocation58_spill] sm:$0xff] }
 0x2f8   : > { %19209 = vst [vmem:[#allocation51_spill] sm:$0xff] %v13506_v51  ;;  %v19210_v55 = vmax.f32 %v13220_v29, 0.0  ;;  %v9541_v26 = vpack.c.bf16 %v13506_v51, %v13491_v18  ;;  %v5160_v60 = vsel %vm5159_vm14, %v5157_v42, %v5154_v41  ;;  %10219 = vpow2.f32 %v3401_v54  ;;  %v9817_v5 = vld [vmem:[#allocation8 + $0x204] ss:$8 sps:$4 sm:$0xff]  }
 0x2f9   : > { %6913 = vst [vmem:[%s11758_s29 + $0x160] sm:$0xff] %v9497_v47  ;;  %7859 = vmatprep.mubr.bf16.mxu0 %v6142_v0  ;;  %v19213_v17 = vpack.c.bf16 %v19208_v32, %v19212_v28  ;;  %v13527_v40 = vadd.f32 %v5160_v60, %v2440_v33  ;;  %v4364_v2 = vadd.f32 1.0, %v4363_v61  ;;  %10221 = vpow2.f32 %v3415_v50  ;;  %v13544_v0 = vpop.f32.mrf.mxu0  ;;  %v13546_v32 = vpop.f32.mrf.mxu1  ;;  %8177 = vmatprep.subr.bf16.mxu0 %v9817_v5 }
 0x2fa   : > { %v13520_v57 = vadd.f32 %v5151_v44, %v19210_v55  ;;  %v3419_v45 = vmul.f32 1.442695, %v2968_v49  ;;  %v13529_v30 = vpop.eup %10211  ;;  %v19215_v29 = vmax.f32 %v13053_v34, 0.0  ;;  %v19216_v44 = vsel %vm13424_vm9, %v13422_v14, %v13398_v63  ;;  %6957 = vst [vmem:[%s11758_s29 + $0x2c0] sm:$0xff] %v9541_v26  ;;  %v9815_v34 = vld [vmem:[#allocation8 + $0x200] ss:$8 sps:$4 sm:$0xff]  }
 0x2fb   : > { %7860 = vmatmul.mubr.bf16.gmra.mxu0 %v19213_v17  ;;  %19214 = vst [vmem:[#allocation71_spill] sm:$0xff] %v13527_v40  ;;  %v2429_v59 = vmax.f32 %v13211_v24, 0.0  ;;  %v5057_v43 = vadd.f32 1.0, %v13464_v52  ;;  %v4366_v61 = vand.u32 2147483647, %v19202_v7  ;;  %v10214_v47 = vpop.eup %10213  ;;  %v2944_v49 = vsub.f32 0.0, %v2688_v4  ;;  %v1397_v17 = vpop.f32.mrf.mxu0 }
 0x2fc   : > { %19211 = vst [vmem:[#allocation49_spill] sm:$0xff] %v13520_v57  ;;  %v13538_v54 = vadd.f32 %v19216_v44, %v19215_v29  ;;  %v5059_v20 = vand.u32 2147483647, %v13404_v16  ;;  %v19218_v63 = vand.u32 2147483647, %v13428_v46  ;;  %v9542_v24 = vpack.c.bf16 %v13527_v40, %v13520_v57  ;;  %8178 = vmatpush1.bf16.msra.mxu0 %v9815_v34  ;;  %v1590_v5 = vpop.f32.mrf.mxu1 }
 0x2fd   : > { %v5055_v41 = vmul.f32 0.6931472, %v10208_v8  ;;  %v2431_v42 = vmax.f32 %v13261_v48, 0.0  ;;  %v5074_v50 = vmul.f32 -0.5, %v13430_v12  ;;  %v5269_v33 = vadd.f32 1.0, %v13529_v30 }
 0x2fe   : > { %19217 = vst [vmem:[#allocation21_spill] sm:$0xff] %v13538_v54  ;;  %v2942_v14 = vsub.f32 0.0, %v19218_v63  ;;  %6958 = vst [vmem:[%s11758_s29 + $0x2c8] sm:$0xff] %v9542_v24  ;;  %v4362_v55 = vmul.f32 0.6931472, %v10214_v47  ;;  %v4365_v26 = vmul.f32 %v19202_v7, %v4364_v2  ;;  %10223 = vpow2.f32 %v3419_v45  ;;  %v13560_v4 = vpop.eup %10215 }
 0x2ff   : > { %v5058_v28 = vmul.f32 %v13404_v16, %v5057_v43  ;;  %vm4367_vm15 = vcmp.lt.f32.partialorder %v4366_v61, 0.0004427343  ;;  %vm13566_vm0 = vcmp.lt.f32.partialorder %v5059_v20, 0.0004427343  ;;  %v3371_v34 = vmul.f32 1.442695, %v2944_v49 }
 0x300   : > { %v3367_v44 = vmul.f32 1.442695, %v2942_v14  ;;  %v4368_v7 = vsel %vm4367_vm15, %v4365_v26, %v4362_v55  ;;  %v5075_v45 = vadd.f32 1.0, %v5074_v50  ;;  %v1384_v47 = vadd.f32 %v13351_v6, %v11550_v58  ;;  %v19221_v16 = vld [vmem:[#allocation64_spill] sm:$0xff] }
 0x301   : > { %v5061_v2 = vsel %vm13566_vm0, %v5058_v28, %v5055_v41  ;;  %v19222_v43 = vmax.f32 %v19221_v16, 0.0  ;;  %10225 = vlog2.f32 %v5269_v33  ;;  %v5287_v20 = vadd.f32 1.0, %v13560_v4  ;;  %v19223_v41 = vld [vmem:[#allocation62_spill] sm:$0xff]  ;;  %v19224_v55 = vld [vmem:[#allocation52_spill] sm:$0xff] }
 0x302   : > { %v1398_v63 = vadd.f32 %v1397_v17, %v11544_v35  ;;  %v1591_v14 = vadd.f32 %v1590_v5, %v11546_v19  ;;  %v5077_v49 = vand.u32 2147483647, %v13430_v12  ;;  %v13583_v6 = vadd.f32 %v5061_v2, %v2429_v59  ;;  %v9821_v54 = vld [vmem:[#allocation8 + $0x2f0] ss:$8 sps:$4 sm:$0xff]  }
 0x303   : > { %v5936_v61 = vadd.f32 %v4368_v7, %v19222_v43  ;;  %v5073_v28 = vmul.f32 0.6931472, %v13513_v38  ;;  %10227 = vpow2.f32 %v3367_v44  ;;  %v1392_v17 = vadd.f32 %v13509_v11, %v11544_v35  ;;  %v19226_v7 = vld [vmem:[#allocation39_spill] sm:$0xff] }
 0x304   : > { %19225 = vst [vmem:[#allocation48_spill] sm:$0xff] %v13583_v6  ;;  %v13586_v33 = vadd.f32 -4.0, %v1398_v63  ;;  %v13588_v29 = vpop.eup %10217  ;;  %10229 = vpow2.f32 %v3371_v34  ;;  %v13593_v5 = vadd.f32 -4.0, %v1591_v14  ;;  %v4486_v16 = vadd.f32 1.0, %v19226_v7  ;;  %v19228_v34 = vld [vmem:[#allocation61_spill] sm:$0xff]  ;;  %v19234_v63 = vld [vmem:[#allocation22_spill] sm:$0xff] }
 0x305   : > { %v6144_v50 = vpack.c.bf16 %v5936_v61, %v19223_v41  ;;  %v9498_v26 = vpack.c.bf16 %v5936_v61, %v19224_v55  ;;  %v13596_v43 = vpop.eup %10219  ;;  %v5076_v59 = vmul.f32 %v13430_v12, %v5075_v45  ;;  %v13599_v38 = vadd.f32 -4.0, %v1384_v47 }
 0x306   : > { %v1577_v44 = vadd.f32 %v13353_v21, %v11553_v22  ;;  %10231 = vlog2.f32 %v5287_v20  ;;  %v19229_v2 = vpack.c.bf16 %v19224_v55, %v19228_v34  ;;  %v13606_v61 = vpop.eup %10221  ;;  %vm13608_vm1 = vcmp.lt.f32.partialorder %v5077_v49, 0.0004427343  ;;  %v9818_v21 = vld [vmem:[#allocation8 + $0x300] ss:$8 sps:$4 sm:$0xff]   ;;  %v1399_v55 = vpop.f32.mrf.mxu0 }
 0x307   : > { %6914 = vst [vmem:[%s11758_s29 + $0x168] sm:$0xff] %v9498_v26  ;;  %8052 = vmatprep.mubr.bf16.mxu1 %v6144_v50  ;;  %19227 = vst [vmem:[#allocation53_spill] sm:$0xff] %v13599_v38  ;;  %v2725_v45 = vand.u32 2147483647, %v13586_v33  ;;  %v5079_v47 = vsel %vm13608_vm1, %v5076_v59, %v5073_v28  ;;  %v5197_v20 = vadd.f32 1.0, %v13588_v29  ;;  %v5278_v14 = vadd.f32 1.0, %v13606_v61 }
 0x308   : > { %8053 = vmatmul.mubr.bf16.gmra.mxu1 %v19229_v2  ;;  %v5215_v49 = vadd.f32 1.0, %v13596_v43  ;;  %v13622_v41 = vadd.f32 -4.0, %v1392_v17  ;;  %v2727_v50 = vand.u32 2147483647, %v13593_v5  ;;  %10233 = vlog2.f32 %v4486_v16 }
 0x309   : > { %v13626_v26 = vadd.f32 -4.0, %v1577_v44  ;;  %10235 = vlog2.f32 %v5278_v14  ;;  %v1585_v34 = vadd.f32 %v13511_v13, %v11546_v19  ;;  %v5272_v2 = vmul.f32 -0.5, %v13529_v30  ;;  %v9820_v13 = vld [vmem:[#allocation8 + $0x304] ss:$8 sps:$4 sm:$0xff]  }
 0x30a   : > { %v5275_v17 = vand.u32 2147483647, %v13529_v30  ;;  %v2981_v11 = vsub.f32 0.0, %v2725_v45  ;;  %v13637_v16 = vadd.f32 %v5079_v47, %v2431_v42  ;;  %10237 = vlog2.f32 %v5197_v20  ;;  %8370 = vmatprep.subr.bf16.mxu1 %v9820_v13 }
 0x30b   : > { %19232 = vst [vmem:[#allocation63_spill] sm:$0xff] %v13626_v26  ;;  %v13630_v28 = vpop.eup %10223  ;;  %v13642_v24 = vmul.f32 -0.5, %v13588_v29  ;;  %10239 = vlog2.f32 %v5215_v49  ;;  %v2717_v8 = vand.u32 2147483647, %v13622_v41  ;;  %v2983_v60 = vsub.f32 0.0, %v2727_v50  ;;  %v1592_v49 = vpop.f32.mrf.mxu1  ;;  %8371 = vmatpush1.bf16.msra.mxu1 %v9818_v21 }
 0x30c   : > { %19233 = vst [vmem:[#allocation59_spill] sm:$0xff] %v13637_v16  ;;  %v5296_v14 = vadd.f32 1.0, %v13630_v28  ;;  %v13647_v42 = vadd.f32 -4.0, %v1585_v34  ;;  %v5273_v20 = vadd.f32 1.0, %v5272_v2  ;;  %v3445_v52 = vmul.f32 1.442695, %v2981_v11 }
 0x30d   : > { %v4489_v12 = vmul.f32 -0.5, %v19226_v7  ;;  %v4504_v44 = vadd.f32 1.0, %v19234_v63  ;;  %vm13651_vm2 = vcmp.lt.f32.partialorder %v5275_v17, 0.0004427343  ;;  %v5290_v48 = vmul.f32 -0.5, %v13560_v4 }
 0x30e   : > { %10241 = vlog2.f32 %v5296_v14  ;;  %v10226_v47 = vpop.eup %10225  ;;  %v5293_v34 = vand.u32 2147483647, %v13560_v4  ;;  %v5281_v14 = vmul.f32 -0.5, %v13606_v61  ;;  %v5284_v2 = vand.u32 2147483647, %v13606_v61 }
 0x30f   : > { %v2973_v11 = vsub.f32 0.0, %v2717_v8  ;;  %v3449_v45 = vmul.f32 1.442695, %v2983_v60  ;;  %10243 = vlog2.f32 %v4504_v44  ;;  %v5271_v21 = vmul.f32 0.6931472, %v10226_v47 }
 0x310   : > { %v13658_v13 = vpop.eup %10227  ;;  %v5299_v17 = vmul.f32 -0.5, %v13630_v28  ;;  %v1400_v40 = vadd.f32 %v1399_v55, %v11550_v58  ;;  %v1593_v51 = vadd.f32 %v1592_v49, %v11553_v22  ;;  %v5274_v62 = vmul.f32 %v13529_v30, %v5273_v20 }
 0x311   : > { %19237 = vst [vmem:[#allocation74_spill] sm:$0xff] %v13658_v13  ;;  %v13661_v59 = vpop.eup %10229  ;;  %10245 = vpow2.f32 %v3445_v52  ;;  %v4490_v6 = vadd.f32 1.0, %v4489_v12  ;;  %v4492_v46 = vand.u32 2147483647, %v19226_v7  ;;  %v5291_v13 = vadd.f32 1.0, %v5290_v48 }
 0x312   : > { %19238 = vst [vmem:[#allocation58_spill] sm:$0xff] %v13661_v59  ;;  %vm13668_vm3 = vcmp.lt.f32.partialorder %v5293_v34, 0.0004427343  ;;  %v5282_v8 = vadd.f32 1.0, %v5281_v14  ;;  %v2719_v44 = vand.u32 2147483647, %v13647_v42  ;;  %10247 = vpow2.f32 %v3449_v45 }
 0x313   : > { %v10232_v9 = vpop.eup %10231  ;;  %v3429_v47 = vmul.f32 1.442695, %v2973_v11  ;;  %v13673_v55 = vadd.f32 -4.0, %v1400_v40  ;;  %v13675_v49 = vadd.f32 -4.0, %v1593_v51  ;;  %v5277_v30 = vsel %vm13651_vm2, %v5274_v62, %v5271_v21 }
 0x314   : > { %v5289_v52 = vmul.f32 0.6931472, %v10232_v9  ;;  %vm13679_vm4 = vcmp.lt.f32.partialorder %v5284_v2, 0.0004427343  ;;  %v5300_v48 = vadd.f32 1.0, %v5299_v17  ;;  %v4491_v14 = vmul.f32 %v19226_v7, %v4490_v6  ;;  %v19243_v7 = vld [vmem:[#allocation20_spill] sm:$0xff] }
 0x315   : > { %v10234_v59 = vpop.eup %10233  ;;  %vm4493_vm5 = vcmp.lt.f32.partialorder %v4492_v46, 0.0004427343  ;;  %v2726_v40 = vand.u32 2147483647, %v13673_v55  ;;  %v5283_v51 = vmul.f32 %v13606_v61, %v5282_v8  ;;  %v4507_v11 = vmul.f32 -0.5, %v19234_v63 }
 0x316   : > { %v10236_v20 = vpop.eup %10235  ;;  %v4488_v34 = vmul.f32 0.6931472, %v10234_v59  ;;  %v2728_v62 = vand.u32 2147483647, %v13675_v49  ;;  %v5292_v50 = vmul.f32 %v13560_v4, %v5291_v13  ;;  %v5302_v2 = vand.u32 2147483647, %v13630_v28 }
 0x317   : > { %v5280_v45 = vmul.f32 0.6931472, %v10236_v20  ;;  %v10238_v9 = vpop.eup %10237  ;;  %v2982_v17 = vsub.f32 0.0, %v2726_v40  ;;  %v9823_v59 = vld [vmem:[#allocation8 + $0x2f4] ss:$8 sps:$4 sm:$0xff]   ;;  %v2975_v6 = vsub.f32 0.0, %v2719_v44  ;;  %v5301_v12 = vmul.f32 %v13630_v28, %v5300_v48 }
 0x318   : > { %v4494_v21 = vsel %vm4493_vm5, %v4491_v14, %v4488_v34  ;;  %v13690_v15 = vpop.eup %10239  ;;  %v19244_v61 = vmax.f32 %v19243_v7, 0.0  ;;  %v2984_v20 = vsub.f32 0.0, %v2728_v62  ;;  %v19245_v39 = vmax.f32 %v13402_v10, 0.0  ;;  %8179 = vmatprep.subr.bf16.mxu0 %v9823_v59  ;;  %v19249_v40 = vld [vmem:[#allocation68_spill] sm:$0xff]  ;;  %v1401_v10 = vpop.f32.mrf.mxu0 }
 0x319   : > { %v5286_v46 = vsel %vm13679_vm4, %v5283_v51, %v5280_v45  ;;  %v5295_v13 = vsel %vm13668_vm3, %v5292_v50, %v5289_v52  ;;  %v19247_v34 = vmax.f32 %v13489_v27, 0.0  ;;  %v19250_v51 = vld [vmem:[#allocation26_spill] sm:$0xff]  ;;  %8180 = vmatpush2.bf16.msra.mxu0 %v9821_v54  ;;  %vm5303_vm6 = vcmp.lt.f32.partialorder %v5302_v2, 0.0004427343 }
 0x31a   : > { %v5950_v8 = vadd.f32 %v4494_v21, %v19244_v61  ;;  %v13698_v4 = vadd.f32 %v5277_v30, %v19245_v39  ;;  %v4508_v21 = vadd.f32 1.0, %v4507_v11  ;;  %v1594_v39 = vpop.f32.mrf.mxu1  ;;  %v4510_v27 = vand.u32 2147483647, %v19234_v63 }
 0x31b   : > { %v10242_v31 = vpop.eup %10241  ;;  %v13704_v14 = vadd.f32 %v5286_v46, %v19247_v34  ;;  %v3447_v30 = vmul.f32 1.442695, %v2982_v17  ;;  %v5201_v52 = vadd.f32 1.0, %v13642_v24  ;;  %v3451_v11 = vmul.f32 1.442695, %v2984_v20  ;;  %v19256_v24 = vld [vmem:[#allocation67_spill] sm:$0xff]  ;;  %v13733_v34 = vpop.f32.mrf.mxu0 }
 0x31c   : > { %19246 = vst [vmem:[#allocation64_spill] sm:$0xff] %v13698_v4  ;;  %v5298_v44 = vmul.f32 0.6931472, %v10242_v31  ;;  %v6150_v45 = vpack.c.bf16 %v5950_v8, %v19249_v40  ;;  %v9505_v62 = vpack.c.bf16 %v5950_v8, %v19250_v51  ;;  %v10244_v28 = vpop.eup %10243  ;;  %v19251_v31 = vand.u32 2147483647, %v13599_v38 }
 0x31d   : > { %19248 = vst [vmem:[#allocation62_spill] sm:$0xff] %v13704_v14  ;;  %v9549_v60 = vpack.c.bf16 %v13704_v14, %v13698_v4  ;;  %v19252_v59 = vmax.f32 %v13414_v3, 0.0  ;;  %v19254_v2 = vmax.f32 %v13493_v25, 0.0  ;;  %10249 = vpow2.f32 %v3429_v47  ;;  %v13735_v25 = vpop.f32.mrf.mxu1 }
 0x31e   : > { %v2958_v48 = vsub.f32 0.0, %v19251_v31  ;;  %v5304_v50 = vsel %vm5303_vm6, %v5301_v12, %v5298_v44  ;;  %6921 = vst [vmem:[%s11758_s29 + $0x1a0] sm:$0xff] %v9505_v62  ;;  %7869 = vmatprep.mubr.bf16.mxu0 %v6150_v45  ;;  %v3433_v17 = vmul.f32 1.442695, %v2975_v6  ;;  %v19257_v7 = vpack.c.bf16 %v19250_v51, %v19256_v24  ;;  %v13728_v61 = vpop.eup %10245  ;;  %v19258_v51 = vld [vmem:[#allocation72_spill] sm:$0xff] }
 0x31f   : > { %v13718_v54 = vadd.f32 %v5295_v13, %v19252_v59  ;;  %6965 = vst [vmem:[%s11758_s29 + $0x300] sm:$0xff] %v9549_v60  ;;  %v13723_v46 = vadd.f32 %v5304_v50, %v19254_v2  ;;  %v5203_v8 = vand.u32 2147483647, %v13588_v29  ;;  %v2704_v3 = vand.u32 2147483647, %v13626_v26  ;;  %v13739_v12 = vpop.eup %10247  ;;  %v19262_v50 = vld [vmem:[#allocation70_spill] sm:$0xff] }
 0x320   : > { %7870 = vmatmul.mubr.bf16.gmra.mxu0 %v19257_v7  ;;  %v4506_v20 = vmul.f32 0.6931472, %v10244_v28  ;;  %v4509_v13 = vmul.f32 %v19234_v63, %v4508_v21  ;;  %v5199_v47 = vmul.f32 0.6931472, %v10238_v9  ;;  %vm4511_vm7 = vcmp.lt.f32.partialorder %v4510_v27, 0.0004427343  ;;  %v1407_v28 = vpop.f32.mrf.mxu0 }
 0x321   : > { %19253 = vst [vmem:[#allocation52_spill] sm:$0xff] %v13718_v54  ;;  %19255 = vst [vmem:[#allocation39_spill] sm:$0xff] %v13723_v46  ;;  %v9550_v6 = vpack.c.bf16 %v13723_v46, %v13718_v54  ;;  %10251 = vpow2.f32 %v3447_v30  ;;  %v5218_v44 = vmul.f32 -0.5, %v13596_v43  ;;  %v1394_v40 = vadd.f32 %v13544_v0, %v11550_v58  ;;  %v19263_v59 = vld [vmem:[#allocation55_spill] sm:$0xff] }
 0x322   : > { %v4512_v45 = vsel %vm4511_vm7, %v4509_v13, %v4506_v20  ;;  %10253 = vpow2.f32 %v3451_v11  ;;  %v5202_v63 = vmul.f32 %v13588_v29, %v5201_v52  ;;  %v5413_v9 = vadd.f32 1.0, %v13728_v61  ;;  %v1600_v29 = vpop.f32.mrf.mxu1 }
 0x323   : > { %6966 = vst [vmem:[%s11758_s29 + $0x308] sm:$0xff] %v9550_v6  ;;  %10255 = vpow2.f32 %v3433_v17  ;;  %v19259_v62 = vmax.f32 %v19258_v51, 0.0  ;;  %vm13751_vm8 = vcmp.lt.f32.partialorder %v5203_v8, 0.0004427343  ;;  %v2960_v30 = vsub.f32 0.0, %v2704_v3 }
 0x324   : > { %v5205_v52 = vsel %vm13751_vm8, %v5202_v63, %v5199_v47  ;;  %v5431_v31 = vadd.f32 1.0, %v13739_v12  ;;  %v5219_v17 = vadd.f32 1.0, %v5218_v44  ;;  %v3399_v24 = vmul.f32 1.442695, %v2958_v48 }
 0x325   : > { %v5952_v21 = vadd.f32 %v4512_v45, %v19259_v62  ;;  %v13761_v7 = vadd.f32 -4.0, %v1394_v40  ;;  %v1402_v8 = vadd.f32 %v1401_v10, %v11544_v35  ;;  %10257 = vlog2.f32 %v5413_v9  ;;  %v19267_v40 = vld [vmem:[#allocation69_spill] sm:$0xff]  ;;  %v19269_v10 = vld [vmem:[#allocation32_spill] sm:$0xff] }
 0x326   : > { %v1595_v3 = vadd.f32 %v1594_v39, %v11546_v19  ;;  %v1408_v20 = vadd.f32 %v1407_v28, %v11544_v35  ;;  %v1601_v13 = vadd.f32 %v1600_v29, %v11546_v19  ;;  %v19265_v47 = vmax.f32 %v13409_v53, 0.0 }
 0x327   : > { %v6152_v11 = vpack.c.bf16 %v5952_v21, %v19262_v50  ;;  %v9506_v2 = vpack.c.bf16 %v5952_v21, %v19263_v59  ;;  %19264 = vst [vmem:[#allocation61_spill] sm:$0xff] %v13761_v7  ;;  %v5221_v44 = vand.u32 2147483647, %v13596_v43  ;;  %v3403_v48 = vmul.f32 1.442695, %v2960_v30 }
 0x328   : > { %v13770_v6 = vadd.f32 %v5205_v52, %v19265_v47  ;;  %v19268_v45 = vpack.c.bf16 %v19263_v59, %v19267_v40  ;;  %v4630_v63 = vadd.f32 1.0, %v19269_v10  ;;  %v13778_v9 = vmul.f32 0.6931472, %v13690_v15  ;;  %v1602_v40 = vpop.f32.mrf.mxu1 }
 0x329   : > { %6922 = vst [vmem:[%s11758_s29 + $0x1a8] sm:$0xff] %v9506_v2  ;;  %8062 = vmatprep.mubr.bf16.mxu1 %v6152_v11  ;;  %10259 = vlog2.f32 %v5431_v31  ;;  %v13780_v39 = vadd.f32 -4.0, %v1408_v20  ;;  %v13782_v51 = vadd.f32 -4.0, %v1601_v13  ;;  %v2718_v53 = vand.u32 2147483647, %v13761_v7  ;;  %v1409_v31 = vpop.f32.mrf.mxu0 }
 0x32a   : > { %19266 = vst [vmem:[#allocation22_spill] sm:$0xff] %v13770_v6  ;;  %8063 = vmatmul.mubr.bf16.gmra.mxu1 %v19268_v45  ;;  %v1587_v62 = vadd.f32 %v13546_v32, %v11553_v22  ;;  %v13787_v21 = vadd.f32 -4.0, %v1402_v8  ;;  %10261 = vlog2.f32 %v4630_v63  ;;  %v13790_v27 = vmul.f32 %v13596_v43, %v5219_v17  ;;  %v13795_v28 = vpop.eup %10249 }
 0x32b   : > { %10263 = vpow2.f32 %v3399_v24  ;;  %v13792_v30 = vadd.f32 -4.0, %v1595_v3  ;;  %v2741_v15 = vand.u32 2147483647, %v13780_v39  ;;  %vm13797_vm9 = vcmp.lt.f32.partialorder %v5221_v44, 0.0004427343 }
 0x32c   : > { %10265 = vpow2.f32 %v3403_v48  ;;  %v2743_v32 = vand.u32 2147483647, %v13782_v51  ;;  %v13813_v2 = vsub.f32 0.0, %v2718_v53  ;;  %v13815_v17 = vadd.f32 -4.0, %v1587_v62 }
 0x32d   : > { %v2733_v8 = vand.u32 2147483647, %v13787_v21  ;;  %v5341_v20 = vadd.f32 1.0, %v13795_v28  ;;  %v2735_v47 = vand.u32 2147483647, %v13792_v30  ;;  %v2997_v44 = vsub.f32 0.0, %v2741_v15 }
 0x32e   : > { %v13811_v59 = vpop.eup %10251  ;;  %19272 = vst [vmem:[#allocation20_spill] sm:$0xff] %v13815_v17  ;;  %v2999_v63 = vsub.f32 0.0, %v2743_v32  ;;  %v4633_v53 = vmul.f32 -0.5, %v19269_v10  ;;  %v5416_v62 = vmul.f32 -0.5, %v13728_v61  ;;  %v5419_v52 = vand.u32 2147483647, %v13728_v61 }
 0x32f   : > { %v13819_v3 = vpop.eup %10253  ;;  %v5422_v13 = vadd.f32 1.0, %v13811_v59  ;;  %v5434_v43 = vmul.f32 -0.5, %v13739_v12  ;;  %v13833_v0 = vmul.f32 -0.5, %v13795_v28  ;;  %v5437_v15 = vand.u32 2147483647, %v13739_v12 }
 0x330   : > { %v13824_v48 = vpop.eup %10255  ;;  %v5440_v45 = vadd.f32 1.0, %v13819_v3  ;;  %v2989_v60 = vsub.f32 0.0, %v2733_v8  ;;  %v2991_v32 = vsub.f32 0.0, %v2735_v47  ;;  %v3477_v50 = vmul.f32 1.442695, %v2997_v44 }
 0x331   : > { %10267 = vlog2.f32 %v5422_v13  ;;  %v5359_v11 = vadd.f32 1.0, %v13824_v48  ;;  %v3481_v14 = vmul.f32 1.442695, %v2999_v63  ;;  %v4634_v26 = vadd.f32 1.0, %v4633_v53  ;;  %v9826_v47 = vld [vmem:[#allocation8 + $0x3f4] ss:$8 sps:$4 sm:$0xff]  }
 0x332   : > { %10269 = vlog2.f32 %v5440_v45  ;;  %v10258_v24 = vpop.eup %10257  ;;  %v4648_v13 = vadd.f32 1.0, %v13081_v56  ;;  %v5417_v18 = vadd.f32 1.0, %v5416_v62  ;;  %vm13839_vm10 = vcmp.lt.f32.partialorder %v5419_v52, 0.0004427343  ;;  %v9824_v62 = vld [vmem:[#allocation8 + $0x3f0] ss:$8 sps:$4 sm:$0xff]   ;;  %8372 = vmatprep.subr.bf16.mxu1 %v9826_v47 }
 0x333   : > { %10271 = vlog2.f32 %v5341_v20  ;;  %v5435_v8 = vadd.f32 1.0, %v5434_v43  ;;  %v4636_v20 = vand.u32 2147483647, %v19269_v10  ;;  %vm13844_vm11 = vcmp.lt.f32.partialorder %v5437_v15, 0.0004427343  ;;  %8373 = vmatpush2.bf16.msra.mxu1 %v9824_v62  ;;  %v19283_v45 = vld [vmem:[#allocation54_spill] sm:$0xff] }
 0x334   : > { %10273 = vpow2.f32 %v3477_v50  ;;  %v3461_v46 = vmul.f32 1.442695, %v2989_v60  ;;  %v1410_v63 = vadd.f32 %v1409_v31, %v11550_v58  ;;  %v1603_v53 = vadd.f32 %v1602_v40, %v11553_v22  ;;  %v9829_v40 = vld [vmem:[#allocation8 + $0x2e4] ss:$8 sps:$4 sm:$0xff]  }
 0x335   : > { %v5415_v38 = vmul.f32 0.6931472, %v10258_v24  ;;  %v5425_v1 = vmul.f32 -0.5, %v13811_v59  ;;  %v3465_v43 = vmul.f32 1.442695, %v2991_v32  ;;  %10275 = vpow2.f32 %v3481_v14  ;;  %8181 = vmatprep.subr.bf16.mxu0 %v9829_v40 }
 0x336   : > { %v10260_v44 = vpop.eup %10259  ;;  %v5443_v15 = vmul.f32 -0.5, %v13819_v3  ;;  %v4635_v54 = vmul.f32 %v19269_v10, %v4634_v26  ;;  %10277 = vlog2.f32 %v4648_v13  ;;  %v2472_v31 = vmax.f32 %v13675_v49, 0.0  ;;  %v19279_v13 = vld [vmem:[#allocation36_spill] sm:$0xff] }
 0x337   : > { %v10262_v52 = vpop.eup %10261  ;;  %10279 = vlog2.f32 %v5359_v11  ;;  %vm4637_vm12 = vcmp.lt.f32.partialorder %v4636_v20, 0.0004427343  ;;  %v13858_v24 = vadd.f32 -4.0, %v1410_v63  ;;  %v5418_v14 = vmul.f32 %v13728_v61, %v5417_v18 }
 0x338   : > { %v13851_v50 = vpop.eup %10263  ;;  %v4632_v16 = vmul.f32 0.6931472, %v10262_v52  ;;  %v5433_v32 = vmul.f32 0.6931472, %v10260_v44  ;;  %v9827_v52 = vld [vmem:[#allocation8 + $0x2e0] ss:$8 sps:$4 sm:$0xff]   ;;  %v5436_v26 = vmul.f32 %v13739_v12, %v5435_v8  ;;  %10281 = vpow2.f32 %v3461_v46 }
 0x339   : > { %19277 = vst [vmem:[#allocation68_spill] sm:$0xff] %v13851_v50  ;;  %v13855_v60 = vpop.eup %10265  ;;  %v13861_v50 = vadd.f32 -4.0, %v1603_v53  ;;  %v5426_v10 = vadd.f32 1.0, %v5425_v1  ;;  %v19280_v62 = vmax.f32 %v19279_v13, 0.0  ;;  %v2742_v11 = vand.u32 2147483647, %v13858_v24  ;;  %8182 = vmatpush2.bf16.msra.mxu0 %v9827_v52 }
 0x33a   : > { %19278 = vst [vmem:[#allocation26_spill] sm:$0xff] %v13855_v60  ;;  %v4638_v47 = vsel %vm4637_vm12, %v4635_v54, %v4632_v16  ;;  %v5428_v49 = vand.u32 2147483647, %v13811_v59  ;;  %v5444_v20 = vadd.f32 1.0, %v5443_v15  ;;  %v5446_v16 = vand.u32 2147483647, %v13819_v3 }
 0x33b   : > { %v5966_v60 = vadd.f32 %v4638_v47, %v19280_v62  ;;  %v2744_v18 = vand.u32 2147483647, %v13861_v50  ;;  %v19281_v54 = vld [vmem:[#allocation73_spill] sm:$0xff]  ;;  %v2998_v8 = vsub.f32 0.0, %v2742_v11  ;;  %v5421_v63 = vsel %vm13839_vm10, %v5418_v14, %v5415_v38  ;;  %v1411_v14 = vpop.f32.mrf.mxu0 }
 0x33c   : > { %v19282_v12 = vld [vmem:[#allocation29_spill] sm:$0xff]  ;;  %v5439_v53 = vsel %vm13844_vm11, %v5436_v26, %v5433_v32  ;;  %10283 = vpow2.f32 %v3465_v43  ;;  %v5427_v47 = vmul.f32 %v13811_v59, %v5426_v10  ;;  %v4651_v52 = vmul.f32 -0.5, %v13081_v56 }
 0x33d   : > { %v6158_v61 = vpack.c.bf16 %v5966_v60, %v19281_v54  ;;  %v9513_v1 = vpack.c.bf16 %v5966_v60, %v19282_v12  ;;  %v3000_v15 = vsub.f32 0.0, %v2744_v18  ;;  %v3479_v13 = vmul.f32 1.442695, %v2998_v8  ;;  %v1604_v8 = vpop.f32.mrf.mxu1 }
 0x33e   : > { %v10268_v44 = vpop.eup %10267  ;;  %vm5429_vm13 = vcmp.lt.f32.partialorder %v5428_v49, 0.0004427343  ;;  %v5445_v6 = vmul.f32 %v13819_v3, %v5444_v20  ;;  %v19284_v43 = vpack.c.bf16 %v19282_v12, %v19283_v45  ;;  %vm5447_vm14 = vcmp.lt.f32.partialorder %v5446_v16, 0.0004427343 }
 0x33f   : > { %v10270_v46 = vpop.eup %10269  ;;  %v5424_v40 = vmul.f32 0.6931472, %v10268_v44  ;;  %6929 = vst [vmem:[%s11758_s29 + $0x1e0] sm:$0xff] %v9513_v1  ;;  %7879 = vmatprep.mubr.bf16.mxu0 %v6158_v61  ;;  %v3483_v38 = vmul.f32 1.442695, %v3000_v15  ;;  %v1404_v59 = vadd.f32 %v13733_v34, %v11550_v58  ;;  %10285 = vpow2.f32 %v3479_v13 }
 0x340   : > { %v10272_v60 = vpop.eup %10271  ;;  %v5442_v62 = vmul.f32 0.6931472, %v10270_v46  ;;  %7880 = vmatmul.mubr.bf16.gmra.mxu0 %v19284_v43  ;;  %v19285_v10 = vmax.f32 %v13586_v33, 0.0  ;;  %v19287_v3 = vmax.f32 %v13673_v55, 0.0  ;;  %v19289_v18 = vmax.f32 %v13593_v5, 0.0  ;;  %v13929_v43 = vpop.f32.mrf.mxu1 }
 0x341   : > { %v5430_v32 = vsel %vm5429_vm13, %v5427_v47, %v5424_v40  ;;  %v13885_v26 = vpop.eup %10273  ;;  %10287 = vpow2.f32 %v3483_v38  ;;  %v1597_v34 = vadd.f32 %v13735_v25, %v11553_v22  ;;  %v4652_v61 = vadd.f32 1.0, %v4651_v52 }
 0x342   : > { %v13889_v11 = vadd.f32 %v5421_v63, %v19285_v10  ;;  %v13893_v49 = vadd.f32 %v5430_v32, %v19287_v3  ;;  %v5448_v20 = vsel %vm5447_vm14, %v5445_v6, %v5442_v62  ;;  %v13897_v54 = vadd.f32 %v5439_v53, %v19289_v18  ;;  %v13903_v12 = vpop.eup %10275 }
 0x343   : > { %v13899_v16 = vadd.f32 %v5448_v20, %v2472_v31  ;;  %v5345_v33 = vadd.f32 1.0, %v13833_v0  ;;  %v5557_v1 = vadd.f32 1.0, %v13885_v26  ;;  %v4654_v5 = vand.u32 2147483647, %v13081_v56  ;;  %v13910_v31 = vpop.f32.mrf.mxu0  ;;  %v10278_v44 = vpop.eup %10277 }
 0x344   : > { %19286 = vst [vmem:[#allocation67_spill] sm:$0xff] %v13889_v11  ;;  %19288 = vst [vmem:[#allocation72_spill] sm:$0xff] %v13893_v49  ;;  %v9557_v55 = vpack.c.bf16 %v13893_v49, %v13889_v11  ;;  %v5347_v25 = vand.u32 2147483647, %v13795_v28  ;;  %v5362_v63 = vmul.f32 -0.5, %v13824_v48  ;;  %v10280_v15 = vpop.eup %10279  ;;  %v13920_v52 = vadd.f32 -4.0, %v1404_v59 }
 0x345   : > { %19290 = vst [vmem:[#allocation70_spill] sm:$0xff] %v13897_v54  ;;  %19291 = vst [vmem:[#allocation55_spill] sm:$0xff] %v13899_v16  ;;  %v2720_v53 = vand.u32 2147483647, %v13815_v17  ;;  %v9558_v0 = vpack.c.bf16 %v13899_v16, %v13897_v54  ;;  %v5343_v46 = vmul.f32 0.6931472, %v10272_v60  ;;  %v4653_v38 = vmul.f32 %v13081_v56, %v4652_v61  ;;  %v13931_v32 = vpop.eup %10281 }
 0x346   : > { %v3431_v47 = vmul.f32 1.442695, %v13813_v2  ;;  %6973 = vst [vmem:[%s11758_s29 + $0x340] sm:$0xff] %v9557_v55  ;;  %19292 = vst [vmem:[#allocation69_spill] sm:$0xff] %v13920_v52  ;;  %v13923_v13 = vadd.f32 -4.0, %v1597_v34  ;;  %v5575_v62 = vadd.f32 1.0, %v13903_v12  ;;  %v5346_v45 = vmul.f32 %v13795_v28, %v5345_v33  ;;  %v1417_v2 = vpop.f32.mrf.mxu0 }
 0x347   : > { %6974 = vst [vmem:[%s11758_s29 + $0x348] sm:$0xff] %v9558_v0  ;;  %v4650_v6 = vmul.f32 0.6931472, %v10278_v44  ;;  %10289 = vlog2.f32 %v5557_v1  ;;  %vm4655_vm15 = vcmp.lt.f32.partialorder %v4654_v5, 0.0004427343  ;;  %v1412_v60 = vadd.f32 %v1411_v14, %v11544_v35  ;;  %v19296_v14 = vld [vmem:[#allocation23_spill] sm:$0xff] }
 0x348   : > { %19293 = vst [vmem:[#allocation32_spill] sm:$0xff] %v13923_v13  ;;  %vm13933_vm0 = vcmp.lt.f32.partialorder %v5347_v25, 0.0004427343  ;;  %v5363_v10 = vadd.f32 1.0, %v5362_v63  ;;  %v2976_v3 = vsub.f32 0.0, %v2720_v53  ;;  %v19297_v34 = vmax.f32 %v19296_v14, 0.0  ;;  %v1419_v7 = vpop.f32.mrf.mxu0 }
 0x349   : > { %v4656_v20 = vsel %vm4655_vm15, %v4653_v38, %v4650_v6  ;;  %v5349_v56 = vsel %vm13933_vm0, %v5346_v45, %v5343_v46  ;;  %v5365_v28 = vand.u32 2147483647, %v13824_v48  ;;  %v2734_v18 = vand.u32 2147483647, %v13920_v52  ;;  %v13943_v33 = vpop.eup %10283  ;;  %v19298_v25 = vld [vmem:[#allocation76_spill] sm:$0xff]  ;;  %v19299_v53 = vld [vmem:[#allocation30_spill] sm:$0xff]  ;;  %v1610_v6 = vpop.f32.mrf.mxu1 }
 0x34a   : > { %v5968_v61 = vadd.f32 %v4656_v20, %v19297_v34  ;;  %v2736_v55 = vand.u32 2147483647, %v13923_v13  ;;  %10291 = vlog2.f32 %v5575_v62  ;;  %v1605_v1 = vadd.f32 %v1604_v8, %v11546_v19  ;;  %v19310_v14 = vld [vmem:[#allocation44_spill] sm:$0xff] }
 0x34b   : > { %v1418_v5 = vadd.f32 %v1417_v2, %v11544_v35  ;;  %v5485_v44 = vadd.f32 1.0, %v13931_v32  ;;  %v13951_v46 = vadd.f32 -4.0, %v1412_v60  ;;  %v19300_v38 = vmax.f32 %v13438_v23, 0.0 }
 0x34c   : > { %v6160_v63 = vpack.c.bf16 %v5968_v61, %v19298_v25  ;;  %v9514_v0 = vpack.c.bf16 %v5968_v61, %v19299_v53  ;;  %v19301_v62 = vsel %vm13797_vm9, %v13790_v27, %v13778_v9  ;;  %v13963_v8 = vmul.f32 %v13824_v48, %v5363_v10  ;;  %v13967_v59 = vpop.eup %10285 }
 0x34d   : > { %v13960_v45 = vadd.f32 %v19301_v62, %v19300_v38  ;;  %10293 = vpow2.f32 %v3431_v47  ;;  %v13965_v2 = vmul.f32 1.442695, %v2976_v3  ;;  %v19303_v60 = vmax.f32 %v13622_v41, 0.0  ;;  %v19308_v3 = vld [vmem:[#allocation75_spill] sm:$0xff] }
 0x34e   : > { %v13973_v23 = vmul.f32 0.6931472, %v10280_v15  ;;  %v13975_v29 = vsub.f32 0.0, %v2734_v18  ;;  %6930 = vst [vmem:[%s11758_s29 + $0x1e8] sm:$0xff] %v9514_v0  ;;  %8072 = vmatprep.mubr.bf16.mxu1 %v6160_v63  ;;  %v13978_v9 = vadd.f32 -4.0, %v1418_v5  ;;  %v13980_v27 = vpop.eup %10287  ;;  %v13986_v47 = vsub.f32 0.0, %v2736_v55 }
 0x34f   : > { %19302 = vst [vmem:[#allocation36_spill] sm:$0xff] %v13960_v45  ;;  %v13971_v20 = vadd.f32 %v5349_v56, %v19303_v60  ;;  %vm13982_vm1 = vcmp.lt.f32.partialorder %v5365_v28, 0.0004427343  ;;  %v5566_v41 = vadd.f32 1.0, %v13967_v59  ;;  %v13989_v10 = vadd.f32 -4.0, %v1605_v1 }
 0x350   : > { %19305 = vst [vmem:[#allocation29_spill] sm:$0xff] %v13978_v9  ;;  %v1611_v15 = vadd.f32 %v1610_v6, %v11546_v19  ;;  %v19309_v56 = vpack.c.bf16 %v19299_v53, %v19308_v3  ;;  %10295 = vlog2.f32 %v5485_v44  ;;  %v5584_v18 = vadd.f32 1.0, %v13980_v27  ;;  %v19312_v6 = vld [vmem:[#allocation35_spill] sm:$0xff] }
 0x351   : > { %19304 = vst [vmem:[#allocation73_spill] sm:$0xff] %v13971_v20  ;;  %v2749_v28 = vand.u32 2147483647, %v13951_v46  ;;  %v4774_v34 = vadd.f32 1.0, %v19310_v14  ;;  %v5503_v61 = vadd.f32 1.0, %v13943_v33  ;;  %v5560_v1 = vmul.f32 -0.5, %v13885_v26 }
 0x352   : > { %8073 = vmatmul.mubr.bf16.gmra.mxu1 %v19309_v56  ;;  %10297 = vlog2.f32 %v5566_v41  ;;  %v5563_v5 = vand.u32 2147483647, %v13885_v26  ;;  %v5578_v25 = vmul.f32 -0.5, %v13903_v12  ;;  %v2757_v44 = vand.u32 2147483647, %v13978_v9 }
 0x353   : > { %10299 = vlog2.f32 %v5584_v18  ;;  %v5581_v63 = vand.u32 2147483647, %v13903_v12  ;;  %v2751_v53 = vand.u32 2147483647, %v13989_v10  ;;  %v14006_v0 = vadd.f32 -4.0, %v1611_v15 }
 0x354   : > { %v4792_v38 = vadd.f32 1.0, %v19312_v6  ;;  %v3005_v60 = vsub.f32 0.0, %v2749_v28  ;;  %v3013_v3 = vsub.f32 0.0, %v2757_v44  ;;  %10301 = vlog2.f32 %v4774_v34  ;;  %v10290_v41 = vpop.eup %10289 }
 0x355   : > { %19311 = vst [vmem:[#allocation54_spill] sm:$0xff] %v14006_v0  ;;  %10303 = vlog2.f32 %v5503_v61  ;;  %v5561_v56 = vadd.f32 1.0, %v5560_v1  ;;  %v2759_v40 = vand.u32 2147483647, %v14006_v0  ;;  %vm14012_vm2 = vcmp.lt.f32.partialorder %v5563_v5, 0.0004427343 }
 0x356   : > { %v5579_v15 = vadd.f32 1.0, %v5578_v25  ;;  %v5569_v16 = vmul.f32 -0.5, %v13967_v59  ;;  %v3509_v49 = vmul.f32 1.442695, %v3013_v3  ;;  %vm14017_vm3 = vcmp.lt.f32.partialorder %v5581_v63, 0.0004427343 }
 0x357   : > { %v5587_v34 = vmul.f32 -0.5, %v13980_v27  ;;  %v3007_v61 = vsub.f32 0.0, %v2751_v53  ;;  %v3015_v1 = vsub.f32 0.0, %v2759_v40  ;;  %10305 = vlog2.f32 %v4792_v38  ;;  %v10292_v44 = vpop.eup %10291  ;;  %v9832_v3 = vld [vmem:[#allocation8 + $0x3e4] ss:$8 sps:$4 sm:$0xff]  }
 0x358   : > { %v5559_v25 = vmul.f32 0.6931472, %v10290_v41  ;;  %v3493_v62 = vmul.f32 1.442695, %v3005_v60  ;;  %10307 = vpow2.f32 %v3509_v49  ;;  %v5572_v63 = vand.u32 2147483647, %v13967_v59  ;;  %v1612_v41 = vpop.f32.mrf.mxu1  ;;  %8374 = vmatprep.subr.bf16.mxu1 %v9832_v3 }
 0x359   : > { %v3513_v18 = vmul.f32 1.442695, %v3015_v1  ;;  %v4777_v54 = vmul.f32 -0.5, %v19310_v14  ;;  %v1420_v11 = vadd.f32 %v1419_v7, %v11550_v58  ;;  %v5562_v40 = vmul.f32 %v13885_v26, %v5561_v56  ;;  %v9830_v60 = vld [vmem:[#allocation8 + $0x3e0] ss:$8 sps:$4 sm:$0xff]  }
 0x35a   : > { %v14029_v53 = vpop.eup %10293  ;;  %v5570_v38 = vadd.f32 1.0, %v5569_v16  ;;  %v2488_v0 = vmax.f32 %v13861_v50, 0.0  ;;  %v5590_v5 = vand.u32 2147483647, %v13980_v27  ;;  %v5577_v49 = vmul.f32 0.6931472, %v10292_v44  ;;  %8375 = vmatpush2.bf16.msra.mxu1 %v9830_v60 }
 0x35b   : > { %19317 = vst [vmem:[#allocation23_spill] sm:$0xff] %v14029_v53  ;;  %v5580_v9 = vmul.f32 %v13903_v12, %v5579_v15  ;;  %v5588_v1 = vadd.f32 1.0, %v5587_v34  ;;  %v3497_v19 = vmul.f32 1.442695, %v3007_v61  ;;  %v5565_v7 = vsel %vm14012_vm2, %v5562_v40, %v5559_v25  ;;  %v9835_v50 = vld [vmem:[#allocation8 + $0x2d4] ss:$8 sps:$4 sm:$0xff]  }
 0x35c   : > { %10309 = vpow2.f32 %v3513_v18  ;;  %v4795_v53 = vmul.f32 -0.5, %v19312_v6  ;;  %v14038_v26 = vadd.f32 -4.0, %v1420_v11  ;;  %v4778_v56 = vadd.f32 1.0, %v4777_v54  ;;  %v9833_v15 = vld [vmem:[#allocation8 + $0x2d0] ss:$8 sps:$4 sm:$0xff]   ;;  %8183 = vmatprep.subr.bf16.mxu0 %v9835_v50 }
 0x35d   : > { %v14040_v16 = vpop.eup %10295  ;;  %10311 = vpow2.f32 %v3493_v62  ;;  %v4780_v44 = vand.u32 2147483647, %v19310_v14  ;;  %v1613_v12 = vadd.f32 %v1612_v41, %v11553_v22  ;;  %v5571_v55 = vmul.f32 %v13967_v59, %v5570_v38  ;;  %8184 = vmatpush2.bf16.msra.mxu0 %v9833_v15 }
 0x35e   : > { %vm14045_vm4 = vcmp.lt.f32.partialorder %v5572_v63, 0.0004427343  ;;  %vm14049_vm5 = vcmp.lt.f32.partialorder %v5590_v5, 0.0004427343  ;;  %v2758_v61 = vand.u32 2147483647, %v14038_v26  ;;  %v5589_v40 = vmul.f32 %v13980_v27, %v5588_v1 }
 0x35f   : > { %v10298_v34 = vpop.eup %10297  ;;  %v19322_v62 = vmax.f32 %v13780_v39, 0.0  ;;  %v14059_v59 = vadd.f32 -4.0, %v1613_v12  ;;  %v5583_v5 = vsel %vm14017_vm3, %v5580_v9, %v5577_v49  ;;  %v4796_v38 = vadd.f32 1.0, %v4795_v53 }
 0x360   : > { %v10300_v54 = vpop.eup %10299  ;;  %v5568_v3 = vmul.f32 0.6931472, %v10298_v34  ;;  %v3014_v41 = vsub.f32 0.0, %v2758_v61  ;;  %v4779_v39 = vmul.f32 %v19310_v14, %v4778_v56  ;;  %v19324_v1 = vmax.f32 %v13858_v24, 0.0 }
 0x361   : > { %v14056_v25 = vadd.f32 %v5565_v7, %v19322_v62  ;;  %v5586_v63 = vmul.f32 0.6931472, %v10300_v54  ;;  %v10302_v60 = vpop.eup %10301  ;;  %v4798_v7 = vand.u32 2147483647, %v19312_v6  ;;  %v2760_v34 = vand.u32 2147483647, %v14059_v59 }
 0x362   : > { %v5574_v50 = vsel %vm14045_vm4, %v5571_v55, %v5568_v3  ;;  %v14068_v27 = vpop.eup %10303  ;;  %v4776_v28 = vmul.f32 0.6931472, %v10302_v60  ;;  %v3511_v53 = vmul.f32 1.442695, %v3014_v41  ;;  %v19326_v49 = vmax.f32 %v13782_v51, 0.0  ;;  %v19329_v54 = vld [vmem:[#allocation56_spill] sm:$0xff] }
 0x363   : > { %19323 = vst [vmem:[#allocation76_spill] sm:$0xff] %v14056_v25  ;;  %v14072_v12 = vadd.f32 %v5574_v50, %v19324_v1  ;;  %v5592_v9 = vsel %vm14049_vm5, %v5589_v40, %v5586_v63  ;;  %vm4781_vm6 = vcmp.lt.f32.partialorder %v4780_v44, 0.0004427343  ;;  %v3016_v56 = vsub.f32 0.0, %v2760_v34  ;;  %v19333_v63 = vld [vmem:[#allocation25_spill] sm:$0xff] }
 0x364   : > { %v14078_v15 = vadd.f32 %v5583_v5, %v19326_v49  ;;  %v14080_v14 = vadd.f32 %v5592_v9, %v2488_v0  ;;  %v10306_v55 = vpop.eup %10305  ;;  %v4782_v18 = vsel %vm4781_vm6, %v4779_v39, %v4776_v28  ;;  %v4797_v11 = vmul.f32 %v19312_v6, %v4796_v38 }
 0x365   : > { %19325 = vst [vmem:[#allocation30_spill] sm:$0xff] %v14072_v12  ;;  %v9565_v24 = vpack.c.bf16 %v14072_v12, %v14056_v25  ;;  %10313 = vpow2.f32 %v3511_v53  ;;  %v14085_v61 = vpop.eup %10307  ;;  %v19330_v62 = vmax.f32 %v19329_v54, 0.0  ;;  %v4794_v3 = vmul.f32 0.6931472, %v10306_v55 }
 0x366   : > { %19327 = vst [vmem:[#allocation75_spill] sm:$0xff] %v14078_v15  ;;  %19328 = vst [vmem:[#allocation44_spill] sm:$0xff] %v14080_v14  ;;  %v9566_v51 = vpack.c.bf16 %v14080_v14, %v14078_v15  ;;  %v3515_v44 = vmul.f32 1.442695, %v3016_v56  ;;  %v5488_v40 = vmul.f32 -0.5, %v13931_v32  ;;  %10315 = vpow2.f32 %v3497_v19 }
 0x367   : > { %v5982_v0 = vadd.f32 %v4782_v18, %v19330_v62  ;;  %6981 = vst [vmem:[%s11758_s29 + $0x380] sm:$0xff] %v9565_v24  ;;  %v5701_v5 = vadd.f32 1.0, %v14085_v61  ;;  %vm14094_vm7 = vcmp.lt.f32.partialorder %v4798_v7, 0.0004427343  ;;  %v3463_v39 = vmul.f32 1.442695, %v13975_v29  ;;  %v1421_v7 = vpop.f32.mrf.mxu0 }
 0x368   : > { %6982 = vst [vmem:[%s11758_s29 + $0x388] sm:$0xff] %v9566_v51  ;;  %v4800_v60 = vsel %vm14094_vm7, %v4797_v11, %v4794_v3  ;;  %10317 = vpow2.f32 %v3515_v44  ;;  %v19334_v1 = vmax.f32 %v13647_v42, 0.0  ;;  %v19335_v9 = vsel %vm13982_vm1, %v13963_v8, %v13973_v23  ;;  %v1614_v23 = vpop.f32.mrf.mxu1  ;;  %v19340_v62 = vld [vmem:[#allocation24_spill] sm:$0xff] }
 0x369   : > { %v6166_v38 = vpack.c.bf16 %v5982_v0, %v19333_v63  ;;  %v9521_v41 = vpack.c.bf16 %v5982_v0, %v13244_v36  ;;  %10319 = vpow2.f32 %v13965_v2  ;;  %v14108_v34 = vpop.eup %10309  ;;  %v5506_v53 = vmul.f32 -0.5, %v13943_v33  ;;  %v19337_v2 = vld [vmem:[#allocation42_spill] sm:$0xff]  ;;  %v14140_v44 = vpop.f32.mrf.mxu0  ;;  %v9836_v11 = vld [vmem:[#allocation8 + $0x3d0] ss:$8 sps:$4 sm:$0xff]  }
 0x36a   : > { %v14117_v28 = vadd.f32 %v19335_v9, %v19334_v1  ;;  %v3467_v49 = vmul.f32 1.442695, %v13986_v47  ;;  %v19338_v29 = vmax.f32 %v19337_v2, 0.0  ;;  %v14124_v55 = vpop.eup %10311  ;;  %v5489_v24 = vadd.f32 1.0, %v5488_v40  ;;  %v19349_v2 = vld [vmem:[#allocation50_spill] sm:$0xff] }
 0x36b   : > { %6937 = vst [vmem:[%s11758_s29 + $0x220] sm:$0xff] %v9521_v41  ;;  %7889 = vmatprep.mubr.bf16.mxu0 %v6166_v38  ;;  %v5491_v48 = vand.u32 2147483647, %v13931_v32  ;;  %v1414_v8 = vadd.f32 %v13910_v31, %v11550_v58  ;;  %v19339_v18 = vpack.c.bf16 %v13244_v36, %v12913_v37  ;;  %10321 = vlog2.f32 %v5701_v5  ;;  %v19341_v31 = vld [vmem:[#allocation34_spill] sm:$0xff]  ;;  %v14155_v41 = vpop.f32.mrf.mxu1 }
 0x36c   : > { %19336 = vst [vmem:[#allocation35_spill] sm:$0xff] %v14117_v28  ;;  %v5984_v56 = vadd.f32 %v4800_v60, %v19338_v29  ;;  %10323 = vpow2.f32 %v3463_v39  ;;  %v5719_v54 = vadd.f32 1.0, %v14108_v34  ;;  %v5507_v40 = vadd.f32 1.0, %v5506_v53  ;;  %v19346_v60 = vld [vmem:[#allocation18_spill] sm:$0xff]  ;;  %v19347_v53 = vld [vmem:[#allocation27_spill] sm:$0xff] }
 0x36d   : > { %7890 = vmatmul.mubr.bf16.gmra.mxu0 %v19339_v18  ;;  %10325 = vpow2.f32 %v3467_v49  ;;  %v14146_v63 = vmul.f32 %v13931_v32, %v5489_v24  ;;  %vm14148_vm8 = vcmp.lt.f32.partialorder %v5491_v48, 0.0004427343  ;;  %v14152_v38 = vadd.f32 -4.0, %v1414_v8  ;;  %v14170_v48 = vld [vmem:[#allocation7] sm:$0xff]  ;;  %v1653_v8 = vpop.f32.mrf.mxu0  ;;  %v9839_v37 = vld [vmem:[#allocation8 + $0x2c0] ss:$8 sps:$4 sm:$0xff]  }
 0x36e   : > { %v6168_v0 = vpack.c.bf16 %v5984_v56, %v19340_v62  ;;  %v9522_v3 = vpack.c.bf16 %v5984_v56, %v19341_v31  ;;  %v571_v39 = vsub.s32 4, %v19346_v60  ;;  %v14159_v1 = vmul.f32 0.6931472, %v14040_v16 }
 0x36f   : > { %19345 = vst [vmem:[#allocation56_spill] sm:$0xff] %v14152_v38  ;;  %v579_v32 = vsub.s32 6, %v19346_v60  ;;  %v19348_v49 = vpack.c.bf16 %v19341_v31, %v19347_v53  ;;  %v4918_v29 = vadd.f32 1.0, %v19349_v2  ;;  %v1607_v56 = vadd.f32 %v13929_v43, %v11553_v22 }
 0x370   : > { %6938 = vst [vmem:[%s11758_s29 + $0x228] sm:$0xff] %v9522_v3  ;;  %8082 = vmatprep.mubr.bf16.mxu1 %v6168_v0  ;;  %10327 = vlog2.f32 %v5719_v54  ;;  %v1422_v24 = vadd.f32 %v1421_v7, %v11544_v35  ;;  %v14173_v16 = vrot.slane %v14170_v48, %v571_v39  ;;  %v14178_v62 = vmul.f32 %v13943_v33, %v5507_v40  ;;  %v19350_v54 = vld [vmem:[#allocation19_spill] sm:$0xff]  ;;  %v1846_v39 = vpop.f32.mrf.mxu1  ;;  %v9838_v40 = vld [vmem:[#allocation8 + $0x3d4] ss:$8 sps:$4 sm:$0xff]  }
 0x371   : > { %8083 = vmatmul.mubr.bf16.gmra.mxu1 %v19348_v49  ;;  %v14182_v31 = vrot.slane %v14170_v48, %v579_v32  ;;  %10329 = vlog2.f32 %v4918_v29  ;;  %v1615_v3 = vadd.f32 %v1614_v23, %v19350_v54  ;;  %v14195_v32 = vmul.f32 0.6931472, %v14068_v27  ;;  %8376 = vmatprep.subr.bf16.mxu1 %v9838_v40 }
 0x372   : > { %v14175_v18 = vpop.eup %10313  ;;  %v1654_v29 = vadd.f32 %v1653_v8, %v14173_v16  ;;  %v14201_v6 = vadd.f32 -4.0, %v1607_v56  ;;  %v5704_v23 = vmul.f32 -0.5, %v14085_v61  ;;  %v14204_v54 = vadd.f32 -4.0, %v1422_v24  ;;  %v19353_v8 = vld [vmem:[#allocation29_spill] sm:$0xff]  ;;  %8377 = vmatpush2.bf16.msra.mxu1 %v9836_v11 }
 0x373   : > { %v5710_v7 = vadd.f32 1.0, %v14175_v18  ;;  %v14188_v53 = vpop.eup %10315  ;;  %v5629_v36 = vadd.f32 1.0, %v14124_v55  ;;  %v5722_v27 = vmul.f32 -0.5, %v14108_v34  ;;  %v1847_v47 = vadd.f32 %v1846_v39, %v14182_v31 }
 0x374   : > { %19351 = vst [vmem:[#allocation25_spill] sm:$0xff] %v14201_v6  ;;  %v5707_v56 = vand.u32 2147483647, %v14085_v61  ;;  %v14214_v43 = vadd.f32 -4.0, %v1615_v3  ;;  %v14216_v0 = vadd.f32 -4.0, %v1654_v29  ;;  %v5647_v24 = vadd.f32 1.0, %v14188_v53 }
 0x375   : > { %v14199_v35 = vpop.eup %10317  ;;  %10331 = vlog2.f32 %v5710_v7  ;;  %v19354_v7 = vld [vmem:[#allocation54_spill] sm:$0xff]  ;;  %v5725_v49 = vand.u32 2147483647, %v14108_v34  ;;  %v5705_v9 = vadd.f32 1.0, %v5704_v23  ;;  %v2765_v39 = vand.u32 2147483647, %v14204_v54 }
 0x376   : > { %v14206_v51 = vpop.eup %10319  ;;  %v5728_v19 = vadd.f32 1.0, %v14199_v35  ;;  %v2521_v50 = vand.u32 2147483647, %v14216_v0  ;;  %v4921_v14 = vmul.f32 -0.5, %v19349_v2  ;;  %v5723_v29 = vadd.f32 1.0, %v5722_v27 }
 0x377   : > { %19352 = vst [vmem:[#allocation42_spill] sm:$0xff] %v14206_v51  ;;  %v2502_v12 = vmax.f32 %v14038_v26, 0.0  ;;  %v14227_v13 = vadd.f32 -4.0, %v1847_v47  ;;  %vm14231_vm9 = vcmp.lt.f32.partialorder %v5707_v56, 0.0004427343  ;;  %v5713_v52 = vmul.f32 -0.5, %v14175_v18 }
 0x378   : > { %10333 = vlog2.f32 %v5728_v19  ;;  %v10322_v42 = vpop.eup %10321  ;;  %vm14238_vm10 = vcmp.lt.f32.partialorder %v5725_v49, 0.0004427343  ;;  %v5731_v47 = vmul.f32 -0.5, %v14199_v35  ;;  %v2777_v40 = vsub.f32 0.0, %v2521_v50  ;;  %v9841_v27 = vld [vmem:[#allocation8 + $0x2c4] ss:$8 sps:$4 sm:$0xff]  }
 0x379   : > { %v14224_v3 = vpop.eup %10323  ;;  %10335 = vlog2.f32 %v5629_v36  ;;  %v5703_v36 = vmul.f32 0.6931472, %v10322_v42  ;;  %v5706_v56 = vmul.f32 %v14085_v61, %v5705_v9  ;;  %v4922_v28 = vadd.f32 1.0, %v4921_v14  ;;  %8185 = vmatprep.subr.bf16.mxu0 %v9841_v27  ;;  %v19361_v61 = vld [vmem:[#allocation47_spill] sm:$0xff] }
 0x37a   : > { %19355 = vst [vmem:[#allocation24_spill] sm:$0xff] %v14224_v3  ;;  %v14229_v19 = vpop.eup %10325  ;;  %v2767_v3 = vand.u32 2147483647, %v14214_v43  ;;  %10337 = vlog2.f32 %v5647_v24  ;;  %v4924_v17 = vand.u32 2147483647, %v19349_v2  ;;  %v5724_v24 = vmul.f32 %v14108_v34, %v5723_v29  ;;  %8186 = vmatpush2.bf16.msra.mxu0 %v9839_v37 }
 0x37b   : > { %19356 = vst [vmem:[#allocation34_spill] sm:$0xff] %v14229_v19  ;;  %v3021_v19 = vsub.f32 0.0, %v2765_v39  ;;  %v5716_v42 = vand.u32 2147483647, %v14175_v18  ;;  %v3037_v49 = vmul.f32 1.442695, %v2777_v40  ;;  %v5709_v14 = vsel %vm14231_vm9, %v5706_v56, %v5703_v36 }
 0x37c   : > { %v2523_v20 = vand.u32 2147483647, %v14227_v13  ;;  %v5714_v50 = vadd.f32 1.0, %v5713_v52  ;;  %v5734_v11 = vand.u32 2147483647, %v14199_v35  ;;  %v3023_v57 = vsub.f32 0.0, %v2767_v3  ;;  %v1655_v3 = vpop.f32.mrf.mxu0 }
 0x37d   : > { %v10328_v4 = vpop.eup %10327  ;;  %v4936_v9 = vadd.f32 1.0, %v19361_v61  ;;  %v5732_v39 = vadd.f32 1.0, %v5731_v47  ;;  %v575_v34 = vsub.s32 5, %v19346_v60  ;;  %v4923_v40 = vmul.f32 %v19349_v2, %v4922_v28 }
 0x37e   : > { %v10330_v51 = vpop.eup %10329  ;;  %v5721_v29 = vmul.f32 0.6931472, %v10328_v4  ;;  %v583_v27 = vsub.s32 7, %v19346_v60  ;;  %vm14255_vm11 = vcmp.lt.f32.partialorder %v5716_v42, 0.0004427343  ;;  %v2779_v37 = vsub.f32 0.0, %v2523_v20  ;;  %v1657_v5 = vpop.f32.mrf.mxu0 }
 0x37f   : > { %v4920_v45 = vmul.f32 0.6931472, %v10330_v51  ;;  %10339 = vlog2.f32 %v4936_v9  ;;  %vm4925_vm12 = vcmp.lt.f32.partialorder %v4924_v17, 0.0004427343  ;;  %v5715_v51 = vmul.f32 %v14175_v18, %v5714_v50  ;;  %v19381_v20 = vld [vmem:[#allocation28_spill] sm:$0xff] }
 0x380   : > { %10341 = vpow2.f32 %v3037_v49  ;;  %v14261_v4 = vrot.slane %v14170_v48, %v575_v34  ;;  %v19365_v28 = vand.u32 2147483647, %v13943_v33  ;;  %v19368_v47 = vmax.f32 %v19353_v8, 0.0  ;;  %v1848_v49 = vpop.f32.mrf.mxu1  ;;  %v19375_v34 = vld [vmem:[#allocation43_spill] sm:$0xff] }
 0x381   : > { %v4926_v36 = vsel %vm4925_vm12, %v4923_v40, %v4920_v45  ;;  %v5733_v17 = vmul.f32 %v14199_v35, %v5732_v39  ;;  %vm14274_vm14 = vcmp.lt.f32.partialorder %v5734_v11, 0.0004427343  ;;  %v19372_v45 = vld [vmem:[#allocation57_spill] sm:$0xff]  ;;  %v5727_v33 = vsel %vm14238_vm10, %v5724_v24, %v5721_v29 }
 0x382   : > { %v10332_v52 = vpop.eup %10331  ;;  %19364 = vst [vmem:[#allocation27_spill] sm:$0xff] %v14261_v4  ;;  %vm14265_vm13 = vcmp.lt.f32.partialorder %v19365_v28, 0.0004427343  ;;  %v14271_v56 = vadd.f32 %v5709_v14, %v19368_v47  ;;  %v19373_v18 = vmax.f32 %v19372_v45, 0.0  ;;  %v1656_v8 = vadd.f32 %v1655_v3, %v14261_v4 }
 0x383   : > { %v5712_v23 = vmul.f32 0.6931472, %v10332_v52  ;;  %v14286_v14 = vrot.slane %v14170_v48, %v583_v27  ;;  %v3041_v39 = vmul.f32 1.442695, %v2779_v37  ;;  %v4939_v26 = vmul.f32 -0.5, %v19361_v61 }
 0x384   : > { %19369 = vst [vmem:[#allocation50_spill] sm:$0xff] %v14271_v56  ;;  %v5998_v42 = vadd.f32 %v4926_v36, %v19373_v18  ;;  %v19376_v36 = vld [vmem:[#allocation37_spill] sm:$0xff]  ;;  %v14293_v15 = vadd.f32 -4.0, %v1656_v8  ;;  %v2752_v48 = vand.u32 2147483647, %v14201_v6  ;;  %v19377_v3 = vmax.f32 %v19354_v7, 0.0 }
 0x385   : > { %v10334_v50 = vpop.eup %10333  ;;  %v5718_v9 = vsel %vm14255_vm11, %v5715_v51, %v5712_v23  ;;  %v1849_v24 = vadd.f32 %v1848_v49, %v14286_v14  ;;  %v3525_v27 = vmul.f32 1.442695, %v3021_v19  ;;  %v19379_v51 = vmax.f32 %v14059_v59, 0.0 }
 0x386   : > { %v14288_v35 = vadd.f32 %v5718_v9, %v2502_v12  ;;  %v5730_v11 = vmul.f32 0.6931472, %v10334_v50  ;;  %v6174_v40 = vpack.c.bf16 %v5998_v42, %v19375_v34  ;;  %v10336_v52 = vpop.eup %10335  ;;  %v9529_v28 = vpack.c.bf16 %v5998_v42, %v19376_v36 }
 0x387   : > { %v14301_v37 = vpop.eup %10337  ;;  %v14305_v23 = vadd.f32 %v5727_v33, %v19377_v3  ;;  %v2522_v45 = vand.u32 2147483647, %v14293_v15  ;;  %v14313_v18 = vadd.f32 -4.0, %v1849_v24  ;;  %v5632_v19 = vmul.f32 -0.5, %v14124_v55 }
 0x388   : > { %19374 = vst [vmem:[#allocation19_spill] sm:$0xff] %v14288_v35  ;;  %v9573_v12 = vpack.c.bf16 %v14288_v35, %v14271_v56  ;;  %v5736_v29 = vsel %vm14274_vm14, %v5733_v17, %v5730_v11  ;;  %7899 = vmatprep.mubr.bf16.mxu0 %v6174_v40  ;;  %6945 = vst [vmem:[%s11758_s29 + $0x260] sm:$0xff] %v9529_v28  ;;  %v19382_v17 = vpack.c.bf16 %v19376_v36, %v19381_v20 }
 0x389   : > { %19378 = vst [vmem:[#allocation29_spill] sm:$0xff] %v14305_v23  ;;  %v14309_v47 = vadd.f32 %v5736_v29, %v19379_v51  ;;  %v3529_v7 = vmul.f32 1.442695, %v3023_v57  ;;  %v1424_v42 = vadd.f32 %v14140_v44, %v11550_v58  ;;  %10343 = vpow2.f32 %v3041_v39  ;;  %v14356_v29 = vpop.f32.mrf.mxu0 }
 0x38a   : > { %7900 = vmatmul.mubr.bf16.gmra.mxu0 %v19382_v17  ;;  %6989 = vst [vmem:[%s11758_s29 + $0x3c0] sm:$0xff] %v9573_v12  ;;  %v19383_v59 = vmax.f32 %v13787_v21, 0.0  ;;  %v19384_v49 = vsel %vm14148_vm8, %v14146_v63, %v14159_v1  ;;  %v4940_v9 = vadd.f32 1.0, %v4939_v26  ;;  %v2778_v8 = vsub.f32 0.0, %v2522_v45  ;;  %v19390_v17 = vld [vmem:[#allocation60_spill] sm:$0xff] }
 0x38b   : > { %19380 = vst [vmem:[#allocation54_spill] sm:$0xff] %v14309_v47  ;;  %v9574_v33 = vpack.c.bf16 %v14309_v47, %v14305_v23  ;;  %v19385_v57 = vand.u32 2147483647, %v14152_v38  ;;  %v1617_v58 = vadd.f32 %v14155_v41, %v11553_v22  ;;  %v4942_v21 = vand.u32 2147483647, %v19361_v61  ;;  %v1850_v41 = vpop.f32.mrf.mxu1 }
 0x38c   : > { %v14329_v50 = vadd.f32 %v19384_v49, %v19383_v59  ;;  %v2524_v44 = vand.u32 2147483647, %v14313_v18  ;;  %v5511_v63 = vsel %vm14265_vm13, %v14178_v62, %v14195_v32  ;;  %v3008_v1 = vsub.f32 0.0, %v2752_v48  ;;  %v10340_v34 = vpop.eup %10339 }
 0x38d   : > { %v3006_v11 = vsub.f32 0.0, %v19385_v57  ;;  %6990 = vst [vmem:[%s11758_s29 + $0x3c8] sm:$0xff] %v9574_v33  ;;  %10345 = vpow2.f32 %v3525_v27  ;;  %v3039_v39 = vmul.f32 1.442695, %v2778_v8  ;;  %v5633_v40 = vadd.f32 1.0, %v5632_v19  ;;  %v14347_v28 = vpop.eup %10341  ;;  %v19392_v57 = vld [vmem:[#allocation33_spill] sm:$0xff] }
 0x38e   : > { %v5650_v36 = vmul.f32 -0.5, %v14188_v53  ;;  %10347 = vpow2.f32 %v3529_v7  ;;  %v14345_v22 = vadd.f32 -4.0, %v1424_v42  ;;  %v4938_v26 = vmul.f32 0.6931472, %v10340_v34  ;;  %v14363_v42 = vpop.f32.mrf.mxu1 }
 0x38f   : > { %v4941_v24 = vmul.f32 %v19361_v61, %v4940_v9  ;;  %10349 = vpow2.f32 %v3039_v39  ;;  %v2780_v2 = vsub.f32 0.0, %v2524_v44  ;;  %v19387_v62 = vmax.f32 %v13792_v30, 0.0 }
 0x390   : > { %19386 = vst [vmem:[#allocation47_spill] sm:$0xff] %v14345_v22  ;;  %v3495_v48 = vmul.f32 1.442695, %v3006_v11  ;;  %v14354_v12 = vadd.f32 -4.0, %v1617_v58  ;;  %vm4943_vm15 = vcmp.lt.f32.partialorder %v4942_v21, 0.0004427343  ;;  %v5634_v59 = vmul.f32 %v14124_v55, %v5633_v40  ;;  %v1663_v21 = vpop.f32.mrf.mxu0 }
 0x391   : > { %v14352_v32 = vadd.f32 %v5511_v63, %v19387_v62  ;;  %v5635_v27 = vand.u32 2147483647, %v14124_v55  ;;  %v5653_v3 = vand.u32 2147483647, %v14188_v53  ;;  %v3499_v51 = vmul.f32 1.442695, %v3008_v1 }
 0x392   : > { %19389 = vst [vmem:[#allocation43_spill] sm:$0xff] %v14354_v12  ;;  %v4944_v45 = vsel %vm4943_vm15, %v4941_v24, %v4938_v26  ;;  %v5631_v20 = vmul.f32 0.6931472, %v10336_v52  ;;  %v3577_v61 = vadd.f32 1.0, %v14347_v28  ;;  %v19391_v19 = vmax.f32 %v19390_v17, 0.0  ;;  %v19393_v11 = vld [vmem:[#allocation21_spill] sm:$0xff]  ;;  %v1665_v60 = vpop.f32.mrf.mxu0 }
 0x393   : > { %19388 = vst [vmem:[#allocation57_spill] sm:$0xff] %v14352_v32  ;;  %v3043_v7 = vmul.f32 1.442695, %v2780_v2  ;;  %v5651_v49 = vadd.f32 1.0, %v5650_v36  ;;  %v2766_v33 = vand.u32 2147483647, %v14345_v22  ;;  %v1658_v9 = vadd.f32 %v1657_v5, %v14173_v16  ;;  %v1856_v36 = vpop.f32.mrf.mxu1 }
 0x394   : > { %v6000_v30 = vadd.f32 %v4944_v45, %v19391_v19  ;;  %v2768_v8 = vand.u32 2147483647, %v14354_v12  ;;  %vm14373_vm0 = vcmp.lt.f32.partialorder %v5635_v27, 0.0004427343  ;;  %v5649_v40 = vmul.f32 0.6931472, %v14301_v37 }
 0x395   : > { %10351 = vpow2.f32 %v3043_v7  ;;  %v5637_v34 = vsel %vm14373_vm0, %v5634_v59, %v5631_v20  ;;  %v3022_v24 = vsub.f32 0.0, %v2766_v33  ;;  %v14386_v2 = vadd.f32 -4.0, %v1658_v9  ;;  %v19400_v45 = vld [vmem:[#allocation74_spill] sm:$0xff]  ;;  %v9845_v55 = vld [vmem:[#allocation8 + $0x2b0] ss:$8 sps:$4 sm:$0xff]  }
 0x396   : > { %v6176_v52 = vpack.c.bf16 %v6000_v30, %v19392_v57  ;;  %v9530_v58 = vpack.c.bf16 %v6000_v30, %v19393_v11  ;;  %10353 = vpow2.f32 %v3495_v48  ;;  %v14384_v26 = vpop.eup %10343  ;;  %v1664_v62 = vadd.f32 %v1663_v21, %v14173_v16  ;;  %v19398_v48 = vld [vmem:[#allocation31_spill] sm:$0xff]  ;;  %v19403_v7 = vld [vmem:[#allocation58_spill] sm:$0xff] }
 0x397   : > { %10355 = vlog2.f32 %v3577_v61  ;;  %v19399_v27 = vpack.c.bf16 %v19393_v11, %v19398_v48  ;;  %v5062_v17 = vadd.f32 1.0, %v19400_v45  ;;  %v5652_v20 = vmul.f32 %v14188_v53, %v5651_v49  ;;  %v9842_v33 = vld [vmem:[#allocation8 + $0x3c0] ss:$8 sps:$4 sm:$0xff]   ;;  %v9844_v49 = vld [vmem:[#allocation8 + $0x3c4] ss:$8 sps:$4 sm:$0xff]  }
 0x398   : > { %6946 = vst [vmem:[%s11758_s29 + $0x268] sm:$0xff] %v9530_v58  ;;  %8092 = vmatprep.mubr.bf16.mxu1 %v6176_v52  ;;  %vm14394_vm1 = vcmp.lt.f32.partialorder %v5653_v3, 0.0004427343  ;;  %10357 = vpow2.f32 %v3499_v51  ;;  %v3024_v61 = vsub.f32 0.0, %v2768_v8  ;;  %v1857_v30 = vadd.f32 %v1856_v36, %v14182_v31  ;;  %8378 = vmatprep.subr.bf16.mxu1 %v9844_v49  ;;  %v9847_v48 = vld [vmem:[#allocation8 + $0x2b4] ss:$8 sps:$4 sm:$0xff]  }
 0x399   : > { %8093 = vmatmul.mubr.bf16.gmra.mxu1 %v19399_v27  ;;  %10359 = vlog2.f32 %v5062_v17  ;;  %v5080_v59 = vadd.f32 1.0, %v19403_v7  ;;  %v19404_v57 = vmax.f32 %v13951_v46, 0.0  ;;  %v3595_v3 = vadd.f32 1.0, %v14384_v26  ;;  %8187 = vmatprep.subr.bf16.mxu0 %v9847_v48 }
 0x39a   : > { %v14401_v9 = vpop.eup %10345  ;;  %v1851_v51 = vadd.f32 %v1850_v41, %v14182_v31  ;;  %v5655_v11 = vsel %vm14394_vm1, %v5652_v20, %v5649_v40  ;;  %v14414_v58 = vmul.f32 1.442695, %v3022_v24  ;;  %v2529_v21 = vand.u32 2147483647, %v14386_v2  ;;  %8379 = vmatpush2.bf16.msra.mxu1 %v9842_v33  ;;  %8188 = vmatpush2.bf16.msra.mxu0 %v9845_v55 }
 0x39b   : > { %v14405_v52 = vadd.f32 %v5637_v34, %v19404_v57  ;;  %v14410_v8 = vpop.eup %10347  ;;  %v14417_v1 = vadd.f32 -4.0, %v1664_v62  ;;  %v14421_v34 = vmul.f32 1.442695, %v3024_v61  ;;  %10361 = vlog2.f32 %v5080_v59 }
 0x39c   : > { %v14419_v46 = vpop.eup %10349  ;;  %v5773_v27 = vadd.f32 1.0, %v14401_v9  ;;  %v3580_v40 = vmul.f32 -0.5, %v14347_v28  ;;  %v14428_v17 = vadd.f32 -4.0, %v1857_v30  ;;  %v5776_v62 = vmul.f32 -0.5, %v14401_v9 }
 0x39d   : > { %19405 = vst [vmem:[#allocation37_spill] sm:$0xff] %v14405_v52  ;;  %v3586_v24 = vadd.f32 1.0, %v14419_v46  ;;  %10363 = vlog2.f32 %v3595_v3  ;;  %v14431_v20 = vadd.f32 -4.0, %v1851_v51  ;;  %v5065_v37 = vmul.f32 -0.5, %v19400_v45 }
 0x39e   : > { %v5791_v61 = vadd.f32 1.0, %v14410_v8  ;;  %v2785_v59 = vsub.f32 0.0, %v2529_v21  ;;  %v2537_v57 = vand.u32 2147483647, %v14417_v1  ;;  %v19406_v30 = vmax.f32 %v13989_v10, 0.0 }
 0x39f   : > { %10365 = vlog2.f32 %v3586_v24  ;;  %v3583_v51 = vand.u32 2147483647, %v14347_v28  ;;  %v3581_v48 = vadd.f32 1.0, %v3580_v40  ;;  %v3598_v21 = vmul.f32 -0.5, %v14384_v26 }
 0x3a0   : > { %v14440_v33 = vadd.f32 %v5655_v11, %v19406_v30  ;;  %10367 = vlog2.f32 %v5773_v27  ;;  %v2539_v24 = vand.u32 2147483647, %v14428_v17  ;;  %v2531_v10 = vand.u32 2147483647, %v14431_v20 }
 0x3a1   : > { %v5066_v11 = vadd.f32 1.0, %v5065_v37  ;;  %v5083_v30 = vmul.f32 -0.5, %v19403_v7  ;;  %v14453_v19 = vadd.f32 1.0, %v5776_v62  ;;  %10369 = vlog2.f32 %v5791_v61 }
 0x3a2   : > { %19407 = vst [vmem:[#allocation28_spill] sm:$0xff] %v14440_v33  ;;  %v14444_v5 = vpop.eup %10351  ;;  %v3053_v27 = vmul.f32 1.442695, %v2785_v59  ;;  %v2793_v40 = vsub.f32 0.0, %v2537_v57  ;;  %vm14455_vm2 = vcmp.lt.f32.partialorder %v3583_v51, 0.0004427343  ;;  %v3582_v55 = vmul.f32 %v14347_v28, %v3581_v48  ;;  %v1858_v59 = vpop.f32.mrf.mxu1 }
 0x3a3   : > { %v14448_v63 = vpop.eup %10353  ;;  %v3604_v49 = vadd.f32 1.0, %v14444_v5  ;;  %v5068_v36 = vand.u32 2147483647, %v19400_v45  ;;  %v3599_v47 = vadd.f32 1.0, %v3598_v21  ;;  %v3589_v62 = vmul.f32 -0.5, %v14419_v46 }
 0x3a4   : > { %19408 = vst [vmem:[#allocation60_spill] sm:$0xff] %v14448_v63  ;;  %v10356_v53 = vpop.eup %10355  ;;  %v2795_v61 = vsub.f32 0.0, %v2539_v24  ;;  %v2787_v35 = vsub.f32 0.0, %v2531_v10  ;;  %v5067_v25 = vmul.f32 %v19400_v45, %v5066_v11  ;;  %v5084_v6 = vadd.f32 1.0, %v5083_v30  ;;  %v19412_v11 = vld [vmem:[#allocation65_spill] sm:$0xff] }
 0x3a5   : > { %10371 = vlog2.f32 %v3604_v49  ;;  %v14461_v37 = vpop.eup %10357  ;;  %v3579_v51 = vmul.f32 0.6931472, %v10356_v53  ;;  %v3069_v41 = vmul.f32 1.442695, %v2793_v40  ;;  %v5086_v52 = vand.u32 2147483647, %v19403_v7 }
 0x3a6   : > { %19411 = vst [vmem:[#allocation33_spill] sm:$0xff] %v14461_v37  ;;  %v10360_v57 = vpop.eup %10359  ;;  %v1666_v38 = vadd.f32 %v1665_v60, %v14261_v4  ;;  %v3592_v37 = vand.u32 2147483647, %v14419_v46  ;;  %10373 = vpow2.f32 %v3053_v27  ;;  %vm5069_vm3 = vcmp.lt.f32.partialorder %v5068_v36, 0.0004427343 }
 0x3a7   : > { %v5064_v49 = vmul.f32 0.6931472, %v10360_v57  ;;  %v1859_v28 = vadd.f32 %v1858_v59, %v14286_v14  ;;  %v3590_v21 = vadd.f32 1.0, %v3589_v62  ;;  %v3073_v24 = vmul.f32 1.442695, %v2795_v61  ;;  %v19415_v61 = vld [vmem:[#allocation48_spill] sm:$0xff] }
 0x3a8   : > { %v10362_v48 = vpop.eup %10361  ;;  %v14470_v10 = vadd.f32 -4.0, %v1666_v38  ;;  %v3607_v45 = vmul.f32 -0.5, %v14444_v5  ;;  %v19413_v30 = vmax.f32 %v19412_v11, 0.0  ;;  %v5085_v60 = vmul.f32 %v19403_v7, %v5084_v6  ;;  %v19414_v38 = vld [vmem:[#allocation45_spill] sm:$0xff]  ;;  %v19416_v7 = vld [vmem:[#allocation66_spill] sm:$0xff]  ;;  %v14488_v11 = vpop.f32.mrf.mxu0 }
 0x3a9   : > { %v5070_v53 = vsel %vm5069_vm3, %v5067_v25, %v5064_v49  ;;  %v5082_v57 = vmul.f32 0.6931472, %v10362_v48  ;;  %v3585_v36 = vsel %vm14455_vm2, %v3582_v55, %v3579_v51  ;;  %10375 = vpow2.f32 %v3069_v41 }
 0x3aa   : > { %v6014_v40 = vadd.f32 %v5070_v53, %v19413_v30  ;;  %v10364_v39 = vpop.eup %10363  ;;  %vm5087_vm4 = vcmp.lt.f32.partialorder %v5086_v52, 0.0004427343  ;;  %v14478_v27 = vadd.f32 -4.0, %v1859_v28  ;;  %v2538_v53 = vand.u32 2147483647, %v14470_v10 }
 0x3ab   : > { %v5088_v49 = vsel %vm5087_vm4, %v5085_v60, %v5082_v57  ;;  %v3591_v6 = vmul.f32 %v14419_v46, %v3590_v21  ;;  %10377 = vpow2.f32 %v3073_v24  ;;  %v19417_v3 = vmax.f32 %v19416_v7, 0.0  ;;  %v14492_v21 = vpop.f32.mrf.mxu1  ;;  %v19418_v24 = vld [vmem:[#allocation40_spill] sm:$0xff]  ;;  %v14519_v7 = vpop.f32.mrf.mxu0 }
 0x3ac   : > { %v10366_v25 = vpop.eup %10365  ;;  %v6182_v62 = vpack.c.bf16 %v6014_v40, %v19414_v38  ;;  %v9537_v59 = vpack.c.bf16 %v6014_v40, %v19415_v61  ;;  %v3597_v52 = vmul.f32 0.6931472, %v10364_v39  ;;  %v2266_v51 = vmax.f32 %v14293_v15, 0.0 }
 0x3ad   : > { %v3588_v48 = vmul.f32 0.6931472, %v10366_v25  ;;  %v6016_v55 = vadd.f32 %v5088_v49, %v19417_v3  ;;  %v10368_v41 = vpop.eup %10367  ;;  %vm3593_vm5 = vcmp.lt.f32.partialorder %v3592_v37, 0.0004427343  ;;  %v3608_v28 = vadd.f32 1.0, %v3607_v45  ;;  %v19427_v3 = vld [vmem:[#allocation59_spill] sm:$0xff] }
 0x3ae   : > { %6953 = vst [vmem:[%s11758_s29 + $0x2a0] sm:$0xff] %v9537_v59  ;;  %7909 = vmatprep.mubr.bf16.mxu0 %v6182_v62  ;;  %v3600_v30 = vmul.f32 %v14384_v26, %v3599_v47  ;;  %v3610_v57 = vand.u32 2147483647, %v14444_v5  ;;  %v3057_v46 = vmul.f32 1.442695, %v2787_v35  ;;  %v19419_v60 = vpack.c.bf16 %v19415_v61, %v19418_v24  ;;  %v10370_v39 = vpop.eup %10369 }
 0x3af   : > { %v3594_v40 = vsel %vm3593_vm5, %v3591_v6, %v3588_v48  ;;  %v19420_v15 = vmax.f32 %v14216_v0, 0.0  ;;  %v2794_v25 = vsub.f32 0.0, %v2538_v53  ;;  %v2540_v47 = vand.u32 2147483647, %v14478_v27 }
 0x3b0   : > { %7910 = vmatmul.mubr.bf16.gmra.mxu0 %v19419_v60  ;;  %v14501_v45 = vadd.f32 %v3594_v40, %v2266_v51  ;;  %v5794_v35 = vmul.f32 -0.5, %v14410_v8  ;;  %v19423_v62 = vand.u32 2147483647, %v14384_v26  ;;  %v1660_v0 = vadd.f32 %v14356_v29, %v14261_v4  ;;  %v14523_v51 = vpop.f32.mrf.mxu1 }
 0x3b1   : > { %v14499_v37 = vadd.f32 %v3585_v36, %v19420_v15  ;;  %v19426_v36 = vld [vmem:[#allocation41_spill] sm:$0xff]  ;;  %v3609_v6 = vmul.f32 %v14444_v5, %v3608_v28  ;;  %v2268_v26 = vmax.f32 %v14313_v18, 0.0  ;;  %vm3611_vm7 = vcmp.lt.f32.partialorder %v3610_v57, 0.0004427343  ;;  %v19428_v5 = vld [vmem:[#allocation38_spill] sm:$0xff] }
 0x3b2   : > { %19422 = vst [vmem:[#allocation31_spill] sm:$0xff] %v14501_v45  ;;  %v10372_v38 = vpop.eup %10371  ;;  %vm14507_vm6 = vcmp.lt.f32.partialorder %v19423_v62, 0.0004427343  ;;  %v6184_v61 = vpack.c.bf16 %v6016_v55, %v19426_v36  ;;  %10379 = vpow2.f32 %v3057_v46  ;;  %v9538_v29 = vpack.c.bf16 %v6016_v55, %v19427_v3  ;;  %v1866_v36 = vpop.f32.mrf.mxu1 }
 0x3b3   : > { %19421 = vst [vmem:[#allocation21_spill] sm:$0xff] %v14499_v37  ;;  %v3603_v49 = vsel %vm14507_vm6, %v3600_v30, %v3597_v52  ;;  %v9455_v53 = vpack.c.bf16 %v14501_v45, %v14499_v37  ;;  %v3606_v48 = vmul.f32 0.6931472, %v10372_v38  ;;  %v1853_v30 = vadd.f32 %v14363_v42, %v14286_v14  ;;  %v14531_v18 = vpop.eup %10373  ;;  %v1673_v38 = vpop.f32.mrf.mxu0 }
 0x3b4   : > { %8102 = vmatprep.mubr.bf16.mxu1 %v6184_v61  ;;  %v3071_v40 = vmul.f32 1.442695, %v2794_v25  ;;  %v2796_v24 = vsub.f32 0.0, %v2540_v47  ;;  %v19429_v28 = vpack.c.bf16 %v19427_v3, %v19428_v5  ;;  %v5775_v57 = vmul.f32 0.6931472, %v10368_v41  ;;  %6954 = vst [vmem:[%s11758_s29 + $0x2a8] sm:$0xff] %v9538_v29 }
 0x3b5   : > { %6871 = vst [vmem:[%s11758_s29 + $0x10] sm:$0xff] %v9455_v53  ;;  %v3612_v52 = vsel %vm3611_vm7, %v3609_v6, %v3606_v48  ;;  %v5797_v46 = vand.u32 2147483647, %v14410_v8  ;;  %v19430_v55 = vmax.f32 %v14227_v13, 0.0  ;;  %v14542_v25 = vadd.f32 -4.0, %v1660_v0  ;;  %v19441_v29 = vld [vmem:[#allocation68_spill] sm:$0xff]  ;;  %v1675_v42 = vpop.f32.mrf.mxu0 }
 0x3b6   : > { %8103 = vmatmul.mubr.bf16.gmra.mxu1 %v19429_v28  ;;  %v14538_v15 = vadd.f32 %v3612_v52, %v2268_v26  ;;  %10381 = vpow2.f32 %v3071_v40  ;;  %v3075_v47 = vmul.f32 1.442695, %v2796_v24  ;;  %v5778_v59 = vmul.f32 %v14401_v9, %v14453_v19  ;;  %v14551_v61 = vpop.eup %10375 }
 0x3b7   : > { %v14536_v60 = vadd.f32 %v3603_v49, %v19430_v55  ;;  %19433 = vst [vmem:[#allocation65_spill] sm:$0xff] %v14542_v25  ;;  %10383 = vpow2.f32 %v14414_v58  ;;  %v19435_v0 = vand.u32 2147483647, %v14401_v9  ;;  %v5795_v53 = vadd.f32 1.0, %v5794_v35  ;;  %v9848_v55 = vld [vmem:[#allocation8 + $0x3b0] ss:$8 sps:$4 sm:$0xff]  }
 0x3b8   : > { %19432 = vst [vmem:[#allocation58_spill] sm:$0xff] %v14538_v15  ;;  %v14559_v48 = vadd.f32 -4.0, %v1853_v30  ;;  %10385 = vpow2.f32 %v3075_v47  ;;  %vm14563_vm9 = vcmp.lt.f32.partialorder %v5797_v46, 0.0004427343  ;;  %v1674_v9 = vadd.f32 %v1673_v38, %v14173_v16  ;;  %v14570_v6 = vpop.eup %10377  ;;  %v9850_v30 = vld [vmem:[#allocation8 + $0x3b4] ss:$8 sps:$4 sm:$0xff]  }
 0x3b9   : > { %19431 = vst [vmem:[#allocation74_spill] sm:$0xff] %v14536_v60  ;;  %v9456_v13 = vpack.c.bf16 %v14538_v15, %v14536_v60  ;;  %vm14555_vm8 = vcmp.lt.f32.partialorder %v19435_v0, 0.0004427343  ;;  %10387 = vpow2.f32 %v14421_v34  ;;  %v3649_v26 = vadd.f32 1.0, %v14531_v18  ;;  %8380 = vmatprep.subr.bf16.mxu1 %v9850_v30  ;;  %v9853_v30 = vld [vmem:[#allocation8 + $0x2a4] ss:$8 sps:$4 sm:$0xff]  }
 0x3ba   : > { %19438 = vst [vmem:[#allocation45_spill] sm:$0xff] %v14559_v48  ;;  %v5781_v19 = vsel %vm14555_vm8, %v5778_v59, %v5775_v57  ;;  %v2530_v35 = vand.u32 2147483647, %v14542_v25  ;;  %v1867_v3 = vadd.f32 %v1866_v36, %v14182_v31  ;;  %v5206_v52 = vadd.f32 1.0, %v19441_v29  ;;  %8381 = vmatpush2.bf16.msra.mxu1 %v9848_v55  ;;  %8189 = vmatprep.subr.bf16.mxu0 %v9853_v30 }
 0x3bb   : > { %6872 = vst [vmem:[%s11758_s29 + $0x18] sm:$0xff] %v9456_v13  ;;  %v5793_v40 = vmul.f32 0.6931472, %v10370_v39  ;;  %v3721_v24 = vadd.f32 1.0, %v14551_v61  ;;  %v1668_v34 = vadd.f32 %v14488_v11, %v14173_v16  ;;  %v14579_v5 = vadd.f32 -4.0, %v1674_v9 }
 0x3bc   : > { %v5796_v28 = vmul.f32 %v14410_v8, %v5795_v53  ;;  %v2532_v57 = vand.u32 2147483647, %v14559_v48  ;;  %v14583_v46 = vadd.f32 -4.0, %v1867_v3  ;;  %10389 = vlog2.f32 %v5206_v52 }
 0x3bd   : > { %v19442_v47 = vmax.f32 %v14204_v54, 0.0  ;;  %v3652_v39 = vmul.f32 -0.5, %v14531_v18  ;;  %v3739_v59 = vadd.f32 1.0, %v14570_v6  ;;  %v1861_v11 = vadd.f32 %v14492_v21, %v14182_v31 }
 0x3be   : > { %10391 = vlog2.f32 %v3649_v26  ;;  %v2786_v8 = vsub.f32 0.0, %v2530_v35  ;;  %v2553_v13 = vand.u32 2147483647, %v14579_v5  ;;  %v2555_v36 = vand.u32 2147483647, %v14583_v46 }
 0x3bf   : > { %v14587_v38 = vadd.f32 %v5781_v19, %v19442_v47  ;;  %v5799_v0 = vsel %vm14563_vm9, %v5796_v28, %v5793_v40  ;;  %10393 = vlog2.f32 %v3721_v24  ;;  %v14598_v49 = vadd.f32 -4.0, %v1668_v34  ;;  %v14600_v53 = vpop.eup %10379  ;;  %v9851_v35 = vld [vmem:[#allocation8 + $0x2a0] ss:$8 sps:$4 sm:$0xff]  }
 0x3c0   : > { %v2788_v26 = vsub.f32 0.0, %v2532_v57  ;;  %v3653_v3 = vadd.f32 1.0, %v3652_v39  ;;  %10395 = vlog2.f32 %v3739_v59  ;;  %v14605_v52 = vadd.f32 -4.0, %v1861_v11  ;;  %8190 = vmatpush2.bf16.msra.mxu0 %v9851_v35 }
 0x3c1   : > { %19443 = vst [vmem:[#allocation48_spill] sm:$0xff] %v14587_v38  ;;  %v2809_v58 = vsub.f32 0.0, %v2553_v13  ;;  %v19444_v24 = vmax.f32 %v14214_v43, 0.0  ;;  %v14613_v28 = vmul.f32 1.442695, %v2786_v8  ;;  %v2811_v55 = vsub.f32 0.0, %v2555_v36 }
 0x3c2   : > { %v3667_v57 = vadd.f32 1.0, %v14600_v53  ;;  %v2545_v59 = vand.u32 2147483647, %v14598_v49  ;;  %v5209_v11 = vmul.f32 -0.5, %v19441_v29  ;;  %v3655_v43 = vand.u32 2147483647, %v14531_v18 }
 0x3c3   : > { %v14611_v34 = vadd.f32 %v5799_v0, %v19444_v24  ;;  %v14615_v47 = vpop.eup %10381  ;;  %v14624_v0 = vmul.f32 1.442695, %v2788_v26  ;;  %v14631_v9 = vmul.f32 %v14531_v18, %v3653_v3  ;;  %v14634_v54 = vmul.f32 -0.5, %v14600_v53  ;;  %v19448_v18 = vld [vmem:[#allocation26_spill] sm:$0xff] }
 0x3c4   : > { %v14621_v13 = vpop.eup %10383  ;;  %v3730_v36 = vadd.f32 1.0, %v14615_v47  ;;  %v2547_v30 = vand.u32 2147483647, %v14605_v52  ;;  %v3101_v40 = vmul.f32 1.442695, %v2809_v58  ;;  %v3724_v26 = vmul.f32 -0.5, %v14551_v61 }
 0x3c5   : > { %19445 = vst [vmem:[#allocation66_spill] sm:$0xff] %v14611_v34  ;;  %19446 = vst [vmem:[#allocation40_spill] sm:$0xff] %v14621_v13  ;;  %v14628_v24 = vpop.eup %10385  ;;  %v3105_v35 = vmul.f32 1.442695, %v2811_v55  ;;  %v2801_v19 = vsub.f32 0.0, %v2545_v59  ;;  %v5210_v8 = vadd.f32 1.0, %v5209_v11  ;;  %v1676_v58 = vadd.f32 %v1675_v42, %v14261_v4  ;;  %v1868_v11 = vpop.f32.mrf.mxu1 }
 0x3c6   : > { %v14637_v41 = vpop.eup %10387  ;;  %10397 = vlog2.f32 %v3730_v36  ;;  %v3748_v21 = vadd.f32 1.0, %v14628_v24  ;;  %v5224_v3 = vadd.f32 1.0, %v19448_v18  ;;  %v3727_v39 = vand.u32 2147483647, %v14551_v61 }
 0x3c7   : > { %19447 = vst [vmem:[#allocation41_spill] sm:$0xff] %v14637_v41  ;;  %10399 = vlog2.f32 %v3667_v57  ;;  %v5212_v15 = vand.u32 2147483647, %v19441_v29  ;;  %v3742_v25 = vmul.f32 -0.5, %v14570_v6  ;;  %v2803_v12 = vsub.f32 0.0, %v2547_v30  ;;  %v14696_v63 = vpop.f32.mrf.mxu1 }
 0x3c8   : > { %10401 = vlog2.f32 %v3748_v21  ;;  %v3725_v55 = vadd.f32 1.0, %v3724_v26  ;;  %v3745_v57 = vand.u32 2147483647, %v14570_v6  ;;  %v3085_v21 = vmul.f32 1.442695, %v2801_v19 }
 0x3c9   : > { %v10390_v45 = vpop.eup %10389  ;;  %10403 = vpow2.f32 %v3101_v40  ;;  %v5211_v22 = vmul.f32 %v19441_v29, %v5210_v8  ;;  %vm14650_vm10 = vcmp.lt.f32.partialorder %v3727_v39, 0.0004427343  ;;  %v3733_v40 = vmul.f32 -0.5, %v14615_v47  ;;  %v19451_v8 = vld [vmem:[#allocation53_spill] sm:$0xff]  ;;  %v9856_v41 = vld [vmem:[#allocation8 + $0x3a4] ss:$8 sps:$4 sm:$0xff]  }
 0x3ca   : > { %10405 = vpow2.f32 %v3105_v35  ;;  %v5208_v38 = vmul.f32 0.6931472, %v10390_v45  ;;  %vm5213_vm11 = vcmp.lt.f32.partialorder %v5212_v15, 0.0004427343  ;;  %v14655_v30 = vadd.f32 -4.0, %v1676_v58  ;;  %v19454_v58 = vld [vmem:[#allocation22_spill] sm:$0xff]  ;;  %8382 = vmatprep.subr.bf16.mxu1 %v9856_v41 }
 0x3cb   : > { %v10392_v56 = vpop.eup %10391  ;;  %10407 = vlog2.f32 %v5224_v3  ;;  %v3743_v26 = vadd.f32 1.0, %v3742_v25  ;;  %v3089_v59 = vmul.f32 1.442695, %v2803_v12  ;;  %v1869_v36 = vadd.f32 %v1868_v11, %v14286_v14  ;;  %v19453_v12 = vld [vmem:[#allocation51_spill] sm:$0xff] }
 0x3cc   : > { %v10394_v42 = vpop.eup %10393  ;;  %v5214_v35 = vsel %vm5213_vm11, %v5211_v22, %v5208_v38  ;;  %v14658_v45 = vmul.f32 0.6931472, %v10392_v56  ;;  %v3751_v29 = vmul.f32 -0.5, %v14628_v24  ;;  %v19452_v39 = vmax.f32 %v19451_v8, 0.0 }
 0x3cd   : > { %v10396_v19 = vpop.eup %10395  ;;  %v2554_v13 = vand.u32 2147483647, %v14655_v30  ;;  %v3723_v62 = vmul.f32 0.6931472, %v10394_v42  ;;  %10409 = vpow2.f32 %v3085_v21  ;;  %v5227_v15 = vmul.f32 -0.5, %v19448_v18 }
 0x3ce   : > { %v6030_v3 = vadd.f32 %v5214_v35, %v19452_v39  ;;  %v14665_v25 = vadd.f32 -4.0, %v1869_v36  ;;  %v3734_v22 = vadd.f32 1.0, %v3733_v40  ;;  %vm14669_vm12 = vcmp.lt.f32.partialorder %v3655_v43, 0.0004427343  ;;  %v9854_v36 = vld [vmem:[#allocation8 + $0x3a0] ss:$8 sps:$4 sm:$0xff]  }
 0x3cf   : > { %v2810_v11 = vsub.f32 0.0, %v2554_v13  ;;  %v3741_v35 = vmul.f32 0.6931472, %v10396_v19  ;;  %v3736_v8 = vand.u32 2147483647, %v14615_v47  ;;  %10411 = vpow2.f32 %v3089_v59  ;;  %8383 = vmatpush2.bf16.msra.mxu1 %v9854_v36 }
 0x3d0   : > { %v6190_v38 = vpack.c.bf16 %v6030_v3, %v19453_v12  ;;  %v9545_v56 = vpack.c.bf16 %v6030_v3, %v19454_v58  ;;  %v2556_v21 = vand.u32 2147483647, %v14665_v25  ;;  %v3726_v42 = vmul.f32 %v14551_v61, %v3725_v55  ;;  %v14685_v12 = vpop.f32.mrf.mxu0  ;;  %v19459_v61 = vld [vmem:[#allocation46_spill] sm:$0xff] }
 0x3d1   : > { %vm14676_vm13 = vcmp.lt.f32.partialorder %v3745_v57, 0.0004427343  ;;  %v3752_v40 = vadd.f32 1.0, %v3751_v29  ;;  %v3103_v13 = vmul.f32 1.442695, %v2810_v11  ;;  %v3744_v39 = vmul.f32 %v14570_v6, %v3743_v26 }
 0x3d2   : > { %6961 = vst [vmem:[%s11758_s29 + $0x2e0] sm:$0xff] %v9545_v56  ;;  %7919 = vmatprep.mubr.bf16.mxu0 %v6190_v38  ;;  %v3754_v19 = vand.u32 2147483647, %v14628_v24  ;;  %v1670_v59 = vadd.f32 %v14519_v7, %v14261_v4  ;;  %v2812_v3 = vsub.f32 0.0, %v2556_v21  ;;  %v19460_v55 = vpack.c.bf16 %v19454_v58, %v19459_v61 }
 0x3d3   : > { %v10398_v43 = vpop.eup %10397  ;;  %v3729_v29 = vsel %vm14650_vm10, %v3726_v42, %v3723_v62  ;;  %v3735_v56 = vmul.f32 %v14615_v47, %v3734_v22  ;;  %v5228_v6 = vadd.f32 1.0, %v5227_v15  ;;  %v3747_v11 = vsel %vm14676_vm13, %v3744_v39, %v3741_v35  ;;  %v14711_v42 = vpop.f32.mrf.mxu0 }
 0x3d4   : > { %7920 = vmatmul.mubr.bf16.gmra.mxu0 %v19460_v55  ;;  %v10400_v57 = vpop.eup %10399  ;;  %v3732_v38 = vmul.f32 0.6931472, %v10398_v43  ;;  %vm3737_vm14 = vcmp.lt.f32.partialorder %v3736_v8, 0.0004427343  ;;  %v5230_v7 = vand.u32 2147483647, %v19448_v18  ;;  %v3753_v62 = vmul.f32 %v14628_v24, %v3752_v40 }
 0x3d5   : > { %v10402_v26 = vpop.eup %10401  ;;  %v3107_v21 = vmul.f32 1.442695, %v2812_v3  ;;  %10413 = vpow2.f32 %v3103_v13  ;;  %v19461_v15 = vmax.f32 %v14417_v1, 0.0  ;;  %v19463_v35 = vmax.f32 %v14470_v10, 0.0 }
 0x3d6   : > { %v14698_v58 = vpop.eup %10403  ;;  %v3738_v61 = vsel %vm3737_vm14, %v3735_v56, %v3732_v38  ;;  %v3750_v55 = vmul.f32 0.6931472, %v10402_v26  ;;  %vm3755_vm15 = vcmp.lt.f32.partialorder %v3754_v19, 0.0004427343  ;;  %v19465_v24 = vmax.f32 %v14428_v17, 0.0  ;;  %v14727_v17 = vpop.f32.mrf.mxu1 }
 0x3d7   : > { %v14701_v47 = vpop.eup %10405  ;;  %v14705_v22 = vadd.f32 %v3729_v29, %v19461_v15  ;;  %v14709_v8 = vadd.f32 %v3738_v61, %v19463_v35  ;;  %10415 = vpow2.f32 %v3107_v21  ;;  %v14717_v39 = vadd.f32 -4.0, %v1670_v59  ;;  %v1683_v61 = vpop.f32.mrf.mxu0 }
 0x3d8   : > { %v10408_v43 = vpop.eup %10407  ;;  %v14715_v40 = vadd.f32 %v3747_v11, %v19465_v24  ;;  %v3756_v13 = vsel %vm3755_vm15, %v3753_v62, %v3750_v55  ;;  %v5229_v1 = vmul.f32 %v19448_v18, %v5228_v6  ;;  %v19468_v19 = vmax.f32 %v14478_v27, 0.0  ;;  %v9859_v27 = vld [vmem:[#allocation8 + $0x294] ss:$8 sps:$4 sm:$0xff]   ;;  %v9857_v55 = vld [vmem:[#allocation8 + $0x290] ss:$8 sps:$4 sm:$0xff]   ;;  %v1876_v36 = vpop.f32.mrf.mxu1 }
 0x3d9   : > { %19462 = vst [vmem:[#allocation59_spill] sm:$0xff] %v14705_v22  ;;  %19464 = vst [vmem:[#allocation38_spill] sm:$0xff] %v14709_v8  ;;  %v9463_v10 = vpack.c.bf16 %v14709_v8, %v14705_v22  ;;  %v3865_v29 = vadd.f32 1.0, %v14698_v58  ;;  %v5226_v38 = vmul.f32 0.6931472, %v10408_v43  ;;  %v3657_v18 = vsel %vm14669_vm12, %v14631_v9, %v14658_v45  ;;  %v19470_v45 = vld [vmem:[#allocation63_spill] sm:$0xff]  ;;  %8191 = vmatprep.subr.bf16.mxu0 %v9859_v27 }
 0x3da   : > { %19466 = vst [vmem:[#allocation68_spill] sm:$0xff] %v14715_v40  ;;  %19467 = vst [vmem:[#allocation26_spill] sm:$0xff] %v14717_v39  ;;  %v14724_v3 = vadd.f32 %v3756_v13, %v19468_v19  ;;  %v3883_v56 = vadd.f32 1.0, %v14701_v47  ;;  %vm5231_vm0 = vcmp.lt.f32.partialorder %v5230_v7, 0.0004427343  ;;  %v3671_v6 = vadd.f32 1.0, %v14634_v54  ;;  %v14742_v62 = vpop.eup %10409  ;;  %8192 = vmatpush2.bf16.msra.mxu0 %v9857_v55 }
 0x3db   : > { %6879 = vst [vmem:[%s11758_s29 + $0x50] sm:$0xff] %v9463_v10  ;;  %v1863_v11 = vadd.f32 %v14523_v51, %v14286_v14  ;;  %v5232_v21 = vsel %vm5231_vm0, %v5229_v1, %v5226_v38  ;;  %v3673_v33 = vand.u32 2147483647, %v14600_v53  ;;  %10417 = vpow2.f32 %v14613_v28  ;;  %v19474_v43 = vld [vmem:[#allocation71_spill] sm:$0xff]  ;;  %v19475_v13 = vld [vmem:[#allocation36_spill] sm:$0xff] }
 0x3dc   : > { %19469 = vst [vmem:[#allocation53_spill] sm:$0xff] %v14724_v3  ;;  %v9464_v26 = vpack.c.bf16 %v14724_v3, %v14715_v40  ;;  %v19471_v54 = vmax.f32 %v19470_v45, 0.0  ;;  %v19472_v41 = vmax.f32 %v14386_v2, 0.0  ;;  %v14753_v51 = vmul.f32 0.6931472, %v10400_v57  ;;  %v14757_v28 = vpop.eup %10411 }
 0x3dd   : > { %v2546_v35 = vand.u32 2147483647, %v14717_v39  ;;  %10419 = vlog2.f32 %v3865_v29  ;;  %v1684_v2 = vadd.f32 %v1683_v61, %v14173_v16  ;;  %v14763_v10 = vmul.f32 %v14600_v53, %v3671_v6 }
 0x3de   : > { %v6032_v7 = vadd.f32 %v5232_v21, %v19471_v54  ;;  %v14751_v15 = vadd.f32 %v3657_v18, %v19472_v41  ;;  %6880 = vst [vmem:[%s11758_s29 + $0x58] sm:$0xff] %v9464_v26  ;;  %10421 = vlog2.f32 %v3883_v56  ;;  %v14766_v57 = vadd.f32 -4.0, %v1863_v11  ;;  %v19477_v56 = vld [vmem:[#allocation23_spill] sm:$0xff] }
 0x3df   : > { %10423 = vpow2.f32 %v14624_v0  ;;  %v1678_v19 = vadd.f32 %v14685_v12, %v14173_v16  ;;  %v3793_v29 = vadd.f32 1.0, %v14742_v62  ;;  %v14772_v38 = vadd.f32 -4.0, %v1684_v2  ;;  %v19480_v12 = vld [vmem:[#allocation49_spill] sm:$0xff] }
 0x3e0   : > { %19473 = vst [vmem:[#allocation51_spill] sm:$0xff] %v14751_v15  ;;  %v6192_v24 = vpack.c.bf16 %v6032_v7, %v19474_v43  ;;  %v9546_v1 = vpack.c.bf16 %v6032_v7, %v19475_v13  ;;  %19476 = vst [vmem:[#allocation22_spill] sm:$0xff] %v14766_v57  ;;  %v1877_v18 = vadd.f32 %v1876_v36, %v14182_v31  ;;  %v5350_v27 = vadd.f32 1.0, %v19477_v56 }
 0x3e1   : > { %vm14776_vm1 = vcmp.lt.f32.partialorder %v3673_v33, 0.0004427343  ;;  %v3811_v6 = vadd.f32 1.0, %v14757_v28  ;;  %v2802_v26 = vsub.f32 0.0, %v2546_v35  ;;  %v19481_v11 = vpack.c.bf16 %v19475_v13, %v19480_v12 }
 0x3e2   : > { %6962 = vst [vmem:[%s11758_s29 + $0x2e8] sm:$0xff] %v9546_v1  ;;  %8112 = vmatprep.mubr.bf16.mxu1 %v6192_v24  ;;  %10425 = vlog2.f32 %v5350_v27  ;;  %v14792_v33 = vpop.eup %10413  ;;  %v14796_v7 = vadd.f32 -4.0, %v1678_v19  ;;  %v2569_v41 = vand.u32 2147483647, %v14772_v38  ;;  %v14803_v24 = vadd.f32 -4.0, %v1877_v18 }
 0x3e3   : > { %8113 = vmatmul.mubr.bf16.gmra.mxu1 %v19481_v11  ;;  %10427 = vlog2.f32 %v3793_v29  ;;  %v3874_v43 = vadd.f32 1.0, %v14792_v33  ;;  %v14805_v13 = vmul.f32 1.442695, %v2802_v26  ;;  %v1871_v2 = vadd.f32 %v14696_v63, %v14182_v31  ;;  %v1685_v11 = vpop.f32.mrf.mxu0 }
 0x3e4   : > { %v14799_v35 = vpop.eup %10415  ;;  %10429 = vlog2.f32 %v3811_v6  ;;  %v3868_v19 = vmul.f32 -0.5, %v14698_v58  ;;  %v3871_v27 = vand.u32 2147483647, %v14698_v58  ;;  %v3886_v29 = vmul.f32 -0.5, %v14701_v47 }
 0x3e5   : > { %v3892_v1 = vadd.f32 1.0, %v14799_v35  ;;  %10431 = vlog2.f32 %v3874_v43  ;;  %v14814_v12 = vmul.f32 -0.5, %v14742_v62  ;;  %v2561_v18 = vand.u32 2147483647, %v14796_v7 }
 0x3e6   : > { %v2825_v6 = vsub.f32 0.0, %v2569_v41  ;;  %v3889_v26 = vand.u32 2147483647, %v14701_v47  ;;  %v2571_v63 = vand.u32 2147483647, %v14803_v24  ;;  %v5353_v21 = vmul.f32 -0.5, %v19477_v56 }
 0x3e7   : > { %10433 = vlog2.f32 %v3892_v1  ;;  %v14824_v43 = vadd.f32 -4.0, %v1871_v2  ;;  %v14828_v1 = vadd.f32 %v14711_v42, %v14261_v4  ;;  %v3869_v0 = vadd.f32 1.0, %v3868_v19  ;;  %v19485_v2 = vld [vmem:[#allocation42_spill] sm:$0xff] }
 0x3e8   : > { %v14821_v9 = vpop.eup %10417  ;;  %v3133_v55 = vmul.f32 1.442695, %v2825_v6  ;;  %vm14830_vm2 = vcmp.lt.f32.partialorder %v3871_v27, 0.0004427343  ;;  %v3887_v61 = vadd.f32 1.0, %v3886_v29  ;;  %v2827_v36 = vsub.f32 0.0, %v2571_v63 }
 0x3e9   : > { %19482 = vst [vmem:[#allocation46_spill] sm:$0xff] %v14821_v9  ;;  %v3877_v3 = vmul.f32 -0.5, %v14792_v33  ;;  %v2817_v59 = vsub.f32 0.0, %v2561_v18  ;;  %v5368_v8 = vadd.f32 1.0, %v19485_v2  ;;  %vm14838_vm3 = vcmp.lt.f32.partialorder %v3889_v26, 0.0004427343 }
 0x3ea   : > { %v10420_v41 = vpop.eup %10419  ;;  %10435 = vpow2.f32 %v3133_v55  ;;  %v3895_v19 = vmul.f32 -0.5, %v14799_v35  ;;  %v3137_v27 = vmul.f32 1.442695, %v2827_v36  ;;  %v5354_v6 = vadd.f32 1.0, %v5353_v21 }
 0x3eb   : > { %v10422_v54 = vpop.eup %10421  ;;  %v2563_v29 = vand.u32 2147483647, %v14824_v43  ;;  %v5356_v63 = vand.u32 2147483647, %v19477_v56  ;;  %10437 = vlog2.f32 %v5368_v8  ;;  %v1686_v18 = vadd.f32 %v1685_v11, %v14261_v4 }
 0x3ec   : > { %v14836_v37 = vpop.eup %10423  ;;  %v3867_v55 = vmul.f32 0.6931472, %v10420_v41  ;;  %v3870_v48 = vmul.f32 %v14698_v58, %v3869_v0  ;;  %v3885_v15 = vmul.f32 0.6931472, %v10422_v54  ;;  %v3888_v26 = vmul.f32 %v14701_v47, %v3887_v61 }
 0x3ed   : > { %19486 = vst [vmem:[#allocation63_spill] sm:$0xff] %v14836_v37  ;;  %v1878_v37 = vpop.f32.mrf.mxu1  ;;  %v3878_v23 = vadd.f32 1.0, %v3877_v3  ;;  %v3880_v34 = vand.u32 2147483647, %v14792_v33  ;;  %v3117_v36 = vmul.f32 1.442695, %v2817_v59  ;;  %10439 = vpow2.f32 %v3137_v27 }
 0x3ee   : > { %v14849_v21 = vadd.f32 -4.0, %v1686_v18  ;;  %v3896_v32 = vadd.f32 1.0, %v3895_v19  ;;  %v5355_v8 = vmul.f32 %v19477_v56, %v5354_v6  ;;  %v2819_v41 = vsub.f32 0.0, %v2563_v29  ;;  %v19491_v19 = vld [vmem:[#allocation61_spill] sm:$0xff] }
 0x3ef   : > { %v10426_v9 = vpop.eup %10425  ;;  %vm5357_vm4 = vcmp.lt.f32.partialorder %v5356_v63, 0.0004427343  ;;  %v1879_v47 = vadd.f32 %v1878_v37, %v14286_v14  ;;  %v3873_v3 = vsel %vm14830_vm2, %v3870_v48, %v3867_v55  ;;  %v3891_v59 = vsel %vm14838_vm3, %v3888_v26, %v3885_v15  ;;  %v19494_v55 = vld [vmem:[#allocation73_spill] sm:$0xff] }
 0x3f0   : > { %v5352_v44 = vmul.f32 0.6931472, %v10426_v9  ;;  %v10428_v11 = vpop.eup %10427  ;;  %v2570_v58 = vand.u32 2147483647, %v14849_v21  ;;  %v3898_v61 = vand.u32 2147483647, %v14799_v35  ;;  %v3879_v45 = vmul.f32 %v14792_v33, %v3878_v23 }
 0x3f1   : > { %v14854_v0 = vpop.eup %10429  ;;  %vm14861_vm5 = vcmp.lt.f32.partialorder %v3880_v34, 0.0004427343  ;;  %v19492_v27 = vmax.f32 %v19491_v19, 0.0  ;;  %v14867_v29 = vadd.f32 -4.0, %v1879_v47  ;;  %v3897_v15 = vmul.f32 %v14799_v35, %v3896_v32  ;;  %v19493_v34 = vld [vmem:[#allocation62_spill] sm:$0xff]  ;;  %v1687_v19 = vpop.f32.mrf.mxu0 }
 0x3f2   : > { %v5358_v9 = vsel %vm5357_vm4, %v5355_v8, %v5352_v44  ;;  %v10432_v54 = vpop.eup %10431  ;;  %v2826_v37 = vsub.f32 0.0, %v2570_v58  ;;  %v5371_v44 = vmul.f32 -0.5, %v19485_v2  ;;  %vm3899_vm6 = vcmp.lt.f32.partialorder %v3898_v61, 0.0004427343 }
 0x3f3   : > { %v6046_v6 = vadd.f32 %v5358_v9, %v19492_v27  ;;  %v3876_v48 = vmul.f32 0.6931472, %v10432_v54  ;;  %v3121_v47 = vmul.f32 1.442695, %v2819_v41  ;;  %v2572_v9 = vand.u32 2147483647, %v14867_v29 }
 0x3f4   : > { %v10434_v63 = vpop.eup %10433  ;;  %v3135_v8 = vmul.f32 1.442695, %v2826_v37  ;;  %v19495_v54 = vmax.f32 %v14579_v5, 0.0  ;;  %v19496_v32 = vmax.f32 %v14655_v30, 0.0  ;;  %v19498_v61 = vmax.f32 %v14583_v46, 0.0  ;;  %v19502_v37 = vld [vmem:[#allocation64_spill] sm:$0xff] }
 0x3f5   : > { %v3894_v42 = vmul.f32 0.6931472, %v10434_v63  ;;  %v6198_v18 = vpack.c.bf16 %v6046_v6, %v19493_v34  ;;  %v9553_v26 = vpack.c.bf16 %v6046_v6, %v19494_v55  ;;  %v3882_v58 = vsel %vm14861_vm5, %v3879_v45, %v3876_v48  ;;  %v14896_v6 = vpop.f32.mrf.mxu1 }
 0x3f6   : > { %v14879_v23 = vadd.f32 %v3873_v3, %v19495_v54  ;;  %v14883_v33 = vadd.f32 %v3882_v58, %v19496_v32  ;;  %10441 = vpow2.f32 %v3135_v8  ;;  %v14890_v41 = vadd.f32 %v3891_v59, %v19498_v61  ;;  %v9860_v58 = vld [vmem:[#allocation8 + $0x390] ss:$8 sps:$4 sm:$0xff]  }
 0x3f7   : > { %v3900_v35 = vsel %vm3899_vm6, %v3897_v15, %v3894_v42  ;;  %6969 = vst [vmem:[%s11758_s29 + $0x320] sm:$0xff] %v9553_v26  ;;  %7929 = vmatprep.mubr.bf16.mxu0 %v6198_v18  ;;  %v14886_v27 = vpop.eup %10435  ;;  %v19500_v56 = vmax.f32 %v14665_v25, 0.0  ;;  %v5372_v3 = vadd.f32 1.0, %v5371_v44  ;;  %v2828_v30 = vsub.f32 0.0, %v2572_v9  ;;  %v9862_v44 = vld [vmem:[#allocation8 + $0x394] ss:$8 sps:$4 sm:$0xff]  }
 0x3f8   : > { %19497 = vst [vmem:[#allocation71_spill] sm:$0xff] %v14883_v33  ;;  %19499 = vst [vmem:[#allocation36_spill] sm:$0xff] %v14890_v41  ;;  %v19503_v63 = vpack.c.bf16 %v19494_v55, %v19502_v37  ;;  %v19504_v48 = vmax.f32 %v14431_v20, 0.0  ;;  %v19505_v46 = vsel %vm14776_vm1, %v14763_v10, %v14753_v51  ;;  %v3814_v25 = vmul.f32 -0.5, %v14757_v28  ;;  %v10438_v42 = vpop.eup %10437  ;;  %v14920_v55 = vpop.f32.mrf.mxu0  ;;  %8384 = vmatprep.subr.bf16.mxu1 %v9862_v44  ;;  %v19513_v44 = vld [vmem:[#allocation39_spill] sm:$0xff] }
 0x3f9   : > { %v14894_v5 = vadd.f32 %v3900_v35, %v19500_v56  ;;  %v9471_v45 = vpack.c.bf16 %v14883_v33, %v14879_v23  ;;  %v5374_v15 = vand.u32 2147483647, %v19485_v2  ;;  %v3797_v34 = vadd.f32 1.0, %v14814_v12  ;;  %8385 = vmatpush2.bf16.msra.mxu1 %v9860_v58 }
 0x3fa   : > { %7930 = vmatmul.mubr.bf16.gmra.mxu0 %v19503_v63  ;;  %v14908_v59 = vadd.f32 %v19505_v46, %v19504_v48  ;;  %10443 = vpow2.f32 %v3117_v36  ;;  %v3139_v53 = vmul.f32 1.442695, %v2828_v30  ;;  %v3799_v51 = vand.u32 2147483647, %v14742_v62  ;;  %v14927_v36 = vpop.f32.mrf.mxu1  ;;  %v14929_v9 = vpop.eup %10439  ;;  %v19511_v63 = vld [vmem:[#allocation20_spill] sm:$0xff] }
 0x3fb   : > { %19501 = vst [vmem:[#allocation23_spill] sm:$0xff] %v14894_v5  ;;  %v9472_v20 = vpack.c.bf16 %v14894_v5, %v14890_v41  ;;  %6887 = vst [vmem:[%s11758_s29 + $0x90] sm:$0xff] %v9471_v45  ;;  %10445 = vpow2.f32 %v3121_v47  ;;  %v4009_v10 = vadd.f32 1.0, %v14886_v27  ;;  %v5370_v18 = vmul.f32 0.6931472, %v10438_v42  ;;  %v1693_v46 = vpop.f32.mrf.mxu0 }
 0x3fc   : > { %19506 = vst [vmem:[#allocation49_spill] sm:$0xff] %v14908_v59  ;;  %v3795_v26 = vmul.f32 0.6931472, %v10428_v11  ;;  %v14924_v8 = vadd.f32 -4.0, %v14828_v1  ;;  %v5373_v12 = vmul.f32 %v19485_v2, %v5372_v3  ;;  %10447 = vpow2.f32 %v3139_v53  ;;  %v9865_v11 = vld [vmem:[#allocation8 + $0x284] ss:$8 sps:$4 sm:$0xff]  }
 0x3fd   : > { %6888 = vst [vmem:[%s11758_s29 + $0x98] sm:$0xff] %v9472_v20  ;;  %v3815_v47 = vadd.f32 1.0, %v3814_v25  ;;  %v19508_v54 = vand.u32 2147483647, %v14766_v57  ;;  %vm5375_vm7 = vcmp.lt.f32.partialorder %v5374_v15, 0.0004427343  ;;  %v1688_v35 = vadd.f32 %v1687_v19, %v14173_v16  ;;  %8193 = vmatprep.subr.bf16.mxu0 %v9865_v11  ;;  %v1886_v15 = vpop.f32.mrf.mxu1 }
 0x3fe   : > { %19507 = vst [vmem:[#allocation42_spill] sm:$0xff] %v14924_v8  ;;  %v3798_v61 = vmul.f32 %v14742_v62, %v3797_v34  ;;  %v3817_v1 = vand.u32 2147483647, %v14757_v28  ;;  %v1873_v2 = vadd.f32 %v14727_v17, %v14286_v14  ;;  %v5376_v56 = vsel %vm5375_vm7, %v5373_v12, %v5370_v18  ;;  %v9863_v3 = vld [vmem:[#allocation8 + $0x280] ss:$8 sps:$4 sm:$0xff]  }
 0x3ff   : > { %v2804_v32 = vsub.f32 0.0, %v19508_v54  ;;  %vm14938_vm8 = vcmp.lt.f32.partialorder %v3799_v51, 0.0004427343  ;;  %v3813_v37 = vmul.f32 0.6931472, %v14854_v0  ;;  %10449 = vlog2.f32 %v4009_v10  ;;  %8194 = vmatpush2.bf16.msra.mxu0 %v9863_v3  ;;  %v19514_v34 = vld [vmem:[#allocation35_spill] sm:$0xff] }
 0x400   : > { %v19512_v19 = vmax.f32 %v19511_v63, 0.0  ;;  %v3801_v17 = vsel %vm14938_vm8, %v3798_v61, %v3795_v26  ;;  %v2562_v25 = vand.u32 2147483647, %v14924_v8  ;;  %v4027_v45 = vadd.f32 1.0, %v14929_v9 }
 0x401   : > { %v3816_v0 = vmul.f32 %v14757_v28, %v3815_v47  ;;  %v14954_v53 = vadd.f32 -4.0, %v1688_v35  ;;  %vm14956_vm9 = vcmp.lt.f32.partialorder %v3817_v1, 0.0004427343  ;;  %v3091_v10 = vmul.f32 1.442695, %v2804_v32 }
 0x402   : > { %v6048_v48 = vadd.f32 %v5376_v56, %v19512_v19  ;;  %v14960_v18 = vadd.f32 -4.0, %v1873_v2  ;;  %v1694_v26 = vadd.f32 %v1693_v46, %v14173_v16  ;;  %v19518_v12 = vmax.f32 %v14598_v49, 0.0  ;;  %v19520_v49 = vld [vmem:[#allocation52_spill] sm:$0xff]  ;;  %v1695_v46 = vpop.f32.mrf.mxu0 }
 0x403   : > { %v3819_v28 = vsel %vm14956_vm9, %v3816_v0, %v3813_v37  ;;  %10451 = vpow2.f32 %v14805_v13  ;;  %v1887_v47 = vadd.f32 %v1886_v15, %v14182_v31  ;;  %v14972_v54 = vpop.eup %10441  ;;  %v2818_v32 = vsub.f32 0.0, %v2562_v25  ;;  %v19522_v56 = vld [vmem:[#allocation24_spill] sm:$0xff] }
 0x404   : > { %v6200_v42 = vpack.c.bf16 %v6048_v48, %v19513_v44  ;;  %v9554_v20 = vpack.c.bf16 %v6048_v48, %v19514_v34  ;;  %19517 = vst [vmem:[#allocation61_spill] sm:$0xff] %v14960_v18  ;;  %v14965_v58 = vadd.f32 %v3801_v17, %v19518_v12  ;;  %10453 = vlog2.f32 %v4027_v45 }
 0x405   : > { %v1881_v35 = vadd.f32 %v14896_v6, %v14182_v31  ;;  %v14976_v11 = vadd.f32 -4.0, %v1694_v26  ;;  %v19521_v61 = vpack.c.bf16 %v19514_v34, %v19520_v49  ;;  %v4018_v1 = vadd.f32 1.0, %v14972_v54 }
 0x406   : > { %19519 = vst [vmem:[#allocation62_spill] sm:$0xff] %v14965_v58  ;;  %6970 = vst [vmem:[%s11758_s29 + $0x328] sm:$0xff] %v9554_v20  ;;  %8122 = vmatprep.mubr.bf16.mxu1 %v6200_v42  ;;  %v2577_v13 = vand.u32 2147483647, %v14954_v53  ;;  %v14983_v2 = vadd.f32 -4.0, %v1887_v47  ;;  %v5494_v3 = vadd.f32 1.0, %v19522_v56  ;;  %10455 = vpow2.f32 %v3091_v10 }
 0x407   : > { %8123 = vmatmul.mubr.bf16.gmra.mxu1 %v19521_v61  ;;  %v2564_v6 = vand.u32 2147483647, %v14960_v18  ;;  %v14989_v63 = vpop.eup %10443  ;;  %v19523_v19 = vmax.f32 %v14605_v52, 0.0  ;;  %10457 = vlog2.f32 %v4018_v1  ;;  %v4012_v15 = vmul.f32 -0.5, %v14886_v27 }
 0x408   : > { %v14997_v25 = vpop.eup %10445  ;;  %v15002_v0 = vadd.f32 -4.0, %v1881_v35  ;;  %v2585_v44 = vand.u32 2147483647, %v14976_v11  ;;  %v15007_v52 = vmul.f32 1.442695, %v2818_v32  ;;  %v2833_v34 = vsub.f32 0.0, %v2577_v13 }
 0x409   : > { %v14993_v48 = vadd.f32 %v3819_v28, %v19523_v19  ;;  %v15005_v42 = vpop.eup %10447  ;;  %v2587_v20 = vand.u32 2147483647, %v14983_v2  ;;  %10459 = vlog2.f32 %v5494_v3  ;;  %v3937_v51 = vadd.f32 1.0, %v14989_v63 }
 0x40a   : > { %v15011_v10 = vsub.f32 0.0, %v2564_v6  ;;  %v4021_v26 = vmul.f32 -0.5, %v14972_v54  ;;  %v4036_v12 = vadd.f32 1.0, %v15005_v42  ;;  %v3955_v28 = vadd.f32 1.0, %v14997_v25 }
 0x40b   : > { %19524 = vst [vmem:[#allocation73_spill] sm:$0xff] %v14993_v48  ;;  %v2313_v47 = vmax.f32 %v14772_v38, 0.0  ;;  %v4015_v35 = vand.u32 2147483647, %v14886_v27  ;;  %v4013_v61 = vadd.f32 1.0, %v4012_v15  ;;  %v2841_v13 = vsub.f32 0.0, %v2585_v44 }
 0x40c   : > { %v10450_v49 = vpop.eup %10449  ;;  %10461 = vlog2.f32 %v4036_v12  ;;  %v2579_v1 = vand.u32 2147483647, %v15002_v0  ;;  %v15021_v3 = vmul.f32 -0.5, %v14989_v63  ;;  %v4030_v6 = vmul.f32 -0.5, %v14929_v9 }
 0x40d   : > { %v3149_v19 = vmul.f32 1.442695, %v2833_v34  ;;  %v2843_v37 = vsub.f32 0.0, %v2587_v20  ;;  %10463 = vlog2.f32 %v3937_v51  ;;  %v4033_v38 = vand.u32 2147483647, %v14929_v9 }
 0x40e   : > { %v4022_v45 = vadd.f32 1.0, %v4021_v26  ;;  %v5497_v30 = vmul.f32 -0.5, %v19522_v56  ;;  %10465 = vlog2.f32 %v3955_v28  ;;  %v4011_v62 = vmul.f32 0.6931472, %v10450_v49  ;;  %v1888_v26 = vpop.f32.mrf.mxu1 }
 0x40f   : > { %vm15026_vm10 = vcmp.lt.f32.partialorder %v4015_v35, 0.0004427343  ;;  %v2314_v44 = vmax.f32 %v14849_v21, 0.0  ;;  %v4014_v17 = vmul.f32 %v14886_v27, %v4013_v61  ;;  %v4039_v34 = vmul.f32 -0.5, %v15005_v42  ;;  %v19528_v35 = vld [vmem:[#allocation34_spill] sm:$0xff] }
 0x410   : > { %v15031_v12 = vpop.eup %10451  ;;  %v2835_v20 = vsub.f32 0.0, %v2579_v1  ;;  %v3165_v51 = vmul.f32 1.442695, %v2841_v13  ;;  %v4031_v5 = vadd.f32 1.0, %v4030_v6  ;;  %10467 = vpow2.f32 %v3149_v19 }
 0x411   : > { %19527 = vst [vmem:[#allocation64_spill] sm:$0xff] %v15031_v12  ;;  %v10454_v32 = vpop.eup %10453  ;;  %v3169_v28 = vmul.f32 1.442695, %v2843_v37  ;;  %v5512_v49 = vadd.f32 1.0, %v19528_v35  ;;  %vm15036_vm11 = vcmp.lt.f32.partialorder %v4033_v38, 0.0004427343  ;;  %v4023_v21 = vmul.f32 %v14972_v54, %v4022_v45 }
 0x412   : > { %v4024_v27 = vand.u32 2147483647, %v14972_v54  ;;  %v5498_v61 = vadd.f32 1.0, %v5497_v30  ;;  %v4017_v1 = vsel %vm15026_vm10, %v4014_v17, %v4011_v62  ;;  %v1696_v13 = vadd.f32 %v1695_v46, %v14261_v4 }
 0x413   : > { %v15042_v57 = vpop.eup %10455  ;;  %10469 = vlog2.f32 %v5512_v49  ;;  %v1889_v37 = vadd.f32 %v1888_v26, %v14286_v14  ;;  %v4029_v19 = vmul.f32 0.6931472, %v10454_v32  ;;  %v4040_v38 = vadd.f32 1.0, %v4039_v34 }
 0x414   : > { %19531 = vst [vmem:[#allocation20_spill] sm:$0xff] %v15042_v57  ;;  %v10458_v6 = vpop.eup %10457  ;;  %10471 = vpow2.f32 %v3165_v51  ;;  %v5500_v22 = vand.u32 2147483647, %v19522_v56  ;;  %v15049_v54 = vadd.f32 -4.0, %v1696_v13  ;;  %v4032_v62 = vmul.f32 %v14929_v9, %v4031_v5  ;;  %v9868_v13 = vld [vmem:[#allocation8 + $0x384] ss:$8 sps:$4 sm:$0xff]  }
 0x415   : > { %v4020_v45 = vmul.f32 0.6931472, %v10458_v6  ;;  %10473 = vpow2.f32 %v3169_v28  ;;  %v15051_v30 = vadd.f32 -4.0, %v1889_v37  ;;  %vm4025_vm12 = vcmp.lt.f32.partialorder %v4024_v27, 0.0004427343  ;;  %8386 = vmatprep.subr.bf16.mxu1 %v9868_v13 }
 0x416   : > { %v10460_v58 = vpop.eup %10459  ;;  %v4042_v46 = vand.u32 2147483647, %v15005_v42  ;;  %v3153_v17 = vmul.f32 1.442695, %v2835_v20  ;;  %v5499_v32 = vmul.f32 %v19522_v56, %v5498_v61  ;;  %v2586_v34 = vand.u32 2147483647, %v15049_v54 }
 0x417   : > { %v4026_v15 = vsel %vm4025_vm12, %v4023_v21, %v4020_v45  ;;  %v5496_v26 = vmul.f32 0.6931472, %v10460_v58  ;;  %v15057_v51 = vadd.f32 %v4017_v1, %v2313_v47  ;;  %vm5501_vm13 = vcmp.lt.f32.partialorder %v5500_v22, 0.0004427343  ;;  %v9866_v56 = vld [vmem:[#allocation8 + $0x380] ss:$8 sps:$4 sm:$0xff]   ;;  %v1697_v1 = vpop.f32.mrf.mxu0 }
 0x418   : > { %v15059_v28 = vadd.f32 %v4026_v15, %v2314_v44  ;;  %v2588_v49 = vand.u32 2147483647, %v15051_v30  ;;  %v4035_v5 = vsel %vm15036_vm11, %v4032_v62, %v4029_v19  ;;  %v4041_v9 = vmul.f32 %v15005_v42, %v4040_v38  ;;  %v19534_v21 = vld [vmem:[#allocation69_spill] sm:$0xff]  ;;  %8387 = vmatpush2.bf16.msra.mxu1 %v9866_v56 }
 0x419   : > { %19532 = vst [vmem:[#allocation39_spill] sm:$0xff] %v15057_v51  ;;  %v10462_v37 = vpop.eup %10461  ;;  %v5502_v20 = vsel %vm5501_vm13, %v5499_v32, %v5496_v26  ;;  %v5515_v58 = vmul.f32 -0.5, %v19528_v35  ;;  %v19535_v22 = vmax.f32 %v19534_v21, 0.0  ;;  %v2842_v61 = vsub.f32 0.0, %v2586_v34 }
 0x41a   : > { %19533 = vst [vmem:[#allocation35_spill] sm:$0xff] %v15059_v28  ;;  %v9479_v47 = vpack.c.bf16 %v15059_v28, %v15057_v51  ;;  %v4038_v44 = vmul.f32 0.6931472, %v10462_v37  ;;  %v10464_v6 = vpop.eup %10463  ;;  %v2316_v33 = vmax.f32 %v14867_v29, 0.0  ;;  %vm4043_vm14 = vcmp.lt.f32.partialorder %v4042_v46, 0.0004427343 }
 0x41b   : > { %v6062_v27 = vadd.f32 %v5502_v20, %v19535_v22  ;;  %10475 = vpow2.f32 %v3153_v17  ;;  %v2844_v42 = vsub.f32 0.0, %v2588_v49  ;;  %v10466_v19 = vpop.eup %10465  ;;  %v3123_v45 = vmul.f32 1.442695, %v15011_v10  ;;  %v19539_v29 = vld [vmem:[#allocation72_spill] sm:$0xff]  ;;  %v1890_v49 = vpop.f32.mrf.mxu1  ;;  %v19540_v22 = vld [vmem:[#allocation67_spill] sm:$0xff] }
 0x41c   : > { %v19536_v62 = vmax.f32 %v14803_v24, 0.0  ;;  %6895 = vst [vmem:[%s11758_s29 + $0xd0] sm:$0xff] %v9479_v47  ;;  %v4044_v26 = vsel %vm4043_vm14, %v4041_v9, %v4038_v44  ;;  %v5516_v34 = vadd.f32 1.0, %v5515_v58  ;;  %v3943_v37 = vand.u32 2147483647, %v14989_v63 }
 0x41d   : > { %v15079_v32 = vadd.f32 %v4044_v26, %v2316_v33  ;;  %v6206_v46 = vpack.c.bf16 %v6062_v27, %v19539_v29  ;;  %v9561_v17 = vpack.c.bf16 %v6062_v27, %v14329_v50  ;;  %v15083_v13 = vpop.eup %10467  ;;  %10477 = vpow2.f32 %v15007_v52  ;;  %v15109_v26 = vpop.f32.mrf.mxu1 }
 0x41e   : > { %v15076_v15 = vadd.f32 %v4035_v5, %v19536_v62  ;;  %v5518_v24 = vand.u32 2147483647, %v19528_v35  ;;  %v3167_v10 = vmul.f32 1.442695, %v2842_v61  ;;  %v15088_v5 = vpop.f32.mrf.mxu0  ;;  %v3941_v9 = vadd.f32 1.0, %v15021_v3 }
 0x41f   : > { %19538 = vst [vmem:[#allocation24_spill] sm:$0xff] %v15079_v32  ;;  %v3958_v20 = vmul.f32 -0.5, %v14997_v25  ;;  %6977 = vst [vmem:[%s11758_s29 + $0x360] sm:$0xff] %v9561_v17  ;;  %7939 = vmatprep.mubr.bf16.mxu0 %v6206_v46  ;;  %v3171_v56 = vmul.f32 1.442695, %v2844_v42  ;;  %10479 = vpow2.f32 %v3123_v45  ;;  %v1690_v21 = vadd.f32 %v14920_v55, %v14261_v4 }
 0x420   : > { %19537 = vst [vmem:[#allocation52_spill] sm:$0xff] %v15076_v15  ;;  %v9480_v58 = vpack.c.bf16 %v15079_v32, %v15076_v15  ;;  %v10470_v47 = vpop.eup %10469  ;;  %v19541_v3 = vpack.c.bf16 %v14329_v50, %v19540_v22  ;;  %v3961_v61 = vand.u32 2147483647, %v14997_v25  ;;  %v1883_v33 = vadd.f32 %v14927_v36, %v14286_v14  ;;  %v1703_v29 = vpop.f32.mrf.mxu0 }
 0x421   : > { %v15102_v27 = vpop.eup %10471  ;;  %v5514_v42 = vmul.f32 0.6931472, %v10470_v47  ;;  %v5517_v62 = vmul.f32 %v19528_v35, %v5516_v34  ;;  %vm15113_vm15 = vcmp.lt.f32.partialorder %v3943_v37, 0.0004427343  ;;  %vm5519_vm0 = vcmp.lt.f32.partialorder %v5518_v24, 0.0004427343 }
 0x422   : > { %7940 = vmatmul.mubr.bf16.gmra.mxu0 %v19541_v3  ;;  %6896 = vst [vmem:[%s11758_s29 + $0xd8] sm:$0xff] %v9480_v58  ;;  %v15111_v45 = vpop.eup %10473  ;;  %10481 = vpow2.f32 %v3167_v10  ;;  %v1698_v50 = vadd.f32 %v1697_v1, %v14173_v16  ;;  %v3942_v46 = vmul.f32 %v14989_v63, %v3941_v9  ;;  %v3959_v17 = vadd.f32 1.0, %v3958_v20  ;;  %v19545_v47 = vld [vmem:[#allocation32_spill] sm:$0xff]  ;;  %v1896_v10 = vpop.f32.mrf.mxu1  ;;  %v19551_v20 = vld [vmem:[#allocation57_spill] sm:$0xff] }
 0x423   : > { %v5520_v36 = vsel %vm5519_vm0, %v5517_v62, %v5514_v42  ;;  %10483 = vpow2.f32 %v3171_v56  ;;  %v3939_v58 = vmul.f32 0.6931472, %v10464_v6  ;;  %v15119_v35 = vadd.f32 -4.0, %v1690_v21  ;;  %v19550_v6 = vld [vmem:[#allocation55_spill] sm:$0xff] }
 0x424   : > { %v4153_v34 = vadd.f32 1.0, %v15102_v27  ;;  %v19546_v37 = vmax.f32 %v19545_v47, 0.0  ;;  %vm15124_vm1 = vcmp.lt.f32.partialorder %v3961_v61, 0.0004427343  ;;  %v15128_v24 = vadd.f32 -4.0, %v1883_v33 }
 0x425   : > { %19544 = vst [vmem:[#allocation34_spill] sm:$0xff] %v15119_v35  ;;  %v4171_v63 = vadd.f32 1.0, %v15111_v45  ;;  %v1704_v1 = vadd.f32 %v1703_v29, %v14173_v16  ;;  %v15134_v21 = vadd.f32 -4.0, %v1698_v50  ;;  %v1891_v42 = vadd.f32 %v1890_v49, %v14182_v31 }
 0x426   : > { %v6064_v22 = vadd.f32 %v5520_v36, %v19546_v37  ;;  %19549 = vst [vmem:[#allocation69_spill] sm:$0xff] %v15128_v24  ;;  %v15137_v61 = vmul.f32 0.6931472, %v10466_v19  ;;  %v15140_v62 = vmul.f32 %v14997_v25, %v3959_v17  ;;  %v19553_v36 = vld [vmem:[#allocation60_spill] sm:$0xff]  ;;  %v3945_v29 = vsel %vm15113_vm15, %v3942_v46, %v3939_v58  ;;  %v19554_v17 = vld [vmem:[#allocation70_spill] sm:$0xff] }
 0x427   : > { %v15142_v33 = vadd.f32 -4.0, %v1704_v1  ;;  %v5638_v47 = vadd.f32 1.0, %v19553_v36  ;;  %10485 = vlog2.f32 %v4153_v34  ;;  %v1897_v19 = vadd.f32 %v1896_v10, %v14182_v31 }
 0x428   : > { %v6208_v9 = vpack.c.bf16 %v6064_v22, %v19550_v6  ;;  %v9562_v56 = vpack.c.bf16 %v6064_v22, %v19551_v20  ;;  %v15145_v37 = vpop.eup %10475  ;;  %v2578_v22 = vand.u32 2147483647, %v15119_v35  ;;  %v4081_v25 = vadd.f32 1.0, %v15083_v13 }
 0x429   : > { %19552 = vst [vmem:[#allocation72_spill] sm:$0xff] %v15142_v33  ;;  %v2580_v50 = vand.u32 2147483647, %v15128_v24  ;;  %10487 = vlog2.f32 %v4171_v63  ;;  %v19555_v1 = vpack.c.bf16 %v19551_v20, %v19554_v17  ;;  %v2593_v55 = vand.u32 2147483647, %v15134_v21 }
 0x42a   : > { %6978 = vst [vmem:[%s11758_s29 + $0x368] sm:$0xff] %v9562_v56  ;;  %8132 = vmatprep.mubr.bf16.mxu1 %v6208_v9  ;;  %v15159_v46 = vadd.f32 -4.0, %v1891_v42  ;;  %v2601_v58 = vand.u32 2147483647, %v15142_v33  ;;  %10489 = vlog2.f32 %v5638_v47  ;;  %v15162_v34 = vpop.eup %10477  ;;  %v19558_v10 = vmax.f32 %v14796_v7, 0.0  ;;  %v19560_v47 = vld [vmem:[#allocation33_spill] sm:$0xff] }
 0x42b   : > { %8133 = vmatmul.mubr.bf16.gmra.mxu1 %v19555_v1  ;;  %19557 = vst [vmem:[#allocation32_spill] sm:$0xff] %v15162_v34  ;;  %v4084_v9 = vmul.f32 -0.5, %v15083_v13  ;;  %v4099_v20 = vadd.f32 1.0, %v15145_v37  ;;  %v15174_v56 = vsub.f32 0.0, %v2578_v22  ;;  %v15176_v17 = vadd.f32 -4.0, %v1897_v19 }
 0x42c   : > { %19556 = vst [vmem:[#allocation67_spill] sm:$0xff] %v15159_v46  ;;  %v15166_v6 = vadd.f32 %v3945_v29, %v19558_v10  ;;  %v2857_v42 = vsub.f32 0.0, %v2601_v58  ;;  %v5656_v1 = vadd.f32 1.0, %v19560_v47  ;;  %v15179_v52 = vpop.eup %10479  ;;  %10491 = vlog2.f32 %v4081_v25 }
 0x42d   : > { %19559 = vst [vmem:[#allocation55_spill] sm:$0xff] %v15176_v17  ;;  %19561 = vst [vmem:[#allocation57_spill] sm:$0xff] %v15179_v52  ;;  %v15181_v7 = vsub.f32 0.0, %v2580_v50  ;;  %v4156_v10 = vmul.f32 -0.5, %v15102_v27  ;;  %v4174_v44 = vmul.f32 -0.5, %v15111_v45  ;;  %v2849_v38 = vsub.f32 0.0, %v2593_v55 }
 0x42e   : > { %v2595_v22 = vand.u32 2147483647, %v15159_v46  ;;  %10493 = vlog2.f32 %v5656_v1  ;;  %v4085_v19 = vadd.f32 1.0, %v4084_v9  ;;  %v3197_v29 = vmul.f32 1.442695, %v2857_v42  ;;  %v19569_v46 = vld [vmem:[#allocation37_spill] sm:$0xff] }
 0x42f   : > { %v15187_v58 = vpop.eup %10481  ;;  %10495 = vlog2.f32 %v4099_v20  ;;  %v2603_v32 = vand.u32 2147483647, %v15176_v17  ;;  %v5641_v55 = vmul.f32 -0.5, %v19553_v36  ;;  %v4157_v28 = vadd.f32 1.0, %v4156_v10 }
 0x430   : > { %v15191_v50 = vpop.eup %10483  ;;  %v4162_v63 = vadd.f32 1.0, %v15187_v58  ;;  %v4159_v1 = vand.u32 2147483647, %v15102_v27  ;;  %v4177_v18 = vand.u32 2147483647, %v15111_v45  ;;  %v4175_v49 = vadd.f32 1.0, %v4174_v44  ;;  %v1705_v44 = vpop.f32.mrf.mxu0 }
 0x431   : > { %v4180_v9 = vadd.f32 1.0, %v15191_v50  ;;  %v3181_v20 = vmul.f32 1.442695, %v2849_v38  ;;  %v2851_v25 = vsub.f32 0.0, %v2595_v22  ;;  %v15200_v8 = vmul.f32 %v15083_v13, %v4085_v19 }
 0x432   : > { %10497 = vlog2.f32 %v4162_v63  ;;  %v15203_v42 = vmul.f32 -0.5, %v15145_v37  ;;  %v15207_v10 = vadd.f32 %v15088_v5, %v14261_v4  ;;  %v2859_v52 = vsub.f32 0.0, %v2603_v32  ;;  %v1898_v63 = vpop.f32.mrf.mxu1 }
 0x433   : > { %10499 = vlog2.f32 %v4180_v9  ;;  %v5642_v34 = vadd.f32 1.0, %v5641_v55  ;;  %v5659_v40 = vmul.f32 -0.5, %v19560_v47  ;;  %v15211_v22 = vmul.f32 %v15102_v27, %v4157_v28 }
 0x434   : > { %10501 = vpow2.f32 %v3197_v29  ;;  %v10486_v38 = vpop.eup %10485  ;;  %vm15213_vm2 = vcmp.lt.f32.partialorder %v4159_v1, 0.0004427343  ;;  %v5644_v5 = vand.u32 2147483647, %v19553_v36  ;;  %v15220_v32 = vmul.f32 %v15111_v45, %v4175_v49 }
 0x435   : > { %vm15222_vm3 = vcmp.lt.f32.partialorder %v4177_v18, 0.0004427343  ;;  %10503 = vpow2.f32 %v3181_v20  ;;  %v3185_v55 = vmul.f32 1.442695, %v2851_v25  ;;  %v4165_v27 = vmul.f32 -0.5, %v15187_v58 }
 0x436   : > { %v10488_v48 = vpop.eup %10487  ;;  %v4183_v1 = vmul.f32 -0.5, %v15191_v50  ;;  %v1706_v39 = vadd.f32 %v1705_v44, %v14261_v4  ;;  %v1899_v9 = vadd.f32 %v1898_v63, %v14286_v14  ;;  %v3201_v57 = vmul.f32 1.442695, %v2859_v52 }
 0x437   : > { %v10490_v28 = vpop.eup %10489  ;;  %v5643_v45 = vmul.f32 %v19553_v36, %v5642_v34  ;;  %v5660_v49 = vadd.f32 1.0, %v5659_v40  ;;  %vm5645_vm4 = vcmp.lt.f32.partialorder %v5644_v5, 0.0004427343  ;;  %v5662_v18 = vand.u32 2147483647, %v19560_v47 }
 0x438   : > { %v5640_v12 = vmul.f32 0.6931472, %v10490_v28  ;;  %v15232_v60 = vadd.f32 -4.0, %v1706_v39  ;;  %v15234_v25 = vadd.f32 -4.0, %v1899_v9  ;;  %v4155_v59 = vmul.f32 0.6931472, %v10486_v38 }
 0x439   : > { %v10492_v20 = vpop.eup %10491  ;;  %v4173_v15 = vmul.f32 0.6931472, %v10488_v48  ;;  %v4168_v17 = vand.u32 2147483647, %v15187_v58  ;;  %v4166_v63 = vadd.f32 1.0, %v4165_v27  ;;  %v4184_v52 = vadd.f32 1.0, %v4183_v1 }
 0x43a   : > { %v5646_v44 = vsel %vm5645_vm4, %v5643_v45, %v5640_v12  ;;  %v19566_v28 = vld [vmem:[#allocation56_spill] sm:$0xff]  ;;  %v2602_v40 = vand.u32 2147483647, %v15232_v60  ;;  %10505 = vpow2.f32 %v3201_v57  ;;  %v5661_v9 = vmul.f32 %v19560_v47, %v5660_v49  ;;  %v19568_v48 = vld [vmem:[#allocation30_spill] sm:$0xff]  ;;  %v19572_v49 = vld [vmem:[#allocation25_spill] sm:$0xff] }
 0x43b   : > { %v10494_v4 = vpop.eup %10493  ;;  %v19567_v33 = vmax.f32 %v19566_v28, 0.0  ;;  %v2604_v38 = vand.u32 2147483647, %v15234_v25  ;;  %vm5663_vm5 = vcmp.lt.f32.partialorder %v5662_v18, 0.0004427343  ;;  %10507 = vpow2.f32 %v3185_v55 }
 0x43c   : > { %v10496_v34 = vpop.eup %10495  ;;  %v5658_v39 = vmul.f32 0.6931472, %v10494_v4  ;;  %v2858_v27 = vsub.f32 0.0, %v2602_v40  ;;  %v4186_v1 = vand.u32 2147483647, %v15191_v50  ;;  %v4179_v4 = vsel %vm15222_vm3, %v15220_v32, %v4173_v15  ;;  %v19574_v32 = vld [vmem:[#allocation76_spill] sm:$0xff] }
 0x43d   : > { %v6078_v36 = vadd.f32 %v5646_v44, %v19567_v33  ;;  %v4161_v33 = vsel %vm15213_vm2, %v15211_v22, %v4155_v59  ;;  %vm15251_vm6 = vcmp.lt.f32.partialorder %v4168_v17, 0.0004427343  ;;  %v19573_v18 = vmax.f32 %v19572_v49, 0.0  ;;  %v15258_v59 = vpop.f32.mrf.mxu0  ;;  %v15260_v22 = vpop.f32.mrf.mxu1 }
 0x43e   : > { %v5664_v45 = vsel %vm5663_vm5, %v5661_v9, %v5658_v39  ;;  %v3199_v19 = vmul.f32 1.442695, %v2858_v27  ;;  %v4185_v15 = vmul.f32 %v15191_v50, %v4184_v52  ;;  %v2860_v17 = vsub.f32 0.0, %v2604_v38  ;;  %v19576_v9 = vld [vmem:[#allocation44_spill] sm:$0xff] }
 0x43f   : > { %v6214_v5 = vpack.c.bf16 %v6078_v36, %v19568_v48  ;;  %v9569_v12 = vpack.c.bf16 %v6078_v36, %v19569_v46  ;;  %v10498_v57 = vpop.eup %10497  ;;  %v6080_v44 = vadd.f32 %v5664_v45, %v19573_v18  ;;  %v4167_v36 = vmul.f32 %v15187_v58, %v4166_v63  ;;  %v15288_v47 = vpop.f32.mrf.mxu1 }
 0x440   : > { %v10500_v55 = vpop.eup %10499  ;;  %v4164_v28 = vmul.f32 0.6931472, %v10498_v57  ;;  %v19575_v29 = vpack.c.bf16 %v19569_v46, %v19574_v32  ;;  %10509 = vpow2.f32 %v3199_v19  ;;  %v4083_v27 = vmul.f32 0.6931472, %v10492_v20  ;;  %v15286_v20 = vpop.f32.mrf.mxu0 }
 0x441   : > { %6985 = vst [vmem:[%s11758_s29 + $0x3a0] sm:$0xff] %v9569_v12  ;;  %7949 = vmatprep.mubr.bf16.mxu0 %v6214_v5  ;;  %v15267_v40 = vpop.eup %10501  ;;  %v4182_v39 = vmul.f32 0.6931472, %v10500_v55  ;;  %v6216_v48 = vpack.c.bf16 %v6080_v44, %v19576_v9  ;;  %v19577_v5 = vld [vmem:[#allocation28_spill] sm:$0xff]  ;;  %v2332_v50 = vmax.f32 %v15051_v30, 0.0  ;;  %v4103_v46 = vadd.f32 1.0, %v15203_v42 }
 0x442   : > { %7950 = vmatmul.mubr.bf16.gmra.mxu0 %v19575_v29  ;;  %v9570_v12 = vpack.c.bf16 %v6080_v44, %v19577_v5  ;;  %v4170_v58 = vsel %vm15251_vm6, %v4167_v36, %v4164_v28  ;;  %vm4187_vm7 = vcmp.lt.f32.partialorder %v4186_v1, 0.0004427343  ;;  %v15274_v63 = vpop.eup %10503  ;;  %v19578_v52 = vmax.f32 %v14976_v11, 0.0 }
 0x443   : > { %v19580_v45 = vmax.f32 %v15049_v54, 0.0  ;;  %v4188_v49 = vsel %vm4187_vm7, %v4185_v15, %v4182_v39  ;;  %8142 = vmatprep.mubr.bf16.mxu1 %v6216_v48  ;;  %v19582_v30 = vmax.f32 %v14983_v2, 0.0  ;;  %v4297_v11 = vadd.f32 1.0, %v15267_v40  ;;  %v19585_v54 = vld [vmem:[#allocation75_spill] sm:$0xff]  ;;  %v1906_v39 = vpop.f32.mrf.mxu1 }
 0x444   : > { %v15279_v38 = vadd.f32 %v4161_v33, %v19578_v52  ;;  %6986 = vst [vmem:[%s11758_s29 + $0x3a8] sm:$0xff] %v9570_v12  ;;  %v15294_v42 = vadd.f32 %v4188_v49, %v2332_v50  ;;  %v3203_v33 = vmul.f32 1.442695, %v2860_v17  ;;  %v19586_v18 = vpack.c.bf16 %v19577_v5, %v19585_v54 }
 0x445   : > { %v15283_v57 = vadd.f32 %v4170_v58, %v19580_v45  ;;  %v15292_v1 = vadd.f32 %v4179_v4, %v19582_v30  ;;  %v19587_v44 = vand.u32 2147483647, %v15083_v13  ;;  %v4105_v2 = vand.u32 2147483647, %v15145_v37 }
 0x446   : > { %19579 = vst [vmem:[#allocation60_spill] sm:$0xff] %v15279_v38  ;;  %19584 = vst [vmem:[#allocation56_spill] sm:$0xff] %v15294_v42  ;;  %8143 = vmatmul.mubr.bf16.gmra.mxu1 %v19586_v18  ;;  %v3151_v4 = vmul.f32 1.442695, %v15174_v56  ;;  %v4101_v36 = vmul.f32 0.6931472, %v10496_v34  ;;  %v19592_v56 = vsel %vm15124_vm1, %v15140_v62, %v15137_v61  ;;  %10511 = vpow2.f32 %v3203_v33  ;;  %v1713_v34 = vpop.f32.mrf.mxu0 }
 0x447   : > { %19581 = vst [vmem:[#allocation70_spill] sm:$0xff] %v15283_v57  ;;  %19583 = vst [vmem:[#allocation33_spill] sm:$0xff] %v15292_v1  ;;  %vm15302_vm8 = vcmp.lt.f32.partialorder %v19587_v44, 0.0004427343  ;;  %v9487_v55 = vpack.c.bf16 %v15283_v57, %v15279_v38  ;;  %v9488_v13 = vpack.c.bf16 %v15294_v42, %v15292_v1  ;;  %v15316_v15 = vadd.f32 -4.0, %v15207_v10  ;;  %v15336_v61 = vpop.eup %10505 }
 0x448   : > { %v4089_v28 = vsel %vm15302_vm8, %v15200_v8, %v4083_v27  ;;  %v19591_v17 = vmax.f32 %v14824_v43, 0.0  ;;  %v3155_v29 = vmul.f32 1.442695, %v15181_v7  ;;  %v1893_v8 = vadd.f32 %v15109_v26, %v14286_v14  ;;  %v15352_v12 = vpop.eup %10507  ;;  %v1715_v27 = vpop.f32.mrf.mxu0 }
 0x449   : > { %19590 = vst [vmem:[#allocation30_spill] sm:$0xff] %v15316_v15  ;;  %6903 = vst [vmem:[%s11758_s29 + $0x110] sm:$0xff] %v9487_v55  ;;  %v2323_v43 = vmax.f32 %v15002_v0, 0.0  ;;  %v4104_v3 = vmul.f32 %v15145_v37, %v4103_v46  ;;  %10513 = vlog2.f32 %v4297_v11  ;;  %v19594_v62 = vmax.f32 %v14954_v53, 0.0  ;;  %v19600_v11 = vld [vmem:[#allocation67_spill] sm:$0xff] }
 0x44a   : > { %v15325_v32 = vadd.f32 %v19592_v56, %v19591_v17  ;;  %6904 = vst [vmem:[%s11758_s29 + $0x118] sm:$0xff] %v9488_v13  ;;  %vm15342_vm9 = vcmp.lt.f32.partialorder %v4105_v2, 0.0004427343  ;;  %10515 = vpow2.f32 %v3151_v4  ;;  %v2594_v37 = vand.u32 2147483647, %v15316_v15  ;;  %v19601_v13 = vld [vmem:[#allocation40_spill] sm:$0xff] }
 0x44b   : > { %v15340_v7 = vadd.f32 %v4089_v28, %v19594_v62  ;;  %v4107_v0 = vsel %vm15342_vm9, %v4104_v3, %v4101_v36  ;;  %v1714_v48 = vadd.f32 %v1713_v34, %v14173_v16  ;;  %v1907_v5 = vadd.f32 %v1906_v39, %v14182_v31 }
 0x44c   : > { %19593 = vst [vmem:[#allocation37_spill] sm:$0xff] %v15325_v32  ;;  %10517 = vpow2.f32 %v3155_v29  ;;  %v15357_v58 = vadd.f32 -4.0, %v1893_v8  ;;  %v4228_v46 = vmul.f32 -0.5, %v15274_v63  ;;  %v4315_v52 = vadd.f32 1.0, %v15336_v61 }
 0x44d   : > { %19595 = vst [vmem:[#allocation25_spill] sm:$0xff] %v15340_v7  ;;  %v15362_v45 = vadd.f32 -4.0, %v1714_v48  ;;  %v15366_v30 = vadd.f32 %v4107_v0, %v2323_v43  ;;  %v1708_v54 = vadd.f32 %v15258_v59, %v14173_v16  ;;  %v15371_v18 = vpop.eup %10509  ;;  %v15374_v19 = vsub.f32 0.0, %v2594_v37  ;;  %v19602_v43 = vld [vmem:[#allocation72_spill] sm:$0xff]  ;;  %v19603_v37 = vld [vmem:[#allocation55_spill] sm:$0xff] }
 0x44e   : > { %19598 = vst [vmem:[#allocation76_spill] sm:$0xff] %v15357_v58  ;;  %v15377_v4 = vadd.f32 -4.0, %v1907_v5  ;;  %v2596_v55 = vand.u32 2147483647, %v15357_v58  ;;  %v4306_v28 = vadd.f32 1.0, %v15371_v18  ;;  %v1901_v36 = vadd.f32 %v15260_v22, %v14182_v31 }
 0x44f   : > { %19599 = vst [vmem:[#allocation44_spill] sm:$0xff] %v15366_v30  ;;  %v2617_v2 = vand.u32 2147483647, %v15362_v45  ;;  %v5782_v17 = vadd.f32 1.0, %v19601_v13  ;;  %v4225_v59 = vadd.f32 1.0, %v15274_v63  ;;  %v4229_v56 = vadd.f32 1.0, %v4228_v46 }
 0x450   : > { %10519 = vlog2.f32 %v4315_v52  ;;  %v4243_v8 = vadd.f32 1.0, %v15352_v12  ;;  %v4246_v34 = vmul.f32 -0.5, %v15352_v12  ;;  %v15387_v39 = vadd.f32 -4.0, %v1708_v54 }
 0x451   : > { %v2873_v29 = vsub.f32 0.0, %v2617_v2  ;;  %10521 = vlog2.f32 %v4306_v28  ;;  %v2345_v3 = vmax.f32 %v19602_v43, 0.0  ;;  %v4300_v62 = vmul.f32 -0.5, %v15267_v40 }
 0x452   : > { %v2619_v22 = vand.u32 2147483647, %v15377_v4  ;;  %v15392_v0 = vsub.f32 0.0, %v2596_v55  ;;  %v15395_v5 = vadd.f32 -4.0, %v1901_v36  ;;  %10523 = vlog2.f32 %v5782_v17 }
 0x453   : > { %v3229_v26 = vmul.f32 1.442695, %v2873_v29  ;;  %v15397_v46 = vpop.eup %10511  ;;  %10525 = vlog2.f32 %v4225_v59  ;;  %v15400_v52 = vmul.f32 %v15274_v63, %v4229_v56  ;;  %v4231_v54 = vand.u32 2147483647, %v15274_v63  ;;  %v19605_v59 = vld [vmem:[#allocation41_spill] sm:$0xff] }
 0x454   : > { %v2875_v2 = vsub.f32 0.0, %v2619_v22  ;;  %10527 = vlog2.f32 %v4243_v8  ;;  %v15403_v29 = vadd.f32 1.0, %v4246_v34  ;;  %v4324_v55 = vadd.f32 1.0, %v15397_v46  ;;  %v1908_v34 = vpop.f32.mrf.mxu1 }
 0x455   : > { %v2609_v43 = vand.u32 2147483647, %v15387_v39  ;;  %v4301_v17 = vadd.f32 1.0, %v4300_v62  ;;  %v4318_v44 = vmul.f32 -0.5, %v15336_v61  ;;  %10529 = vpow2.f32 %v3229_v26  ;;  %v19607_v62 = vld [vmem:[#allocation27_spill] sm:$0xff] }
 0x456   : > { %v10514_v28 = vpop.eup %10513  ;;  %v5800_v56 = vadd.f32 1.0, %v19605_v59  ;;  %v4303_v63 = vand.u32 2147483647, %v15267_v40  ;;  %v4309_v22 = vmul.f32 -0.5, %v15371_v18  ;;  %10531 = vlog2.f32 %v4324_v55 }
 0x457   : > { %v15407_v36 = vpop.eup %10515  ;;  %v2611_v8 = vand.u32 2147483647, %v15395_v5  ;;  %v4299_v9 = vmul.f32 0.6931472, %v10514_v28  ;;  %v2346_v53 = vmax.f32 %v15232_v60, 0.0  ;;  %v15419_v10 = vadd.f32 %v15286_v20, %v19607_v62 }
 0x458   : > { %19604 = vst [vmem:[#allocation28_spill] sm:$0xff] %v15407_v36  ;;  %v3233_v26 = vmul.f32 1.442695, %v2875_v2  ;;  %v4321_v33 = vand.u32 2147483647, %v15336_v61  ;;  %v2865_v50 = vsub.f32 0.0, %v2609_v43  ;;  %v1716_v55 = vadd.f32 %v1715_v27, %v19607_v62 }
 0x459   : > { %v15414_v49 = vpop.eup %10517  ;;  %v5785_v48 = vmul.f32 -0.5, %v19601_v13  ;;  %v4302_v42 = vmul.f32 %v15267_v40, %v4301_v17  ;;  %v4319_v57 = vadd.f32 1.0, %v4318_v44  ;;  %10533 = vlog2.f32 %v5800_v56 }
 0x45a   : > { %19606 = vst [vmem:[#allocation75_spill] sm:$0xff] %v15414_v49  ;;  %v1909_v28 = vadd.f32 %v1908_v34, %v14286_v14  ;;  %vm15426_vm10 = vcmp.lt.f32.partialorder %v4303_v63, 0.0004427343  ;;  %v4310_v20 = vadd.f32 1.0, %v4309_v22  ;;  %v4312_v2 = vand.u32 2147483647, %v15371_v18 }
 0x45b   : > { %v2867_v15 = vsub.f32 0.0, %v2611_v8  ;;  %v4305_v43 = vsel %vm15426_vm10, %v4302_v42, %v4299_v9  ;;  %10535 = vpow2.f32 %v3233_v26  ;;  %v15433_v24 = vadd.f32 -4.0, %v1716_v55 }
 0x45c   : > { %v15435_v27 = vadd.f32 -4.0, %v1909_v28  ;;  %vm15437_vm11 = vcmp.lt.f32.partialorder %v4321_v33, 0.0004427343  ;;  %v4327_v17 = vmul.f32 -0.5, %v15397_v46  ;;  %v3213_v56 = vmul.f32 1.442695, %v2865_v50 }
 0x45d   : > { %v10520_v40 = vpop.eup %10519  ;;  %v5786_v63 = vadd.f32 1.0, %v5785_v48  ;;  %v4320_v8 = vmul.f32 %v15336_v61, %v4319_v57  ;;  %v5788_v34 = vand.u32 2147483647, %v19601_v13  ;;  %v2618_v42 = vand.u32 2147483647, %v15433_v24 }
 0x45e   : > { %v10522_v22 = vpop.eup %10521  ;;  %v2620_v9 = vand.u32 2147483647, %v15435_v27  ;;  %v15446_v26 = vadd.f32 %v4305_v43, %v2345_v3  ;;  %v4311_v33 = vmul.f32 %v15371_v18, %v4310_v20  ;;  %v3217_v28 = vmul.f32 1.442695, %v2867_v15  ;;  %v1717_v20 = vpop.f32.mrf.mxu0 }
 0x45f   : > { %v4308_v55 = vmul.f32 0.6931472, %v10522_v22  ;;  %v10524_v60 = vpop.eup %10523  ;;  %vm15449_vm12 = vcmp.lt.f32.partialorder %v4231_v54, 0.0004427343  ;;  %v4317_v50 = vmul.f32 0.6931472, %v10520_v40  ;;  %v5787_v3 = vmul.f32 %v19601_v13, %v5786_v63 }
 0x460   : > { %19612 = vst [vmem:[#allocation67_spill] sm:$0xff] %v15446_v26  ;;  %vm4313_vm13 = vcmp.lt.f32.partialorder %v4312_v2, 0.0004427343  ;;  %v2874_v57 = vsub.f32 0.0, %v2618_v42  ;;  %v2876_v61 = vsub.f32 0.0, %v2620_v9  ;;  %v10526_v48 = vpop.eup %10525  ;;  %v4328_v35 = vadd.f32 1.0, %v4327_v17 }
 0x461   : > { %v4314_v7 = vsel %vm4313_vm13, %v4311_v33, %v4308_v55  ;;  %v5784_v49 = vmul.f32 0.6931472, %v10524_v60  ;;  %v10528_v43 = vpop.eup %10527  ;;  %v4330_v15 = vand.u32 2147483647, %v15397_v46  ;;  %vm15457_vm14 = vcmp.lt.f32.partialorder %v5788_v34, 0.0004427343 }
 0x462   : > { %v15454_v22 = vadd.f32 %v4314_v7, %v2346_v53  ;;  %v5803_v54 = vmul.f32 -0.5, %v19605_v59  ;;  %v15462_v2 = vpop.eup %10529  ;;  %10537 = vpow2.f32 %v3213_v56  ;;  %v3231_v13 = vmul.f32 1.442695, %v2874_v57  ;;  %v15466_v7 = vpop.f32.mrf.mxu1  ;;  %v19618_v56 = vld [vmem:[#allocation47_spill] sm:$0xff] }
 0x463   : > { %v5790_v40 = vsel %vm15457_vm14, %v5787_v3, %v5784_v49  ;;  %v3235_v17 = vmul.f32 1.442695, %v2876_v61  ;;  %v10532_v53 = vpop.eup %10531  ;;  %v4227_v63 = vmul.f32 0.6931472, %v10526_v48  ;;  %v4323_v34 = vsel %vm15437_vm11, %v4320_v8, %v4317_v50  ;;  %v15477_v61 = vpop.f32.mrf.mxu0 }
 0x464   : > { %19615 = vst [vmem:[#allocation40_spill] sm:$0xff] %v15454_v22  ;;  %v9495_v42 = vpack.c.bf16 %v15454_v22, %v15446_v26  ;;  %10539 = vpow2.f32 %v3217_v28  ;;  %v4326_v9 = vmul.f32 0.6931472, %v10532_v53  ;;  %v4329_v55 = vmul.f32 %v15397_v46, %v4328_v35  ;;  %v15484_v50 = vpop.f32.mrf.mxu1 }
 0x465   : > { %v19619_v33 = vmax.f32 %v19618_v56, 0.0  ;;  %10541 = vpow2.f32 %v3231_v13  ;;  %v2348_v49 = vmax.f32 %v15234_v25, 0.0  ;;  %vm4331_vm15 = vcmp.lt.f32.partialorder %v4330_v15, 0.0004427343  ;;  %v19624_v15 = vld [vmem:[#allocation19_spill] sm:$0xff]  ;;  %v1723_v56 = vpop.f32.mrf.mxu0 }
 0x466   : > { %6911 = vst [vmem:[%s11758_s29 + $0x150] sm:$0xff] %v9495_v42  ;;  %v5804_v57 = vadd.f32 1.0, %v5803_v54  ;;  %10543 = vpow2.f32 %v3235_v17  ;;  %v10534_v44 = vpop.eup %10533  ;;  %v4332_v8 = vsel %vm4331_vm15, %v4329_v55, %v4326_v9  ;;  %v15480_v28 = vadd.f32 -4.0, %v15419_v10  ;;  %v19625_v54 = vld [vmem:[#allocation48_spill] sm:$0xff] }
 0x467   : > { %v6094_v60 = vadd.f32 %v5790_v40, %v19619_v33  ;;  %v4441_v35 = vadd.f32 1.0, %v15462_v2  ;;  %v5806_v46 = vand.u32 2147483647, %v19605_v59  ;;  %v19621_v48 = vmax.f32 %v19603_v37, 0.0 }
 0x468   : > { %19620 = vst [vmem:[#allocation72_spill] sm:$0xff] %v15480_v28  ;;  %v15490_v3 = vadd.f32 %v4332_v8, %v2348_v49  ;;  %v15494_v13 = vpop.eup %10535  ;;  %v4233_v10 = vsel %vm15449_vm12, %v15400_v52, %v4227_v63  ;;  %v4245_v17 = vmul.f32 0.6931472, %v10528_v43  ;;  %v4249_v53 = vand.u32 2147483647, %v15352_v12  ;;  %v1916_v43 = vpop.f32.mrf.mxu1 }
 0x469   : > { %v15488_v25 = vadd.f32 %v4323_v34, %v19621_v48  ;;  %v6222_v18 = vpack.c.bf16 %v6094_v60, %v19624_v15  ;;  %v9577_v40 = vpack.c.bf16 %v6094_v60, %v19625_v54  ;;  %v3183_v37 = vmul.f32 1.442695, %v15374_v19  ;;  %v19626_v19 = vld [vmem:[#allocation50_spill] sm:$0xff] }
 0x46a   : > { %19623 = vst [vmem:[#allocation41_spill] sm:$0xff] %v15490_v3  ;;  %v1903_v42 = vadd.f32 %v15288_v47, %v14286_v14  ;;  %v5802_v9 = vmul.f32 0.6931472, %v10534_v44  ;;  %v5805_v55 = vmul.f32 %v19605_v59, %v5804_v57  ;;  %v3187_v51 = vmul.f32 1.442695, %v15392_v0  ;;  %v19632_v44 = vld [vmem:[#allocation43_spill] sm:$0xff] }
 0x46b   : > { %19622 = vst [vmem:[#allocation55_spill] sm:$0xff] %v15488_v25  ;;  %v9496_v34 = vpack.c.bf16 %v15490_v3, %v15488_v25  ;;  %6993 = vst [vmem:[%s11758_s29 + $0x3e0] sm:$0xff] %v9577_v40  ;;  %7959 = vmatprep.mubr.bf16.mxu0 %v6222_v18  ;;  %v2610_v52 = vand.u32 2147483647, %v15480_v28  ;;  %10545 = vlog2.f32 %v4441_v35  ;;  %vm5807_vm0 = vcmp.lt.f32.partialorder %v5806_v46, 0.0004427343 }
 0x46c   : > { %v19627_v63 = vpack.c.bf16 %v19625_v54, %v19626_v19  ;;  %v4248_v47 = vmul.f32 %v15352_v12, %v15403_v29  ;;  %v4459_v33 = vadd.f32 1.0, %v15494_v13  ;;  %v5808_v60 = vsel %vm5807_vm0, %v5805_v55, %v5802_v9  ;;  %v19635_v48 = vld [vmem:[#allocation54_spill] sm:$0xff]  ;;  %v1725_v55 = vpop.f32.mrf.mxu0 }
 0x46d   : > { %6912 = vst [vmem:[%s11758_s29 + $0x158] sm:$0xff] %v9496_v34  ;;  %v1718_v59 = vadd.f32 %v1717_v20, %v14173_v16  ;;  %v19628_v0 = vmax.f32 %v15134_v21, 0.0  ;;  %vm15521_vm1 = vcmp.lt.f32.partialorder %v4249_v53, 0.0004427343  ;;  %v19633_v8 = vmax.f32 %v19632_v44, 0.0  ;;  %v19636_v18 = vld [vmem:[#allocation66_spill] sm:$0xff] }
 0x46e   : > { %7960 = vmatmul.mubr.bf16.gmra.mxu0 %v19627_v63  ;;  %v1724_v46 = vadd.f32 %v1723_v56, %v14173_v16  ;;  %v4251_v12 = vsel %vm15521_vm1, %v4248_v47, %v4245_v17  ;;  %10547 = vpow2.f32 %v3183_v37  ;;  %v15530_v29 = vadd.f32 -4.0, %v1903_v42 }
 0x46f   : > { %v15519_v49 = vadd.f32 %v4233_v10, %v19628_v0  ;;  %v6096_v35 = vadd.f32 %v5808_v60, %v19633_v8  ;;  %v1917_v21 = vadd.f32 %v1916_v43, %v14182_v31  ;;  %v2866_v20 = vsub.f32 0.0, %v2610_v52  ;;  %v15537_v10 = vpop.eup %10537 }
 0x470   : > { %19634 = vst [vmem:[#allocation47_spill] sm:$0xff] %v15530_v29  ;;  %v15535_v40 = vadd.f32 -4.0, %v1724_v46  ;;  %10549 = vlog2.f32 %v4459_v33  ;;  %v15542_v37 = vadd.f32 -4.0, %v1718_v59  ;;  %v19638_v43 = vmax.f32 %v19600_v11, 0.0 }
 0x471   : > { %19629 = vst [vmem:[#allocation27_spill] sm:$0xff] %v15519_v49  ;;  %v6224_v15 = vpack.c.bf16 %v6096_v35, %v19635_v48  ;;  %v9578_v54 = vpack.c.bf16 %v6096_v35, %v19636_v18  ;;  %v15544_v42 = vpop.eup %10539  ;;  %10551 = vpow2.f32 %v3187_v51  ;;  %v1911_v63 = vadd.f32 %v15466_v7, %v14182_v31  ;;  %v19640_v51 = vld [vmem:[#allocation29_spill] sm:$0xff]  ;;  %v19642_v48 = vld [vmem:[#allocation46_spill] sm:$0xff] }
 0x472   : > { %v15551_v52 = vpop.eup %10541  ;;  %v15555_v19 = vadd.f32 %v4251_v12, %v19638_v43  ;;  %v2633_v47 = vand.u32 2147483647, %v15535_v40  ;;  %v15560_v33 = vadd.f32 -4.0, %v1917_v21  ;;  %v19641_v60 = vpack.c.bf16 %v19636_v18, %v19640_v51 }
 0x473   : > { %6994 = vst [vmem:[%s11758_s29 + $0x3e8] sm:$0xff] %v9578_v54  ;;  %8152 = vmatprep.mubr.bf16.mxu1 %v6224_v15  ;;  %v15565_v59 = vpop.eup %10543  ;;  %v15568_v57 = vmul.f32 1.442695, %v2866_v20  ;;  %v2612_v11 = vand.u32 2147483647, %v15530_v29  ;;  %v4450_v44 = vadd.f32 1.0, %v15551_v52 }
 0x474   : > { %19639 = vst [vmem:[#allocation19_spill] sm:$0xff] %v15555_v19  ;;  %8153 = vmatmul.mubr.bf16.gmra.mxu1 %v19641_v60  ;;  %v4369_v7 = vadd.f32 1.0, %v15537_v10  ;;  %v4372_v8 = vmul.f32 -0.5, %v15537_v10  ;;  %v4468_v35 = vadd.f32 1.0, %v15565_v59  ;;  %v2625_v46 = vand.u32 2147483647, %v15542_v37 }
 0x475   : > { %v4387_v12 = vadd.f32 1.0, %v15544_v42  ;;  %v4444_v21 = vmul.f32 -0.5, %v15462_v2  ;;  %10553 = vlog2.f32 %v4450_v44  ;;  %v3658_v20 = vadd.f32 1.0, %v19642_v48 }
 0x476   : > { %10555 = vlog2.f32 %v4468_v35  ;;  %v15579_v15 = vadd.f32 -4.0, %v1911_v63  ;;  %v2889_v18 = vsub.f32 0.0, %v2633_v47  ;;  %v2635_v54 = vand.u32 2147483647, %v15560_v33 }
 0x477   : > { %v15583_v51 = vsub.f32 0.0, %v2612_v11  ;;  %v2361_v60 = vmax.f32 %v15362_v45, 0.0  ;;  %10557 = vlog2.f32 %v4369_v7  ;;  %v15587_v9 = vadd.f32 1.0, %v4372_v8 }
 0x478   : > { %v10546_v17 = vpop.eup %10545  ;;  %v4447_v44 = vand.u32 2147483647, %v15462_v2  ;;  %v2881_v35 = vsub.f32 0.0, %v2625_v46  ;;  %v4445_v63 = vadd.f32 1.0, %v4444_v21  ;;  %v4462_v47 = vmul.f32 -0.5, %v15494_v13  ;;  %v19644_v46 = vld [vmem:[#allocation63_spill] sm:$0xff] }
 0x479   : > { %v3261_v34 = vmul.f32 1.442695, %v2889_v18  ;;  %10559 = vlog2.f32 %v3658_v20  ;;  %v4465_v11 = vand.u32 2147483647, %v15494_v13  ;;  %v2627_v56 = vand.u32 2147483647, %v15579_v15  ;;  %v1918_v18 = vpop.f32.mrf.mxu1 }
 0x47a   : > { %10561 = vlog2.f32 %v4387_v12  ;;  %v2891_v45 = vsub.f32 0.0, %v2635_v54  ;;  %v4443_v7 = vmul.f32 0.6931472, %v10546_v17  ;;  %v2362_v8 = vmax.f32 %v15433_v24, 0.0 }
 0x47b   : > { %v15593_v43 = vpop.eup %10547  ;;  %v4453_v0 = vmul.f32 -0.5, %v15551_v52  ;;  %v3676_v21 = vadd.f32 1.0, %v19644_v46  ;;  %vm15598_vm2 = vcmp.lt.f32.partialorder %v4447_v44, 0.0004427343  ;;  %v4471_v12 = vmul.f32 -0.5, %v15565_v59 }
 0x47c   : > { %19643 = vst [vmem:[#allocation48_spill] sm:$0xff] %v15593_v43  ;;  %v3245_v20 = vmul.f32 1.442695, %v2881_v35  ;;  %10563 = vpow2.f32 %v3261_v34  ;;  %v4446_v22 = vmul.f32 %v15462_v2, %v4445_v63  ;;  %v4463_v28 = vadd.f32 1.0, %v4462_v47 }
 0x47d   : > { %v10550_v54 = vpop.eup %10549  ;;  %10565 = vlog2.f32 %v3676_v21  ;;  %v1726_v24 = vadd.f32 %v1725_v55, %v19607_v62  ;;  %vm15607_vm3 = vcmp.lt.f32.partialorder %v4465_v11, 0.0004427343  ;;  %v2364_v44 = vmax.f32 %v15435_v27, 0.0 }
 0x47e   : > { %v15605_v17 = vpop.eup %10551  ;;  %v2883_v38 = vsub.f32 0.0, %v2627_v56  ;;  %v3265_v49 = vmul.f32 1.442695, %v2891_v45  ;;  %v4449_v34 = vsel %vm15598_vm2, %v4446_v22, %v4443_v7  ;;  %v4454_v35 = vadd.f32 1.0, %v4453_v0 }
 0x47f   : > { %19647 = vst [vmem:[#allocation50_spill] sm:$0xff] %v15605_v17  ;;  %v15614_v43 = vadd.f32 -4.0, %v1726_v24  ;;  %v1919_v2 = vadd.f32 %v1918_v18, %v14286_v14  ;;  %v4461_v63 = vmul.f32 0.6931472, %v10550_v54  ;;  %v4456_v55 = vand.u32 2147483647, %v15551_v52 }
 0x480   : > { %v4472_v47 = vadd.f32 1.0, %v4471_v12  ;;  %10567 = vpow2.f32 %v3245_v20  ;;  %v4464_v11 = vmul.f32 %v15494_v13, %v4463_v28  ;;  %v4474_v21 = vand.u32 2147483647, %v15565_v59 }
 0x481   : > { %v2634_v27 = vand.u32 2147483647, %v15614_v43  ;;  %v15621_v56 = vadd.f32 -4.0, %v1919_v2  ;;  %v15623_v22 = vadd.f32 %v4449_v34, %v2361_v60  ;;  %v3249_v0 = vmul.f32 1.442695, %v2883_v38 }
 0x482   : > { %v10554_v3 = vpop.eup %10553  ;;  %10569 = vpow2.f32 %v3265_v49  ;;  %v3661_v45 = vmul.f32 -0.5, %v19642_v48  ;;  %v4455_v12 = vmul.f32 %v15551_v52, %v4454_v35  ;;  %v4467_v13 = vsel %vm15607_vm3, %v4464_v11, %v4461_v63 }
 0x483   : > { %19650 = vst [vmem:[#allocation43_spill] sm:$0xff] %v15623_v22  ;;  %v10556_v7 = vpop.eup %10555  ;;  %v4452_v18 = vmul.f32 0.6931472, %v10554_v3  ;;  %v2890_v20 = vsub.f32 0.0, %v2634_v27  ;;  %v2636_v28 = vand.u32 2147483647, %v15621_v56  ;;  %v4473_v24 = vmul.f32 %v15565_v59, %v4472_v47  ;;  %v1727_v47 = vpop.f32.mrf.mxu0 }
 0x484   : > { %vm4457_vm4 = vcmp.lt.f32.partialorder %v4456_v55, 0.0004427343  ;;  %v4470_v54 = vmul.f32 0.6931472, %v10556_v7  ;;  %v10558_v60 = vpop.eup %10557  ;;  %vm4475_vm5 = vcmp.lt.f32.partialorder %v4474_v21, 0.0004427343  ;;  %v1720_v11 = vadd.f32 %v15477_v61, %v19607_v62 }
 0x485   : > { %v4458_v34 = vsel %vm4457_vm4, %v4455_v12, %v4452_v18  ;;  %v3679_v38 = vmul.f32 -0.5, %v19644_v46  ;;  %v3263_v49 = vmul.f32 1.442695, %v2890_v20  ;;  %v3662_v35 = vadd.f32 1.0, %v3661_v45 }
 0x486   : > { %v10560_v2 = vpop.eup %10559  ;;  %v15632_v3 = vadd.f32 %v4458_v34, %v2362_v8  ;;  %v4476_v52 = vsel %vm4475_vm5, %v4473_v24, %v4470_v54  ;;  %v2892_v27 = vsub.f32 0.0, %v2636_v28  ;;  %v19652_v58 = vmax.f32 %v15377_v4, 0.0  ;;  %v15648_v4 = vpop.f32.mrf.mxu1 }
 0x487   : > { %v15634_v17 = vpop.eup %10561  ;;  %v15640_v55 = vadd.f32 %v4476_v52, %v2364_v44  ;;  %v3664_v59 = vand.u32 2147483647, %v19642_v48  ;;  %10571 = vpow2.f32 %v3263_v49  ;;  %v3660_v21 = vmul.f32 0.6931472, %v10560_v2  ;;  %v15668_v24 = vpop.f32.mrf.mxu0  ;;  %v19659_v2 = vld [vmem:[#allocation65_spill] sm:$0xff] }
 0x488   : > { %19651 = vst [vmem:[#allocation54_spill] sm:$0xff] %v15632_v3  ;;  %v15638_v63 = vadd.f32 %v4467_v13, %v19652_v58  ;;  %10573 = vpow2.f32 %v15568_v57  ;;  %v9503_v8 = vpack.c.bf16 %v15632_v3, %v15623_v22  ;;  %v3219_v44 = vmul.f32 1.442695, %v15583_v51 }
 0x489   : > { %19654 = vst [vmem:[#allocation29_spill] sm:$0xff] %v15640_v55  ;;  %v15650_v45 = vpop.eup %10563  ;;  %10575 = vpow2.f32 %v3249_v0  ;;  %v3680_v18 = vadd.f32 1.0, %v3679_v38  ;;  %v4371_v12 = vmul.f32 0.6931472, %v10558_v60  ;;  %v3663_v20 = vmul.f32 %v19642_v48, %v3662_v35  ;;  %v15675_v38 = vpop.f32.mrf.mxu1 }
 0x48a   : > { %19653 = vst [vmem:[#allocation66_spill] sm:$0xff] %v15638_v63  ;;  %v9504_v7 = vpack.c.bf16 %v15640_v55, %v15638_v63  ;;  %v10566_v57 = vpop.eup %10565  ;;  %6919 = vst [vmem:[%s11758_s29 + $0x190] sm:$0xff] %v9503_v8  ;;  %v3682_v61 = vand.u32 2147483647, %v19644_v46  ;;  %v3267_v28 = vmul.f32 1.442695, %v2892_v27  ;;  %v4374_v13 = vmul.f32 %v15537_v10, %v15587_v9 }
 0x48b   : > { %v19655_v54 = vand.u32 2147483647, %v15537_v10  ;;  %v4390_v0 = vmul.f32 -0.5, %v15544_v42  ;;  %vm3665_vm7 = vcmp.lt.f32.partialorder %v3664_v59, 0.0004427343  ;;  %v15670_v60 = vadd.f32 -4.0, %v1720_v11 }
 0x48c   : > { %6920 = vst [vmem:[%s11758_s29 + $0x198] sm:$0xff] %v9504_v7  ;;  %v1913_v48 = vadd.f32 %v15484_v50, %v14286_v14  ;;  %v4585_v34 = vadd.f32 1.0, %v15650_v45  ;;  %v3666_v9 = vsel %vm3665_vm7, %v3663_v20, %v3660_v21  ;;  %v4393_v49 = vand.u32 2147483647, %v15544_v42  ;;  %v19661_v21 = vld [vmem:[#allocation31_spill] sm:$0xff]  ;;  %v19678_v59 = vld [vmem:[#allocation20_spill] sm:$0xff] }
 0x48d   : > { %vm15662_vm6 = vcmp.lt.f32.partialorder %v19655_v54, 0.0004427343  ;;  %19658 = vst [vmem:[#allocation46_spill] sm:$0xff] %v15670_v60  ;;  %v15677_v10 = vpop.eup %10567  ;;  %v19660_v52 = vmax.f32 %v19659_v2, 0.0  ;;  %v3678_v27 = vmul.f32 0.6931472, %v10566_v57  ;;  %v3681_v58 = vmul.f32 %v19644_v46, %v3680_v18  ;;  %v1733_v57 = vpop.f32.mrf.mxu0 }
 0x48e   : > { %v4377_v50 = vsel %vm15662_vm6, %v4374_v13, %v4371_v12  ;;  %vm3683_vm8 = vcmp.lt.f32.partialorder %v3682_v61, 0.0004427343  ;;  %10577 = vpow2.f32 %v3267_v28  ;;  %v4391_v11 = vadd.f32 1.0, %v4390_v0  ;;  %v19662_v20 = vld [vmem:[#allocation51_spill] sm:$0xff]  ;;  %v19664_v2 = vld [vmem:[#allocation45_spill] sm:$0xff]  ;;  %v1926_v61 = vpop.f32.mrf.mxu1 }
 0x48f   : > { %v5858_v35 = vadd.f32 %v3666_v9, %v19660_v52  ;;  %v15687_v8 = vpop.eup %10569  ;;  %v3684_v9 = vsel %vm3683_vm8, %v3681_v58, %v3678_v27  ;;  %v2626_v46 = vand.u32 2147483647, %v15670_v60  ;;  %v15692_v18 = vadd.f32 -4.0, %v1913_v48  ;;  %v19671_v27 = vld [vmem:[#allocation49_spill] sm:$0xff] }
 0x490   : > { %10579 = vlog2.f32 %v4585_v34  ;;  %v19665_v51 = vmax.f32 %v19664_v2, 0.0  ;;  %v19666_v28 = vmax.f32 %v15387_v39, 0.0  ;;  %vm15700_vm9 = vcmp.lt.f32.partialorder %v4393_v49, 0.0004427343  ;;  %v19670_v34 = vld [vmem:[#allocation58_spill] sm:$0xff]  ;;  %v1928_v1 = vpop.f32.mrf.mxu1 }
 0x491   : > { %v6106_v7 = vpack.c.bf16 %v5858_v35, %v19661_v21  ;;  %v9459_v54 = vpack.c.bf16 %v5858_v35, %v19662_v20  ;;  %19663 = vst [vmem:[#allocation63_spill] sm:$0xff] %v15692_v18  ;;  %10581 = vpow2.f32 %v3219_v44  ;;  %v4603_v48 = vadd.f32 1.0, %v15687_v8 }
 0x492   : > { %v5860_v12 = vadd.f32 %v3684_v9, %v19665_v51  ;;  %v15698_v13 = vadd.f32 %v4377_v50, %v19666_v28  ;;  %v1734_v39 = vadd.f32 %v1733_v57, %v14173_v16  ;;  %v19672_v50 = vld [vmem:[#allocation21_spill] sm:$0xff]  ;;  %v15714_v21 = vmul.f32 %v15544_v42, %v4391_v11 }
 0x493   : > { %6875 = vst [vmem:[%s11758_s29 + $0x30] sm:$0xff] %v9459_v54  ;;  %8195 = vmatprep.mubr.bf16.mxu0 %v6106_v7  ;;  %v19673_v49 = vpack.c.bf16 %v19662_v20, %v19672_v50  ;;  %v1728_v54 = vadd.f32 %v1727_v47, %v14173_v16  ;;  %v1927_v7 = vadd.f32 %v1926_v61, %v14182_v31  ;;  %v15722_v2 = vmul.f32 0.6931472, %v15634_v17  ;;  %v19675_v17 = vld [vmem:[#allocation74_spill] sm:$0xff] }
 0x494   : > { %19667 = vst [vmem:[#allocation65_spill] sm:$0xff] %v15698_v13  ;;  %v6108_v35 = vpack.c.bf16 %v5860_v12, %v19670_v34  ;;  %v9460_v58 = vpack.c.bf16 %v5860_v12, %v19671_v27  ;;  %v15719_v9 = vpop.eup %10571  ;;  %v2882_v51 = vsub.f32 0.0, %v2626_v46  ;;  %v2628_v57 = vand.u32 2147483647, %v15692_v18 }
 0x495   : > { %8196 = vmatmul.mubr.bf16.vlgmr.msra.gmra.mxu0 %v19673_v49  ;;  %v15726_v20 = vadd.f32 -4.0, %v1734_v39  ;;  %v15728_v42 = vpop.eup %10573  ;;  %v4513_v47 = vadd.f32 1.0, %v15677_v10  ;;  %v4594_v61 = vadd.f32 1.0, %v15719_v9  ;;  %v19676_v46 = vpack.c.bf16 %v19671_v27, %v19675_v17 }
 0x496   : > { %6876 = vst [vmem:[%s11758_s29 + $0x38] sm:$0xff] %v9460_v58  ;;  %8388 = vmatprep.mubr.bf16.mxu1 %v6108_v35  ;;  %19674 = vst [vmem:[#allocation31_spill] sm:$0xff] %v15728_v42  ;;  %v15738_v28 = vpop.eup %10575  ;;  %v4516_v34 = vmul.f32 -0.5, %v15677_v10  ;;  %10583 = vlog2.f32 %v4603_v48  ;;  %v15741_v35 = vadd.f32 -4.0, %v1927_v7  ;;  %v19677_v58 = vld [vmem:[#allocation64_spill] sm:$0xff]  ;;  %v15744_v50 = vadd.f32 -4.0, %v1728_v54  ;;  %v1735_v42 = vpop.f32.mrf.mxu0 }
 0x497   : > { %8389 = vmatmul.mubr.bf16.vlgmr.msra.gmra.mxu1 %v19676_v46  ;;  %v3802_v39 = vadd.f32 1.0, %v19677_v58  ;;  %10585 = vlog2.f32 %v4594_v61  ;;  %v1921_v49 = vadd.f32 %v15648_v4, %v14182_v31  ;;  %v2649_v52 = vand.u32 2147483647, %v15726_v20 }
 0x498   : > { %v15753_v17 = vmul.f32 1.442695, %v2882_v51  ;;  %v15755_v48 = vsub.f32 0.0, %v2628_v57  ;;  %v2651_v7 = vand.u32 2147483647, %v15741_v35  ;;  %10587 = vlog2.f32 %v4513_v47 }
 0x499   : > { %v4531_v54 = vadd.f32 1.0, %v15738_v28  ;;  %v2905_v46 = vsub.f32 0.0, %v2649_v52  ;;  %v4588_v11 = vmul.f32 -0.5, %v15650_v45  ;;  %10589 = vlog2.f32 %v3802_v39 }
 0x49a   : > { %v15765_v51 = vadd.f32 1.0, %v4516_v34  ;;  %v15768_v57 = vmul.f32 -0.5, %v15738_v28  ;;  %v2641_v47 = vand.u32 2147483647, %v15744_v50  ;;  %v15771_v44 = vadd.f32 -4.0, %v1921_v49 }
 0x49b   : > { %v15763_v12 = vpop.eup %10577  ;;  %v4591_v52 = vand.u32 2147483647, %v15650_v45  ;;  %v3293_v61 = vmul.f32 1.442695, %v2905_v46  ;;  %v2907_v27 = vsub.f32 0.0, %v2651_v7  ;;  %10591 = vlog2.f32 %v4531_v54 }
 0x49c   : > { %v4612_v4 = vadd.f32 1.0, %v15763_v12  ;;  %v4597_v34 = vmul.f32 -0.5, %v15719_v9  ;;  %v3820_v3 = vadd.f32 1.0, %v19678_v59  ;;  %v4589_v26 = vadd.f32 1.0, %v4588_v11 }
 0x49d   : > { %v10580_v55 = vpop.eup %10579  ;;  %v4606_v49 = vmul.f32 -0.5, %v15687_v8  ;;  %v4609_v13 = vand.u32 2147483647, %v15687_v8  ;;  %v2378_v46 = vmax.f32 %v15614_v43, 0.0  ;;  %v2897_v7 = vsub.f32 0.0, %v2641_v47 }
 0x49e   : > { %v15778_v29 = vpop.eup %10581  ;;  %10593 = vlog2.f32 %v4612_v4  ;;  %v2643_v54 = vand.u32 2147483647, %v15771_v44  ;;  %v3805_v39 = vmul.f32 -0.5, %v19677_v58  ;;  %v4587_v19 = vmul.f32 0.6931472, %v10580_v55 }
 0x49f   : > { %19679 = vst [vmem:[#allocation51_spill] sm:$0xff] %v15778_v29  ;;  %vm15785_vm10 = vcmp.lt.f32.partialorder %v4591_v52, 0.0004427343  ;;  %10595 = vpow2.f32 %v3293_v61  ;;  %v3297_v11 = vmul.f32 1.442695, %v2907_v27  ;;  %v4598_v29 = vadd.f32 1.0, %v4597_v34 }
 0x4a0   : > { %v4600_v30 = vand.u32 2147483647, %v15719_v9  ;;  %10597 = vlog2.f32 %v3820_v3  ;;  %v1736_v4 = vadd.f32 %v1735_v42, %v19607_v62  ;;  %v4590_v43 = vmul.f32 %v15650_v45, %v4589_v26 }
 0x4a1   : > { %v4607_v47 = vadd.f32 1.0, %v4606_v49  ;;  %vm15792_vm11 = vcmp.lt.f32.partialorder %v4609_v13, 0.0004427343  ;;  %v1929_v55 = vadd.f32 %v1928_v1, %v14286_v14  ;;  %v4615_v36 = vmul.f32 -0.5, %v15763_v12 }
 0x4a2   : > { %v3277_v61 = vmul.f32 1.442695, %v2897_v7  ;;  %v2899_v27 = vsub.f32 0.0, %v2643_v54  ;;  %v3806_v34 = vadd.f32 1.0, %v3805_v39  ;;  %v4593_v3 = vsel %vm15785_vm10, %v4590_v43, %v4587_v19 }
 0x4a3   : > { %v10584_v52 = vpop.eup %10583  ;;  %10599 = vpow2.f32 %v3297_v11  ;;  %v15800_v42 = vadd.f32 -4.0, %v1736_v4  ;;  %v15802_v26 = vadd.f32 -4.0, %v1929_v55  ;;  %v4599_v13 = vmul.f32 %v15719_v9, %v4598_v29 }
 0x4a4   : > { %v10586_v32 = vpop.eup %10585  ;;  %vm4601_vm12 = vcmp.lt.f32.partialorder %v4600_v30, 0.0004427343  ;;  %v3808_v1 = vand.u32 2147483647, %v19677_v58  ;;  %v19684_v7 = vmax.f32 %v15395_v5, 0.0  ;;  %v19685_v53 = vsel %vm15700_vm9, %v15714_v21, %v15722_v2 }
 0x4a5   : > { %v4596_v45 = vmul.f32 0.6931472, %v10586_v32  ;;  %v10588_v49 = vpop.eup %10587  ;;  %v4605_v39 = vmul.f32 0.6931472, %v10584_v52  ;;  %v2650_v54 = vand.u32 2147483647, %v15800_v42  ;;  %v3807_v5 = vmul.f32 %v19677_v58, %v3806_v34 }
 0x4a6   : > { %v15813_v19 = vadd.f32 %v19685_v53, %v19684_v7  ;;  %v2652_v32 = vand.u32 2147483647, %v15802_v26  ;;  %v10590_v11 = vpop.eup %10589  ;;  %v19687_v30 = vmax.f32 %v15535_v40, 0.0  ;;  %v4616_v4 = vadd.f32 1.0, %v4615_v36  ;;  %v1737_v40 = vpop.f32.mrf.mxu0 }
 0x4a7   : > { %v4602_v9 = vsel %vm4601_vm12, %v4599_v13, %v4596_v45  ;;  %v3804_v43 = vmul.f32 0.6931472, %v10590_v11  ;;  %v3823_v21 = vmul.f32 -0.5, %v19678_v59  ;;  %v2906_v2 = vsub.f32 0.0, %v2650_v54  ;;  %v15835_v54 = vpop.f32.mrf.mxu1 }
 0x4a8   : > { %19686 = vst [vmem:[#allocation45_spill] sm:$0xff] %v15813_v19  ;;  %v15819_v29 = vadd.f32 %v4593_v3, %v19687_v30  ;;  %v15822_v0 = vadd.f32 %v4602_v9, %v2378_v46  ;;  %v4608_v55 = vmul.f32 %v15687_v8, %v4607_v47  ;;  %v4618_v52 = vand.u32 2147483647, %v15763_v12  ;;  %v10592_v3 = vpop.eup %10591  ;;  %v19690_v47 = vld [vmem:[#allocation26_spill] sm:$0xff] }
 0x4a9   : > { %vm3809_vm13 = vcmp.lt.f32.partialorder %v3808_v1, 0.0004427343  ;;  %v2908_v7 = vsub.f32 0.0, %v2652_v32  ;;  %v3281_v45 = vmul.f32 1.442695, %v2899_v27  ;;  %10601 = vpow2.f32 %v3277_v61 }
 0x4aa   : > { %19688 = vst [vmem:[#allocation58_spill] sm:$0xff] %v15819_v29  ;;  %19689 = vst [vmem:[#allocation49_spill] sm:$0xff] %v15822_v0  ;;  %v9511_v36 = vpack.c.bf16 %v15822_v0, %v15819_v29  ;;  %v3810_v58 = vsel %vm3809_vm13, %v3807_v5, %v3804_v43  ;;  %v3295_v46 = vmul.f32 1.442695, %v2906_v2  ;;  %v4611_v13 = vsel %vm15792_vm11, %v4608_v55, %v4605_v39 }
 0x4ab   : > { %v10594_v34 = vpop.eup %10593  ;;  %v1730_v8 = vadd.f32 %v15668_v24, %v19607_v62  ;;  %v19691_v53 = vmax.f32 %v19690_v47, 0.0  ;;  %v4617_v11 = vmul.f32 %v15763_v12, %v4616_v4  ;;  %v3824_v27 = vadd.f32 1.0, %v3823_v21  ;;  %v15843_v24 = vpop.f32.mrf.mxu0 }
 0x4ac   : > { %6927 = vst [vmem:[%s11758_s29 + $0x1d0] sm:$0xff] %v9511_v36  ;;  %v4614_v32 = vmul.f32 0.6931472, %v10594_v34  ;;  %10603 = vpow2.f32 %v3295_v46  ;;  %v15839_v30 = vpop.eup %10595  ;;  %v4535_v41 = vadd.f32 1.0, %v15768_v57  ;;  %v2380_v61 = vmax.f32 %v15621_v56, 0.0  ;;  %v19696_v56 = vld [vmem:[#allocation38_spill] sm:$0xff] }
 0x4ad   : > { %v5874_v1 = vadd.f32 %v3810_v58, %v19691_v53  ;;  %vm4619_vm14 = vcmp.lt.f32.partialorder %v4618_v52, 0.0004427343  ;;  %v3299_v39 = vmul.f32 1.442695, %v2908_v7  ;;  %v10598_v9 = vpop.eup %10597  ;;  %10605 = vpow2.f32 %v3281_v45  ;;  %v15857_v52 = vpop.f32.mrf.mxu1  ;;  %v19697_v45 = vld [vmem:[#allocation62_spill] sm:$0xff]  ;;  %v19702_v53 = vld [vmem:[#allocation59_spill] sm:$0xff] }
 0x4ae   : > { %v4620_v5 = vsel %vm4619_vm14, %v4617_v11, %v4614_v32  ;;  %v1923_v43 = vadd.f32 %v15675_v38, %v14286_v14  ;;  %v3826_v12 = vand.u32 2147483647, %v19678_v59  ;;  %v19692_v4 = vmax.f32 %v15560_v33, 0.0 }
 0x4af   : > { %v15852_v2 = vadd.f32 %v4620_v5, %v2380_v61  ;;  %v15854_v57 = vadd.f32 -4.0, %v1730_v8  ;;  %v6114_v55 = vpack.c.bf16 %v5874_v1, %v19696_v56  ;;  %v4515_v7 = vmul.f32 0.6931472, %v10588_v49  ;;  %v1743_v8 = vpop.f32.mrf.mxu0  ;;  %v19707_v5 = vld [vmem:[#allocation22_spill] sm:$0xff] }
 0x4b0   : > { %v15850_v21 = vadd.f32 %v4611_v13, %v19692_v4  ;;  %v4533_v36 = vmul.f32 0.6931472, %v10592_v3  ;;  %v9467_v58 = vpack.c.bf16 %v5874_v1, %v19697_v45  ;;  %v3825_v38 = vmul.f32 %v19678_v59, %v3824_v27  ;;  %v15861_v46 = vpop.eup %10599  ;;  %v1936_v27 = vpop.f32.mrf.mxu1 }
 0x4b1   : > { %19694 = vst [vmem:[#allocation74_spill] sm:$0xff] %v15852_v2  ;;  %19695 = vst [vmem:[#allocation64_spill] sm:$0xff] %v15854_v57  ;;  %v4729_v34 = vadd.f32 1.0, %v15839_v30  ;;  %8205 = vmatprep.mubr.bf16.mxu0 %v6114_v55  ;;  %v3822_v13 = vmul.f32 0.6931472, %v10598_v9  ;;  %10607 = vpow2.f32 %v3299_v39  ;;  %v4518_v49 = vmul.f32 %v15677_v10, %v15765_v51  ;;  %v19709_v55 = vld [vmem:[#allocation53_spill] sm:$0xff] }
 0x4b2   : > { %19693 = vst [vmem:[#allocation21_spill] sm:$0xff] %v15850_v21  ;;  %v9512_v33 = vpack.c.bf16 %v15852_v2, %v15850_v21  ;;  %v19698_v3 = vand.u32 2147483647, %v15677_v10  ;;  %v15874_v59 = vadd.f32 -4.0, %v1923_v43  ;;  %6883 = vst [vmem:[%s11758_s29 + $0x70] sm:$0xff] %v9467_v58  ;;  %v19703_v1 = vpack.c.bf16 %v19697_v45, %v19702_v53  ;;  %v19710_v58 = vld [vmem:[#allocation73_spill] sm:$0xff] }
 0x4b3   : > { %vm3827_vm0 = vcmp.lt.f32.partialorder %v3826_v12, 0.0004427343  ;;  %v4536_v32 = vmul.f32 %v15738_v28, %v4535_v41  ;;  %v2642_v11 = vand.u32 2147483647, %v15854_v57  ;;  %v1738_v10 = vadd.f32 %v1737_v40, %v14173_v16 }
 0x4b4   : > { %vm15870_vm15 = vcmp.lt.f32.partialorder %v19698_v3, 0.0004427343  ;;  %19701 = vst [vmem:[#allocation20_spill] sm:$0xff] %v15874_v59  ;;  %8206 = vmatmul.mubr.bf16.gmra.mxu0 %v19703_v1  ;;  %6928 = vst [vmem:[%s11758_s29 + $0x1d8] sm:$0xff] %v9512_v33  ;;  %v3828_v51 = vsel %vm3827_vm0, %v3825_v38, %v3822_v13  ;;  %v19704_v61 = vand.u32 2147483647, %v15738_v28  ;;  %v1744_v41 = vadd.f32 %v1743_v8, %v14173_v16 }
 0x4b5   : > { %v4747_v9 = vadd.f32 1.0, %v15861_v46  ;;  %v19708_v43 = vmax.f32 %v19707_v5, 0.0  ;;  %v4521_v4 = vsel %vm15870_vm15, %v4518_v49, %v4515_v7  ;;  %v3251_v28 = vmul.f32 1.442695, %v15755_v48  ;;  %v19718_v3 = vld [vmem:[#allocation57_spill] sm:$0xff] }
 0x4b6   : > { %vm15886_vm1 = vcmp.lt.f32.partialorder %v19704_v61, 0.0004427343  ;;  %10609 = vlog2.f32 %v4729_v34  ;;  %v2644_v56 = vand.u32 2147483647, %v15874_v59  ;;  %v1937_v33 = vadd.f32 %v1936_v27, %v14182_v31  ;;  %v19717_v61 = vld [vmem:[#allocation32_spill] sm:$0xff] }
 0x4b7   : > { %v5876_v12 = vadd.f32 %v3828_v51, %v19708_v43  ;;  %v4539_v40 = vsel %vm15886_vm1, %v4536_v32, %v4533_v36  ;;  %10611 = vpow2.f32 %v15753_v17  ;;  %v2898_v13 = vsub.f32 0.0, %v2642_v11  ;;  %v15908_v36 = vpop.eup %10601  ;;  %v19715_v32 = vld [vmem:[#allocation68_spill] sm:$0xff] }
 0x4b8   : > { %v15904_v8 = vadd.f32 -4.0, %v1738_v10  ;;  %v15906_v7 = vadd.f32 -4.0, %v1744_v41  ;;  %v19711_v48 = vmax.f32 %v15542_v37, 0.0  ;;  %10613 = vlog2.f32 %v4747_v9 }
 0x4b9   : > { %v6116_v45 = vpack.c.bf16 %v5876_v12, %v19709_v55  ;;  %v9468_v38 = vpack.c.bf16 %v5876_v12, %v19710_v58  ;;  %v15917_v47 = vpop.eup %10603  ;;  %v19713_v53 = vmax.f32 %v15579_v15, 0.0  ;;  %10615 = vpow2.f32 %v3251_v28 }
 0x4ba   : > { %v15912_v34 = vadd.f32 %v4521_v4, %v19711_v48  ;;  %v2665_v37 = vand.u32 2147483647, %v15906_v7  ;;  %v19716_v11 = vpack.c.bf16 %v19710_v58, %v19715_v32  ;;  %v2900_v51 = vsub.f32 0.0, %v2644_v56  ;;  %v15933_v9 = vpop.eup %10605 }
 0x4bb   : > { %6884 = vst [vmem:[%s11758_s29 + $0x78] sm:$0xff] %v9468_v38  ;;  %8398 = vmatprep.mubr.bf16.mxu1 %v6116_v45  ;;  %v15923_v1 = vadd.f32 %v4539_v40, %v19713_v53  ;;  %v4738_v10 = vadd.f32 1.0, %v15917_v47  ;;  %v15930_v27 = vadd.f32 -4.0, %v1937_v33  ;;  %v3946_v39 = vadd.f32 1.0, %v19717_v61 }
 0x4bc   : > { %19712 = vst [vmem:[#allocation26_spill] sm:$0xff] %v15912_v34  ;;  %8399 = vmatmul.mubr.bf16.gmra.mxu1 %v19716_v11  ;;  %v3279_v43 = vmul.f32 1.442695, %v2898_v13  ;;  %v2657_v12 = vand.u32 2147483647, %v15904_v8  ;;  %v4657_v4 = vadd.f32 1.0, %v15908_v36  ;;  %v1931_v32 = vadd.f32 %v15835_v54, %v14182_v31 }
 0x4bd   : > { %19714 = vst [vmem:[#allocation38_spill] sm:$0xff] %v15923_v1  ;;  %v4732_v40 = vmul.f32 -0.5, %v15839_v30  ;;  %10617 = vlog2.f32 %v4738_v10  ;;  %v2921_v45 = vsub.f32 0.0, %v2665_v37  ;;  %v4675_v38 = vadd.f32 1.0, %v15933_v9 }
 0x4be   : > { %v15946_v58 = vpop.eup %10607  ;;  %v15949_v33 = vmul.f32 1.442695, %v2900_v51  ;;  %v2667_v13 = vand.u32 2147483647, %v15930_v27  ;;  %10619 = vlog2.f32 %v3946_v39  ;;  %v2913_v53 = vsub.f32 0.0, %v2657_v12 }
 0x4bf   : > { %10621 = vpow2.f32 %v3279_v43  ;;  %v4756_v48 = vadd.f32 1.0, %v15946_v58  ;;  %v4733_v11 = vadd.f32 1.0, %v4732_v40  ;;  %v4735_v37 = vand.u32 2147483647, %v15839_v30 }
 0x4c0   : > { %10623 = vlog2.f32 %v4657_v4  ;;  %v4750_v10 = vmul.f32 -0.5, %v15861_v46  ;;  %v2393_v55 = vmax.f32 %v15726_v20, 0.0  ;;  %v4753_v51 = vand.u32 2147483647, %v15861_v46  ;;  %v1745_v4 = vpop.f32.mrf.mxu0 }
 0x4c1   : > { %10625 = vlog2.f32 %v4756_v48  ;;  %v3325_v56 = vmul.f32 1.442695, %v2921_v45  ;;  %v15960_v43 = vmul.f32 -0.5, %v15908_v36  ;;  %v4741_v12 = vmul.f32 -0.5, %v15917_v47 }
 0x4c2   : > { %10627 = vlog2.f32 %v4675_v38  ;;  %v2923_v54 = vsub.f32 0.0, %v2667_v13  ;;  %v2394_v40 = vmax.f32 %v15800_v42, 0.0  ;;  %v3309_v28 = vmul.f32 1.442695, %v2913_v53  ;;  %v1938_v13 = vpop.f32.mrf.mxu1 }
 0x4c3   : > { %v10610_v39 = vpop.eup %10609  ;;  %v15964_v41 = vadd.f32 -4.0, %v1931_v32  ;;  %v3964_v20 = vadd.f32 1.0, %v19718_v3  ;;  %v4734_v45 = vmul.f32 %v15839_v30, %v4733_v11  ;;  %vm15970_vm2 = vcmp.lt.f32.partialorder %v4735_v37, 0.0004427343 }
 0x4c4   : > { %v15967_v49 = vpop.eup %10611  ;;  %v4751_v38 = vadd.f32 1.0, %v4750_v10  ;;  %v3949_v17 = vmul.f32 -0.5, %v19717_v61  ;;  %v4731_v15 = vmul.f32 0.6931472, %v10610_v39  ;;  %vm15975_vm3 = vcmp.lt.f32.partialorder %v4753_v51, 0.0004427343 }
 0x4c5   : > { %19719 = vst [vmem:[#allocation62_spill] sm:$0xff] %v15967_v49  ;;  %v10614_v5 = vpop.eup %10613  ;;  %10629 = vpow2.f32 %v3325_v56  ;;  %v1746_v53 = vadd.f32 %v1745_v4, %v19607_v62  ;;  %v4742_v30 = vadd.f32 1.0, %v4741_v12  ;;  %v4759_v11 = vmul.f32 -0.5, %v15946_v58 }
 0x4c6   : > { %v15980_v32 = vpop.eup %10615  ;;  %v3329_v37 = vmul.f32 1.442695, %v2923_v54  ;;  %10631 = vlog2.f32 %v3964_v20  ;;  %v4744_v10 = vand.u32 2147483647, %v15917_v47  ;;  %v2659_v2 = vand.u32 2147483647, %v15964_v41 }
 0x4c7   : > { %19724 = vst [vmem:[#allocation59_spill] sm:$0xff] %v15980_v32  ;;  %v15985_v59 = vadd.f32 -4.0, %v1746_v53  ;;  %v1939_v51 = vadd.f32 %v1938_v13, %v14286_v14  ;;  %v4749_v39 = vmul.f32 0.6931472, %v10614_v5  ;;  %v4752_v56 = vmul.f32 %v15861_v46, %v4751_v38 }
 0x4c8   : > { %10633 = vpow2.f32 %v3309_v28  ;;  %v3950_v4 = vadd.f32 1.0, %v3949_v17  ;;  %v4737_v12 = vsel %vm15970_vm2, %v4734_v45, %v4731_v15  ;;  %v3952_v54 = vand.u32 2147483647, %v19717_v61 }
 0x4c9   : > { %v2666_v20 = vand.u32 2147483647, %v15985_v59  ;;  %v15993_v57 = vadd.f32 -4.0, %v1939_v51  ;;  %v4743_v53 = vmul.f32 %v15917_v47, %v4742_v30  ;;  %v4760_v1 = vadd.f32 1.0, %v4759_v11  ;;  %v16001_v51 = vpop.f32.mrf.mxu0 }
 0x4ca   : > { %v10618_v0 = vpop.eup %10617  ;;  %10635 = vpow2.f32 %v3329_v37  ;;  %vm4745_vm4 = vcmp.lt.f32.partialorder %v4744_v10, 0.0004427343  ;;  %v2915_v46 = vsub.f32 0.0, %v2659_v2  ;;  %v4762_v45 = vand.u32 2147483647, %v15946_v58 }
 0x4cb   : > { %v4740_v63 = vmul.f32 0.6931472, %v10618_v0  ;;  %v10620_v5 = vpop.eup %10619  ;;  %v2922_v28 = vsub.f32 0.0, %v2666_v20  ;;  %v2668_v17 = vand.u32 2147483647, %v15993_v57  ;;  %v3951_v13 = vmul.f32 %v19717_v61, %v3950_v4  ;;  %v1940_v20 = vpop.f32.mrf.mxu1 }
 0x4cc   : > { %v15997_v38 = vpop.eup %10621  ;;  %v3948_v48 = vmul.f32 0.6931472, %v10620_v5  ;;  %v16003_v47 = vadd.f32 %v4737_v12, %v2393_v55  ;;  %vm16007_vm5 = vcmp.lt.f32.partialorder %v3952_v54, 0.0004427343  ;;  %v4761_v10 = vmul.f32 %v15946_v58, %v4760_v1  ;;  %v16023_v58 = vpop.f32.mrf.mxu0 }
 0x4cd   : > { %19725 = vst [vmem:[#allocation22_spill] sm:$0xff] %v15997_v38  ;;  %v4746_v15 = vsel %vm4745_vm4, %v4743_v53, %v4740_v63  ;;  %v10624_v0 = vpop.eup %10623  ;;  %v3327_v11 = vmul.f32 1.442695, %v2922_v28  ;;  %v4755_v63 = vsel %vm15975_vm3, %v4752_v56, %v4749_v39  ;;  %v3967_v55 = vmul.f32 -0.5, %v19718_v3  ;;  %v19730_v28 = vld [vmem:[#allocation42_spill] sm:$0xff] }
 0x4ce   : > { %19726 = vst [vmem:[#allocation53_spill] sm:$0xff] %v16003_v47  ;;  %v16005_v30 = vadd.f32 %v4746_v15, %v2394_v40  ;;  %v10626_v37 = vpop.eup %10625  ;;  %v3954_v61 = vsel %vm16007_vm5, %v3951_v13, %v3948_v48  ;;  %v2924_v54 = vsub.f32 0.0, %v2668_v17  ;;  %v2395_v42 = vmax.f32 %v15741_v35, 0.0 }
 0x4cf   : > { %v16017_v4 = vpop.eup %10627  ;;  %v4758_v12 = vmul.f32 0.6931472, %v10626_v37  ;;  %10637 = vpow2.f32 %v3327_v11  ;;  %v2396_v39 = vmax.f32 %v15802_v26, 0.0  ;;  %vm4763_vm6 = vcmp.lt.f32.partialorder %v4762_v45, 0.0004427343  ;;  %v16041_v37 = vpop.f32.mrf.mxu1 }
 0x4d0   : > { %19727 = vst [vmem:[#allocation73_spill] sm:$0xff] %v16005_v30  ;;  %v9519_v40 = vpack.c.bf16 %v16005_v30, %v16003_v47  ;;  %v3313_v1 = vmul.f32 1.442695, %v2915_v46  ;;  %v4663_v56 = vand.u32 2147483647, %v15908_v36  ;;  %v1740_v5 = vadd.f32 %v15843_v24, %v19607_v62 }
 0x4d1   : > { %v4764_v53 = vsel %vm4763_vm6, %v4761_v10, %v4758_v12  ;;  %v19731_v15 = vmax.f32 %v19730_v28, 0.0  ;;  %v4678_v35 = vmul.f32 -0.5, %v15933_v9  ;;  %v16034_v13 = vadd.f32 %v4755_v63, %v2395_v42  ;;  %v19735_v12 = vld [vmem:[#allocation71_spill] sm:$0xff] }
 0x4d2   : > { %6935 = vst [vmem:[%s11758_s29 + $0x210] sm:$0xff] %v9519_v40  ;;  %v16031_v17 = vpop.eup %10629  ;;  %v16036_v26 = vadd.f32 %v4764_v53, %v2396_v39  ;;  %v3968_v46 = vadd.f32 1.0, %v3967_v55  ;;  %v4661_v2 = vadd.f32 1.0, %v15960_v43  ;;  %10639 = vpow2.f32 %v15949_v33  ;;  %v1753_v55 = vpop.f32.mrf.mxu0 }
 0x4d3   : > { %v5890_v48 = vadd.f32 %v3954_v61, %v19731_v15  ;;  %19732 = vst [vmem:[#allocation68_spill] sm:$0xff] %v16034_v13  ;;  %v10632_v45 = vpop.eup %10631  ;;  %v3970_v24 = vand.u32 2147483647, %v19718_v3  ;;  %v3331_v11 = vmul.f32 1.442695, %v2924_v54  ;;  %10641 = vpow2.f32 %v3313_v1 }
 0x4d4   : > { %19733 = vst [vmem:[#allocation32_spill] sm:$0xff] %v16036_v26  ;;  %v4659_v10 = vmul.f32 0.6931472, %v10624_v0  ;;  %v4681_v61 = vand.u32 2147483647, %v15933_v9  ;;  %v9520_v63 = vpack.c.bf16 %v16036_v26, %v16034_v13  ;;  %v16048_v43 = vadd.f32 -4.0, %v1740_v5  ;;  %v1755_v29 = vpop.f32.mrf.mxu0 }
 0x4d5   : > { %v16046_v40 = vpop.eup %10633  ;;  %v4873_v33 = vadd.f32 1.0, %v16031_v17  ;;  %v6122_v42 = vpack.c.bf16 %v5890_v48, %v19735_v12  ;;  %v9475_v54 = vpack.c.bf16 %v5890_v48, %v15166_v6  ;;  %vm16053_vm7 = vcmp.lt.f32.partialorder %v4663_v56, 0.0004427343  ;;  %v1946_v48 = vpop.f32.mrf.mxu1  ;;  %v19744_v12 = vld [vmem:[#allocation37_spill] sm:$0xff] }
 0x4d6   : > { %19734 = vst [vmem:[#allocation57_spill] sm:$0xff] %v16048_v43  ;;  %v4679_v39 = vadd.f32 1.0, %v4678_v35  ;;  %6936 = vst [vmem:[%s11758_s29 + $0x218] sm:$0xff] %v9520_v63  ;;  %v3966_v53 = vmul.f32 0.6931472, %v10632_v45  ;;  %v3969_v1 = vmul.f32 %v19718_v3, %v3968_v46  ;;  %v4662_v5 = vmul.f32 %v15908_v36, %v4661_v2 }
 0x4d7   : > { %v16059_v28 = vpop.eup %10635  ;;  %6891 = vst [vmem:[%s11758_s29 + $0xb0] sm:$0xff] %v9475_v54  ;;  %8215 = vmatprep.mubr.bf16.mxu0 %v6122_v42  ;;  %vm3971_vm8 = vcmp.lt.f32.partialorder %v3970_v24, 0.0004427343  ;;  %10643 = vpow2.f32 %v3331_v11  ;;  %v1754_v15 = vadd.f32 %v1753_v55, %v14173_v16  ;;  %vm16064_vm9 = vcmp.lt.f32.partialorder %v4681_v61, 0.0004427343  ;;  %v19741_v24 = vld [vmem:[#allocation61_spill] sm:$0xff] }
 0x4d8   : > { %v1933_v35 = vadd.f32 %v15857_v52, %v14286_v14  ;;  %v3972_v45 = vsel %vm3971_vm8, %v3969_v1, %v3966_v53  ;;  %v1748_v3 = vadd.f32 %v16001_v51, %v14173_v16  ;;  %v19740_v36 = vpack.c.bf16 %v15166_v6, %v14879_v23  ;;  %v19743_v55 = vld [vmem:[#allocation23_spill] sm:$0xff] }
 0x4d9   : > { %v4665_v46 = vsel %vm16053_vm7, %v4662_v5, %v4659_v10  ;;  %v2658_v2 = vand.u32 2147483647, %v16048_v43  ;;  %10645 = vlog2.f32 %v4873_v33  ;;  %v19742_v11 = vmax.f32 %v19741_v24, 0.0 }
 0x4da   : > { %8216 = vmatmul.mubr.bf16.gmra.mxu0 %v19740_v36  ;;  %v16081_v52 = vmul.f32 %v15933_v9, %v4679_v39  ;;  %v4891_v63 = vadd.f32 1.0, %v16059_v28  ;;  %v1941_v51 = vadd.f32 %v1940_v20, %v14182_v31  ;;  %v1947_v23 = vadd.f32 %v1946_v48, %v14182_v31  ;;  %v19748_v48 = vld [vmem:[#allocation28_spill] sm:$0xff] }
 0x4db   : > { %v5892_v61 = vadd.f32 %v3972_v45, %v19742_v11  ;;  %v4804_v6 = vmul.f32 -0.5, %v16046_v40  ;;  %v16089_v33 = vadd.f32 -4.0, %v1754_v15  ;;  %v19745_v0 = vmax.f32 %v15744_v50, 0.0 }
 0x4dc   : > { %v16091_v54 = vpop.eup %10637  ;;  %v16098_v39 = vmul.f32 0.6931472, %v16017_v4  ;;  %v16101_v53 = vadd.f32 -4.0, %v1748_v3  ;;  %v2914_v1 = vsub.f32 0.0, %v2658_v2  ;;  %v16103_v5 = vadd.f32 -4.0, %v1933_v35 }
 0x4dd   : > { %v6124_v10 = vpack.c.bf16 %v5892_v61, %v19743_v55  ;;  %v9476_v42 = vpack.c.bf16 %v5892_v61, %v19744_v12  ;;  %v16095_v9 = vadd.f32 %v4665_v46, %v19745_v0  ;;  %v4882_v15 = vadd.f32 1.0, %v16091_v54  ;;  %v19749_v46 = vld [vmem:[#allocation36_spill] sm:$0xff] }
 0x4de   : > { %19747 = vst [vmem:[#allocation71_spill] sm:$0xff] %v16103_v5  ;;  %v4090_v45 = vadd.f32 1.0, %v19748_v48  ;;  %10647 = vlog2.f32 %v4891_v63  ;;  %v16109_v36 = vadd.f32 -4.0, %v1941_v51  ;;  %v16111_v4 = vadd.f32 -4.0, %v1947_v23 }
 0x4df   : > { %19746 = vst [vmem:[#allocation42_spill] sm:$0xff] %v16095_v9  ;;  %6892 = vst [vmem:[%s11758_s29 + $0xb8] sm:$0xff] %v9476_v42  ;;  %8408 = vmatprep.mubr.bf16.mxu1 %v6124_v10  ;;  %v19750_v3 = vpack.c.bf16 %v19744_v12, %v19749_v46  ;;  %v4801_v35 = vadd.f32 1.0, %v16046_v40  ;;  %v4805_v2 = vadd.f32 1.0, %v4804_v6  ;;  %10649 = vlog2.f32 %v4882_v15  ;;  %v16118_v11 = vpop.eup %10639 }
 0x4e0   : > { %v2681_v24 = vand.u32 2147483647, %v16089_v33  ;;  %19751 = vst [vmem:[#allocation61_spill] sm:$0xff] %v16118_v11  ;;  %v2673_v51 = vand.u32 2147483647, %v16101_v53  ;;  %v16128_v55 = vpop.eup %10641  ;;  %10651 = vlog2.f32 %v4090_v45  ;;  %v4876_v0 = vmul.f32 -0.5, %v16031_v17  ;;  %v1948_v11 = vpop.f32.mrf.mxu1 }
 0x4e1   : > { %8409 = vmatmul.mubr.bf16.gmra.mxu1 %v19750_v3  ;;  %v2683_v23 = vand.u32 2147483647, %v16111_v4  ;;  %v16131_v10 = vmul.f32 1.442695, %v2914_v1  ;;  %v2675_v46 = vand.u32 2147483647, %v16109_v36  ;;  %10653 = vlog2.f32 %v4801_v35 }
 0x4e2   : > { %v16139_v3 = vmul.f32 %v16046_v40, %v4805_v2  ;;  %v2937_v6 = vsub.f32 0.0, %v2681_v24  ;;  %v4819_v50 = vadd.f32 1.0, %v16128_v55  ;;  %v4879_v45 = vand.u32 2147483647, %v16031_v17  ;;  %v19752_v2 = vld [vmem:[#allocation75_spill] sm:$0xff] }
 0x4e3   : > { %v2929_v20 = vsub.f32 0.0, %v2673_v51  ;;  %v2939_v63 = vsub.f32 0.0, %v2683_v23  ;;  %v16147_v12 = vmul.f32 -0.5, %v16128_v55  ;;  %v4885_v15 = vmul.f32 -0.5, %v16091_v54 }
 0x4e4   : > { %v16142_v1 = vpop.eup %10643  ;;  %v4108_v42 = vadd.f32 1.0, %v19752_v2  ;;  %v4877_v61 = vadd.f32 1.0, %v4876_v0  ;;  %v4894_v24 = vmul.f32 -0.5, %v16059_v28  ;;  %v2410_v30 = vmax.f32 %v15985_v59, 0.0 }
 0x4e5   : > { %v4900_v35 = vadd.f32 1.0, %v16142_v1  ;;  %v2931_v43 = vsub.f32 0.0, %v2675_v46  ;;  %v4888_v51 = vand.u32 2147483647, %v16091_v54  ;;  %v3357_v23 = vmul.f32 1.442695, %v2937_v6 }
 0x4e6   : > { %v10646_v26 = vpop.eup %10645  ;;  %v4093_v9 = vmul.f32 -0.5, %v19748_v48  ;;  %vm16156_vm10 = vcmp.lt.f32.partialorder %v4879_v45, 0.0004427343  ;;  %v3341_v22 = vmul.f32 1.442695, %v2929_v20  ;;  %v4886_v34 = vadd.f32 1.0, %v4885_v15 }
 0x4e7   : > { %10655 = vlog2.f32 %v4900_v35  ;;  %v3361_v0 = vmul.f32 1.442695, %v2939_v63  ;;  %v4875_v18 = vmul.f32 0.6931472, %v10646_v26  ;;  %v1756_v59 = vadd.f32 %v1755_v29, %v19607_v62 }
 0x4e8   : > { %10657 = vlog2.f32 %v4819_v50  ;;  %v4878_v46 = vmul.f32 %v16031_v17, %v4877_v61  ;;  %v4895_v60 = vadd.f32 1.0, %v4894_v24  ;;  %v4897_v6 = vand.u32 2147483647, %v16059_v28 }
 0x4e9   : > { %10659 = vlog2.f32 %v4108_v42  ;;  %v1949_v35 = vadd.f32 %v1948_v11, %v14286_v14  ;;  %vm16164_vm11 = vcmp.lt.f32.partialorder %v4888_v51, 0.0004427343  ;;  %v3345_v45 = vmul.f32 1.442695, %v2931_v43 }
 0x4ea   : > { %10661 = vpow2.f32 %v3357_v23  ;;  %v4094_v20 = vadd.f32 1.0, %v4093_v9  ;;  %v4096_v63 = vand.u32 2147483647, %v19748_v48  ;;  %v16169_v29 = vadd.f32 -4.0, %v1756_v59 }
 0x4eb   : > { %v10648_v32 = vpop.eup %10647  ;;  %10663 = vpow2.f32 %v3361_v0  ;;  %v16171_v17 = vadd.f32 -4.0, %v1949_v35  ;;  %v4881_v61 = vsel %vm16156_vm10, %v4878_v46, %v4875_v18  ;;  %v4887_v42 = vmul.f32 %v16091_v54, %v4886_v34 }
 0x4ec   : > { %v10650_v26 = vpop.eup %10649  ;;  %v4903_v15 = vmul.f32 -0.5, %v16142_v1  ;;  %v4893_v43 = vmul.f32 0.6931472, %v10648_v32  ;;  %v1750_v9 = vadd.f32 %v16023_v58, %v19607_v62  ;;  %v2682_v51 = vand.u32 2147483647, %v16169_v29 }
 0x4ed   : > { %v4884_v11 = vmul.f32 0.6931472, %v10650_v26  ;;  %v10652_v24 = vpop.eup %10651  ;;  %v2684_v23 = vand.u32 2147483647, %v16171_v17  ;;  %v4095_v18 = vmul.f32 %v19748_v48, %v4094_v20  ;;  %v4111_v38 = vmul.f32 -0.5, %v19752_v2 }
 0x4ee   : > { %v4092_v59 = vmul.f32 0.6931472, %v10652_v24  ;;  %v10654_v34 = vpop.eup %10653  ;;  %v19757_v54 = vmax.f32 %v15906_v7, 0.0  ;;  %vm4097_vm12 = vcmp.lt.f32.partialorder %v4096_v63, 0.0004427343  ;;  %v2938_v58 = vsub.f32 0.0, %v2682_v51 }
 0x4ef   : > { %v4890_v0 = vsel %vm16164_vm11, %v4887_v42, %v4884_v11  ;;  %v4904_v35 = vadd.f32 1.0, %v4903_v15  ;;  %10665 = vpow2.f32 %v3341_v22  ;;  %v2940_v50 = vsub.f32 0.0, %v2684_v23  ;;  %v19762_v63 = vld [vmem:[#allocation34_spill] sm:$0xff]  ;;  %v1757_v15 = vpop.f32.mrf.mxu0  ;;  %v16207_v23 = vpop.f32.mrf.mxu1 }
 0x4f0   : > { %v16187_v46 = vadd.f32 %v4881_v61, %v19757_v54  ;;  %v16189_v32 = vadd.f32 %v4890_v0, %v2410_v30  ;;  %v4098_v26 = vsel %vm4097_vm12, %v4095_v18, %v4092_v59  ;;  %v4896_v11 = vmul.f32 %v16059_v28, %v4895_v60  ;;  %v19764_v18 = vld [vmem:[#allocation35_spill] sm:$0xff] }
 0x4f1   : > { %v4906_v20 = vand.u32 2147483647, %v16142_v1  ;;  %10667 = vpow2.f32 %v3345_v45  ;;  %v4825_v7 = vand.u32 2147483647, %v16128_v55  ;;  %vm16196_vm13 = vcmp.lt.f32.partialorder %v4897_v6, 0.0004427343 }
 0x4f2   : > { %19758 = vst [vmem:[#allocation23_spill] sm:$0xff] %v16187_v46  ;;  %19759 = vst [vmem:[#allocation37_spill] sm:$0xff] %v16189_v32  ;;  %v9527_v48 = vpack.c.bf16 %v16189_v32, %v16187_v46  ;;  %v19763_v61 = vmax.f32 %v19762_v63, 0.0  ;;  %v4112_v22 = vadd.f32 1.0, %v4111_v38  ;;  %v4823_v60 = vadd.f32 1.0, %v16147_v12 }
 0x4f3   : > { %v4899_v28 = vsel %vm16196_vm13, %v4896_v11, %v4893_v43  ;;  %v4114_v45 = vand.u32 2147483647, %v19752_v2  ;;  %v3359_v51 = vmul.f32 1.442695, %v2938_v58  ;;  %v4905_v59 = vmul.f32 %v16142_v1, %v4904_v35  ;;  %v19766_v43 = vld [vmem:[#allocation25_spill] sm:$0xff] }
 0x4f4   : > { %v5906_v42 = vadd.f32 %v4098_v26, %v19763_v61  ;;  %v10656_v24 = vpop.eup %10655  ;;  %6943 = vst [vmem:[%s11758_s29 + $0x250] sm:$0xff] %v9527_v48  ;;  %v3363_v38 = vmul.f32 1.442695, %v2940_v50  ;;  %v2412_v12 = vmax.f32 %v15993_v57, 0.0  ;;  %vm4907_vm14 = vcmp.lt.f32.partialorder %v4906_v20, 0.0004427343 }
 0x4f5   : > { %v10658_v6 = vpop.eup %10657  ;;  %v4902_v0 = vmul.f32 0.6931472, %v10656_v24  ;;  %v16212_v30 = vadd.f32 -4.0, %v1750_v9  ;;  %v4803_v48 = vmul.f32 0.6931472, %v10654_v34  ;;  %v4113_v61 = vmul.f32 %v19752_v2, %v4112_v22  ;;  %v16216_v24 = vpop.f32.mrf.mxu0  ;;  %v19770_v34 = vld [vmem:[#allocation39_spill] sm:$0xff] }
 0x4f6   : > { %v6130_v54 = vpack.c.bf16 %v5906_v42, %v19764_v18  ;;  %v10660_v26 = vpop.eup %10659  ;;  %v9483_v11 = vpack.c.bf16 %v5906_v42, %v19766_v43  ;;  %v19767_v35 = vmax.f32 %v15930_v27, 0.0  ;;  %vm4115_vm15 = vcmp.lt.f32.partialorder %v4114_v45, 0.0004427343  ;;  %v16227_v9 = vpop.f32.mrf.mxu1  ;;  %v19776_v18 = vld [vmem:[#allocation69_spill] sm:$0xff]  ;;  %v19788_v45 = vld [vmem:[#allocation52_spill] sm:$0xff] }
 0x4f7   : > { %19765 = vst [vmem:[#allocation28_spill] sm:$0xff] %v16212_v30  ;;  %v4908_v58 = vsel %vm4907_vm14, %v4905_v59, %v4902_v0  ;;  %v4110_v63 = vmul.f32 0.6931472, %v10660_v26  ;;  %v16218_v1 = vpop.eup %10661  ;;  %10669 = vpow2.f32 %v3359_v51  ;;  %v19771_v20 = vpack.c.bf16 %v19766_v43, %v19770_v34 }
 0x4f8   : > { %8225 = vmatprep.mubr.bf16.mxu0 %v6130_v54  ;;  %v16222_v50 = vadd.f32 %v4899_v28, %v19767_v35  ;;  %v16224_v57 = vadd.f32 %v4908_v58, %v2412_v12  ;;  %6899 = vst [vmem:[%s11758_s29 + $0xf0] sm:$0xff] %v9483_v11  ;;  %v16232_v2 = vpop.eup %10663  ;;  %v4821_v42 = vmul.f32 0.6931472, %v10658_v6  ;;  %v1943_v27 = vadd.f32 %v16041_v37, %v14286_v14  ;;  %v1763_v12 = vpop.f32.mrf.mxu0  ;;  %v19780_v58 = vld [vmem:[#allocation24_spill] sm:$0xff] }
 0x4f9   : > { %8226 = vmatmul.mubr.bf16.gmra.mxu0 %v19771_v20  ;;  %v4116_v22 = vsel %vm4115_vm15, %v4113_v61, %v4110_v63  ;;  %10671 = vpow2.f32 %v3363_v38  ;;  %v19772_v28 = vand.u32 2147483647, %v16046_v40  ;;  %v19775_v51 = vand.u32 2147483647, %v16103_v5  ;;  %v19781_v61 = vld [vmem:[#allocation44_spill] sm:$0xff] }
 0x4fa   : > { %19768 = vst [vmem:[#allocation36_spill] sm:$0xff] %v16222_v50  ;;  %19769 = vst [vmem:[#allocation75_spill] sm:$0xff] %v16224_v57  ;;  %v9528_v59 = vpack.c.bf16 %v16224_v57, %v16222_v50  ;;  %v19777_v54 = vmax.f32 %v19776_v18, 0.0  ;;  %v4824_v38 = vmul.f32 %v16128_v55, %v4823_v60  ;;  %vm16252_vm1 = vcmp.lt.f32.partialorder %v4825_v7, 0.0004427343 }
 0x4fb   : > { %vm16238_vm0 = vcmp.lt.f32.partialorder %v19772_v28, 0.0004427343  ;;  %v2916_v0 = vsub.f32 0.0, %v19775_v51  ;;  %v5017_v26 = vadd.f32 1.0, %v16218_v1  ;;  %v2674_v43 = vand.u32 2147483647, %v16212_v30 }
 0x4fc   : > { %v5908_v6 = vadd.f32 %v4116_v22, %v19777_v54  ;;  %v4809_v37 = vsel %vm16238_vm0, %v16139_v3, %v4803_v48  ;;  %6944 = vst [vmem:[%s11758_s29 + $0x258] sm:$0xff] %v9528_v59  ;;  %v5035_v11 = vadd.f32 1.0, %v16232_v2  ;;  %v1956_v3 = vpop.f32.mrf.mxu1  ;;  %v19782_v55 = vmax.f32 %v15771_v44, 0.0  ;;  %v16276_v22 = vpop.eup %10665 }
 0x4fd   : > { %v19783_v7 = vsel %vm16064_vm9, %v16081_v52, %v16098_v39  ;;  %v4827_v48 = vsel %vm16252_vm1, %v4824_v38, %v4821_v42  ;;  %v16274_v20 = vadd.f32 -4.0, %v1943_v27  ;;  %10673 = vpow2.f32 %v16131_v10  ;;  %v19790_v10 = vld [vmem:[#allocation48_spill] sm:$0xff] }
 0x4fe   : > { %v6132_v63 = vpack.c.bf16 %v5908_v6, %v19780_v58  ;;  %v9484_v35 = vpack.c.bf16 %v5908_v6, %v19781_v61  ;;  %v16269_v60 = vadd.f32 %v19783_v7, %v19782_v55  ;;  %v3315_v28 = vmul.f32 1.442695, %v2916_v0  ;;  %v16282_v52 = vpop.eup %10667 }
 0x4ff   : > { %19785 = vst [vmem:[#allocation35_spill] sm:$0xff] %v16274_v20  ;;  %v1758_v44 = vadd.f32 %v1757_v15, %v14173_v16  ;;  %v1764_v56 = vadd.f32 %v1763_v12, %v14173_v16  ;;  %v19786_v39 = vmax.f32 %v15904_v8, 0.0  ;;  %10675 = vlog2.f32 %v5017_v26  ;;  %v19795_v26 = vld [vmem:[#allocation50_spill] sm:$0xff] }
 0x500   : > { %19784 = vst [vmem:[#allocation34_spill] sm:$0xff] %v16269_v60  ;;  %6900 = vst [vmem:[%s11758_s29 + $0xf8] sm:$0xff] %v9484_v35  ;;  %8418 = vmatprep.mubr.bf16.mxu1 %v6132_v63  ;;  %v1957_v27 = vadd.f32 %v1956_v3, %v14182_v31  ;;  %v19789_v51 = vpack.c.bf16 %v19781_v61, %v19788_v45  ;;  %v4234_v0 = vadd.f32 1.0, %v19790_v10  ;;  %v19791_v59 = vmax.f32 %v15964_v41, 0.0 }
 0x501   : > { %v16286_v42 = vadd.f32 %v4809_v37, %v19786_v39  ;;  %v2930_v18 = vsub.f32 0.0, %v2674_v43  ;;  %10677 = vlog2.f32 %v5035_v11  ;;  %v16297_v54 = vadd.f32 -4.0, %v1764_v56 }
 0x502   : > { %8419 = vmatmul.mubr.bf16.gmra.mxu1 %v19789_v51  ;;  %v16295_v15 = vadd.f32 %v4827_v48, %v19791_v59  ;;  %v4945_v8 = vadd.f32 1.0, %v16276_v22  ;;  %v2676_v6 = vand.u32 2147483647, %v16274_v20  ;;  %v16301_v37 = vadd.f32 -4.0, %v1957_v27  ;;  %v1765_v59 = vpop.f32.mrf.mxu0 }
 0x503   : > { %19787 = vst [vmem:[#allocation25_spill] sm:$0xff] %v16286_v42  ;;  %10679 = vlog2.f32 %v4234_v0  ;;  %v4963_v40 = vadd.f32 1.0, %v16282_v52  ;;  %v16306_v41 = vadd.f32 -4.0, %v1758_v44  ;;  %v2697_v43 = vand.u32 2147483647, %v16297_v54 }
 0x504   : > { %19792 = vst [vmem:[#allocation39_spill] sm:$0xff] %v16295_v15  ;;  %10681 = vpow2.f32 %v3315_v28  ;;  %v2699_v11 = vand.u32 2147483647, %v16301_v37  ;;  %v16317_v35 = vmul.f32 1.442695, %v2930_v18  ;;  %v16319_v3 = vpop.eup %10669  ;;  %v4948_v55 = vmul.f32 -0.5, %v16276_v22  ;;  %v1958_v18 = vpop.f32.mrf.mxu1 }
 0x505   : > { %10683 = vlog2.f32 %v4945_v8  ;;  %v16322_v7 = vsub.f32 0.0, %v2676_v6  ;;  %v5026_v44 = vadd.f32 1.0, %v16319_v3  ;;  %v2689_v56 = vand.u32 2147483647, %v16306_v41 }
 0x506   : > { %v16325_v28 = vpop.eup %10671  ;;  %10685 = vlog2.f32 %v4963_v40  ;;  %v2953_v39 = vsub.f32 0.0, %v2697_v43  ;;  %v5020_v27 = vmul.f32 -0.5, %v16218_v1  ;;  %v2955_v51 = vsub.f32 0.0, %v2699_v11  ;;  %v16347_v6 = vpop.f32.mrf.mxu1 }
 0x507   : > { %v5044_v45 = vadd.f32 1.0, %v16325_v28  ;;  %v4237_v0 = vmul.f32 -0.5, %v19790_v10  ;;  %10687 = vlog2.f32 %v5026_v44  ;;  %v1951_v40 = vadd.f32 %v16207_v23, %v14182_v31 }
 0x508   : > { %v16336_v61 = vadd.f32 1.0, %v4948_v55  ;;  %v5023_v43 = vand.u32 2147483647, %v16218_v1  ;;  %v5038_v58 = vmul.f32 -0.5, %v16232_v2  ;;  %v5041_v11 = vand.u32 2147483647, %v16232_v2  ;;  %v16345_v55 = vpop.f32.mrf.mxu0 }
 0x509   : > { %10689 = vlog2.f32 %v5044_v45  ;;  %v3389_v38 = vmul.f32 1.442695, %v2953_v39  ;;  %v5021_v44 = vadd.f32 1.0, %v5020_v27  ;;  %v2945_v12 = vsub.f32 0.0, %v2689_v56  ;;  %v19808_v39 = vld [vmem:[#allocation60_spill] sm:$0xff] }
 0x50a   : > { %v16343_v63 = vpop.eup %10673  ;;  %v3393_v8 = vmul.f32 1.442695, %v2955_v51  ;;  %v4238_v23 = vadd.f32 1.0, %v4237_v0  ;;  %v16349_v57 = vadd.f32 -4.0, %v1951_v40  ;;  %v4240_v45 = vand.u32 2147483647, %v19790_v10 }
 0x50b   : > { %19793 = vst [vmem:[#allocation69_spill] sm:$0xff] %v16343_v63  ;;  %10691 = vpow2.f32 %v3389_v38  ;;  %v4252_v32 = vadd.f32 1.0, %v19795_v26  ;;  %vm16353_vm2 = vcmp.lt.f32.partialorder %v5023_v43, 0.0004427343  ;;  %v5039_v56 = vadd.f32 1.0, %v5038_v58  ;;  %v19802_v63 = vld [vmem:[#allocation30_spill] sm:$0xff] }
 0x50c   : > { %v10676_v48 = vpop.eup %10675  ;;  %19794 = vst [vmem:[#allocation24_spill] sm:$0xff] %v16349_v57  ;;  %10693 = vpow2.f32 %v3393_v8  ;;  %v1766_v27 = vadd.f32 %v1765_v59, %v19607_v62  ;;  %vm16358_vm3 = vcmp.lt.f32.partialorder %v5041_v11, 0.0004427343  ;;  %v5029_v38 = vmul.f32 -0.5, %v16319_v3  ;;  %v16370_v59 = vpop.f32.mrf.mxu0 }
 0x50d   : > { %10695 = vlog2.f32 %v4252_v32  ;;  %v1959_v40 = vadd.f32 %v1958_v18, %v14286_v14  ;;  %v5047_v43 = vmul.f32 -0.5, %v16325_v28  ;;  %v4239_v58 = vmul.f32 %v19790_v10, %v4238_v23  ;;  %v16372_v11 = vpop.f32.mrf.mxu1 }
 0x50e   : > { %v10678_v34 = vpop.eup %10677  ;;  %v16368_v8 = vadd.f32 -4.0, %v1766_v27  ;;  %19801 = vst [vmem:[#allocation52_spill] sm:$0xff] %v16372_v11  ;;  %v5019_v47 = vmul.f32 0.6931472, %v10676_v48  ;;  %v5022_v15 = vmul.f32 %v16218_v1, %v5021_v44  ;;  %v2691_v32 = vand.u32 2147483647, %v16349_v57 }
 0x50f   : > { %vm4241_vm4 = vcmp.lt.f32.partialorder %v4240_v45, 0.0004427343  ;;  %v5037_v18 = vmul.f32 0.6931472, %v10678_v34  ;;  %v5030_v10 = vadd.f32 1.0, %v5029_v38  ;;  %v19803_v21 = vmax.f32 %v19802_v63, 0.0  ;;  %v16386_v34 = vpop.f32.mrf.mxu0 }
 0x510   : > { %v10680_v51 = vpop.eup %10679  ;;  %v2698_v42 = vand.u32 2147483647, %v16368_v8  ;;  %v5032_v23 = vand.u32 2147483647, %v16319_v3  ;;  %v3373_v27 = vmul.f32 1.442695, %v2945_v12  ;;  %v5040_v1 = vmul.f32 %v16232_v2, %v5039_v56 }
 0x511   : > { %v16364_v30 = vpop.eup %10681  ;;  %v4236_v13 = vmul.f32 0.6931472, %v10680_v51  ;;  %v5048_v44 = vadd.f32 1.0, %v5047_v43  ;;  %v5050_v38 = vand.u32 2147483647, %v16325_v28  ;;  %v19804_v12 = vld [vmem:[#allocation70_spill] sm:$0xff]  ;;  %v5025_v2 = vsel %vm16353_vm2, %v5022_v15, %v5019_v47 }
 0x512   : > { %19800 = vst [vmem:[#allocation44_spill] sm:$0xff] %v16364_v30  ;;  %v16377_v30 = vadd.f32 -4.0, %v1959_v40  ;;  %v10684_v51 = vpop.eup %10683  ;;  %v2954_v45 = vsub.f32 0.0, %v2698_v42  ;;  %v16388_v40 = vpop.f32.mrf.mxu1  ;;  %v19805_v63 = vld [vmem:[#allocation27_spill] sm:$0xff]  ;;  %v5043_v42 = vsel %vm16358_vm3, %v5040_v1, %v5037_v18  ;;  %v5031_v50 = vmul.f32 %v16319_v3, %v5030_v10 }
 0x513   : > { %v4242_v5 = vsel %vm4241_vm4, %v4239_v58, %v4236_v13  ;;  %v16382_v48 = vpop.eup %10685  ;;  %v2947_v58 = vsub.f32 0.0, %v2691_v32  ;;  %vm16398_vm5 = vcmp.lt.f32.partialorder %v5032_v23, 0.0004427343  ;;  %v5049_v47 = vmul.f32 %v16325_v28, %v5048_v44  ;;  %v16408_v18 = vpop.f32.mrf.mxu0  ;;  %v19844_v57 = vld [vmem:[#allocation51_spill] sm:$0xff] }
 0x514   : > { %v5922_v60 = vadd.f32 %v4242_v5, %v19803_v21  ;;  %v2700_v13 = vand.u32 2147483647, %v16377_v30  ;;  %v10688_v5 = vpop.eup %10687  ;;  %v3391_v56 = vmul.f32 1.442695, %v2954_v45  ;;  %v19809_v0 = vpack.c.bf16 %v19805_v63, %v19808_v39  ;;  %v16410_v3 = vpop.f32.mrf.mxu1 }
 0x515   : > { %v5028_v19 = vmul.f32 0.6931472, %v10688_v5  ;;  %vm5051_vm6 = vcmp.lt.f32.partialorder %v5050_v38, 0.0004427343  ;;  %v19812_v1 = vmax.f32 %v16169_v29, 0.0  ;;  %v4966_v11 = vmul.f32 -0.5, %v16282_v52  ;;  %v16439_v5 = vpop.f32.mrf.mxu0 }
 0x516   : > { %v6138_v25 = vpack.c.bf16 %v5922_v60, %v19804_v12  ;;  %v9491_v21 = vpack.c.bf16 %v5922_v60, %v19805_v63  ;;  %v2956_v43 = vsub.f32 0.0, %v2700_v13  ;;  %v10690_v49 = vpop.eup %10689  ;;  %v4255_v60 = vmul.f32 -0.5, %v19795_v26 }
 0x517   : > { %v5046_v32 = vmul.f32 0.6931472, %v10690_v49  ;;  %10697 = vpow2.f32 %v3391_v56  ;;  %v5034_v10 = vsel %vm16398_vm5, %v5031_v50, %v5028_v19  ;;  %v19810_v49 = vmax.f32 %v16089_v33, 0.0 }
 0x518   : > { %6907 = vst [vmem:[%s11758_s29 + $0x130] sm:$0xff] %v9491_v21  ;;  %8235 = vmatprep.mubr.bf16.mxu0 %v6138_v25  ;;  %v3395_v15 = vmul.f32 1.442695, %v2956_v43  ;;  %10699 = vpow2.f32 %v3373_v27  ;;  %v3377_v25 = vmul.f32 1.442695, %v2947_v58  ;;  %v16414_v23 = vpop.eup %10691  ;;  %v16422_v44 = vadd.f32 %v5034_v10, %v19812_v1 }
 0x519   : > { %8236 = vmatmul.mubr.bf16.gmra.mxu0 %v19809_v0  ;;  %v16418_v28 = vadd.f32 %v5025_v2, %v19810_v49  ;;  %v5052_v45 = vsel %vm5051_vm6, %v5049_v47, %v5046_v32  ;;  %v16424_v13 = vpop.eup %10693  ;;  %v19814_v19 = vmax.f32 %v16111_v4, 0.0  ;;  %v19816_v27 = vmax.f32 %v16171_v17, 0.0  ;;  %v16441_v4 = vpop.f32.mrf.mxu1 }
 0x51a   : > { %19813 = vst [vmem:[#allocation50_spill] sm:$0xff] %v16422_v44  ;;  %10701 = vpow2.f32 %v3395_v15  ;;  %v4256_v33 = vadd.f32 1.0, %v4255_v60  ;;  %v10696_v58 = vpop.eup %10695  ;;  %v4947_v29 = vmul.f32 0.6931472, %v10684_v51  ;;  %v5161_v63 = vadd.f32 1.0, %v16414_v23 }
 0x51b   : > { %19811 = vst [vmem:[#allocation48_spill] sm:$0xff] %v16418_v28  ;;  %v16429_v50 = vadd.f32 %v5043_v42, %v19814_v19  ;;  %v16433_v38 = vadd.f32 %v5052_v45, %v19816_v27  ;;  %v9535_v12 = vpack.c.bf16 %v16422_v44, %v16418_v28  ;;  %v4258_v21 = vand.u32 2147483647, %v19795_v26 }
 0x51c   : > { %10703 = vpow2.f32 %v3377_v25  ;;  %v1760_v2 = vadd.f32 %v16216_v24, %v19607_v62  ;;  %v5179_v51 = vadd.f32 1.0, %v16424_v13  ;;  %v4950_v42 = vmul.f32 %v16276_v22, %v16336_v61 }
 0x51d   : > { %19815 = vst [vmem:[#allocation30_spill] sm:$0xff] %v16429_v50  ;;  %19817 = vst [vmem:[#allocation70_spill] sm:$0xff] %v16433_v38  ;;  %v9536_v17 = vpack.c.bf16 %v16433_v38, %v16429_v50  ;;  %v19818_v56 = vand.u32 2147483647, %v16276_v22  ;;  %10705 = vpow2.f32 %v16317_v35  ;;  %v3347_v60 = vmul.f32 1.442695, %v16322_v7  ;;  %v16468_v35 = vpop.f32.mrf.mxu0  ;;  %v16470_v7 = vpop.f32.mrf.mxu1 }
 0x51e   : > { %6951 = vst [vmem:[%s11758_s29 + $0x290] sm:$0xff] %v9535_v12  ;;  %v1953_v24 = vadd.f32 %v16227_v9, %v14286_v14  ;;  %v4254_v32 = vmul.f32 0.6931472, %v10696_v58  ;;  %v4257_v47 = vmul.f32 %v19795_v26, %v4256_v33  ;;  %v1768_v61 = vadd.f32 %v16345_v55, %v14173_v16  ;;  %19821 = vst [vmem:[#allocation27_spill] sm:$0xff] %v16468_v35  ;;  %v19824_v55 = vld [vmem:[#allocation76_spill] sm:$0xff]  ;;  %v19832_v12 = vld [vmem:[#allocation19_spill] sm:$0xff] }
 0x51f   : > { %vm16452_vm7 = vcmp.lt.f32.partialorder %v19818_v56, 0.0004427343  ;;  %6952 = vst [vmem:[%s11758_s29 + $0x298] sm:$0xff] %v9536_v17  ;;  %v4969_v15 = vand.u32 2147483647, %v16282_v52  ;;  %10707 = vlog2.f32 %v5161_v63  ;;  %19822 = vst [vmem:[#allocation60_spill] sm:$0xff] %v16470_v7  ;;  %v1774_v49 = vadd.f32 %v16386_v34, %v14173_v16  ;;  %v16497_v63 = vpop.f32.mrf.mxu0 }
 0x520   : > { %v4953_v22 = vsel %vm16452_vm7, %v4950_v42, %v4947_v29  ;;  %vm4259_vm8 = vcmp.lt.f32.partialorder %v4258_v21, 0.0004427343  ;;  %v4967_v39 = vadd.f32 1.0, %v4966_v11  ;;  %v16472_v0 = vadd.f32 -4.0, %v1760_v2  ;;  %v19831_v58 = vld [vmem:[#allocation56_spill] sm:$0xff]  ;;  %v16499_v21 = vpop.f32.mrf.mxu1 }
 0x521   : > { %10709 = vlog2.f32 %v5179_v51  ;;  %v4260_v9 = vsel %vm4259_vm8, %v4257_v47, %v4254_v32  ;;  %v19825_v10 = vmax.f32 %v19824_v55, 0.0  ;;  %v19826_v1 = vmax.f32 %v16101_v53, 0.0  ;;  %v19835_v55 = vld [vmem:[#allocation31_spill] sm:$0xff]  ;;  %v19863_v33 = vld [vmem:[#allocation40_spill] sm:$0xff] }
 0x522   : > { %19823 = vst [vmem:[#allocation77_spill] sm:$0xff] %v16472_v0  ;;  %10711 = vpow2.f32 %v3347_v60  ;;  %v16483_v19 = vadd.f32 -4.0, %v1953_v24  ;;  %v16485_v11 = vadd.f32 -4.0, %v1768_v61  ;;  %v1967_v27 = vadd.f32 %v16388_v40, %v14182_v31 }
 0x523   : > { %v5924_v25 = vadd.f32 %v4260_v9, %v19825_v10  ;;  %v16481_v45 = vadd.f32 %v4953_v22, %v19826_v1  ;;  %vm16489_vm9 = vcmp.lt.f32.partialorder %v4969_v15, 0.0004427343  ;;  %v1961_v53 = vadd.f32 %v16347_v6, %v14182_v31  ;;  %v19833_v22 = vld [vmem:[#allocation33_spill] sm:$0xff] }
 0x524   : > { %19828 = vst [vmem:[#allocation78_spill] sm:$0xff] %v16483_v19  ;;  %v16501_v17 = vpop.eup %10697  ;;  %v16504_v2 = vmul.f32 0.6931472, %v16382_v48  ;;  %v16507_v40 = vmul.f32 %v16282_v52, %v4967_v39  ;;  %v2690_v51 = vand.u32 2147483647, %v16472_v0  ;;  %v16510_v42 = vadd.f32 -4.0, %v1774_v49  ;;  %v16536_v49 = vpop.f32.mrf.mxu1 }
 0x525   : > { %19827 = vst [vmem:[#allocation76_spill] sm:$0xff] %v16481_v45  ;;  %v6140_v29 = vpack.c.bf16 %v5924_v25, %v19831_v58  ;;  %v9492_v34 = vpack.c.bf16 %v5924_v25, %v19832_v12  ;;  %v16512_v56 = vpop.eup %10699  ;;  %v5170_v60 = vadd.f32 1.0, %v16501_v17  ;;  %v16518_v24 = vadd.f32 -4.0, %v1967_v27  ;;  %v16534_v25 = vpop.f32.mrf.mxu0 }
 0x526   : > { %v2692_v32 = vand.u32 2147483647, %v16483_v19  ;;  %v2705_v47 = vand.u32 2147483647, %v16485_v11  ;;  %v2713_v61 = vand.u32 2147483647, %v16510_v42  ;;  %v19834_v15 = vpack.c.bf16 %v19832_v12, %v19833_v22 }
 0x527   : > { %6908 = vst [vmem:[%s11758_s29 + $0x138] sm:$0xff] %v9492_v34  ;;  %8428 = vmatprep.mubr.bf16.mxu1 %v6140_v29  ;;  %v16520_v48 = vpop.eup %10701  ;;  %10713 = vlog2.f32 %v5170_v60  ;;  %v16531_v9 = vadd.f32 -4.0, %v1961_v53  ;;  %v4378_v10 = vadd.f32 1.0, %v19835_v55  ;;  %v5089_v27 = vadd.f32 1.0, %v16512_v56  ;;  %v16559_v1 = vpop.f32.mrf.mxu0 }
 0x528   : > { %8429 = vmatmul.mubr.bf16.gmra.mxu1 %v19834_v15  ;;  %v5188_v39 = vadd.f32 1.0, %v16520_v48  ;;  %v16544_v29 = vsub.f32 0.0, %v2690_v51  ;;  %v5164_v34 = vmul.f32 -0.5, %v16414_v23  ;;  %v5182_v53 = vmul.f32 -0.5, %v16424_v13  ;;  %19837 = vst [vmem:[#allocation19_spill] sm:$0xff] %v16559_v1 }
 0x529   : > { %v16546_v12 = vpop.eup %10703  ;;  %v2715_v60 = vand.u32 2147483647, %v16518_v24  ;;  %v16553_v15 = vsub.f32 0.0, %v2692_v32  ;;  %v2441_v26 = vmax.f32 %v16297_v54, 0.0  ;;  %v2961_v52 = vsub.f32 0.0, %v2705_v47 }
 0x52a   : > { %10715 = vlog2.f32 %v5188_v39  ;;  %v16551_v22 = vpop.eup %10705  ;;  %v2969_v43 = vsub.f32 0.0, %v2713_v61  ;;  %v5167_v51 = vand.u32 2147483647, %v16414_v23  ;;  %v5173_v58 = vmul.f32 -0.5, %v16501_v17  ;;  %v16561_v39 = vpop.f32.mrf.mxu1 }
 0x52b   : > { %19836 = vst [vmem:[#allocation56_spill] sm:$0xff] %v16551_v22  ;;  %v2707_v6 = vand.u32 2147483647, %v16531_v9  ;;  %10717 = vlog2.f32 %v4378_v10  ;;  %19838 = vst [vmem:[#allocation33_spill] sm:$0xff] %v16561_v39  ;;  %v16564_v44 = vmul.f32 -0.5, %v16512_v56  ;;  %v5107_v32 = vadd.f32 1.0, %v16546_v12 }
 0x52c   : > { %v10708_v38 = vpop.eup %10707  ;;  %v2443_v54 = vmax.f32 %v16301_v37, 0.0  ;;  %v2971_v47 = vsub.f32 0.0, %v2715_v60  ;;  %10719 = vlog2.f32 %v5089_v27  ;;  %v5165_v0 = vadd.f32 1.0, %v5164_v34 }
 0x52d   : > { %v5183_v20 = vadd.f32 1.0, %v5182_v53  ;;  %v2442_v46 = vmax.f32 %v16368_v8, 0.0  ;;  %v2444_v45 = vmax.f32 %v16377_v30, 0.0  ;;  %v5191_v22 = vmul.f32 -0.5, %v16520_v48  ;;  %v16580_v53 = vpop.f32.mrf.mxu0  ;;  %v16582_v8 = vpop.f32.mrf.mxu1 }
 0x52e   : > { %v10710_v61 = vpop.eup %10709  ;;  %v16573_v39 = vmul.f32 1.442695, %v2961_v52  ;;  %v3421_v50 = vmul.f32 1.442695, %v2969_v43  ;;  %vm16575_vm10 = vcmp.lt.f32.partialorder %v5167_v51, 0.0004427343  ;;  %10721 = vlog2.f32 %v5107_v32 }
 0x52f   : > { %v16569_v10 = vpop.eup %10711  ;;  %v5185_v37 = vand.u32 2147483647, %v16424_v13  ;;  %v5174_v27 = vadd.f32 1.0, %v5173_v58  ;;  %v2963_v34 = vsub.f32 0.0, %v2707_v6  ;;  %19842 = vst [vmem:[#allocation79_spill] sm:$0xff] %v16580_v53  ;;  %19843 = vst [vmem:[#allocation80_spill] sm:$0xff] %v16582_v8  ;;  %v5166_v52 = vmul.f32 %v16414_v23, %v5165_v0 }
 0x530   : > { %19839 = vst [vmem:[#allocation31_spill] sm:$0xff] %v16569_v10  ;;  %v5163_v60 = vmul.f32 0.6931472, %v10708_v38  ;;  %v5181_v30 = vmul.f32 0.6931472, %v10710_v61  ;;  %v5184_v43 = vmul.f32 %v16424_v13, %v5183_v20  ;;  %v4381_v51 = vmul.f32 -0.5, %v19835_v55  ;;  %v16598_v13 = vpop.f32.mrf.mxu0  ;;  %v16600_v38 = vpop.f32.mrf.mxu1 }
 0x531   : > { %v3425_v10 = vmul.f32 1.442695, %v2971_v47  ;;  %v4396_v7 = vadd.f32 1.0, %v19844_v57  ;;  %v5176_v35 = vand.u32 2147483647, %v16501_v17  ;;  %v5192_v58 = vadd.f32 1.0, %v5191_v22 }
 0x532   : > { %v5194_v6 = vand.u32 2147483647, %v16520_v48  ;;  %10723 = vpow2.f32 %v3421_v50  ;;  %vm16590_vm11 = vcmp.lt.f32.partialorder %v5185_v37, 0.0004427343  ;;  %v1776_v23 = vadd.f32 %v16408_v18, %v19607_v62 }
 0x533   : > { %10725 = vlog2.f32 %v4396_v7  ;;  %v1969_v20 = vadd.f32 %v16410_v3, %v14286_v14  ;;  %v5169_v22 = vsel %vm16575_vm10, %v5166_v52, %v5163_v60  ;;  %v5187_v50 = vsel %vm16590_vm11, %v5184_v43, %v5181_v30  ;;  %v16620_v60 = vpop.f32.mrf.mxu0  ;;  %v16622_v30 = vpop.f32.mrf.mxu1 }
 0x534   : > { %v10714_v0 = vpop.eup %10713  ;;  %v5175_v32 = vmul.f32 %v16501_v17, %v5174_v27  ;;  %10727 = vpow2.f32 %v3425_v10  ;;  %v4382_v47 = vadd.f32 1.0, %v4381_v51  ;;  %v16607_v18 = vadd.f32 -4.0, %v1776_v23  ;;  %19850 = vst [vmem:[#allocation81_spill] sm:$0xff] %v16620_v60  ;;  %19851 = vst [vmem:[#allocation82_spill] sm:$0xff] %v16622_v30  ;;  %v19911_v30 = vld [vmem:[#allocation26_spill] sm:$0xff] }
 0x535   : > { %v5172_v7 = vmul.f32 0.6931472, %v10714_v0  ;;  %v16609_v61 = vadd.f32 -4.0, %v1969_v20  ;;  %vm5177_vm12 = vcmp.lt.f32.partialorder %v5176_v35, 0.0004427343  ;;  %v5193_v37 = vmul.f32 %v16520_v48, %v5192_v58 }
 0x536   : > { %vm16612_vm13 = vcmp.lt.f32.partialorder %v5194_v6, 0.0004427343  ;;  %v4384_v1 = vand.u32 2147483647, %v19835_v55  ;;  %v16617_v8 = vadd.f32 %v5169_v22, %v2441_v26  ;;  %v2714_v27 = vand.u32 2147483647, %v16607_v18 }
 0x537   : > { %v10716_v3 = vpop.eup %10715  ;;  %v5178_v17 = vsel %vm5177_vm12, %v5175_v32, %v5172_v7  ;;  %v16624_v35 = vadd.f32 %v5187_v50, %v2443_v54  ;;  %v4399_v43 = vmul.f32 -0.5, %v19844_v57  ;;  %v2716_v51 = vand.u32 2147483647, %v16609_v61  ;;  %v16639_v7 = vpop.f32.mrf.mxu0 }
 0x538   : > { %19849 = vst [vmem:[#allocation51_spill] sm:$0xff] %v16617_v8  ;;  %v5190_v10 = vmul.f32 0.6931472, %v10716_v3  ;;  %v10718_v52 = vpop.eup %10717  ;;  %v16626_v48 = vadd.f32 %v5178_v17, %v2442_v46  ;;  %v4383_v6 = vmul.f32 %v19835_v55, %v4382_v47  ;;  %v2970_v23 = vsub.f32 0.0, %v2714_v27  ;;  %19855 = vst [vmem:[#allocation86_spill] sm:$0xff] %v16639_v7  ;;  %v16641_v3 = vpop.f32.mrf.mxu1  ;;  %v19857_v47 = vld [vmem:[#allocation72_spill] sm:$0xff] }
 0x539   : > { %19852 = vst [vmem:[#allocation83_spill] sm:$0xff] %v16624_v35  ;;  %v4380_v58 = vmul.f32 0.6931472, %v10718_v52  ;;  %v10720_v20 = vpop.eup %10719  ;;  %vm4385_vm14 = vcmp.lt.f32.partialorder %v4384_v1, 0.0004427343  ;;  %v2972_v46 = vsub.f32 0.0, %v2716_v51  ;;  %10729 = vpow2.f32 %v16573_v39 }
 0x53a   : > { %19853 = vst [vmem:[#allocation84_spill] sm:$0xff] %v16626_v48  ;;  %v5196_v26 = vsel %vm16612_vm13, %v5193_v37, %v5190_v10  ;;  %v9543_v0 = vpack.c.bf16 %v16626_v48, %v16617_v8  ;;  %v3375_v22 = vmul.f32 1.442695, %v16544_v29  ;;  %v3379_v50 = vmul.f32 1.442695, %v16553_v15  ;;  %19856 = vst [vmem:[#allocation87_spill] sm:$0xff] %v16641_v3 }
 0x53b   : > { %v16635_v54 = vadd.f32 %v5196_v26, %v2444_v45  ;;  %v3409_v32 = vmul.f32 1.442695, %v2963_v34  ;;  %v4386_v53 = vsel %vm4385_vm14, %v4383_v6, %v4380_v58  ;;  %v5093_v55 = vadd.f32 1.0, %v16564_v44  ;;  %v10722_v1 = vpop.eup %10721  ;;  %v19910_v7 = vld [vmem:[#allocation54_spill] sm:$0xff] }
 0x53c   : > { %6959 = vst [vmem:[%s11758_s29 + $0x2d0] sm:$0xff] %v9543_v0  ;;  %v19858_v37 = vmax.f32 %v19857_v47, 0.0  ;;  %v5095_v15 = vand.u32 2147483647, %v16512_v56  ;;  %v4400_v17 = vadd.f32 1.0, %v4399_v43  ;;  %v19859_v27 = vmax.f32 %v16109_v36, 0.0 }
 0x53d   : > { %19854 = vst [vmem:[#allocation85_spill] sm:$0xff] %v16635_v54  ;;  %v9544_v45 = vpack.c.bf16 %v16635_v54, %v16624_v35  ;;  %v3423_v10 = vmul.f32 1.442695, %v2970_v23  ;;  %v19860_v44 = vsel %vm16489_vm9, %v16507_v40, %v16504_v2  ;;  %v5091_v39 = vmul.f32 0.6931472, %v10720_v20  ;;  %v19862_v36 = vld [vmem:[#allocation52_spill] sm:$0xff]  ;;  %v16670_v2 = vpop.f32.mrf.mxu0  ;;  %v16672_v40 = vpop.f32.mrf.mxu1 }
 0x53e   : > { %v5938_v29 = vadd.f32 %v4386_v53, %v19858_v37  ;;  %v16659_v52 = vadd.f32 %v19860_v44, %v19859_v27  ;;  %v4402_v51 = vand.u32 2147483647, %v19844_v57  ;;  %v3427_v26 = vmul.f32 1.442695, %v2972_v46  ;;  %19864 = vst [vmem:[#allocation52_spill] sm:$0xff] %v16670_v2  ;;  %19865 = vst [vmem:[#allocation40_spill] sm:$0xff] %v16672_v40 }
 0x53f   : > { %6960 = vst [vmem:[%s11758_s29 + $0x2d8] sm:$0xff] %v9544_v45  ;;  %v16663_v58 = vpop.eup %10723  ;;  %10731 = vpow2.f32 %v3409_v32  ;;  %v1770_v43 = vadd.f32 %v16370_v59, %v19607_v62  ;;  %v1963_v6 = vadd.f32 %v19862_v36, %v14286_v14  ;;  %v5094_v0 = vmul.f32 %v16512_v56, %v5093_v55  ;;  %v19866_v32 = vld [vmem:[#allocation65_spill] sm:$0xff]  ;;  %v16699_v36 = vpop.f32.mrf.mxu1  ;;  %v19892_v44 = vld [vmem:[#allocation59_spill] sm:$0xff] }
 0x540   : > { %19861 = vst [vmem:[#allocation72_spill] sm:$0xff] %v16659_v52  ;;  %v6146_v23 = vpack.c.bf16 %v5938_v29, %v19863_v33  ;;  %v10726_v20 = vpop.eup %10725  ;;  %v5110_v46 = vmul.f32 -0.5, %v16546_v12  ;;  %10733 = vpow2.f32 %v3375_v22  ;;  %v9499_v53 = vpack.c.bf16 %v5938_v29, %v19866_v32  ;;  %v19870_v22 = vld [vmem:[#allocation67_spill] sm:$0xff]  ;;  %19875 = vst [vmem:[#allocation89_spill] sm:$0xff] %v16699_v36  ;;  %v19881_v59 = vld [vmem:[#allocation45_spill] sm:$0xff] }
 0x541   : > { %v16677_v45 = vpop.eup %10727  ;;  %vm16679_vm15 = vcmp.lt.f32.partialorder %v5095_v15, 0.0004427343  ;;  %v4398_v47 = vmul.f32 0.6931472, %v10726_v20  ;;  %v4401_v37 = vmul.f32 %v19844_v57, %v4400_v17  ;;  %10735 = vpow2.f32 %v3423_v10  ;;  %v16697_v10 = vpop.f32.mrf.mxu0 }
 0x542   : > { %8245 = vmatprep.mubr.bf16.mxu0 %v6146_v23  ;;  %v5097_v56 = vsel %vm16679_vm15, %v5094_v0, %v5091_v39  ;;  %6915 = vst [vmem:[%s11758_s29 + $0x170] sm:$0xff] %v9499_v53  ;;  %vm4403_vm0 = vcmp.lt.f32.partialorder %v4402_v51, 0.0004427343  ;;  %10737 = vpow2.f32 %v3427_v26  ;;  %v19871_v55 = vpack.c.bf16 %v19866_v32, %v19870_v22  ;;  %19874 = vst [vmem:[#allocation88_spill] sm:$0xff] %v16697_v10  ;;  %v19876_v51 = vld [vmem:[#allocation47_spill] sm:$0xff]  ;;  %v19880_v53 = vld [vmem:[#allocation41_spill] sm:$0xff] }
 0x543   : > { %v16692_v29 = vadd.f32 -4.0, %v1770_v43  ;;  %v16694_v15 = vadd.f32 -4.0, %v1963_v6  ;;  %v5305_v57 = vadd.f32 1.0, %v16663_v58  ;;  %v4404_v17 = vsel %vm4403_vm0, %v4401_v37, %v4398_v47 }
 0x544   : > { %8246 = vmatmul.mubr.bf16.gmra.mxu0 %v19871_v55  ;;  %v5111_v33 = vadd.f32 1.0, %v5110_v46  ;;  %v5113_v39 = vand.u32 2147483647, %v16546_v12  ;;  %10739 = vpow2.f32 %v3379_v50  ;;  %v19877_v26 = vmax.f32 %v19876_v51, 0.0  ;;  %v16725_v55 = vpop.f32.mrf.mxu1 }
 0x545   : > { %19872 = vst [vmem:[#allocation65_spill] sm:$0xff] %v16692_v29  ;;  %19873 = vst [vmem:[#allocation67_spill] sm:$0xff] %v16694_v15  ;;  %v19878_v20 = vmax.f32 %v16306_v41, 0.0  ;;  %v5323_v6 = vadd.f32 1.0, %v16677_v45  ;;  %v1778_v0 = vadd.f32 %v16439_v5, %v14173_v16  ;;  %v1784_v32 = vadd.f32 %v16497_v63, %v14173_v16  ;;  %v16723_v5 = vpop.f32.mrf.mxu0 }
 0x546   : > { %v5940_v23 = vadd.f32 %v4404_v17, %v19877_v26  ;;  %v16713_v46 = vmul.f32 0.6931472, %v10722_v1  ;;  %v1971_v41 = vadd.f32 %v16441_v4, %v14182_v31  ;;  %v2706_v37 = vand.u32 2147483647, %v16692_v29  ;;  %19882 = vst [vmem:[#allocation41_spill] sm:$0xff] %v16723_v5  ;;  %19883 = vst [vmem:[#allocation45_spill] sm:$0xff] %v16725_v55  ;;  %v16738_v51 = vpop.eup %10729 }
 0x547   : > { %v16706_v43 = vadd.f32 %v5097_v56, %v19878_v20  ;;  %v2708_v56 = vand.u32 2147483647, %v16694_v15  ;;  %10741 = vlog2.f32 %v5305_v57  ;;  %v16721_v22 = vadd.f32 -4.0, %v1784_v32  ;;  %v19886_v17 = vld [vmem:[#allocation62_spill] sm:$0xff] }
 0x548   : > { %v6148_v50 = vpack.c.bf16 %v5940_v23, %v19880_v53  ;;  %v9500_v47 = vpack.c.bf16 %v5940_v23, %v19881_v59  ;;  %v16728_v63 = vmul.f32 %v16546_v12, %v5111_v33  ;;  %vm16730_vm1 = vcmp.lt.f32.partialorder %v5113_v39, 0.0004427343  ;;  %v19887_v33 = vld [vmem:[#allocation55_spill] sm:$0xff] }
 0x549   : > { %19879 = vst [vmem:[#allocation47_spill] sm:$0xff] %v16706_v43  ;;  %v1977_v4 = vadd.f32 %v16499_v21, %v14182_v31  ;;  %v4522_v57 = vadd.f32 1.0, %v19886_v17  ;;  %10743 = vlog2.f32 %v5323_v6  ;;  %v16742_v12 = vadd.f32 -4.0, %v1778_v0 }
 0x54a   : > { %6916 = vst [vmem:[%s11758_s29 + $0x178] sm:$0xff] %v9500_v47  ;;  %8438 = vmatprep.mubr.bf16.mxu1 %v6148_v50  ;;  %v19888_v39 = vpack.c.bf16 %v19881_v59, %v19887_v33  ;;  %v16747_v20 = vadd.f32 -4.0, %v1971_v41  ;;  %v2729_v32 = vand.u32 2147483647, %v16721_v22  ;;  %v16758_v0 = vsub.f32 0.0, %v2706_v37  ;;  %v16762_v59 = vpop.f32.mrf.mxu0  ;;  %v16764_v47 = vpop.f32.mrf.mxu1 }
 0x54b   : > { %v16750_v21 = vadd.f32 -4.0, %v1977_v4  ;;  %10745 = vlog2.f32 %v4522_v57  ;;  %v16760_v50 = vsub.f32 0.0, %v2708_v56  ;;  %19889 = vst [vmem:[#allocation62_spill] sm:$0xff] %v16762_v59  ;;  %19890 = vst [vmem:[#allocation55_spill] sm:$0xff] %v16764_v47  ;;  %v5233_v4 = vadd.f32 1.0, %v16738_v51 }
 0x54c   : > { %8439 = vmatmul.mubr.bf16.gmra.mxu1 %v19888_v39  ;;  %v16766_v41 = vpop.eup %10731  ;;  %v5308_v33 = vmul.f32 -0.5, %v16663_v58  ;;  %v2721_v56 = vand.u32 2147483647, %v16742_v12  ;;  %v2985_v34 = vsub.f32 0.0, %v2729_v32  ;;  %v4540_v23 = vadd.f32 1.0, %v19892_v44  ;;  %v16788_v19 = vpop.f32.mrf.mxu0 }
 0x54d   : > { %v16772_v53 = vpop.eup %10733  ;;  %v5236_v6 = vmul.f32 -0.5, %v16738_v51  ;;  %v5326_v54 = vmul.f32 -0.5, %v16677_v45  ;;  %v2723_v57 = vand.u32 2147483647, %v16747_v20  ;;  %v2731_v48 = vand.u32 2147483647, %v16750_v21  ;;  %v16790_v43 = vpop.f32.mrf.mxu1 }
 0x54e   : > { %19891 = vst [vmem:[#allocation90_spill] sm:$0xff] %v16772_v53  ;;  %v16777_v26 = vpop.eup %10735  ;;  %v5251_v28 = vadd.f32 1.0, %v16766_v41  ;;  %v4525_v32 = vmul.f32 -0.5, %v19886_v17  ;;  %10747 = vlog2.f32 %v4540_v23  ;;  %19893 = vst [vmem:[#allocation59_spill] sm:$0xff] %v16788_v19  ;;  %v5309_v27 = vadd.f32 1.0, %v5308_v33 }
 0x54f   : > { %v16783_v39 = vpop.eup %10737  ;;  %v5314_v37 = vadd.f32 1.0, %v16777_v26  ;;  %19894 = vst [vmem:[#allocation91_spill] sm:$0xff] %v16790_v43  ;;  %10749 = vlog2.f32 %v5233_v4  ;;  %v5311_v52 = vand.u32 2147483647, %v16663_v58  ;;  %v5329_v59 = vand.u32 2147483647, %v16677_v45  ;;  %v16802_v43 = vpop.f32.mrf.mxu0 }
 0x550   : > { %v5332_v53 = vadd.f32 1.0, %v16783_v39  ;;  %v2977_v40 = vsub.f32 0.0, %v2721_v56  ;;  %v3453_v2 = vmul.f32 1.442695, %v2985_v34  ;;  %v5327_v55 = vadd.f32 1.0, %v5326_v54  ;;  %19896 = vst [vmem:[#allocation93_spill] sm:$0xff] %v16802_v43  ;;  %v16804_v36 = vpop.f32.mrf.mxu1 }
 0x551   : > { %v16794_v47 = vpop.eup %10739  ;;  %10751 = vlog2.f32 %v5314_v37  ;;  %v2979_v23 = vsub.f32 0.0, %v2723_v57  ;;  %v2987_v5 = vsub.f32 0.0, %v2731_v48  ;;  %v16797_v19 = vadd.f32 1.0, %v5236_v6  ;;  %19897 = vst [vmem:[#allocation94_spill] sm:$0xff] %v16804_v36  ;;  %v16832_v43 = vpop.f32.mrf.mxu0 }
 0x552   : > { %19895 = vst [vmem:[#allocation92_spill] sm:$0xff] %v16794_v47  ;;  %10753 = vlog2.f32 %v5332_v53  ;;  %v16800_v4 = vmul.f32 -0.5, %v16766_v41  ;;  %v4526_v33 = vadd.f32 1.0, %v4525_v32  ;;  %v16807_v37 = vmul.f32 %v16663_v58, %v5309_v27  ;;  %19902 = vst [vmem:[#allocation95_spill] sm:$0xff] %v16832_v43  ;;  %v19918_v53 = vld [vmem:[#allocation63_spill] sm:$0xff] }
 0x553   : > { %10755 = vlog2.f32 %v5251_v28  ;;  %v4543_v48 = vmul.f32 -0.5, %v19892_v44  ;;  %vm16812_vm2 = vcmp.lt.f32.partialorder %v5311_v52, 0.0004427343  ;;  %vm16816_vm3 = vcmp.lt.f32.partialorder %v5329_v59, 0.0004427343 }
 0x554   : > { %v10742_v47 = vpop.eup %10741  ;;  %v3437_v6 = vmul.f32 1.442695, %v2977_v40  ;;  %10757 = vpow2.f32 %v3453_v2  ;;  %v4528_v57 = vand.u32 2147483647, %v19886_v17  ;;  %v1786_v58 = vadd.f32 %v16534_v25, %v19607_v62  ;;  %v16834_v25 = vpop.f32.mrf.mxu1 }
 0x555   : > { %v16824_v56 = vmul.f32 %v16677_v45, %v5327_v55  ;;  %v3441_v32 = vmul.f32 1.442695, %v2979_v23  ;;  %v3457_v52 = vmul.f32 1.442695, %v2987_v5  ;;  %v1979_v34 = vadd.f32 %v16536_v49, %v14286_v14  ;;  %19903 = vst [vmem:[#allocation96_spill] sm:$0xff] %v16834_v25 }
 0x556   : > { %v10744_v27 = vpop.eup %10743  ;;  %v5307_v54 = vmul.f32 0.6931472, %v10742_v47  ;;  %v5317_v36 = vmul.f32 -0.5, %v16777_v26  ;;  %v4527_v2 = vmul.f32 %v19886_v17, %v4526_v33  ;;  %v16830_v40 = vadd.f32 -4.0, %v1786_v58  ;;  %v16840_v47 = vpop.f32.mrf.mxu0 }
 0x557   : > { %v5335_v45 = vmul.f32 -0.5, %v16783_v39  ;;  %v4544_v23 = vadd.f32 1.0, %v4543_v48  ;;  %v16837_v5 = vadd.f32 -4.0, %v1979_v34  ;;  %v5325_v10 = vmul.f32 0.6931472, %v10744_v27  ;;  %19904 = vst [vmem:[#allocation97_spill] sm:$0xff] %v16840_v47  ;;  %v16842_v17 = vpop.f32.mrf.mxu1 }
 0x558   : > { %v10746_v59 = vpop.eup %10745  ;;  %10759 = vpow2.f32 %v3437_v6  ;;  %vm4529_vm4 = vcmp.lt.f32.partialorder %v4528_v57, 0.0004427343  ;;  %v4546_v49 = vand.u32 2147483647, %v19892_v44  ;;  %19905 = vst [vmem:[#allocation98_spill] sm:$0xff] %v16842_v17  ;;  %v5318_v43 = vadd.f32 1.0, %v5317_v36  ;;  %v16849_v57 = vpop.f32.mrf.mxu0 }
 0x559   : > { %v4524_v55 = vmul.f32 0.6931472, %v10746_v59  ;;  %10761 = vpow2.f32 %v3457_v52  ;;  %v2730_v58 = vand.u32 2147483647, %v16830_v40  ;;  %v2732_v25 = vand.u32 2147483647, %v16837_v5  ;;  %v16851_v59 = vpop.f32.mrf.mxu1 }
 0x55a   : > { %v5320_v48 = vand.u32 2147483647, %v16777_v26  ;;  %10763 = vpow2.f32 %v3441_v32  ;;  %v19906_v34 = vld [vmem:[#allocation46_spill] sm:$0xff]  ;;  %19909 = vst [vmem:[#allocation99_spill] sm:$0xff] %v16851_v59  ;;  %v5336_v3 = vadd.f32 1.0, %v5335_v45  ;;  %v5313_v45 = vsel %vm16812_vm2, %v16807_v37, %v5307_v54 }
 0x55b   : > { %v4530_v33 = vsel %vm4529_vm4, %v4527_v2, %v4524_v55  ;;  %v19907_v27 = vmax.f32 %v19906_v34, 0.0  ;;  %19908 = vst [vmem:[#allocation46_spill] sm:$0xff] %v16849_v57  ;;  %v10748_v47 = vpop.eup %10747  ;;  %v5338_v52 = vand.u32 2147483647, %v16783_v39  ;;  %v4545_v2 = vmul.f32 %v19892_v44, %v4544_v23 }
 0x55c   : > { %v2986_v55 = vsub.f32 0.0, %v2730_v58  ;;  %v10750_v17 = vpop.eup %10749  ;;  %v4542_v60 = vmul.f32 0.6931472, %v10748_v47  ;;  %v2988_v34 = vsub.f32 0.0, %v2732_v25  ;;  %v5331_v44 = vsel %vm16816_vm3, %v16824_v56, %v5325_v10 }
 0x55d   : > { %v5954_v6 = vadd.f32 %v4530_v33, %v19907_v27  ;;  %v16857_v33 = vpop.f32.mrf.mxu0  ;;  %v16859_v27 = vpop.f32.mrf.mxu1  ;;  %vm4547_vm5 = vcmp.lt.f32.partialorder %v4546_v49, 0.0004427343  ;;  %v5319_v47 = vmul.f32 %v16777_v26, %v5318_v43  ;;  %vm16868_vm6 = vcmp.lt.f32.partialorder %v5320_v48, 0.0004427343  ;;  %v19920_v43 = vld [vmem:[#allocation43_spill] sm:$0xff] }
 0x55e   : > { %19912 = vst [vmem:[#allocation54_spill] sm:$0xff] %v16857_v33  ;;  %19913 = vst [vmem:[#allocation26_spill] sm:$0xff] %v16859_v27  ;;  %v10752_v59 = vpop.eup %10751  ;;  %v3455_v23 = vmul.f32 1.442695, %v2986_v55  ;;  %v5337_v10 = vmul.f32 %v16783_v39, %v5336_v3  ;;  %v19919_v56 = vmax.f32 %v19918_v53, 0.0  ;;  %v19921_v26 = vpack.c.bf16 %v19911_v30, %v19920_v43 }
 0x55f   : > { %v6154_v36 = vpack.c.bf16 %v5954_v6, %v19910_v7  ;;  %v9507_v32 = vpack.c.bf16 %v5954_v6, %v19911_v30  ;;  %v10754_v7 = vpop.eup %10753  ;;  %v5316_v58 = vmul.f32 0.6931472, %v10752_v59  ;;  %v4548_v6 = vsel %vm4547_vm5, %v4545_v2, %v4542_v60  ;;  %v16873_v27 = vpop.f32.mrf.mxu0 }
 0x560   : > { %19916 = vst [vmem:[#allocation100_spill] sm:$0xff] %v16873_v27  ;;  %v16875_v37 = vpop.f32.mrf.mxu1  ;;  %v10756_v54 = vpop.eup %10755  ;;  %v5334_v28 = vmul.f32 0.6931472, %v10754_v7  ;;  %v5956_v49 = vadd.f32 %v4548_v6, %v19919_v56  ;;  %10765 = vpow2.f32 %v3455_v23  ;;  %v19922_v48 = vmax.f32 %v16510_v42, 0.0  ;;  %v19927_v42 = vld [vmem:[#allocation29_spill] sm:$0xff]  ;;  %v19928_v23 = vld [vmem:[#allocation38_spill] sm:$0xff] }
 0x561   : > { %6923 = vst [vmem:[%s11758_s29 + $0x1b0] sm:$0xff] %v9507_v32  ;;  %8255 = vmatprep.mubr.bf16.mxu0 %v6154_v36  ;;  %19917 = vst [vmem:[#allocation101_spill] sm:$0xff] %v16875_v37  ;;  %v5322_v60 = vsel %vm16868_vm6, %v5319_v47, %v5316_v58  ;;  %vm5339_vm7 = vcmp.lt.f32.partialorder %v5338_v52, 0.0004427343  ;;  %v3459_v2 = vmul.f32 1.442695, %v2988_v34  ;;  %v16889_v55 = vpop.f32.mrf.mxu0  ;;  %v16893_v39 = vpop.eup %10757 }
 0x562   : > { %8256 = vmatmul.mubr.bf16.gmra.mxu0 %v19921_v26  ;;  %v16885_v59 = vadd.f32 %v5313_v45, %v19922_v48  ;;  %19923 = vst [vmem:[#allocation63_spill] sm:$0xff] %v16889_v55  ;;  %v16891_v3 = vpop.f32.mrf.mxu1  ;;  %v19925_v36 = vmax.f32 %v16607_v18, 0.0  ;;  %v5340_v32 = vsel %vm5339_vm7, %v5337_v10, %v5334_v28  ;;  %v6156_v45 = vpack.c.bf16 %v5956_v49, %v19927_v42 }
 0x563   : > { %19924 = vst [vmem:[#allocation43_spill] sm:$0xff] %v16891_v3  ;;  %v9508_v7 = vpack.c.bf16 %v5956_v49, %v19928_v23  ;;  %v5255_v58 = vadd.f32 1.0, %v16800_v4  ;;  %v5257_v52 = vand.u32 2147483647, %v16766_v41  ;;  %v19929_v34 = vmax.f32 %v16518_v24, 0.0  ;;  %v16911_v18 = vpop.f32.mrf.mxu0  ;;  %v19934_v4 = vld [vmem:[#allocation27_spill] sm:$0xff] }
 0x564   : > { %v16897_v30 = vadd.f32 %v5322_v60, %v19925_v36  ;;  %v19930_v25 = vmax.f32 %v16609_v61, 0.0  ;;  %19932 = vst [vmem:[#allocation38_spill] sm:$0xff] %v16911_v18  ;;  %v16913_v53 = vpop.f32.mrf.mxu1  ;;  %v5235_v28 = vmul.f32 0.6931472, %v10750_v17  ;;  %v1780_v56 = vadd.f32 %v19934_v4, %v19607_v62  ;;  %v19935_v24 = vld [vmem:[#allocation60_spill] sm:$0xff]  ;;  %8448 = vmatprep.mubr.bf16.mxu1 %v6156_v45  ;;  %v19936_v17 = vld [vmem:[#allocation66_spill] sm:$0xff] }
 0x565   : > { %v16905_v47 = vadd.f32 %v5331_v44, %v19929_v34  ;;  %19933 = vst [vmem:[#allocation103_spill] sm:$0xff] %v16913_v53  ;;  %v1973_v44 = vadd.f32 %v19935_v24, %v14286_v14  ;;  %6924 = vst [vmem:[%s11758_s29 + $0x1b8] sm:$0xff] %v9508_v7  ;;  %v5253_v61 = vmul.f32 0.6931472, %v10756_v54  ;;  %v5449_v43 = vadd.f32 1.0, %v16893_v39  ;;  %v16928_v48 = vpop.f32.mrf.mxu0  ;;  %v16932_v36 = vpop.eup %10759 }
 0x566   : > { %19926 = vst [vmem:[#allocation102_spill] sm:$0xff] %v16897_v30  ;;  %v16909_v6 = vadd.f32 %v5340_v32, %v19930_v25  ;;  %v9551_v10 = vpack.c.bf16 %v16897_v30, %v16885_v59  ;;  %10767 = vpow2.f32 %v3459_v2  ;;  %v19937_v26 = vpack.c.bf16 %v19928_v23, %v19936_v17  ;;  %19938 = vst [vmem:[#allocation27_spill] sm:$0xff] %v16928_v48  ;;  %v16930_v60 = vpop.f32.mrf.mxu1  ;;  %v16941_v45 = vpop.eup %10761  ;;  %v19940_v23 = vld [vmem:[#allocation24_spill] sm:$0xff] }
 0x567   : > { %19939 = vst [vmem:[#allocation60_spill] sm:$0xff] %v16930_v60  ;;  %v5238_v54 = vmul.f32 %v16738_v51, %v16797_v19  ;;  %v3407_v42 = vmul.f32 1.442695, %v16758_v0  ;;  %v1794_v2 = vadd.f32 %v16598_v13, %v14173_v16  ;;  %v19941_v7 = vmax.f32 %v19940_v23, 0.0  ;;  %v16965_v1 = vpop.eup %10763  ;;  %v19973_v60 = vld [vmem:[#allocation61_spill] sm:$0xff] }
 0x568   : > { %19931 = vst [vmem:[#allocation29_spill] sm:$0xff] %v16909_v6  ;;  %v9552_v49 = vpack.c.bf16 %v16909_v6, %v16905_v47  ;;  %8449 = vmatmul.mubr.bf16.gmra.mxu1 %v19937_v26  ;;  %6967 = vst [vmem:[%s11758_s29 + $0x310] sm:$0xff] %v9551_v10  ;;  %v19942_v34 = vsel %vm16730_vm1, %v16728_v63, %v16713_v46  ;;  %v19944_v19 = vand.u32 2147483647, %v16738_v51  ;;  %v3411_v13 = vmul.f32 1.442695, %v16760_v50  ;;  %v16961_v10 = vpop.f32.mrf.mxu0  ;;  %v16963_v24 = vpop.f32.mrf.mxu1 }
 0x569   : > { %v16950_v25 = vadd.f32 %v19942_v34, %v19941_v7  ;;  %v5256_v0 = vmul.f32 %v16766_v41, %v5255_v58  ;;  %19947 = vst [vmem:[#allocation24_spill] sm:$0xff] %v16961_v10  ;;  %19948 = vst [vmem:[#allocation104_spill] sm:$0xff] %v16963_v24  ;;  %vm16969_vm9 = vcmp.lt.f32.partialorder %v5257_v52, 0.0004427343  ;;  %v19951_v41 = vld [vmem:[#allocation19_spill] sm:$0xff]  ;;  %v16980_v17 = vadd.f32 -4.0, %v1973_v44 }
 0x56a   : > { %vm16954_vm8 = vcmp.lt.f32.partialorder %v19944_v19, 0.0004427343  ;;  %6968 = vst [vmem:[%s11758_s29 + $0x318] sm:$0xff] %v9552_v49  ;;  %v1788_v58 = vadd.f32 %v19951_v41, %v14173_v16  ;;  %v16978_v49 = vadd.f32 -4.0, %v1780_v56  ;;  %10769 = vlog2.f32 %v5449_v43  ;;  %v16982_v26 = vpop.f32.mrf.mxu0  ;;  %v19959_v43 = vld [vmem:[#allocation22_spill] sm:$0xff] }
 0x56b   : > { %19943 = vst [vmem:[#allocation66_spill] sm:$0xff] %v16950_v25  ;;  %v5241_v46 = vsel %vm16954_vm8, %v5238_v54, %v5235_v28  ;;  %v5259_v50 = vsel %vm16969_vm9, %v5256_v0, %v5253_v61  ;;  %19953 = vst [vmem:[#allocation105_spill] sm:$0xff] %v16980_v17  ;;  %v16984_v28 = vpop.f32.mrf.mxu1  ;;  %10771 = vpow2.f32 %v3407_v42  ;;  %v5467_v52 = vadd.f32 1.0, %v16941_v45 }
 0x56c   : > { %19952 = vst [vmem:[#allocation19_spill] sm:$0xff] %v16978_v49  ;;  %19954 = vst [vmem:[#allocation106_spill] sm:$0xff] %v16982_v26  ;;  %v16987_v54 = vadd.f32 -4.0, %v1794_v2  ;;  %v1987_v23 = vadd.f32 %v16600_v38, %v14182_v31  ;;  %v19957_v56 = vmax.f32 %v16485_v11, 0.0  ;;  %10773 = vpow2.f32 %v3411_v13  ;;  %v16998_v19 = vpop.f32.mrf.mxu0 }
 0x56d   : > { %19955 = vst [vmem:[#allocation107_spill] sm:$0xff] %v16984_v28  ;;  %v4666_v34 = vadd.f32 1.0, %v19959_v43  ;;  %19960 = vst [vmem:[#allocation22_spill] sm:$0xff] %v16998_v19  ;;  %v17000_v42 = vpop.f32.mrf.mxu1  ;;  %v19962_v2 = vmax.f32 %v16531_v9, 0.0  ;;  %v17007_v0 = vadd.f32 -4.0, %v1788_v58  ;;  %v17010_v11 = vpop.eup %10765  ;;  %v5452_v58 = vmul.f32 -0.5, %v16893_v39 }
 0x56e   : > { %v16995_v44 = vadd.f32 %v5241_v46, %v19957_v56  ;;  %19961 = vst [vmem:[#allocation109_spill] sm:$0xff] %v17000_v42  ;;  %v2745_v63 = vand.u32 2147483647, %v16987_v54  ;;  %v2722_v13 = vand.u32 2147483647, %v16978_v49  ;;  %v17014_v41 = vadd.f32 -4.0, %v1987_v23  ;;  %v17016_v56 = vpop.f32.mrf.mxu0 }
 0x56f   : > { %v17004_v4 = vadd.f32 %v5259_v50, %v19962_v2  ;;  %v2724_v46 = vand.u32 2147483647, %v16980_v17  ;;  %10775 = vlog2.f32 %v4666_v34  ;;  %19964 = vst [vmem:[#allocation111_spill] sm:$0xff] %v17016_v56  ;;  %v17018_v9 = vpop.f32.mrf.mxu1  ;;  %v5377_v50 = vadd.f32 1.0, %v16932_v36  ;;  %v19966_v34 = vld [vmem:[#allocation33_spill] sm:$0xff] }
 0x570   : > { %19958 = vst [vmem:[#allocation108_spill] sm:$0xff] %v16995_v44  ;;  %19965 = vst [vmem:[#allocation112_spill] sm:$0xff] %v17018_v9  ;;  %10777 = vlog2.f32 %v5467_v52  ;;  %v5458_v2 = vadd.f32 1.0, %v17010_v11  ;;  %v5395_v23 = vadd.f32 1.0, %v16965_v1  ;;  %v1981_v61 = vadd.f32 %v19966_v34, %v14182_v31  ;;  %v17029_v38 = vpop.f32.mrf.mxu0 }
 0x571   : > { %19963 = vst [vmem:[#allocation110_spill] sm:$0xff] %v17004_v4  ;;  %19967 = vst [vmem:[#allocation33_spill] sm:$0xff] %v17029_v38  ;;  %v17031_v9 = vpop.f32.mrf.mxu1  ;;  %v2737_v42 = vand.u32 2147483647, %v17007_v0  ;;  %v3001_v52 = vsub.f32 0.0, %v2745_v63  ;;  %v17038_v24 = vsub.f32 0.0, %v2722_v13 }
 0x572   : > { %19968 = vst [vmem:[#allocation113_spill] sm:$0xff] %v17031_v9  ;;  %10779 = vlog2.f32 %v5458_v2  ;;  %v2747_v28 = vand.u32 2147483647, %v17014_v41  ;;  %v17040_v56 = vsub.f32 0.0, %v2724_v46  ;;  %v17042_v34 = vpop.f32.mrf.mxu0  ;;  %v5453_v2 = vadd.f32 1.0, %v5452_v58 }
 0x573   : > { %19969 = vst [vmem:[#allocation114_spill] sm:$0xff] %v17042_v34  ;;  %v17044_v38 = vpop.f32.mrf.mxu1  ;;  %v17046_v9 = vpop.eup %10767  ;;  %10781 = vlog2.f32 %v5377_v50  ;;  %v5455_v19 = vand.u32 2147483647, %v16893_v39  ;;  %v5470_v51 = vmul.f32 -0.5, %v16941_v45  ;;  %v4669_v46 = vmul.f32 -0.5, %v19959_v43 }
 0x574   : > { %19970 = vst [vmem:[#allocation115_spill] sm:$0xff] %v17044_v38  ;;  %v5476_v32 = vadd.f32 1.0, %v17046_v9  ;;  %v3003_v13 = vsub.f32 0.0, %v2747_v28  ;;  %v17053_v26 = vpop.f32.mrf.mxu0  ;;  %10783 = vlog2.f32 %v5395_v23  ;;  %v2993_v38 = vsub.f32 0.0, %v2737_v42 }
 0x575   : > { %19971 = vst [vmem:[#allocation116_spill] sm:$0xff] %v17053_v26  ;;  %v17055_v34 = vpop.f32.mrf.mxu1  ;;  %v17057_v10 = vadd.f32 -4.0, %v1981_v61  ;;  %v3485_v50 = vmul.f32 1.442695, %v3001_v52  ;;  %v4684_v53 = vadd.f32 1.0, %v19973_v60  ;;  %v5461_v42 = vmul.f32 -0.5, %v17010_v11 }
 0x576   : > { %19972 = vst [vmem:[#allocation117_spill] sm:$0xff] %v17055_v34  ;;  %10785 = vlog2.f32 %v5476_v32  ;;  %v17062_v3 = vpop.f32.mrf.mxu0  ;;  %vm17066_vm10 = vcmp.lt.f32.partialorder %v5455_v19, 0.0004427343  ;;  %v5473_v61 = vand.u32 2147483647, %v16941_v45  ;;  %v5454_v32 = vmul.f32 %v16893_v39, %v5453_v2  ;;  %v19980_v39 = vld [vmem:[#allocation81_spill] sm:$0xff] }
 0x577   : > { %19974 = vst [vmem:[#allocation61_spill] sm:$0xff] %v17062_v3  ;;  %v17064_v28 = vpop.f32.mrf.mxu1  ;;  %v10770_v37 = vpop.eup %10769  ;;  %v5471_v58 = vadd.f32 1.0, %v5470_v51  ;;  %v3489_v63 = vmul.f32 1.442695, %v3003_v13  ;;  %v4670_v34 = vadd.f32 1.0, %v4669_v46  ;;  %10787 = vpow2.f32 %v3485_v50  ;;  %v19992_v26 = vld [vmem:[#allocation64_spill] sm:$0xff] }
 0x578   : > { %19975 = vst [vmem:[#allocation118_spill] sm:$0xff] %v17064_v28  ;;  %v17073_v52 = vpop.eup %10771  ;;  %v17076_v3 = vpop.f32.mrf.mxu0  ;;  %v3469_v48 = vmul.f32 1.442695, %v2993_v38  ;;  %v2739_v18 = vand.u32 2147483647, %v17057_v10  ;;  %10789 = vlog2.f32 %v4684_v53  ;;  %v1796_v51 = vadd.f32 %v19980_v39, %v19607_v62 }
 0x579   : > { %19978 = vst [vmem:[#allocation119_spill] sm:$0xff] %v17076_v3  ;;  %v17078_v28 = vpop.f32.mrf.mxu1  ;;  %v17080_v19 = vpop.eup %10773  ;;  %v4672_v55 = vand.u32 2147483647, %v19959_v43  ;;  %v5451_v23 = vmul.f32 0.6931472, %v10770_v37  ;;  %v5462_v38 = vadd.f32 1.0, %v5461_v42  ;;  %10791 = vpow2.f32 %v3489_v63 }
 0x57a   : > { %19979 = vst [vmem:[#allocation120_spill] sm:$0xff] %v17078_v28  ;;  %v5464_v27 = vand.u32 2147483647, %v17010_v11  ;;  %v17087_v2 = vpop.f32.mrf.mxu0  ;;  %vm17091_vm11 = vcmp.lt.f32.partialorder %v5473_v61, 0.0004427343  ;;  %v5479_v50 = vmul.f32 -0.5, %v17046_v9  ;;  %v4671_v39 = vmul.f32 %v19959_v43, %v4670_v34 }
 0x57b   : > { %19981 = vst [vmem:[#allocation81_spill] sm:$0xff] %v17087_v2  ;;  %v17089_v13 = vpop.f32.mrf.mxu1  ;;  %v19985_v37 = vld [vmem:[#allocation82_spill] sm:$0xff]  ;;  %v17099_v30 = vadd.f32 -4.0, %v1796_v51  ;;  %v5472_v61 = vmul.f32 %v16941_v45, %v5471_v58  ;;  %v2995_v33 = vsub.f32 0.0, %v2739_v18  ;;  %vm4673_vm12 = vcmp.lt.f32.partialorder %v4672_v55, 0.0004427343 }
 0x57c   : > { %19982 = vst [vmem:[#allocation121_spill] sm:$0xff] %v17089_v13  ;;  %v10776_v46 = vpop.eup %10775  ;;  %v1989_v3 = vadd.f32 %v19985_v37, %v14286_v14  ;;  %v17101_v2 = vpop.f32.mrf.mxu0  ;;  %v5457_v37 = vsel %vm17066_vm10, %v5454_v32, %v5451_v23  ;;  %vm17110_vm13 = vcmp.lt.f32.partialorder %v5464_v27, 0.0004427343  ;;  %v5463_v55 = vmul.f32 %v17010_v11, %v5462_v38 }
 0x57d   : > { %v10778_v6 = vpop.eup %10777  ;;  %v4668_v53 = vmul.f32 0.6931472, %v10776_v46  ;;  %19986 = vst [vmem:[#allocation82_spill] sm:$0xff] %v17101_v2  ;;  %v17103_v13 = vpop.f32.mrf.mxu1  ;;  %v2746_v34 = vand.u32 2147483647, %v17099_v30  ;;  %v19993_v23 = vmax.f32 %v19992_v26, 0.0  ;;  %10793 = vpow2.f32 %v3469_v48 }
 0x57e   : > { %19987 = vst [vmem:[#allocation122_spill] sm:$0xff] %v17103_v13  ;;  %v17106_v42 = vadd.f32 -4.0, %v1989_v3  ;;  %v17115_v51 = vpop.f32.mrf.mxu0  ;;  %v5469_v45 = vmul.f32 0.6931472, %v10778_v6  ;;  %v5480_v3 = vadd.f32 1.0, %v5479_v50  ;;  %v4687_v32 = vmul.f32 -0.5, %v19973_v60 }
 0x57f   : > { %v10780_v49 = vpop.eup %10779  ;;  %v4674_v43 = vsel %vm4673_vm12, %v4671_v39, %v4668_v53  ;;  %19990 = vst [vmem:[#allocation123_spill] sm:$0xff] %v17115_v51  ;;  %v17117_v46 = vpop.f32.mrf.mxu1  ;;  %v3002_v13 = vsub.f32 0.0, %v2746_v34  ;;  %v19996_v6 = vmax.f32 %v16721_v22, 0.0  ;;  %v5482_v38 = vand.u32 2147483647, %v17046_v9  ;;  %v20006_v48 = vld [vmem:[#allocation58_spill] sm:$0xff] }
 0x580   : > { %19991 = vst [vmem:[#allocation124_spill] sm:$0xff] %v17117_v46  ;;  %v5460_v18 = vmul.f32 0.6931472, %v10780_v49  ;;  %v17120_v58 = vpop.eup %10781  ;;  %v5970_v27 = vadd.f32 %v4674_v43, %v19993_v23  ;;  %v2748_v53 = vand.u32 2147483647, %v17106_v42  ;;  %v17126_v39 = vpop.f32.mrf.mxu0  ;;  %v19998_v34 = vmax.f32 %v16830_v40, 0.0 }
 0x581   : > { %19994 = vst [vmem:[#allocation64_spill] sm:$0xff] %v17126_v39  ;;  %v17128_v51 = vpop.f32.mrf.mxu1  ;;  %v17132_v49 = vadd.f32 %v5457_v37, %v19996_v6  ;;  %v3473_v50 = vmul.f32 1.442695, %v2995_v33  ;;  %v17137_v43 = vpop.eup %10783  ;;  %v20000_v23 = vld [vmem:[#allocation49_spill] sm:$0xff]  ;;  %v3487_v22 = vmul.f32 1.442695, %v3002_v13  ;;  %v5481_v33 = vmul.f32 %v17046_v9, %v5480_v3 }
 0x582   : > { %19995 = vst [vmem:[#allocation125_spill] sm:$0xff] %v17128_v51  ;;  %v5466_v11 = vsel %vm17110_vm13, %v5463_v55, %v5460_v18  ;;  %v6162_v46 = vpack.c.bf16 %v5970_v27, %v20000_v23  ;;  %v20001_v51 = vld [vmem:[#allocation42_spill] sm:$0xff]  ;;  %v17145_v37 = vpop.f32.mrf.mxu0  ;;  %v5475_v18 = vsel %vm17091_vm11, %v5472_v61, %v5469_v45  ;;  %v3004_v55 = vsub.f32 0.0, %v2748_v53 }
 0x583   : > { %19997 = vst [vmem:[#allocation126_spill] sm:$0xff] %v17132_v49  ;;  %v17141_v26 = vadd.f32 %v5466_v11, %v19998_v34  ;;  %v9515_v39 = vpack.c.bf16 %v5970_v27, %v20001_v51  ;;  %20002 = vst [vmem:[#allocation49_spill] sm:$0xff] %v17145_v37  ;;  %v17147_v6 = vpop.f32.mrf.mxu1  ;;  %v10786_v63 = vpop.eup %10785  ;;  %v4688_v13 = vadd.f32 1.0, %v4687_v32  ;;  %10795 = vpow2.f32 %v3487_v22  ;;  %v20008_v32 = vld [vmem:[#allocation79_spill] sm:$0xff] }
 0x584   : > { %20003 = vst [vmem:[#allocation42_spill] sm:$0xff] %v17147_v6  ;;  %v5478_v11 = vmul.f32 0.6931472, %v10786_v63  ;;  %8265 = vmatprep.mubr.bf16.mxu0 %v6162_v46  ;;  %v17155_v27 = vpop.f32.mrf.mxu0  ;;  %vm5483_vm14 = vcmp.lt.f32.partialorder %v5482_v38, 0.0004427343  ;;  %10797 = vpow2.f32 %v3473_v50  ;;  %v20007_v61 = vpack.c.bf16 %v20001_v51, %v20006_v48  ;;  %v17163_v45 = vpop.eup %10787 }
 0x585   : > { %19999 = vst [vmem:[#allocation127_spill] sm:$0xff] %v17141_v26  ;;  %v9559_v40 = vpack.c.bf16 %v17141_v26, %v17132_v49  ;;  %6931 = vst [vmem:[%s11758_s29 + $0x1f0] sm:$0xff] %v9515_v39  ;;  %v17157_v34 = vpop.f32.mrf.mxu1  ;;  %v4690_v28 = vand.u32 2147483647, %v19973_v60  ;;  %v3491_v9 = vmul.f32 1.442695, %v3004_v55  ;;  %v1790_v53 = vadd.f32 %v20008_v32, %v19607_v62  ;;  %v10790_v22 = vpop.eup %10789 }
 0x586   : > { %20004 = vst [vmem:[#allocation128_spill] sm:$0xff] %v17155_v27  ;;  %20005 = vst [vmem:[#allocation129_spill] sm:$0xff] %v17157_v34  ;;  %8266 = vmatmul.mubr.bf16.gmra.mxu0 %v20007_v61  ;;  %v5380_v3 = vmul.f32 -0.5, %v16932_v36  ;;  %v5484_v46 = vsel %vm5483_vm14, %v5481_v33, %v5478_v11  ;;  %v20009_v39 = vld [vmem:[#allocation86_spill] sm:$0xff]  ;;  %v17171_v50 = vpop.f32.mrf.mxu0  ;;  %v20012_v51 = vmax.f32 %v16750_v21, 0.0  ;;  %v20013_v55 = vmax.f32 %v16837_v5, 0.0 }
 0x587   : > { %6975 = vst [vmem:[%s11758_s29 + $0x350] sm:$0xff] %v9559_v40  ;;  %v1798_v38 = vadd.f32 %v20009_v39, %v14173_v16  ;;  %20010 = vst [vmem:[#allocation58_spill] sm:$0xff] %v17171_v50  ;;  %v17173_v23 = vpop.f32.mrf.mxu1  ;;  %v20015_v33 = vld [vmem:[#allocation80_spill] sm:$0xff]  ;;  %10799 = vpow2.f32 %v3491_v9  ;;  %v3439_v11 = vmul.f32 1.442695, %v17038_v24  ;;  %v4689_v39 = vmul.f32 %v19973_v60, %v4688_v13  ;;  %v20018_v24 = vld [vmem:[#allocation87_spill] sm:$0xff] }
 0x588   : > { %20011 = vst [vmem:[#allocation79_spill] sm:$0xff] %v17173_v23  ;;  %v17177_v63 = vadd.f32 %v5475_v18, %v20012_v51  ;;  %v17181_v48 = vadd.f32 %v5484_v46, %v20013_v55  ;;  %v1983_v40 = vadd.f32 %v20015_v33, %v14286_v14  ;;  %v3443_v61 = vmul.f32 1.442695, %v17040_v56  ;;  %v17188_v23 = vpop.f32.mrf.mxu0  ;;  %v17192_v18 = vpop.eup %10791  ;;  %v20029_v34 = vld [vmem:[#allocation34_spill] sm:$0xff] }
 0x589   : > { %v4686_v32 = vmul.f32 0.6931472, %v10790_v22  ;;  %20016 = vst [vmem:[#allocation80_spill] sm:$0xff] %v17188_v23  ;;  %v17190_v21 = vpop.f32.mrf.mxu1  ;;  %v5593_v46 = vadd.f32 1.0, %v17163_v45  ;;  %vm4691_vm15 = vcmp.lt.f32.partialorder %v4690_v28, 0.0004427343  ;;  %v1991_v9 = vadd.f32 %v20018_v24, %v14182_v31 }
 0x58a   : > { %20014 = vst [vmem:[#allocation86_spill] sm:$0xff] %v17181_v48  ;;  %20017 = vst [vmem:[#allocation130_spill] sm:$0xff] %v17190_v21  ;;  %v9560_v5 = vpack.c.bf16 %v17181_v48, %v17177_v63  ;;  %v5381_v56 = vadd.f32 1.0, %v5380_v3  ;;  %v17199_v22 = vadd.f32 -4.0, %v1790_v53  ;;  %v17201_v13 = vadd.f32 -4.0, %v1798_v38  ;;  %v17203_v51 = vpop.f32.mrf.mxu0  ;;  %v20023_v28 = vld [vmem:[#allocation20_spill] sm:$0xff] }
 0x58b   : > { %v4692_v60 = vsel %vm4691_vm15, %v4689_v39, %v4686_v32  ;;  %20020 = vst [vmem:[#allocation131_spill] sm:$0xff] %v17203_v51  ;;  %v17205_v55 = vpop.f32.mrf.mxu1  ;;  %v5383_v33 = vand.u32 2147483647, %v16932_v36  ;;  %v5398_v21 = vmul.f32 -0.5, %v16965_v1  ;;  %v17210_v23 = vadd.f32 -4.0, %v1983_v40  ;;  %v20025_v32 = vld [vmem:[#allocation88_spill] sm:$0xff] }
 0x58c   : > { %20019 = vst [vmem:[#allocation87_spill] sm:$0xff] %v17199_v22  ;;  %20021 = vst [vmem:[#allocation132_spill] sm:$0xff] %v17205_v55  ;;  %v20024_v50 = vmax.f32 %v20023_v28, 0.0  ;;  %v5379_v3 = vmul.f32 0.6931472, %v17120_v58  ;;  %v5611_v38 = vadd.f32 1.0, %v17192_v18  ;;  %v1804_v39 = vadd.f32 %v20025_v32, %v14173_v16  ;;  %v17219_v55 = vpop.f32.mrf.mxu0 }
 0x58d   : > { %6976 = vst [vmem:[%s11758_s29 + $0x358] sm:$0xff] %v9560_v5  ;;  %20022 = vst [vmem:[#allocation133_spill] sm:$0xff] %v17210_v23  ;;  %v5401_v53 = vand.u32 2147483647, %v16965_v1  ;;  %v17221_v51 = vpop.f32.mrf.mxu1  ;;  %10801 = vlog2.f32 %v5593_v46  ;;  %v20028_v40 = vld [vmem:[#allocation74_spill] sm:$0xff]  ;;  %v5382_v58 = vmul.f32 %v16932_v36, %v5381_v56  ;;  %v17242_v36 = vpop.eup %10793  ;;  %v5596_v37 = vmul.f32 -0.5, %v17163_v45 }
 0x58e   : > { %v5972_v24 = vadd.f32 %v4692_v60, %v20024_v50  ;;  %20026 = vst [vmem:[#allocation20_spill] sm:$0xff] %v17219_v55  ;;  %20027 = vst [vmem:[#allocation88_spill] sm:$0xff] %v17221_v51  ;;  %v17225_v50 = vadd.f32 -4.0, %v1991_v9  ;;  %v2738_v60 = vand.u32 2147483647, %v17199_v22  ;;  %v17230_v27 = vadd.f32 -4.0, %v1804_v39  ;;  %v17232_v32 = vpop.f32.mrf.mxu0 }
 0x58f   : > { %v2753_v6 = vand.u32 2147483647, %v17201_v13  ;;  %20030 = vst [vmem:[#allocation74_spill] sm:$0xff] %v17232_v32  ;;  %v17234_v55 = vpop.f32.mrf.mxu1  ;;  %vm17236_vm0 = vcmp.lt.f32.partialorder %v5383_v33, 0.0004427343  ;;  %10803 = vpow2.f32 %v3439_v11  ;;  %v20034_v39 = vld [vmem:[#allocation89_spill] sm:$0xff] }
 0x590   : > { %v6164_v5 = vpack.c.bf16 %v5972_v24, %v20028_v40  ;;  %v9516_v28 = vpack.c.bf16 %v5972_v24, %v20029_v34  ;;  %20031 = vst [vmem:[#allocation34_spill] sm:$0xff] %v17234_v55  ;;  %v5399_v40 = vadd.f32 1.0, %v5398_v21  ;;  %v2740_v9 = vand.u32 2147483647, %v17210_v23  ;;  %v20035_v55 = vld [vmem:[#allocation21_spill] sm:$0xff]  ;;  %v17252_v11 = vpop.f32.mrf.mxu0 }
 0x591   : > { %v5385_v56 = vsel %vm17236_vm0, %v5382_v58, %v5379_v3  ;;  %10805 = vlog2.f32 %v5611_v38  ;;  %v1997_v33 = vadd.f32 %v20034_v39, %v14182_v31  ;;  %v20036_v32 = vpack.c.bf16 %v20029_v34, %v20035_v55  ;;  %20037 = vst [vmem:[#allocation89_spill] sm:$0xff] %v17252_v11  ;;  %v17254_v21 = vpop.f32.mrf.mxu1  ;;  %v20096_v3 = vld [vmem:[#allocation57_spill] sm:$0xff] }
 0x592   : > { %6932 = vst [vmem:[%s11758_s29 + $0x1f8] sm:$0xff] %v9516_v28  ;;  %8458 = vmatprep.mubr.bf16.mxu1 %v6164_v5  ;;  %20038 = vst [vmem:[#allocation21_spill] sm:$0xff] %v17254_v21  ;;  %v17256_v5 = vpop.eup %10795  ;;  %v17259_v28 = vmul.f32 0.6931472, %v17137_v43  ;;  %vm17261_vm1 = vcmp.lt.f32.partialorder %v5401_v53, 0.0004427343  ;;  %10807 = vpow2.f32 %v3443_v61  ;;  %v17270_v39 = vpop.f32.mrf.mxu0  ;;  %v17279_v61 = vmul.f32 %v16965_v1, %v5399_v40 }
 0x593   : > { %8459 = vmatmul.mubr.bf16.gmra.mxu1 %v20036_v32  ;;  %v2755_v38 = vand.u32 2147483647, %v17225_v50  ;;  %v17266_v58 = vpop.eup %10797  ;;  %v2994_v34 = vsub.f32 0.0, %v2738_v60  ;;  %v5602_v55 = vadd.f32 1.0, %v17256_v5  ;;  %v3009_v32 = vsub.f32 0.0, %v2753_v6  ;;  %20041 = vst [vmem:[#allocation134_spill] sm:$0xff] %v17270_v39  ;;  %v17272_v24 = vpop.f32.mrf.mxu1 }
 0x594   : > { %v2761_v46 = vand.u32 2147483647, %v17230_v27  ;;  %20042 = vst [vmem:[#allocation135_spill] sm:$0xff] %v17272_v24  ;;  %v20043_v43 = vmax.f32 %v16742_v12, 0.0  ;;  %v2996_v11 = vsub.f32 0.0, %v2740_v9  ;;  %v17282_v60 = vpop.eup %10799  ;;  %v5521_v6 = vadd.f32 1.0, %v17242_v36  ;;  %v17288_v24 = vpop.f32.mrf.mxu0 }
 0x595   : > { %10809 = vlog2.f32 %v5602_v55  ;;  %v17286_v39 = vadd.f32 -4.0, %v1997_v33  ;;  %20044 = vst [vmem:[#allocation136_spill] sm:$0xff] %v17288_v24  ;;  %v17290_v12 = vpop.f32.mrf.mxu1  ;;  %v5539_v40 = vadd.f32 1.0, %v17266_v58  ;;  %v5620_v9 = vadd.f32 1.0, %v17282_v60  ;;  %v20048_v1 = vld [vmem:[#allocation69_spill] sm:$0xff] }
 0x596   : > { %v17276_v53 = vadd.f32 %v5385_v56, %v20043_v43  ;;  %20045 = vst [vmem:[#allocation137_spill] sm:$0xff] %v17290_v12  ;;  %v3011_v56 = vsub.f32 0.0, %v2755_v38  ;;  %v17298_v43 = vmul.f32 1.442695, %v2994_v34  ;;  %v3501_v33 = vmul.f32 1.442695, %v3009_v32  ;;  %v17301_v21 = vpop.f32.mrf.mxu0 }
 0x597   : > { %v3017_v51 = vsub.f32 0.0, %v2761_v46  ;;  %20046 = vst [vmem:[#allocation138_spill] sm:$0xff] %v17301_v21  ;;  %v17303_v24 = vpop.f32.mrf.mxu1  ;;  %v17305_v12 = vmul.f32 1.442695, %v2996_v11  ;;  %10811 = vlog2.f32 %v5620_v9  ;;  %v4810_v2 = vadd.f32 1.0, %v20048_v1  ;;  %v20051_v38 = vld [vmem:[#allocation44_spill] sm:$0xff] }
 0x598   : > { %20047 = vst [vmem:[#allocation139_spill] sm:$0xff] %v17303_v24  ;;  %10813 = vlog2.f32 %v5521_v6  ;;  %v5614_v34 = vmul.f32 -0.5, %v17192_v18  ;;  %v2763_v55 = vand.u32 2147483647, %v17286_v39  ;;  %v17312_v32 = vpop.f32.mrf.mxu0  ;;  %v5524_v24 = vmul.f32 -0.5, %v17242_v36 }
 0x599   : > { %20049 = vst [vmem:[#allocation69_spill] sm:$0xff] %v17312_v32  ;;  %v17314_v46 = vpop.f32.mrf.mxu1  ;;  %10815 = vlog2.f32 %v5539_v40  ;;  %v3505_v21 = vmul.f32 1.442695, %v3011_v56  ;;  %v5605_v48 = vmul.f32 -0.5, %v17256_v5  ;;  %v3517_v6 = vmul.f32 1.442695, %v3017_v51 }
 0x59a   : > { %20050 = vst [vmem:[#allocation140_spill] sm:$0xff] %v17314_v46  ;;  %v10802_v9 = vpop.eup %10801  ;;  %10817 = vpow2.f32 %v3501_v33  ;;  %v4828_v26 = vadd.f32 1.0, %v20051_v38  ;;  %v17320_v17 = vpop.f32.mrf.mxu0  ;;  %v5597_v32 = vadd.f32 1.0, %v5596_v37  ;;  %v5599_v46 = vand.u32 2147483647, %v17163_v45 }
 0x59b   : > { %20052 = vst [vmem:[#allocation44_spill] sm:$0xff] %v17320_v17  ;;  %v17322_v57 = vpop.f32.mrf.mxu1  ;;  %v3019_v35 = vsub.f32 0.0, %v2763_v55  ;;  %10819 = vlog2.f32 %v4810_v2  ;;  %v5615_v40 = vadd.f32 1.0, %v5614_v34  ;;  %v5617_v56 = vand.u32 2147483647, %v17192_v18  ;;  %v20056_v55 = vld [vmem:[#allocation41_spill] sm:$0xff] }
 0x59c   : > { %20053 = vst [vmem:[#allocation141_spill] sm:$0xff] %v17322_v57  ;;  %v17325_v8 = vpop.eup %10803  ;;  %v5623_v11 = vmul.f32 -0.5, %v17282_v60  ;;  %10821 = vlog2.f32 %v4828_v26  ;;  %v17329_v51 = vpop.f32.mrf.mxu0  ;;  %v17333_v4 = vadd.f32 1.0, %v5524_v24  ;;  %v5595_v37 = vmul.f32 0.6931472, %v10802_v9 }
 0x59d   : > { %20054 = vst [vmem:[#allocation142_spill] sm:$0xff] %v17329_v51  ;;  %v17331_v33 = vpop.f32.mrf.mxu1  ;;  %10823 = vpow2.f32 %v3505_v21  ;;  %v1806_v2 = vadd.f32 %v20056_v55, %v19607_v62  ;;  %v2490_v34 = vmax.f32 %v17099_v30, 0.0  ;;  %v5606_v15 = vadd.f32 1.0, %v5605_v48 }
 0x59e   : > { %20055 = vst [vmem:[#allocation143_spill] sm:$0xff] %v17331_v33  ;;  %v10806_v17 = vpop.eup %10805  ;;  %v5608_v44 = vand.u32 2147483647, %v17256_v5  ;;  %10825 = vpow2.f32 %v3517_v6  ;;  %v17341_v26 = vpop.f32.mrf.mxu0  ;;  %v5598_v24 = vmul.f32 %v17163_v45, %v5597_v32  ;;  %vm17346_vm2 = vcmp.lt.f32.partialorder %v5599_v46, 0.0004427343 }
 0x59f   : > { %v17337_v57 = vpop.eup %10807  ;;  %20057 = vst [vmem:[#allocation41_spill] sm:$0xff] %v17341_v26  ;;  %v17343_v51 = vpop.f32.mrf.mxu1  ;;  %v2492_v21 = vmax.f32 %v17106_v42, 0.0  ;;  %v3521_v55 = vmul.f32 1.442695, %v3019_v35  ;;  %v5613_v33 = vmul.f32 0.6931472, %v10806_v17  ;;  %v5616_v30 = vmul.f32 %v17192_v18, %v5615_v40 }
 0x5a0   : > { %20058 = vst [vmem:[#allocation144_spill] sm:$0xff] %v17343_v51  ;;  %vm17352_vm3 = vcmp.lt.f32.partialorder %v5617_v56, 0.0004427343  ;;  %v5624_v6 = vadd.f32 1.0, %v5623_v11  ;;  %v17356_v26 = vpop.f32.mrf.mxu0  ;;  %v5601_v32 = vsel %vm17346_vm2, %v5598_v24, %v5595_v37  ;;  %v4813_v46 = vmul.f32 -0.5, %v20048_v1  ;;  %v20065_v35 = vld [vmem:[#allocation45_spill] sm:$0xff] }
 0x5a1   : > { %20063 = vst [vmem:[#allocation145_spill] sm:$0xff] %v17356_v26  ;;  %v17358_v51 = vpop.f32.mrf.mxu1  ;;  %v17363_v42 = vadd.f32 -4.0, %v1806_v2  ;;  %v1999_v17 = vadd.f32 %v20065_v35, %v14286_v14  ;;  %v5607_v40 = vmul.f32 %v17256_v5, %v5606_v15  ;;  %vm17368_vm4 = vcmp.lt.f32.partialorder %v5608_v44, 0.0004427343 }
 0x5a2   : > { %20064 = vst [vmem:[#allocation146_spill] sm:$0xff] %v17358_v51  ;;  %v10810_v45 = vpop.eup %10809  ;;  %v5626_v56 = vand.u32 2147483647, %v17282_v60  ;;  %v17373_v51 = vpop.f32.mrf.mxu0  ;;  %10827 = vpow2.f32 %v3521_v55  ;;  %v4831_v37 = vmul.f32 -0.5, %v20051_v38  ;;  %v20070_v15 = vmax.f32 %v16987_v54, 0.0 }
 0x5a3   : > { %v5604_v18 = vmul.f32 0.6931472, %v10810_v45  ;;  %20068 = vst [vmem:[#allocation45_spill] sm:$0xff] %v17373_v51  ;;  %v17375_v9 = vpop.f32.mrf.mxu1  ;;  %v2762_v2 = vand.u32 2147483647, %v17363_v42  ;;  %v17379_v24 = vadd.f32 -4.0, %v1999_v17  ;;  %v5619_v5 = vsel %vm17352_vm3, %v5616_v30, %v5613_v33 }
 0x5a4   : > { %20069 = vst [vmem:[#allocation147_spill] sm:$0xff] %v17375_v9  ;;  %v10812_v45 = vpop.eup %10811  ;;  %v17383_v44 = vadd.f32 %v5601_v32, %v20070_v15  ;;  %v5625_v9 = vmul.f32 %v17282_v60, %v5624_v6  ;;  %v17390_v55 = vpop.f32.mrf.mxu0  ;;  %v4814_v7 = vadd.f32 1.0, %v4813_v46  ;;  %vm5627_vm5 = vcmp.lt.f32.partialorder %v5626_v56, 0.0004427343  ;;  %v20074_v33 = vld [vmem:[#allocation52_spill] sm:$0xff] }
 0x5a5   : > { %v5610_v35 = vsel %vm17368_vm4, %v5607_v40, %v5604_v18  ;;  %20071 = vst [vmem:[#allocation148_spill] sm:$0xff] %v17390_v55  ;;  %v17392_v51 = vpop.f32.mrf.mxu1  ;;  %v10814_v26 = vpop.eup %10813  ;;  %v5622_v29 = vmul.f32 0.6931472, %v10812_v45  ;;  %v3018_v54 = vsub.f32 0.0, %v2762_v2  ;;  %v1800_v30 = vadd.f32 %v20074_v33, %v19607_v62  ;;  %v20108_v40 = vld [vmem:[#allocation39_spill] sm:$0xff] }
 0x5a6   : > { %20072 = vst [vmem:[#allocation149_spill] sm:$0xff] %v17392_v51  ;;  %v17394_v17 = vadd.f32 %v5610_v35, %v2490_v34  ;;  %v17396_v32 = vpop.eup %10815  ;;  %v4816_v48 = vand.u32 2147483647, %v20048_v1  ;;  %v2764_v60 = vand.u32 2147483647, %v17379_v24  ;;  %v17402_v6 = vpop.f32.mrf.mxu0  ;;  %v4832_v2 = vadd.f32 1.0, %v4831_v37 }
 0x5a7   : > { %20075 = vst [vmem:[#allocation52_spill] sm:$0xff] %v17402_v6  ;;  %v17404_v18 = vpop.f32.mrf.mxu1  ;;  %v17406_v34 = vpop.eup %10817  ;;  %v20077_v46 = vand.u32 2147483647, %v17242_v36  ;;  %v5628_v56 = vsel %vm5627_vm5, %v5625_v9, %v5622_v29  ;;  %v3519_v45 = vmul.f32 1.442695, %v3018_v54  ;;  %v5542_v35 = vmul.f32 -0.5, %v17266_v58 }
 0x5a8   : > { %20073 = vst [vmem:[#allocation150_spill] sm:$0xff] %v17394_v17  ;;  %20076 = vst [vmem:[#allocation151_spill] sm:$0xff] %v17404_v18  ;;  %v9567_v11 = vpack.c.bf16 %v17394_v17, %v17383_v44  ;;  %v10820_v15 = vpop.eup %10819  ;;  %v20080_v33 = vmax.f32 %v17014_v41, 0.0  ;;  %v17421_v51 = vadd.f32 %v5628_v56, %v2492_v21  ;;  %v17424_v6 = vpop.f32.mrf.mxu0  ;;  %v4815_v9 = vmul.f32 %v20048_v1, %v4814_v7 }
 0x5a9   : > { %vm17410_vm6 = vcmp.lt.f32.partialorder %v20077_v46, 0.0004427343  ;;  %v4834_v46 = vand.u32 2147483647, %v20051_v38  ;;  %20082 = vst [vmem:[#allocation153_spill] sm:$0xff] %v17424_v6  ;;  %v17426_v55 = vpop.f32.mrf.mxu1  ;;  %v10822_v25 = vpop.eup %10821  ;;  %10829 = vpow2.f32 %v3519_v45  ;;  %v3020_v37 = vsub.f32 0.0, %v2764_v60 }
 0x5aa   : > { %v17419_v18 = vadd.f32 %v5619_v5, %v20080_v33  ;;  %20081 = vst [vmem:[#allocation152_spill] sm:$0xff] %v17421_v51  ;;  %20083 = vst [vmem:[#allocation154_spill] sm:$0xff] %v17426_v55  ;;  %v4812_v29 = vmul.f32 0.6931472, %v10820_v15  ;;  %v17430_v54 = vpop.eup %10823  ;;  %v17434_v21 = vadd.f32 -4.0, %v1800_v30  ;;  %v20085_v5 = vld [vmem:[#allocation40_spill] sm:$0xff]  ;;  %v4833_v30 = vmul.f32 %v20051_v38, %v4832_v2 }
 0x5ab   : > { %6983 = vst [vmem:[%s11758_s29 + $0x390] sm:$0xff] %v9567_v11  ;;  %v1993_v56 = vadd.f32 %v20085_v5, %v14286_v14  ;;  %vm17438_vm7 = vcmp.lt.f32.partialorder %v4816_v48, 0.0004427343  ;;  %v17442_v11 = vpop.f32.mrf.mxu0  ;;  %v17444_v7 = vpop.f32.mrf.mxu1  ;;  %v4830_v45 = vmul.f32 0.6931472, %v10822_v25  ;;  %v20090_v55 = vmax.f32 %v16747_v20, 0.0 }
 0x5ac   : > { %v9568_v41 = vpack.c.bf16 %v17421_v51, %v17419_v18  ;;  %20084 = vst [vmem:[#allocation155_spill] sm:$0xff] %v17434_v21  ;;  %20088 = vst [vmem:[#allocation40_spill] sm:$0xff] %v17442_v11  ;;  %v17446_v1 = vpop.eup %10825  ;;  %v4818_v60 = vsel %vm17438_vm7, %v4815_v9, %v4812_v29  ;;  %v3523_v15 = vmul.f32 1.442695, %v3020_v37  ;;  %v20091_v48 = vsel %vm17261_vm1, %v17279_v61, %v17259_v28  ;;  %v20101_v33 = vld [vmem:[#allocation25_spill] sm:$0xff] }
 0x5ad   : > { %20089 = vst [vmem:[#allocation156_spill] sm:$0xff] %v17444_v7  ;;  %v17458_v5 = vadd.f32 %v20091_v48, %v20090_v55  ;;  %v5523_v11 = vmul.f32 0.6931472, %v10814_v26  ;;  %v5665_v7 = vadd.f32 1.0, %v17406_v34  ;;  %vm17462_vm8 = vcmp.lt.f32.partialorder %v4834_v46, 0.0004427343  ;;  %v17466_v25 = vpop.f32.mrf.mxu0  ;;  %v17468_v38 = vpop.f32.mrf.mxu1 }
 0x5ae   : > { %6984 = vst [vmem:[%s11758_s29 + $0x398] sm:$0xff] %v9568_v41  ;;  %20094 = vst [vmem:[#allocation157_spill] sm:$0xff] %v17466_v25  ;;  %v5683_v20 = vadd.f32 1.0, %v17430_v54  ;;  %v20097_v2 = vmax.f32 %v20096_v3, 0.0  ;;  %v4836_v28 = vsel %vm17462_vm8, %v4833_v30, %v4830_v45  ;;  %10831 = vpow2.f32 %v3523_v15  ;;  %v20102_v30 = vld [vmem:[#allocation71_spill] sm:$0xff] }
 0x5af   : > { %20095 = vst [vmem:[#allocation158_spill] sm:$0xff] %v17468_v38  ;;  %v5526_v61 = vmul.f32 %v17242_v36, %v17333_v4  ;;  %v2754_v26 = vand.u32 2147483647, %v17434_v21  ;;  %v17478_v55 = vadd.f32 -4.0, %v1993_v56  ;;  %v5737_v46 = vadd.f32 1.0, %v17446_v1  ;;  %v17481_v9 = vpop.f32.mrf.mxu0  ;;  %v17483_v37 = vpop.f32.mrf.mxu1 }
 0x5b0   : > { %v5986_v29 = vadd.f32 %v4818_v60, %v20097_v2  ;;  %20098 = vst [vmem:[#allocation57_spill] sm:$0xff] %v17481_v9  ;;  %20099 = vst [vmem:[#allocation159_spill] sm:$0xff] %v17483_v37  ;;  %v5543_v41 = vadd.f32 1.0, %v5542_v35  ;;  %v20100_v60 = vld [vmem:[#allocation73_spill] sm:$0xff]  ;;  %v20103_v15 = vmax.f32 %v20102_v30, 0.0  ;;  %v17489_v4 = vpop.eup %10827  ;;  %10833 = vlog2.f32 %v5665_v7  ;;  %v20104_v2 = vld [vmem:[#allocation62_spill] sm:$0xff] }
 0x5b1   : > { %v5529_v36 = vsel %vm17410_vm6, %v5526_v61, %v5523_v11  ;;  %v5545_v56 = vand.u32 2147483647, %v17266_v58  ;;  %v1808_v9 = vadd.f32 %v20104_v2, %v14173_v16  ;;  %v17496_v37 = vpop.f32.mrf.mxu0  ;;  %v17498_v35 = vpop.f32.mrf.mxu1  ;;  %10835 = vlog2.f32 %v5683_v20  ;;  %v20109_v16 = vld [vmem:[#allocation53_spill] sm:$0xff] }
 0x5b2   : > { %v6170_v48 = vpack.c.bf16 %v5986_v29, %v20100_v60  ;;  %v9523_v45 = vpack.c.bf16 %v5986_v29, %v20101_v33  ;;  %v5988_v3 = vadd.f32 %v4836_v28, %v20103_v15  ;;  %20105 = vst [vmem:[#allocation73_spill] sm:$0xff] %v17496_v37  ;;  %20106 = vst [vmem:[#allocation25_spill] sm:$0xff] %v17498_v35  ;;  %v5541_v29 = vmul.f32 0.6931472, %v17396_v32  ;;  %v20107_v28 = vld [vmem:[#allocation32_spill] sm:$0xff] }
 0x5b3   : > { %v3010_v7 = vsub.f32 0.0, %v2754_v26  ;;  %v2756_v30 = vand.u32 2147483647, %v17478_v55  ;;  %10837 = vlog2.f32 %v5737_v46  ;;  %v20110_v15 = vpack.c.bf16 %v20101_v33, %v20109_v16  ;;  %v17509_v2 = vpop.f32.mrf.mxu0  ;;  %v17511_v32 = vpop.f32.mrf.mxu1  ;;  %v20113_v26 = vld [vmem:[#allocation56_spill] sm:$0xff] }
 0x5b4   : > { %6939 = vst [vmem:[%s11758_s29 + $0x230] sm:$0xff] %v9523_v45  ;;  %8275 = vmatprep.mubr.bf16.mxu0 %v6170_v48  ;;  %v6172_v60 = vpack.c.bf16 %v5988_v3, %v20107_v28  ;;  %v9524_v11 = vpack.c.bf16 %v5988_v3, %v20108_v40  ;;  %20111 = vst [vmem:[#allocation71_spill] sm:$0xff] %v17509_v2  ;;  %v5544_v48 = vmul.f32 %v17266_v58, %v5543_v41  ;;  %v20118_v58 = vld [vmem:[#allocation68_spill] sm:$0xff] }
 0x5b5   : > { %8276 = vmatmul.mubr.bf16.gmra.mxu0 %v20110_v15  ;;  %20112 = vst [vmem:[#allocation62_spill] sm:$0xff] %v17511_v32  ;;  %v5755_v45 = vadd.f32 1.0, %v17489_v4  ;;  %v4954_v3 = vadd.f32 1.0, %v20113_v26  ;;  %v20114_v46 = vmax.f32 %v17007_v0, 0.0  ;;  %vm17523_vm9 = vcmp.lt.f32.partialorder %v5545_v56, 0.0004427343 }
 0x5b6   : > { %6940 = vst [vmem:[%s11758_s29 + $0x238] sm:$0xff] %v9524_v11  ;;  %8468 = vmatprep.mubr.bf16.mxu1 %v6172_v60  ;;  %10839 = vpow2.f32 %v17298_v43  ;;  %v17528_v16 = vadd.f32 -4.0, %v1808_v9  ;;  %v20119_v41 = vpack.c.bf16 %v20108_v40, %v20118_v58  ;;  %v17533_v11 = vpop.f32.mrf.mxu0  ;;  %v17535_v60 = vpop.f32.mrf.mxu1  ;;  %v5668_v9 = vmul.f32 -0.5, %v17406_v34 }
 0x5b7   : > { %v17521_v28 = vadd.f32 %v5529_v36, %v20114_v46  ;;  %20120 = vst [vmem:[#allocation39_spill] sm:$0xff] %v17533_v11  ;;  %20121 = vst [vmem:[#allocation53_spill] sm:$0xff] %v17535_v60  ;;  %v5547_v36 = vsel %vm17523_vm9, %v5544_v48, %v5541_v29  ;;  %10841 = vpow2.f32 %v17305_v12  ;;  %v17543_v43 = vpop.eup %10829  ;;  %v3503_v40 = vmul.f32 1.442695, %v3010_v7  ;;  %v20124_v48 = vld [vmem:[#allocation55_spill] sm:$0xff] }
 0x5b8   : > { %8469 = vmatmul.mubr.bf16.gmra.mxu1 %v20119_v41  ;;  %v3012_v15 = vsub.f32 0.0, %v2756_v30  ;;  %10843 = vlog2.f32 %v4954_v3  ;;  %v17546_v46 = vpop.f32.mrf.mxu0  ;;  %v17548_v58 = vpop.f32.mrf.mxu1  ;;  %v5746_v29 = vadd.f32 1.0, %v17543_v43  ;;  %v2001_v33 = vadd.f32 %v20124_v48, %v14182_v31  ;;  %v20130_v31 = vld [vmem:[#allocation31_spill] sm:$0xff] }
 0x5b9   : > { %20115 = vst [vmem:[#allocation32_spill] sm:$0xff] %v17521_v28  ;;  %20122 = vst [vmem:[#allocation56_spill] sm:$0xff] %v17546_v46  ;;  %10845 = vlog2.f32 %v5755_v45  ;;  %v20125_v56 = vmax.f32 %v17057_v10, 0.0  ;;  %v2769_v3 = vand.u32 2147483647, %v17528_v16  ;;  %v5686_v45 = vmul.f32 -0.5, %v17430_v54 }
 0x5ba   : > { %20123 = vst [vmem:[#allocation68_spill] sm:$0xff] %v17548_v58  ;;  %v17562_v61 = vpop.f32.mrf.mxu0  ;;  %v17564_v0 = vpop.f32.mrf.mxu1  ;;  %10847 = vlog2.f32 %v5746_v29  ;;  %v5669_v10 = vadd.f32 1.0, %v5668_v9  ;;  %v5740_v41 = vmul.f32 -0.5, %v17446_v1  ;;  %v17580_v20 = vadd.f32 -4.0, %v2001_v33 }
 0x5bb   : > { %v17558_v7 = vadd.f32 %v5547_v36, %v20125_v56  ;;  %20126 = vst [vmem:[#allocation55_spill] sm:$0xff] %v17562_v61  ;;  %20127 = vst [vmem:[#allocation160_spill] sm:$0xff] %v17564_v0  ;;  %v17569_v48 = vpop.eup %10831  ;;  %10849 = vpow2.f32 %v3503_v40  ;;  %v17571_v36 = vmul.f32 1.442695, %v3012_v15  ;;  %v4972_v29 = vadd.f32 1.0, %v20130_v31 }
 0x5bc   : > { %v17574_v12 = vpop.f32.mrf.mxu0  ;;  %v17576_v30 = vpop.f32.mrf.mxu1  ;;  %v5764_v0 = vadd.f32 1.0, %v17569_v48  ;;  %v5671_v58 = vand.u32 2147483647, %v17406_v34  ;;  %v5743_v9 = vand.u32 2147483647, %v17446_v1  ;;  %v3025_v40 = vsub.f32 0.0, %v2769_v3 }
 0x5bd   : > { %20128 = vst [vmem:[#allocation161_spill] sm:$0xff] %v17574_v12  ;;  %20129 = vst [vmem:[#allocation162_spill] sm:$0xff] %v17576_v30  ;;  %v4957_v15 = vmul.f32 -0.5, %v20113_v26  ;;  %v10834_v30 = vpop.eup %10833  ;;  %v17590_v61 = vadd.f32 1.0, %v5686_v45  ;;  %v5758_v33 = vmul.f32 -0.5, %v17489_v4  ;;  %v17595_v32 = vmul.f32 %v17406_v34, %v5669_v10  ;;  %v20138_v3 = vld [vmem:[#allocation91_spill] sm:$0xff] }
 0x5be   : > { %v17586_v56 = vpop.f32.mrf.mxu0  ;;  %v17588_v12 = vpop.f32.mrf.mxu1  ;;  %10851 = vlog2.f32 %v5764_v0  ;;  %v5749_v11 = vmul.f32 -0.5, %v17543_v43  ;;  %v5741_v2 = vadd.f32 1.0, %v5740_v41  ;;  %v5761_v0 = vand.u32 2147483647, %v17489_v4 }
 0x5bf   : > { %20131 = vst [vmem:[#allocation31_spill] sm:$0xff] %v17586_v56  ;;  %20132 = vst [vmem:[#allocation163_spill] sm:$0xff] %v17588_v12  ;;  %v10836_v60 = vpop.eup %10835  ;;  %v20133_v56 = vld [vmem:[#allocation59_spill] sm:$0xff]  ;;  %v2771_v37 = vand.u32 2147483647, %v17580_v20  ;;  %10853 = vlog2.f32 %v4972_v29  ;;  %v5759_v25 = vadd.f32 1.0, %v5758_v33 }
 0x5c0   : > { %v17601_v35 = vadd.f32 %v20133_v56, %v19607_v62  ;;  %v17603_v12 = vpop.f32.mrf.mxu0  ;;  %v17605_v45 = vpop.f32.mrf.mxu1  ;;  %vm17609_vm10 = vcmp.lt.f32.partialorder %v5743_v9, 0.0004427343  ;;  %v3533_v10 = vmul.f32 1.442695, %v3025_v40  ;;  %v17615_v62 = vadd.f32 %v20138_v3, %v14286_v14 }
 0x5c1   : > { %20134 = vst [vmem:[#allocation59_spill] sm:$0xff] %v17603_v12  ;;  %20135 = vst [vmem:[#allocation164_spill] sm:$0xff] %v17605_v45  ;;  %v10838_v46 = vpop.eup %10837  ;;  %v4958_v56 = vadd.f32 1.0, %v4957_v15  ;;  %v17623_v38 = vmul.f32 0.6931472, %v10834_v30  ;;  %v5750_v3 = vadd.f32 1.0, %v5749_v11  ;;  %v5742_v30 = vmul.f32 %v17446_v1, %v5741_v2 }
 0x5c2   : > { %v17617_v12 = vpop.f32.mrf.mxu0  ;;  %v17619_v45 = vpop.f32.mrf.mxu1  ;;  %v4960_v9 = vand.u32 2147483647, %v20113_v26  ;;  %v17629_v40 = vmul.f32 0.6931472, %v10836_v60  ;;  %v5739_v14 = vmul.f32 0.6931472, %v10838_v46  ;;  %v5760_v1 = vmul.f32 %v17489_v4, %v5759_v25 }
 0x5c3   : > { %20139 = vst [vmem:[#allocation91_spill] sm:$0xff] %v17617_v12  ;;  %20140 = vst [vmem:[#allocation165_spill] sm:$0xff] %v17619_v45  ;;  %v17621_v41 = vpop.eup %10839  ;;  %v20141_v15 = vld [vmem:[#allocation90_spill] sm:$0xff]  ;;  %vm17637_vm11 = vcmp.lt.f32.partialorder %v5761_v0, 0.0004427343  ;;  %v5767_v60 = vmul.f32 -0.5, %v17569_v48  ;;  %v4959_v11 = vmul.f32 %v20113_v26, %v4958_v56  ;;  %v5751_v26 = vmul.f32 %v17543_v43, %v5750_v3 }
 0x5c4   : > { %v17627_v6 = vpop.eup %10841  ;;  %v5098_v51 = vadd.f32 1.0, %v20141_v15  ;;  %v17632_v12 = vpop.f32.mrf.mxu0  ;;  %v5752_v29 = vand.u32 2147483647, %v17543_v43  ;;  %v4975_v49 = vmul.f32 -0.5, %v20130_v31  ;;  %v3027_v2 = vsub.f32 0.0, %v2771_v37  ;;  %v20150_v56 = vld [vmem:[#allocation92_spill] sm:$0xff] }
 0x5c5   : > { %20142 = vst [vmem:[#allocation90_spill] sm:$0xff] %v17632_v12  ;;  %v17634_v45 = vpop.f32.mrf.mxu1  ;;  %v10844_v17 = vpop.eup %10843  ;;  %vm4961_vm12 = vcmp.lt.f32.partialorder %v4960_v9, 0.0004427343  ;;  %vm17650_vm13 = vcmp.lt.f32.partialorder %v5671_v58, 0.0004427343  ;;  %v5768_v58 = vadd.f32 1.0, %v5767_v60 }
 0x5c6   : > { %20143 = vst [vmem:[#allocation166_spill] sm:$0xff] %v17634_v45  ;;  %v10846_v21 = vpop.eup %10845  ;;  %v4956_v46 = vmul.f32 0.6931472, %v10844_v17  ;;  %10855 = vlog2.f32 %v5098_v51  ;;  %v17645_v12 = vpop.f32.mrf.mxu0  ;;  %v5745_v17 = vsel %vm17609_vm10, %v5742_v30, %v5739_v14  ;;  %vm5753_vm14 = vcmp.lt.f32.partialorder %v5752_v29, 0.0004427343 }
 0x5c7   : > { %20146 = vst [vmem:[#allocation167_spill] sm:$0xff] %v17645_v12  ;;  %v17647_v45 = vpop.f32.mrf.mxu1  ;;  %10857 = vpow2.f32 %v3533_v10  ;;  %v10848_v0 = vpop.eup %10847  ;;  %v5116_v12 = vadd.f32 1.0, %v20150_v56  ;;  %v5757_v37 = vmul.f32 0.6931472, %v10846_v21  ;;  %v20153_v10 = vld [vmem:[#allocation28_spill] sm:$0xff]  ;;  %v4976_v14 = vadd.f32 1.0, %v4975_v49 }
 0x5c8   : > { %20147 = vst [vmem:[#allocation168_spill] sm:$0xff] %v17647_v45  ;;  %v4962_v51 = vsel %vm4961_vm12, %v4959_v11, %v4956_v46  ;;  %v17658_v28 = vpop.f32.mrf.mxu0  ;;  %v17662_v25 = vpop.eup %10849  ;;  %v5748_v4 = vmul.f32 0.6931472, %v10848_v0  ;;  %v20154_v9 = vmax.f32 %v20153_v10, 0.0  ;;  %v5770_v34 = vand.u32 2147483647, %v17569_v48 }
 0x5c9   : > { %20151 = vst [vmem:[#allocation92_spill] sm:$0xff] %v17658_v28  ;;  %v17660_v45 = vpop.f32.mrf.mxu1  ;;  %10859 = vlog2.f32 %v5116_v12  ;;  %v20157_v46 = vld [vmem:[#allocation37_spill] sm:$0xff]  ;;  %v5101_v60 = vmul.f32 -0.5, %v20141_v15  ;;  %v20160_v49 = vmax.f32 %v17363_v42, 0.0  ;;  %v17683_v10 = vadd.f32 -4.0, %v17601_v35 }
 0x5ca   : > { %20152 = vst [vmem:[#allocation169_spill] sm:$0xff] %v17660_v45  ;;  %v6002_v22 = vadd.f32 %v4962_v51, %v20154_v9  ;;  %v17667_v43 = vpop.f32.mrf.mxu0  ;;  %v5754_v30 = vsel %vm5753_vm14, %v5751_v26, %v5748_v4  ;;  %v20158_v45 = vld [vmem:[#allocation76_spill] sm:$0xff]  ;;  %v20159_v51 = vmax.f32 %v17230_v27, 0.0  ;;  %v4978_v26 = vand.u32 2147483647, %v20130_v31 }
 0x5cb   : > { %20155 = vst [vmem:[#allocation28_spill] sm:$0xff] %v17667_v43  ;;  %v17669_v3 = vpop.f32.mrf.mxu1  ;;  %v10852_v0 = vpop.eup %10851  ;;  %v17680_v12 = vadd.f32 %v5754_v30, %v20160_v49  ;;  %v5769_v27 = vmul.f32 %v17569_v48, %v5768_v58  ;;  %vm5771_vm15 = vcmp.lt.f32.partialorder %v5770_v34, 0.0004427343  ;;  %v4977_v30 = vmul.f32 %v20130_v31, %v4976_v14  ;;  %v20182_v43 = vld [vmem:[#allocation47_spill] sm:$0xff] }
 0x5cc   : > { %20156 = vst [vmem:[#allocation170_spill] sm:$0xff] %v17669_v3  ;;  %v6178_v11 = vpack.c.bf16 %v6002_v22, %v20157_v46  ;;  %v9531_v21 = vpack.c.bf16 %v6002_v22, %v20158_v45  ;;  %v17676_v29 = vadd.f32 %v5745_v17, %v20159_v51  ;;  %v17686_v4 = vpop.f32.mrf.mxu0  ;;  %v5763_v22 = vsel %vm17637_vm11, %v5760_v1, %v5757_v37  ;;  %v10854_v42 = vpop.eup %10853  ;;  %v20161_v51 = vld [vmem:[#allocation23_spill] sm:$0xff] }
 0x5cd   : > { %v17688_v9 = vpop.f32.mrf.mxu1  ;;  %v5766_v46 = vmul.f32 0.6931472, %v10852_v0  ;;  %v17694_v17 = vadd.f32 -4.0, %v17615_v62  ;;  %v20162_v33 = vpack.c.bf16 %v20158_v45, %v20161_v51  ;;  %v5242_v1 = vadd.f32 1.0, %v17073_v52 }
 0x5ce   : > { %6947 = vst [vmem:[%s11758_s29 + $0x270] sm:$0xff] %v9531_v21  ;;  %8285 = vmatprep.mubr.bf16.mxu0 %v6178_v11  ;;  %v9575_v35 = vpack.c.bf16 %v17680_v12, %v17676_v29  ;;  %v17704_v48 = vpop.f32.mrf.mxu0  ;;  %v4974_v58 = vmul.f32 0.6931472, %v10854_v42  ;;  %v5102_v11 = vadd.f32 1.0, %v5101_v60  ;;  %v5119_v21 = vmul.f32 -0.5, %v20150_v56  ;;  %v20165_v42 = vld [vmem:[#allocation35_spill] sm:$0xff] }
 0x5cf   : > { %8286 = vmatmul.mubr.bf16.gmra.mxu0 %v20162_v33  ;;  %v17706_v62 = vpop.f32.mrf.mxu1  ;;  %v5772_v37 = vsel %vm5771_vm15, %v5769_v27, %v5766_v46  ;;  %v20163_v0 = vmax.f32 %v17286_v39, 0.0  ;;  %v20164_v31 = vmax.f32 %v17379_v24, 0.0  ;;  %vm4979_vm0 = vcmp.lt.f32.partialorder %v4978_v26, 0.0004427343 }
 0x5d0   : > { %6991 = vst [vmem:[%s11758_s29 + $0x3d0] sm:$0xff] %v9575_v35  ;;  %10861 = vlog2.f32 %v5242_v1  ;;  %v17718_v14 = vpop.f32.mrf.mxu0  ;;  %v5673_v60 = vsel %vm17650_vm13, %v17595_v32, %v17623_v38  ;;  %v4980_v39 = vsel %vm4979_vm0, %v4977_v30, %v4974_v58  ;;  %v5260_v46 = vadd.f32 1.0, %v17080_v19 }
 0x5d1   : > { %v17711_v34 = vadd.f32 %v5763_v22, %v20163_v0  ;;  %v17716_v45 = vadd.f32 %v5772_v37, %v20164_v31  ;;  %v17720_v49 = vpop.f32.mrf.mxu1  ;;  %v5104_v22 = vand.u32 2147483647, %v20141_v15  ;;  %v3537_v26 = vmul.f32 1.442695, %v3027_v2  ;;  %v20167_v2 = vld [vmem:[#allocation75_spill] sm:$0xff]  ;;  %v20168_v0 = vld [vmem:[#allocation72_spill] sm:$0xff] }
 0x5d2   : > { %v2770_v27 = vand.u32 2147483647, %v17683_v10  ;;  %v20166_v35 = vmax.f32 %v20165_v42, 0.0  ;;  %v17733_v33 = vpop.f32.mrf.mxu0  ;;  %v2772_v38 = vand.u32 2147483647, %v17694_v17  ;;  %v5103_v32 = vmul.f32 %v20141_v15, %v5102_v11 }
 0x5d3   : > { %v9576_v24 = vpack.c.bf16 %v17716_v45, %v17711_v34  ;;  %v17735_v1 = vpop.f32.mrf.mxu1  ;;  %v10856_v23 = vpop.eup %10855  ;;  %v5120_v30 = vadd.f32 1.0, %v5119_v21  ;;  %10863 = vlog2.f32 %v5260_v46  ;;  %v5122_v42 = vand.u32 2147483647, %v20150_v56 }
 0x5d4   : > { %v6004_v51 = vadd.f32 %v4980_v39, %v20166_v35  ;;  %v17739_v37 = vpop.eup %10857  ;;  %v5100_v39 = vmul.f32 0.6931472, %v10856_v23  ;;  %v17745_v35 = vpop.f32.mrf.mxu0  ;;  %v5688_v15 = vmul.f32 %v17430_v54, %v17590_v61  ;;  %10865 = vpow2.f32 %v17571_v36 }
 0x5d5   : > { %6992 = vst [vmem:[%s11758_s29 + $0x3d8] sm:$0xff] %v9576_v24  ;;  %v17747_v3 = vpop.f32.mrf.mxu1  ;;  %vm5105_vm1 = vcmp.lt.f32.partialorder %v5104_v22, 0.0004427343  ;;  %v20170_v21 = vand.u32 2147483647, %v17430_v54  ;;  %v3026_v24 = vsub.f32 0.0, %v2770_v27  ;;  %10867 = vpow2.f32 %v3537_v26 }
 0x5d6   : > { %v6180_v58 = vpack.c.bf16 %v6004_v51, %v20167_v2  ;;  %v9532_v31 = vpack.c.bf16 %v6004_v51, %v20168_v0  ;;  %20169 = vst [vmem:[#allocation37_spill] sm:$0xff] %v17747_v3  ;;  %v5106_v51 = vsel %vm5105_vm1, %v5103_v32, %v5100_v39  ;;  %v5245_v23 = vmul.f32 -0.5, %v17073_v52  ;;  %v17761_v2 = vpop.f32.mrf.mxu0  ;;  %v10860_v11 = vpop.eup %10859  ;;  %v17775_v27 = vld [vmem:[%s18524_s4] sm:$0x3]  ;;  %v20175_v32 = vld [vmem:[#allocation36_spill] sm:$0xff] }
 0x5d7   : > { %vm17755_vm2 = vcmp.lt.f32.partialorder %v20170_v21, 0.0004427343  ;;  %v17763_v61 = vpop.f32.mrf.mxu1  ;;  %v20174_v36 = vmax.f32 %v17201_v13, 0.0  ;;  %v3028_v13 = vsub.f32 0.0, %v2772_v38  ;;  %vm5123_vm3 = vcmp.lt.f32.partialorder %v5122_v42, 0.0004427343 }
 0x5d8   : > { %6948 = vst [vmem:[%s11758_s29 + $0x278] sm:$0xff] %v9532_v31  ;;  %8478 = vmatprep.mubr.bf16.mxu1 %v6180_v58  ;;  %20173 = vst [vmem:[#allocation76_spill] sm:$0xff] %v17763_v61  ;;  %v5691_v54 = vsel %vm17755_vm2, %v5688_v15, %v17629_v40  ;;  %v20176_v58 = vpack.c.bf16 %v20168_v0, %v20175_v32  ;;  %v20177_v31 = vld [vmem:[#allocation77_spill] sm:$0xff]  ;;  %v17783_v40 = vpop.f32.mrf.mxu0  ;;  %v20181_v15 = vld [vmem:[#allocation50_spill] sm:$0xff]  ;;  %v5263_v0 = vmul.f32 -0.5, %v17080_v19  ;;  %v5386_v32 = vadd.f32 1.0, %v17325_v8 }
 0x5d9   : > { %v17767_v22 = vadd.f32 %v5673_v60, %v20174_v36  ;;  %v20178_v39 = vmax.f32 %v20177_v31, 0.0  ;;  %v5118_v60 = vmul.f32 0.6931472, %v10860_v11  ;;  %v5121_v36 = vmul.f32 %v20150_v56, %v5120_v30  ;;  %20179 = vst [vmem:[#allocation23_spill] sm:$0xff] %v17783_v40  ;;  %v17785_v26 = vpop.f32.mrf.mxu1 }
 0x5da   : > { %8479 = vmatmul.mubr.bf16.gmra.mxu1 %v20176_v58  ;;  %20180 = vst [vmem:[#allocation35_spill] sm:$0xff] %v17785_v26  ;;  %v3535_v58 = vmul.f32 1.442695, %v3026_v24  ;;  %v5246_v30 = vadd.f32 1.0, %v5245_v23  ;;  %v17796_v42 = vpop.f32.mrf.mxu0  ;;  %v5248_v26 = vand.u32 2147483647, %v17073_v52  ;;  %10869 = vlog2.f32 %v5386_v32 }
 0x5db   : > { %v6018_v21 = vadd.f32 %v5106_v51, %v20178_v39  ;;  %v20183_v51 = vld [vmem:[#allocation18_spill] sm:$0xff]  ;;  %v5124_v56 = vsel %vm5123_vm3, %v5121_v36, %v5118_v60  ;;  %20185 = vst [vmem:[#allocation75_spill] sm:$0xff] %v17796_v42  ;;  %v17798_v31 = vpop.f32.mrf.mxu1  ;;  %v5404_v24 = vadd.f32 1.0, %v17337_v57  ;;  %v3539_v36 = vmul.f32 1.442695, %v3028_v13 }
 0x5dc   : > { %v20184_v38 = vsub.s32 0, %v20183_v51  ;;  %20186 = vst [vmem:[#allocation72_spill] sm:$0xff] %v17798_v31  ;;  %v20187_v39 = vld [vmem:[#allocation78_spill] sm:$0xff]  ;;  %v20189_v31 = vld [vmem:[#allocation48_spill] sm:$0xff]  ;;  %v20195_v60 = vmax.f32 %v17225_v50, 0.0 }
 0x5dd   : > { %v6186_v46 = vpack.c.bf16 %v6018_v21, %v20181_v15  ;;  %v9539_v28 = vpack.c.bf16 %v6018_v21, %v20182_v43  ;;  %v20188_v21 = vmax.f32 %v20187_v39, 0.0  ;;  %v10862_v32 = vpop.eup %10861  ;;  %v20193_v39 = vld [vmem:[#allocation70_spill] sm:$0xff]  ;;  %10871 = vlog2.f32 %v5404_v24 }
 0x5de   : > { %v17794_v11 = vrot.slane %v17775_v27, %v20184_v38  ;;  %v20194_v42 = vld [vmem:[#allocation66_spill] sm:$0xff]  ;;  %v5264_v38 = vadd.f32 1.0, %v5263_v0  ;;  %v17820_v23 = vadd.f32 %v5691_v54, %v20195_v60  ;;  %v5244_v13 = vmul.f32 0.6931472, %v10862_v32  ;;  %v20198_v0 = vld [vmem:[#allocation93_spill] sm:$0xff] }
 0x5df   : > { %6955 = vst [vmem:[%s11758_s29 + $0x2b0] sm:$0xff] %v9539_v28  ;;  %8295 = vmatprep.mubr.bf16.mxu0 %v6186_v46  ;;  %v6020_v15 = vadd.f32 %v5124_v56, %v20188_v21  ;;  %v20190_v28 = vpack.c.bf16 %v20182_v43, %v20189_v31  ;;  %v17812_v46 = vpop.f32.mrf.mxu0  ;;  %v17814_v56 = vpop.f32.mrf.mxu1  ;;  %v5247_v43 = vmul.f32 %v17073_v52, %v5246_v30  ;;  %v5266_v31 = vand.u32 2147483647, %v17080_v19  ;;  %v20199_v52 = vld [vmem:[#allocation30_spill] sm:$0xff] }
 0x5e0   : > { %20191 = vst [vmem:[#allocation36_spill] sm:$0xff] %v17812_v46  ;;  %20192 = vst [vmem:[#allocation77_spill] sm:$0xff] %v17814_v56  ;;  %10873 = vpow2.f32 %v3535_v58  ;;  %vm5249_vm4 = vcmp.lt.f32.partialorder %v5248_v26, 0.0004427343  ;;  %v10864_v50 = vpop.eup %10863  ;;  %v5809_v54 = vadd.f32 1.0, %v17739_v37  ;;  %v20200_v30 = vpack.c.bf16 %v20194_v42, %v20199_v52  ;;  %v20210_v56 = vld [vmem:[#allocation67_spill] sm:$0xff] }
 0x5e1   : > { %8296 = vmatmul.mubr.bf16.gmra.mxu0 %v20190_v28  ;;  %v6188_v21 = vpack.c.bf16 %v6020_v15, %v20193_v39  ;;  %v9540_v61 = vpack.c.bf16 %v6020_v15, %v20194_v42  ;;  %v17824_v28 = vpop.f32.mrf.mxu0  ;;  %v17826_v46 = vpop.f32.mrf.mxu1  ;;  %v7812_v15 = vadd.f32 %v20198_v0, %v17794_v11  ;;  %10875 = vpow2.f32 %v3539_v36  ;;  %v20203_v39 = vld [vmem:[#allocation65_spill] sm:$0xff] }
 0x5e2   : > { %20196 = vst [vmem:[#allocation50_spill] sm:$0xff] %v17824_v28  ;;  %20197 = vst [vmem:[#allocation47_spill] sm:$0xff] %v17826_v46  ;;  %v5250_v24 = vsel %vm5249_vm4, %v5247_v43, %v5244_v13  ;;  %v5530_v60 = vadd.f32 1.0, %v17621_v41  ;;  %v20204_v0 = vmax.f32 %v20203_v39, 0.0  ;;  %v5265_v26 = vmul.f32 %v17080_v19, %v5264_v38  ;;  %v17846_v36 = vpop.eup %10865  ;;  %v20207_v39 = vld [vmem:[#allocation84_spill] sm:$0xff] }
 0x5e3   : > { %6956 = vst [vmem:[%s11758_s29 + $0x2b8] sm:$0xff] %v9540_v61  ;;  %8488 = vmatprep.mubr.bf16.mxu1 %v6188_v21  ;;  %v17838_v32 = vpop.f32.mrf.mxu0  ;;  %v17840_v58 = vpop.f32.mrf.mxu1  ;;  %v5262_v21 = vmul.f32 0.6931472, %v10864_v50  ;;  %v5389_v46 = vmul.f32 -0.5, %v17325_v8  ;;  %v5812_v42 = vmul.f32 -0.5, %v17739_v37  ;;  %v5407_v13 = vmul.f32 -0.5, %v17337_v57 }
 0x5e4   : > { %8489 = vmatmul.mubr.bf16.gmra.mxu1 %v20200_v30  ;;  %20201 = vst [vmem:[#allocation18_spill] sm:$0xff] %v17838_v32  ;;  %20202 = vst [vmem:[#allocation78_spill] sm:$0xff] %v17840_v58  ;;  %v6034_v61 = vadd.f32 %v5250_v24, %v20204_v0  ;;  %vm5267_vm5 = vcmp.lt.f32.partialorder %v5266_v31, 0.0004427343  ;;  %10877 = vlog2.f32 %v5530_v60  ;;  %v20208_v50 = vld [vmem:[#allocation108_spill] sm:$0xff]  ;;  %v5548_v38 = vadd.f32 1.0, %v17627_v6  ;;  %v17857_v0 = vpop.eup %10867 }
 0x5e5   : > { %v17850_v43 = vpop.f32.mrf.mxu0  ;;  %v17852_v52 = vpop.f32.mrf.mxu1  ;;  %v5268_v19 = vsel %vm5267_vm5, %v5265_v26, %v5262_v21  ;;  %10879 = vlog2.f32 %v5809_v54  ;;  %v20209_v58 = vsub.s32 1, %v20183_v51  ;;  %v5390_v26 = vadd.f32 1.0, %v5389_v46  ;;  %v20214_v51 = vld [vmem:[#allocation85_spill] sm:$0xff]  ;;  %v20220_v21 = vld [vmem:[#allocation94_spill] sm:$0xff] }
 0x5e6   : > { %20205 = vst [vmem:[#allocation48_spill] sm:$0xff] %v17850_v43  ;;  %20206 = vst [vmem:[#allocation70_spill] sm:$0xff] %v17852_v52  ;;  %v6194_v30 = vpack.c.bf16 %v6034_v61, %v20207_v39  ;;  %v9547_v24 = vpack.c.bf16 %v6034_v61, %v20208_v50  ;;  %v20211_v52 = vmax.f32 %v20210_v56, 0.0  ;;  %v5392_v31 = vand.u32 2147483647, %v17325_v8  ;;  %v20216_v56 = vld [vmem:[#allocation51_spill] sm:$0xff] }
 0x5e7   : > { %v17864_v60 = vrot.slane %v17775_v27, %v20209_v58  ;;  %v17868_v39 = vpop.f32.mrf.mxu0  ;;  %v17870_v61 = vpop.f32.mrf.mxu1  ;;  %10881 = vlog2.f32 %v5548_v38  ;;  %v20215_v27 = vld [vmem:[#allocation110_spill] sm:$0xff]  ;;  %v5813_v46 = vadd.f32 1.0, %v5812_v42  ;;  %v5827_v32 = vadd.f32 1.0, %v17857_v0  ;;  %v20225_v38 = vld [vmem:[#allocation97_spill] sm:$0xff] }
 0x5e8   : > { %v6036_v43 = vadd.f32 %v5268_v19, %v20211_v52  ;;  %20212 = vst [vmem:[#allocation66_spill] sm:$0xff] %v17868_v39  ;;  %20213 = vst [vmem:[#allocation93_spill] sm:$0xff] %v17870_v61  ;;  %8305 = vmatprep.mubr.bf16.mxu0 %v6194_v30  ;;  %v20217_v52 = vpack.c.bf16 %v20208_v50, %v20216_v56  ;;  %v5408_v19 = vadd.f32 1.0, %v5407_v13  ;;  %v5533_v61 = vmul.f32 -0.5, %v17621_v41  ;;  %v20222_v50 = vld [vmem:[#allocation95_spill] sm:$0xff] }
 0x5e9   : > { %6963 = vst [vmem:[%s11758_s29 + $0x2f0] sm:$0xff] %v9547_v24  ;;  %v17881_v39 = vpop.f32.mrf.mxu0  ;;  %v17883_v24 = vpop.f32.mrf.mxu1  ;;  %v5815_v30 = vand.u32 2147483647, %v17739_v37  ;;  %v7814_v13 = vadd.f32 %v20222_v50, %v17864_v60  ;;  %v5410_v56 = vand.u32 2147483647, %v17337_v57  ;;  %v5391_v50 = vmul.f32 %v17325_v8, %v5390_v26  ;;  %v20230_v8 = vld [vmem:[#allocation46_spill] sm:$0xff] }
 0x5ea   : > { %v6196_v54 = vpack.c.bf16 %v6036_v43, %v20214_v51  ;;  %v9548_v58 = vpack.c.bf16 %v6036_v43, %v20215_v27  ;;  %8306 = vmatmul.mubr.bf16.gmra.mxu0 %v20217_v52  ;;  %20218 = vst [vmem:[#allocation30_spill] sm:$0xff] %v17881_v39  ;;  %20219 = vst [vmem:[#allocation65_spill] sm:$0xff] %v17883_v24  ;;  %v17888_v51 = vadd.f32 %v20220_v21, %v7812_v15  ;;  %v10870_v43 = vpop.eup %10869  ;;  %v20226_v21 = vld [vmem:[#allocation83_spill] sm:$0xff] }
 0x5eb   : > { %v5674_v52 = vadd.f32 1.0, %v17662_v25  ;;  %v17896_v42 = vpop.f32.mrf.mxu0  ;;  %v17898_v24 = vpop.f32.mrf.mxu1  ;;  %v7816_v15 = vadd.f32 %v20225_v38, %v17794_v11  ;;  %v20227_v39 = vpack.c.bf16 %v20215_v27, %v20226_v21  ;;  %v5388_v28 = vmul.f32 0.6931472, %v10870_v43  ;;  %v20235_v21 = vld [vmem:[#allocation54_spill] sm:$0xff] }
 0x5ec   : > { %20221 = vst [vmem:[#allocation84_spill] sm:$0xff] %v17888_v51  ;;  %6964 = vst [vmem:[%s11758_s29 + $0x2f8] sm:$0xff] %v9548_v58  ;;  %8498 = vmatprep.mubr.bf16.mxu1 %v6196_v54  ;;  %v5692_v54 = vadd.f32 1.0, %v17846_v36  ;;  %v10872_v58 = vpop.eup %10871  ;;  %vm5393_vm6 = vcmp.lt.f32.partialorder %v5392_v31, 0.0004427343  ;;  %v5409_v40 = vmul.f32 %v17337_v57, %v5408_v19  ;;  %v5534_v51 = vadd.f32 1.0, %v5533_v61 }
 0x5ed   : > { %20223 = vst [vmem:[#allocation108_spill] sm:$0xff] %v17896_v42  ;;  %20224 = vst [vmem:[#allocation67_spill] sm:$0xff] %v17898_v24  ;;  %8499 = vmatmul.mubr.bf16.gmra.mxu1 %v20227_v39  ;;  %10883 = vlog2.f32 %v5674_v52  ;;  %v17908_v42 = vpop.f32.mrf.mxu0  ;;  %v17910_v24 = vpop.f32.mrf.mxu1  ;;  %v5394_v38 = vsel %vm5393_vm6, %v5391_v50, %v5388_v28  ;;  %v5406_v3 = vmul.f32 0.6931472, %v10872_v58  ;;  %v5551_v27 = vmul.f32 -0.5, %v17627_v6  ;;  %v20231_v31 = vld [vmem:[#allocation19_spill] sm:$0xff] }
 0x5ee   : > { %20228 = vst [vmem:[#allocation85_spill] sm:$0xff] %v17908_v42  ;;  %20229 = vst [vmem:[#allocation110_spill] sm:$0xff] %v17910_v24  ;;  %10885 = vlog2.f32 %v5692_v54  ;;  %v17913_v39 = vpop.eup %10873  ;;  %v7818_v26 = vadd.f32 %v20230_v8, %v17864_v60  ;;  %v20232_v43 = vmax.f32 %v20231_v31, 0.0  ;;  %vm5411_vm7 = vcmp.lt.f32.partialorder %v5410_v56, 0.0004427343  ;;  %v20236_v58 = vld [vmem:[#allocation96_spill] sm:$0xff] }
 0x5ef   : > { %10887 = vlog2.f32 %v5827_v32  ;;  %v17919_v61 = vpop.f32.mrf.mxu0  ;;  %v17921_v19 = vpop.f32.mrf.mxu1  ;;  %v17926_v28 = vmul.f32 %v17739_v37, %v5813_v46  ;;  %v7822_v32 = vadd.f32 %v20235_v21, %v17794_v11  ;;  %v5412_v50 = vsel %vm5411_vm7, %v5409_v40, %v5406_v3  ;;  %v20238_v56 = vld [vmem:[#allocation102_spill] sm:$0xff] }
 0x5f0   : > { %v6050_v57 = vadd.f32 %v5394_v38, %v20232_v43  ;;  %20233 = vst [vmem:[#allocation51_spill] sm:$0xff] %v17919_v61  ;;  %20234 = vst [vmem:[#allocation94_spill] sm:$0xff] %v17921_v19  ;;  %v17923_v52 = vpop.eup %10875  ;;  %v5536_v54 = vand.u32 2147483647, %v17621_v41  ;;  %v17932_v8 = vadd.f32 %v20236_v58, %v7814_v13  ;;  %v20239_v43 = vld [vmem:[#allocation105_spill] sm:$0xff]  ;;  %v5535_v21 = vmul.f32 %v17621_v41, %v5534_v51  ;;  %v20270_v51 = vld [vmem:[#allocation155_spill] sm:$0xff] }
 0x5f1   : > { %v20240_v19 = vmax.f32 %v20239_v43, 0.0  ;;  %v17938_v61 = vpop.f32.mrf.mxu0  ;;  %v17940_v37 = vpop.f32.mrf.mxu1  ;;  %v5552_v3 = vadd.f32 1.0, %v5551_v27  ;;  %v5554_v40 = vand.u32 2147483647, %v17627_v6  ;;  %v5818_v13 = vadd.f32 1.0, %v17913_v39  ;;  %v20243_v58 = vld [vmem:[#allocation29_spill] sm:$0xff] }
 0x5f2   : > { %20237 = vst [vmem:[#allocation95_spill] sm:$0xff] %v17932_v8  ;;  %v6202_v38 = vpack.c.bf16 %v6050_v57, %v20238_v56  ;;  %v9555_v31 = vpack.c.bf16 %v6050_v57, %v17276_v53  ;;  %20241 = vst [vmem:[#allocation97_spill] sm:$0xff] %v17938_v61  ;;  %v10878_v46 = vpop.eup %10877  ;;  %vm17953_vm8 = vcmp.lt.f32.partialorder %v5815_v30, 0.0004427343  ;;  %v20248_v27 = vpack.c.bf16 %v17276_v53, %v16885_v59 }
 0x5f3   : > { %v6052_v24 = vadd.f32 %v5412_v50, %v20240_v19  ;;  %20242 = vst [vmem:[#allocation83_spill] sm:$0xff] %v17940_v37  ;;  %v5532_v19 = vmul.f32 0.6931472, %v10878_v46  ;;  %v5677_v50 = vmul.f32 -0.5, %v17662_v25  ;;  %v17949_v43 = vpop.f32.mrf.mxu0  ;;  %v17951_v37 = vpop.f32.mrf.mxu1  ;;  %vm5537_vm9 = vcmp.lt.f32.partialorder %v5536_v54, 0.0004427343 }
 0x5f4   : > { %6971 = vst [vmem:[%s11758_s29 + $0x330] sm:$0xff] %v9555_v31  ;;  %8315 = vmatprep.mubr.bf16.mxu0 %v6202_v38  ;;  %20244 = vst [vmem:[#allocation46_spill] sm:$0xff] %v17949_v43  ;;  %v10880_v41 = vpop.eup %10879  ;;  %10889 = vlog2.f32 %v5818_v13  ;;  %v5836_v38 = vadd.f32 1.0, %v17923_v52  ;;  %v5830_v46 = vmul.f32 -0.5, %v17857_v0  ;;  %v20251_v53 = vpack.c.bf16 %v17458_v5, %v16905_v47  ;;  %v20252_v54 = vld [vmem:[#allocation87_spill] sm:$0xff] }
 0x5f5   : > { %v6204_v56 = vpack.c.bf16 %v6052_v24, %v20243_v58  ;;  %v9556_v57 = vpack.c.bf16 %v6052_v24, %v17458_v5  ;;  %20245 = vst [vmem:[#allocation19_spill] sm:$0xff] %v17951_v37  ;;  %8316 = vmatmul.mubr.bf16.gmra.mxu0 %v20248_v27  ;;  %v5695_v24 = vmul.f32 -0.5, %v17846_v36  ;;  %v10882_v31 = vpop.eup %10881  ;;  %v5833_v58 = vand.u32 2147483647, %v17857_v0  ;;  %v20249_v37 = vld [vmem:[#allocation98_spill] sm:$0xff]  ;;  %v17968_v61 = vpop.f32.mrf.mxu0  ;;  %v20257_v5 = vld [vmem:[#allocation32_spill] sm:$0xff] }
 0x5f6   : > { %v17965_v30 = vadd.f32 %v20249_v37, %v7816_v15  ;;  %v5538_v43 = vsel %vm5537_vm9, %v5535_v21, %v5532_v19  ;;  %v17970_v59 = vpop.f32.mrf.mxu1  ;;  %v20253_v13 = vmax.f32 %v20252_v54, 0.0  ;;  %v5550_v42 = vmul.f32 0.6931472, %v10882_v31  ;;  %v20254_v15 = vld [vmem:[#allocation99_spill] sm:$0xff] }
 0x5f7   : > { %6972 = vst [vmem:[%s11758_s29 + $0x338] sm:$0xff] %v9556_v57  ;;  %8508 = vmatprep.mubr.bf16.mxu1 %v6204_v56  ;;  %20250 = vst [vmem:[#allocation54_spill] sm:$0xff] %v17970_v59  ;;  %v5553_v8 = vmul.f32 %v17627_v6, %v5552_v3  ;;  %10891 = vlog2.f32 %v5836_v38  ;;  %v17979_v37 = vadd.f32 %v20254_v15, %v7818_v26  ;;  %vm5555_vm10 = vcmp.lt.f32.partialorder %v5554_v40, 0.0004427343  ;;  %v17982_v57 = vpop.f32.mrf.mxu0  ;;  %v20256_v19 = vld [vmem:[#allocation127_spill] sm:$0xff]  ;;  %v20259_v3 = vld [vmem:[#allocation133_spill] sm:$0xff] }
 0x5f8   : > { %8509 = vmatmul.mubr.bf16.gmra.mxu1 %v20251_v53  ;;  %v6066_v27 = vadd.f32 %v5538_v43, %v20253_v13  ;;  %v5678_v21 = vadd.f32 1.0, %v5677_v50  ;;  %v5680_v56 = vand.u32 2147483647, %v17662_v25  ;;  %20255 = vst [vmem:[#allocation96_spill] sm:$0xff] %v17982_v57  ;;  %v5696_v43 = vadd.f32 1.0, %v5695_v24  ;;  %v20258_v13 = vld [vmem:[#allocation26_spill] sm:$0xff]  ;;  %v17992_v50 = vpop.f32.mrf.mxu1 }
 0x5f9   : > { %v5556_v54 = vsel %vm5555_vm10, %v5553_v8, %v5550_v42  ;;  %v5811_v31 = vmul.f32 0.6931472, %v10880_v41  ;;  %v17987_v6 = vadd.f32 %v20258_v13, %v7822_v32  ;;  %v20260_v26 = vmax.f32 %v20259_v3, 0.0  ;;  %v17994_v15 = vpop.f32.mrf.mxu0  ;;  %v20263_v42 = vld [vmem:[#allocation100_spill] sm:$0xff]  ;;  %v20264_v24 = vld [vmem:[#allocation86_spill] sm:$0xff] }
 0x5fa   : > { %v6210_v47 = vpack.c.bf16 %v6066_v27, %v20256_v19  ;;  %v9563_v53 = vpack.c.bf16 %v6066_v27, %v20257_v5  ;;  %v5698_v40 = vand.u32 2147483647, %v17846_v36  ;;  %v10884_v59 = vpop.eup %10883  ;;  %v5831_v57 = vadd.f32 1.0, %v5830_v46  ;;  %v20265_v3 = vld [vmem:[#allocation126_spill] sm:$0xff] }
 0x5fb   : > { %v6068_v38 = vadd.f32 %v5556_v54, %v20260_v26  ;;  %vm17996_vm11 = vcmp.lt.f32.partialorder %v5833_v58, 0.0004427343  ;;  %v7824_v8 = vadd.f32 %v20263_v42, %v17864_v60  ;;  %v5821_v32 = vmul.f32 -0.5, %v17913_v39  ;;  %v10886_v41 = vpop.eup %10885 }
 0x5fc   : > { %6979 = vst [vmem:[%s11758_s29 + $0x370] sm:$0xff] %v9563_v53  ;;  %8325 = vmatprep.mubr.bf16.mxu0 %v6210_v47  ;;  %v5676_v13 = vmul.f32 0.6931472, %v10884_v59  ;;  %v5679_v46 = vmul.f32 %v17662_v25, %v5678_v21  ;;  %v10888_v58 = vpop.eup %10887  ;;  %v20266_v26 = vpack.c.bf16 %v20257_v5, %v20265_v3  ;;  %vm5681_vm12 = vcmp.lt.f32.partialorder %v5680_v56, 0.0004427343  ;;  %v18018_v21 = vpop.f32.mrf.mxu1  ;;  %v20268_v56 = vld [vmem:[#allocation38_spill] sm:$0xff] }
 0x5fd   : > { %v6212_v27 = vpack.c.bf16 %v6068_v38, %v20264_v24  ;;  %v9564_v54 = vpack.c.bf16 %v6068_v38, %v17558_v7  ;;  %v5694_v42 = vmul.f32 0.6931472, %v10886_v41  ;;  %v5697_v53 = vmul.f32 %v17846_v36, %v5696_v43  ;;  %v20267_v38 = vld [vmem:[#allocation63_spill] sm:$0xff]  ;;  %v18020_v5 = vpop.f32.mrf.mxu0 }
 0x5fe   : > { %8326 = vmatmul.mubr.bf16.gmra.mxu0 %v20266_v26  ;;  %v5839_v47 = vmul.f32 -0.5, %v17923_v52  ;;  %v5817_v24 = vsel %vm17953_vm8, %v17926_v28, %v5811_v31  ;;  %v7826_v59 = vadd.f32 %v20267_v38, %v17794_v11  ;;  %v5682_v25 = vsel %vm5681_vm12, %v5679_v46, %v5676_v13 }
 0x5ff   : > { %6980 = vst [vmem:[%s11758_s29 + $0x378] sm:$0xff] %v9564_v54  ;;  %8518 = vmatprep.mubr.bf16.mxu1 %v6212_v27  ;;  %vm5699_vm13 = vcmp.lt.f32.partialorder %v5698_v40, 0.0004427343  ;;  %v7828_v36 = vadd.f32 %v20268_v56, %v17864_v60  ;;  %v20269_v43 = vpack.c.bf16 %v17558_v7, %v17177_v63  ;;  %v20271_v28 = vmax.f32 %v20270_v51, 0.0  ;;  %v20272_v27 = vld [vmem:[#allocation27_spill] sm:$0xff]  ;;  %v20275_v63 = vld [vmem:[#allocation150_spill] sm:$0xff] }
 0x600   : > { %v5700_v41 = vsel %vm5699_vm13, %v5697_v53, %v5694_v42  ;;  %v5822_v3 = vadd.f32 1.0, %v5821_v32  ;;  %v5829_v54 = vmul.f32 0.6931472, %v10888_v58  ;;  %v7832_v40 = vadd.f32 %v20272_v27, %v17794_v11  ;;  %v20276_v53 = vld [vmem:[#allocation152_spill] sm:$0xff]  ;;  %v20278_v27 = vld [vmem:[#allocation43_spill] sm:$0xff] }
 0x601   : > { %8519 = vmatmul.mubr.bf16.gmra.mxu1 %v20269_v43  ;;  %v6082_v31 = vadd.f32 %v5682_v25, %v20271_v28  ;;  %v20273_v13 = vmax.f32 %v17478_v55, 0.0  ;;  %v5824_v26 = vand.u32 2147483647, %v17913_v39  ;;  %v20274_v38 = vmax.f32 %v17528_v16, 0.0  ;;  %v10890_v32 = vpop.eup %10889  ;;  %v18044_v28 = vpop.f32.mrf.mxu1 }
 0x602   : > { %v5840_v42 = vadd.f32 1.0, %v5839_v47  ;;  %v5832_v58 = vmul.f32 %v17857_v0, %v5831_v57  ;;  %v5842_v51 = vand.u32 2147483647, %v17923_v52  ;;  %v18046_v16 = vpop.f32.mrf.mxu0  ;;  %v5820_v0 = vmul.f32 0.6931472, %v10890_v32 }
 0x603   : > { %v6084_v46 = vadd.f32 %v5700_v41, %v20273_v13  ;;  %v18036_v56 = vadd.f32 %v5817_v24, %v20274_v38  ;;  %v6218_v7 = vpack.c.bf16 %v6082_v31, %v20275_v63  ;;  %v9571_v25 = vpack.c.bf16 %v6082_v31, %v17767_v22  ;;  %v20277_v24 = vld [vmem:[#allocation101_spill] sm:$0xff]  ;;  %v20280_v63 = vld [vmem:[#allocation60_spill] sm:$0xff]  ;;  %v18077_v32 = vpop.f32.mrf.mxu1 }
 0x604   : > { %v18049_v41 = vadd.f32 %v20277_v24, %v7824_v8  ;;  %v18052_v31 = vadd.f32 %v20278_v27, %v7826_v59  ;;  %v5823_v57 = vmul.f32 %v17913_v39, %v5822_v3  ;;  %v10892_v47 = vpop.eup %10891  ;;  %v5835_v13 = vsel %vm17996_vm11, %v5832_v58, %v5829_v54  ;;  %v20287_v58 = vld [vmem:[#allocation111_spill] sm:$0xff] }
 0x605   : > { %v6220_v43 = vpack.c.bf16 %v6084_v46, %v20276_v53  ;;  %v9572_v55 = vpack.c.bf16 %v6084_v46, %v17820_v23  ;;  %6987 = vst [vmem:[%s11758_s29 + $0x3b0] sm:$0xff] %v9571_v25  ;;  %8335 = vmatprep.mubr.bf16.mxu0 %v6218_v7  ;;  %v20279_v46 = vld [vmem:[#allocation103_spill] sm:$0xff]  ;;  %v18062_v53 = vadd.f32 %v20280_v63, %v7832_v40  ;;  %vm5825_vm14 = vcmp.lt.f32.partialorder %v5824_v26, 0.0004427343  ;;  %v20283_v40 = vld [vmem:[#allocation106_spill] sm:$0xff] }
 0x606   : > { %v18059_v38 = vadd.f32 %v20279_v46, %v7828_v36  ;;  %v6225_v8 = vpack.c.bf16 %v18036_v56, %v17676_v29  ;;  %v20281_v59 = vpack.c.bf16 %v17767_v22, %v17383_v44  ;;  %v5826_v39 = vsel %vm5825_vm14, %v5823_v57, %v5820_v0  ;;  %v20282_v36 = vld [vmem:[#allocation24_spill] sm:$0xff]  ;;  %v18079_v29 = vpop.f32.mrf.mxu0 }
 0x607   : > { %6988 = vst [vmem:[%s11758_s29 + $0x3b8] sm:$0xff] %v9572_v55  ;;  %8528 = vmatprep.mubr.bf16.mxu1 %v6220_v43  ;;  %v5838_v3 = vmul.f32 0.6931472, %v10892_v47  ;;  %v5841_v19 = vmul.f32 %v17923_v52, %v5840_v42  ;;  %v7834_v54 = vadd.f32 %v20282_v36, %v17864_v60  ;;  %v7836_v7 = vadd.f32 %v20283_v40, %v17794_v11  ;;  %v20286_v52 = vld [vmem:[#allocation22_spill] sm:$0xff]  ;;  %v20292_v46 = vld [vmem:[#allocation116_spill] sm:$0xff]  ;;  %v18110_v40 = vpop.f32.mrf.mxu1 }
 0x608   : > { %8336 = vmatmul.mubr.bf16.gmra.mxu0 %v20281_v59  ;;  %v20284_v25 = vmax.f32 %v17683_v10, 0.0  ;;  %vm5843_vm15 = vcmp.lt.f32.partialorder %v5842_v51, 0.0004427343  ;;  %v20285_v44 = vmax.f32 %v17580_v20, 0.0  ;;  %v7838_v42 = vadd.f32 %v20286_v52, %v17864_v60  ;;  %v20289_v51 = vld [vmem:[#allocation33_spill] sm:$0xff]  ;;  %v20291_v47 = vld [vmem:[#allocation114_spill] sm:$0xff] }
 0x609   : > { %v7842_v43 = vadd.f32 %v20287_v58, %v17794_v11  ;;  %v20288_v55 = vpack.c.bf16 %v17820_v23, %v17419_v18  ;;  %v5844_v10 = vsel %vm5843_vm15, %v5841_v19, %v5838_v3  ;;  %v7844_v24 = vadd.f32 %v20289_v51, %v17864_v60  ;;  %v20293_v18 = vld [vmem:[#allocation61_spill] sm:$0xff]  ;;  %v20294_v59 = vld [vmem:[#allocation119_spill] sm:$0xff]  ;;  %v20300_v51 = vld [vmem:[#allocation64_spill] sm:$0xff] }
 0x60a   : > { %v6098_v26 = vadd.f32 %v5826_v39, %v20284_v25  ;;  %v6099_v22 = vadd.f32 %v5835_v13, %v20285_v44  ;;  %v20290_v0 = vmax.f32 %v17694_v17, 0.0  ;;  %v7846_v13 = vadd.f32 %v20291_v47, %v17794_v11  ;;  %v20295_v3 = vld [vmem:[#allocation81_spill] sm:$0xff]  ;;  %v18112_v25 = vpop.f32.mrf.mxu0  ;;  %v20298_v52 = vld [vmem:[#allocation107_spill] sm:$0xff] }
 0x60b   : > { %8529 = vmatmul.mubr.bf16.gmra.mxu1 %v20288_v55  ;;  %v7848_v63 = vadd.f32 %v20292_v46, %v17864_v60  ;;  %v7852_v23 = vadd.f32 %v20293_v18, %v17794_v11  ;;  %v7854_v39 = vadd.f32 %v20294_v59, %v17864_v60  ;;  %v18118_v58 = vadd.f32 %v20298_v52, %v7836_v7  ;;  %v20299_v55 = vld [vmem:[#allocation123_spill] sm:$0xff]  ;;  %v20303_v46 = vld [vmem:[#allocation49_spill] sm:$0xff]  ;;  %v20307_v52 = vld [vmem:[#allocation128_spill] sm:$0xff] }
 0x60c   : > { %v6226_v27 = vpack.c.bf16 %v6098_v26, %v17680_v12  ;;  %v9579_v20 = vpack.c.bf16 %v6098_v26, %v18036_v56  ;;  %v6100_v57 = vadd.f32 %v5844_v10, %v20290_v0  ;;  %v7856_v12 = vadd.f32 %v20295_v3, %v17794_v11  ;;  %v20296_v56 = vld [vmem:[#allocation82_spill] sm:$0xff]  ;;  %v20297_v26 = vld [vmem:[#allocation104_spill] sm:$0xff]  ;;  %v20304_v7 = vld [vmem:[#allocation113_spill] sm:$0xff] }
 0x60d   : > { %v7858_v17 = vadd.f32 %v20296_v56, %v17864_v60  ;;  %v18115_v44 = vadd.f32 %v20297_v26, %v7834_v54  ;;  %v7862_v10 = vadd.f32 %v20299_v55, %v17794_v11  ;;  %v7866_v54 = vadd.f32 %v20303_v46, %v17794_v11  ;;  %v20305_v59 = vld [vmem:[#allocation115_spill] sm:$0xff]  ;;  %v20306_v56 = vld [vmem:[#allocation117_spill] sm:$0xff] }
 0x60e   : > { %6995 = vst [vmem:[%s11758_s29 + $0x3f0] sm:$0xff] %v9579_v20  ;;  %8345 = vmatprep.mubr.bf16.mxu0 %v6226_v27  ;;  %v6228_v19 = vpack.c.bf16 %v6100_v57, %v17716_v45  ;;  %v9580_v36 = vpack.c.bf16 %v6100_v57, %v6099_v22  ;;  %v7864_v20 = vadd.f32 %v20300_v51, %v17864_v60  ;;  %v20301_v45 = vld [vmem:[#allocation109_spill] sm:$0xff]  ;;  %v20302_v57 = vld [vmem:[#allocation112_spill] sm:$0xff] }
 0x60f   : > { %v6227_v27 = vpack.c.bf16 %v6099_v22, %v17711_v34  ;;  %v8031_v0 = vadd.f32 %v20301_v45, %v7838_v42  ;;  %v18127_v47 = vadd.f32 %v20302_v57, %v7842_v43  ;;  %v8037_v18 = vadd.f32 %v20304_v7, %v7844_v24  ;;  %v20308_v22 = vld [vmem:[#allocation118_spill] sm:$0xff]  ;;  %v20309_v43 = vld [vmem:[#allocation120_spill] sm:$0xff]  ;;  %v20310_v51 = vld [vmem:[#allocation121_spill] sm:$0xff] }
 0x610   : > { %6996 = vst [vmem:[%s11758_s29 + $0x3f8] sm:$0xff] %v9580_v36  ;;  %8538 = vmatprep.mubr.bf16.mxu1 %v6228_v19  ;;  %v8039_v3 = vadd.f32 %v20305_v59, %v7846_v13  ;;  %v18135_v26 = vadd.f32 %v20306_v56, %v7848_v63  ;;  %v7868_v34 = vadd.f32 %v20307_v52, %v17864_v60  ;;  %v20311_v19 = vld [vmem:[#allocation122_spill] sm:$0xff]  ;;  %v18151_v13 = vpop.f32.mrf.mxu1  ;;  %v18153_v63 = vpop.f32.mrf.mxu0  ;;  %v20312_v45 = vld [vmem:[#allocation124_spill] sm:$0xff]  ;;  %v20315_v59 = vld [vmem:[#allocation129_spill] sm:$0xff] }
 0x611   : > { %8346 = vmatmul.mubr.bf16.gmra.mxu0 %v6225_v8  ;;  %v18140_v42 = vadd.f32 %v20308_v22, %v7852_v23  ;;  %v18143_v55 = vadd.f32 %v20309_v43, %v7854_v39  ;;  %v18146_v36 = vadd.f32 %v20310_v51, %v7856_v12  ;;  %v18149_v24 = vadd.f32 %v20311_v19, %v7858_v17  ;;  %v20313_v8 = vld [vmem:[#allocation125_spill] sm:$0xff]  ;;  %v20314_v12 = vld [vmem:[#allocation42_spill] sm:$0xff]  ;;  %v20317_v52 = vld [vmem:[#allocation84_spill] sm:$0xff] }
 0x612   : > { %v18156_v57 = vadd.f32 %v20312_v45, %v7862_v10  ;;  %v18159_v46 = vadd.f32 %v20313_v8, %v7864_v20  ;;  %v7956_v23 = vadd.f32 %v17686_v4, %v17794_v11  ;;  %v7958_v39 = vadd.f32 %v17704_v48, %v17864_v60  ;;  %v20316_v56 = vld [vmem:[#allocation37_spill] sm:$0xff]  ;;  %v18196_v22 = vpop.f32.mrf.mxu1  ;;  %v20319_v43 = vld [vmem:[#allocation76_spill] sm:$0xff]  ;;  %v20321_v19 = vld [vmem:[#allocation75_spill] sm:$0xff] }
 0x613   : > { %8539 = vmatmul.mubr.bf16.gmra.mxu1 %v6227_v27  ;;  %v18166_v17 = vadd.f32 %v20314_v12, %v7866_v54  ;;  %v7962_v7 = vadd.f32 %v17718_v14, %v17794_v11  ;;  %v7964_v10 = vadd.f32 %v17733_v33, %v17864_v60  ;;  %v7966_v20 = vadd.f32 %v17745_v35, %v17794_v11  ;;  %v20322_v45 = vld [vmem:[#allocation36_spill] sm:$0xff]  ;;  %v20323_v8 = vld [vmem:[#allocation50_spill] sm:$0xff] }
 0x614   : > { %v18175_v27 = vadd.f32 %v20315_v59, %v7868_v34  ;;  %v18178_v4 = vadd.f32 %v17688_v9, %v7956_v23  ;;  %v18181_v48 = vadd.f32 %v17706_v62, %v7958_v39  ;;  %v7968_v54 = vadd.f32 %v17761_v2, %v17864_v60  ;;  %v20318_v34 = vld [vmem:[#allocation23_spill] sm:$0xff]  ;;  %v8249_v62 = vpop.f32.mrf.mxu0 }
 0x615   : > { %v18186_v14 = vadd.f32 %v17720_v49, %v7962_v7  ;;  %v18189_v33 = vadd.f32 %v17735_v1, %v7964_v10  ;;  %v18192_v35 = vadd.f32 %v20316_v56, %v7966_v20  ;;  %v8198_v9 = vadd.f32 %v20318_v34, %v20317_v52  ;;  %v20320_v2 = vld [vmem:[#allocation95_spill] sm:$0xff]  ;;  %v20325_v7 = vld [vmem:[#allocation18_spill] sm:$0xff]  ;;  %v20326_v20 = vld [vmem:[#allocation48_spill] sm:$0xff] }
 0x616   : > { %v18199_v51 = vadd.f32 %v20319_v43, %v7968_v54  ;;  %v8200_v49 = vadd.f32 %v20321_v19, %v20320_v2  ;;  %v8202_v1 = vadd.f32 %v20322_v45, %v17965_v30  ;;  %v8204_v23 = vadd.f32 %v20323_v8, %v17979_v37  ;;  %v20324_v39 = vld [vmem:[#allocation35_spill] sm:$0xff]  ;;  %v20327_v54 = vld [vmem:[#allocation66_spill] sm:$0xff]  ;;  %v20328_v52 = vld [vmem:[#allocation72_spill] sm:$0xff] }
 0x617   : > { %v8391_v12 = vadd.f32 %v20324_v39, %v8198_v9  ;;  %v8208_v10 = vadd.f32 %v20325_v7, %v17987_v6  ;;  %v8210_v59 = vadd.f32 %v20326_v20, %v18049_v41  ;;  %v8212_v56 = vadd.f32 %v20327_v54, %v18052_v31  ;;  %v20329_v43 = vld [vmem:[#allocation77_spill] sm:$0xff]  ;;  %v20330_v19 = vld [vmem:[#allocation47_spill] sm:$0xff]  ;;  %v20331_v45 = vld [vmem:[#allocation30_spill] sm:$0xff]  ;;  %v8251_v39 = vpop.f32.mrf.mxu0 }
 0x618   : > { %v8393_v34 = vadd.f32 %v20328_v52, %v8200_v49  ;;  %v8395_v2 = vadd.f32 %v20329_v43, %v8202_v1  ;;  %v8397_v30 = vadd.f32 %v20330_v19, %v8204_v23  ;;  %v8214_v37 = vadd.f32 %v20331_v45, %v18059_v38  ;;  %v20332_v6 = vld [vmem:[#allocation78_spill] sm:$0xff]  ;;  %v20334_v49 = vld [vmem:[#allocation93_spill] sm:$0xff]  ;;  %v20335_v8 = vld [vmem:[#allocation108_spill] sm:$0xff]  ;;  %v8442_v23 = vpop.f32.mrf.mxu1 }
 0x619   : > { %8549 = vst [vmem:[%s18221_s7] sm:$0xff] %v8391_v12  ;;  %v8401_v41 = vadd.f32 %v20332_v6, %v8208_v10  ;;  %v20333_v31 = vld [vmem:[#allocation70_spill] sm:$0xff]  ;;  %v8405_v1 = vadd.f32 %v20334_v49, %v8212_v56  ;;  %v8218_v38 = vadd.f32 %v20335_v8, %v18062_v53  ;;  %v20336_v7 = vld [vmem:[#allocation65_spill] sm:$0xff]  ;;  %v20338_v10 = vld [vmem:[#allocation51_spill] sm:$0xff]  ;;  %v8230_v19 = vadd.f32 %v17968_v61, %v8037_v18  ;;  %v8253_v8 = vpop.f32.mrf.mxu0 }
 0x61a   : > { %v8403_v9 = vadd.f32 %v20333_v31, %v8210_v59  ;;  %8550 = vst [vmem:[%s18221_s7 + $0x8] sm:$0xff] %v8393_v34  ;;  %8551 = vst [vmem:[%s18221_s7 + $0x10] sm:$0xff] %v8395_v2  ;;  %v8407_v20 = vadd.f32 %v20336_v7, %v8214_v37  ;;  %v20337_v12 = vld [vmem:[#allocation85_spill] sm:$0xff]  ;;  %v8222_v59 = vadd.f32 %v20338_v10, %v18118_v58  ;;  %v20340_v53 = vld [vmem:[#allocation67_spill] sm:$0xff] }
 0x61b   : > { %8552 = vst [vmem:[%s18221_s7 + $0x18] sm:$0xff] %v8397_v30  ;;  %v8220_v54 = vadd.f32 %v20337_v12, %v18115_v44  ;;  %v20339_v52 = vld [vmem:[#allocation97_spill] sm:$0xff]  ;;  %8553 = vst [vmem:[%s18221_s7 + $0x20] sm:$0xff] %v8401_v41  ;;  %v8411_v43 = vadd.f32 %v20340_v53, %v8218_v38  ;;  %v20341_v34 = vld [vmem:[#allocation46_spill] sm:$0xff]  ;;  %v8234_v31 = vadd.f32 %v17994_v15, %v18135_v26 }
 0x61c   : > { %v8224_v56 = vadd.f32 %v20339_v52, %v8031_v0  ;;  %8554 = vst [vmem:[%s18221_s7 + $0x28] sm:$0xff] %v8403_v9  ;;  %8555 = vst [vmem:[%s18221_s7 + $0x30] sm:$0xff] %v8405_v1  ;;  %v8228_v2 = vadd.f32 %v20341_v34, %v18127_v47  ;;  %v20342_v30 = vld [vmem:[#allocation96_spill] sm:$0xff]  ;;  %v20343_v45 = vld [vmem:[#allocation110_spill] sm:$0xff]  ;;  %v8238_v49 = vadd.f32 %v18020_v5, %v18140_v42  ;;  %v8444_v1 = vpop.f32.mrf.mxu1 }
 0x61d   : > { %v8232_v44 = vadd.f32 %v20342_v30, %v8039_v3  ;;  %8556 = vst [vmem:[%s18221_s7 + $0x38] sm:$0xff] %v8407_v20  ;;  %v8413_v58 = vadd.f32 %v20343_v45, %v8220_v54  ;;  %v20344_v37 = vld [vmem:[#allocation94_spill] sm:$0xff]  ;;  %v20345_v6 = vld [vmem:[#allocation83_spill] sm:$0xff]  ;;  %8557 = vst [vmem:[%s18221_s7 + $0x40] sm:$0xff] %v8411_v43  ;;  %v8427_v15 = vadd.f32 %v18018_v21, %v8234_v31 }
 0x61e   : > { %v8415_v0 = vadd.f32 %v20344_v37, %v8222_v59  ;;  %v8417_v41 = vadd.f32 %v20345_v6, %v8224_v56  ;;  %v20346_v47 = vld [vmem:[#allocation19_spill] sm:$0xff]  ;;  %v20347_v61 = vld [vmem:[#allocation54_spill] sm:$0xff]  ;;  %v8240_v26 = vadd.f32 %v18046_v16, %v18143_v55  ;;  %v8242_v38 = vadd.f32 %v18079_v29, %v18146_v36  ;;  %v20353_v12 = vld [vmem:[#allocation20_spill] sm:$0xff] }
 0x61f   : > { %v8421_v9 = vadd.f32 %v20346_v47, %v8228_v2  ;;  %v8423_v18 = vadd.f32 %v20347_v61, %v8230_v19  ;;  %v8425_v3 = vadd.f32 %v17992_v50, %v8232_v44  ;;  %8558 = vst [vmem:[%s18221_s7 + $0x48] sm:$0xff] %v8413_v58  ;;  %v8244_v50 = vadd.f32 %v18112_v25, %v18149_v24  ;;  %v20352_v7 = vld [vmem:[#allocation130_spill] sm:$0xff]  ;;  %v20354_v52 = vld [vmem:[#allocation132_spill] sm:$0xff] }
 0x620   : > { %8559 = vst [vmem:[%s18221_s7 + $0x50] sm:$0xff] %v8415_v0  ;;  %8560 = vst [vmem:[%s18221_s7 + $0x58] sm:$0xff] %v8417_v41  ;;  %v8431_v5 = vadd.f32 %v18044_v28, %v8238_v49  ;;  %v8248_v21 = vadd.f32 %v18153_v63, %v18156_v57  ;;  %v8250_v42 = vadd.f32 %v8249_v62, %v18159_v46  ;;  %v8446_v57 = vpop.f32.mrf.mxu1  ;;  %v20355_v2 = vld [vmem:[#allocation88_spill] sm:$0xff]  ;;  %v20356_v61 = vld [vmem:[#allocation74_spill] sm:$0xff] }
 0x621   : > { %8561 = vst [vmem:[%s18221_s7 + $0x60] sm:$0xff] %v8421_v9  ;;  %8562 = vst [vmem:[%s18221_s7 + $0x68] sm:$0xff] %v8423_v18  ;;  %v8252_v16 = vadd.f32 %v8251_v39, %v18166_v17  ;;  %v8433_v29 = vadd.f32 %v18077_v32, %v8240_v26  ;;  %v8435_v25 = vadd.f32 %v18110_v40, %v8242_v38  ;;  %v20348_v32 = vld [vmem:[#allocation58_spill] sm:$0xff]  ;;  %v20357_v49 = vld [vmem:[#allocation89_spill] sm:$0xff] }
 0x622   : > { %8563 = vst [vmem:[%s18221_s7 + $0x70] sm:$0xff] %v8425_v3  ;;  %8564 = vst [vmem:[%s18221_s7 + $0x78] sm:$0xff] %v8427_v15  ;;  %v8437_v55 = vadd.f32 %v18151_v13, %v8244_v50  ;;  %v8254_v28 = vadd.f32 %v8253_v8, %v18175_v27  ;;  %v8441_v36 = vadd.f32 %v18196_v22, %v8248_v21  ;;  %v20349_v13 = vld [vmem:[#allocation80_spill] sm:$0xff]  ;;  %v20350_v27 = vld [vmem:[#allocation79_spill] sm:$0xff]  ;;  %v8257_v39 = vpop.f32.mrf.mxu0 }
 0x623   : > { %8565 = vst [vmem:[%s18221_s7 + $0x80] sm:$0xff] %v8431_v5  ;;  %v8443_v24 = vadd.f32 %v8442_v23, %v8250_v42  ;;  %v8445_v63 = vadd.f32 %v8444_v1, %v8252_v16  ;;  %8566 = vst [vmem:[%s18221_s7 + $0x88] sm:$0xff] %v8433_v29  ;;  %v7872_v40 = vadd.f32 %v20348_v32, %v17794_v11  ;;  %v20351_v22 = vld [vmem:[#allocation131_spill] sm:$0xff]  ;;  %v20358_v8 = vld [vmem:[#allocation34_spill] sm:$0xff] }
 0x624   : > { %8567 = vst [vmem:[%s18221_s7 + $0x90] sm:$0xff] %v8435_v25  ;;  %8568 = vst [vmem:[%s18221_s7 + $0x98] sm:$0xff] %v8437_v55  ;;  %v8447_v46 = vadd.f32 %v8446_v57, %v8254_v28  ;;  %v7874_v17 = vadd.f32 %v20349_v13, %v17864_v60  ;;  %v7876_v23 = vadd.f32 %v20351_v22, %v17794_v11  ;;  %v8259_v59 = vpop.f32.mrf.mxu0  ;;  %v20359_v26 = vld [vmem:[#allocation134_spill] sm:$0xff]  ;;  %v20360_v5 = vld [vmem:[#allocation21_spill] sm:$0xff] }
 0x625   : > { %8569 = vst [vmem:[%s18221_s7 + $0xa0] sm:$0xff] %v8441_v36  ;;  %8570 = vst [vmem:[%s18221_s7 + $0xa8] sm:$0xff] %v8443_v24  ;;  %v8065_v62 = vadd.f32 %v20350_v27, %v7872_v40  ;;  %v7878_v54 = vadd.f32 %v20353_v12, %v17864_v60  ;;  %v7882_v18 = vadd.f32 %v20356_v61, %v17794_v11  ;;  %v20361_v42 = vld [vmem:[#allocation136_spill] sm:$0xff]  ;;  %v20362_v25 = vld [vmem:[#allocation135_spill] sm:$0xff] }
 0x626   : > { %8571 = vst [vmem:[%s18221_s7 + $0xb0] sm:$0xff] %v8445_v63  ;;  %8572 = vst [vmem:[%s18221_s7 + $0xb8] sm:$0xff] %v8447_v46  ;;  %v8067_v20 = vadd.f32 %v20352_v7, %v7874_v17  ;;  %v8069_v56 = vadd.f32 %v20354_v52, %v7876_v23  ;;  %v8261_v43 = vpop.f32.mrf.mxu0  ;;  %v7884_v1 = vadd.f32 %v20357_v49, %v17864_v60  ;;  %v20363_v63 = vld [vmem:[#allocation137_spill] sm:$0xff] }
 0x627   : > { %v8258_v10 = vadd.f32 %v8257_v39, %v8065_v62  ;;  %v8071_v19 = vadd.f32 %v20355_v2, %v7878_v54  ;;  %v8075_v15 = vadd.f32 %v20358_v8, %v7882_v18  ;;  %v7886_v38 = vadd.f32 %v20359_v26, %v17794_v11 }
 0x628   : > { %v8260_v53 = vadd.f32 %v8259_v59, %v8067_v20  ;;  %v8450_v34 = vpop.f32.mrf.mxu1  ;;  %v8262_v44 = vadd.f32 %v8261_v43, %v8069_v56  ;;  %v8263_v45 = vpop.f32.mrf.mxu0  ;;  %v8077_v21 = vadd.f32 %v20360_v5, %v7884_v1  ;;  %v7888_v16 = vadd.f32 %v20361_v42, %v17864_v60 }
 0x629   : > { %v8451_v30 = vadd.f32 %v8450_v34, %v8258_v10  ;;  %v8264_v0 = vadd.f32 %v8263_v45, %v8071_v19  ;;  %v8079_v55 = vadd.f32 %v20362_v25, %v7886_v38 }
 0x62a   : > { %v8452_v58 = vpop.f32.mrf.mxu1  ;;  %v8081_v57 = vadd.f32 %v20363_v63, %v7888_v16 }
 0x62b   : > { %8573 = vst [vmem:[%s18221_s7 + $0xc0] sm:$0xff] %v8451_v30  ;;  %v8453_v37 = vadd.f32 %v8452_v58, %v8260_v53 }
 0x62c   : > { %v8454_v6 = vpop.f32.mrf.mxu1 }
 0x62d   : > { %8574 = vst [vmem:[%s18221_s7 + $0xc8] sm:$0xff] %v8453_v37  ;;  %v8455_v41 = vadd.f32 %v8454_v6, %v8262_v44 }
 0x62e   : > { %v8456_v31 = vpop.f32.mrf.mxu1 }
 0x62f   : > { %8575 = vst [vmem:[%s18221_s7 + $0xd0] sm:$0xff] %v8455_v41  ;;  %v8457_v47 = vadd.f32 %v8456_v31, %v8264_v0 }
 0x631   : > { %8576 = vst [vmem:[%s18221_s7 + $0xd8] sm:$0xff] %v8457_v47 }
 0x646   : > { %v8267_v9 = vpop.f32.mrf.mxu0 }
 0x647   : > { %v8268_v29 = vadd.f32 %v8267_v9, %v8075_v15 }
 0x648   : > { %v8269_v3 = vpop.f32.mrf.mxu0 }
 0x649   : > { %v8270_v28 = vadd.f32 %v8269_v3, %v8077_v21 }
 0x64a   : > { %v8271_v50 = vpop.f32.mrf.mxu0 }
 0x64b   : > { %v8272_v32 = vadd.f32 %v8271_v50, %v8079_v55 }
 0x64c   : > { %v8273_v24 = vpop.f32.mrf.mxu0 }
 0x64d   : > { %v8274_v17 = vadd.f32 %v8273_v24, %v8081_v57 }
 0x653   : > { %v8460_v36 = vpop.f32.mrf.mxu1 }
 0x654   : > { %v8461_v46 = vadd.f32 %v8460_v36, %v8268_v29 }
 0x655   : > { %v8462_v40 = vpop.f32.mrf.mxu1 }
 0x656   : > { %8577 = vst [vmem:[%s18221_s7 + $0xe0] sm:$0xff] %v8461_v46  ;;  %v8463_v13 = vadd.f32 %v8462_v40, %v8270_v28 }
 0x657   : > { %v8464_v27 = vpop.f32.mrf.mxu1 }
 0x658   : > { %8578 = vst [vmem:[%s18221_s7 + $0xe8] sm:$0xff] %v8463_v13  ;;  %v8465_v62 = vadd.f32 %v8464_v27, %v8272_v32 }
 0x659   : > { %v8466_v22 = vpop.f32.mrf.mxu1 }
 0x65a   : > { %8579 = vst [vmem:[%s18221_s7 + $0xf0] sm:$0xff] %v8465_v62  ;;  %v8467_v23 = vadd.f32 %v8466_v22, %v8274_v17 }
 0x65c   : > { %8580 = vst [vmem:[%s18221_s7 + $0xf8] sm:$0xff] %v8467_v23 }
 0x65d   : > { %11013 = shalt.err (!%p11010_p9)
}
 0x65e   : > { %s11014_s29 = scalar_lea.hbm %s18326_s10, 16384  ;;  %s11018_s9 = scalar_lea.hbm %s18526_s6, 32768 }
 0x65f   : > { %p11015_p1 = scmp.ne.s32.totalorder %s18326_s10, %s11014_s29  ;;  %p11019_p11 = scmp.lt.s32.totalorder %s18326_s10, %s18526_s6 }
 0x660   : > { %p11020_p13 = scmp.lt.s32.totalorder %s11018_s9, %s11014_s29 }
 0x661   : > { %p11016_p8 = pnand %p11015_p1, %p20364_p6 }
 0x662   : > { %p11021_p2 = por %p11020_p13, %p11019_p11 }
 0x663   : > { %p11017_p10 = pneg %p11016_p8 }
 0x665   : > { %p11022_p4 = pnand %p11021_p2, %p11017_p10 }
 0x667   : > { %11025 = shalt.err (!%p11022_p4)
}
 0x668   : > { %s11115_s12 = smov 512   ;;  %s11116_s18 = smov 32   ;;  %v20365_v39 = vld [vmem:[#allocation138_spill] sm:$0xff]  ;;  %v20366_v20 = vld [vmem:[#allocation69_spill] sm:$0xff]  ;;  %v20367_v54 = vld [vmem:[#allocation139_spill] sm:$0xff] }
 0x669   : > { %9600 = dma.vmem_to_hbm [thread:$0]  (%p20364_p6), %s18328_s19, 16384, %s18326_s10, %s8619_s14, %s11115_s12, %s11115_s12, %s11116_s18   ;;  %v7892_v7 = vadd.f32 %v20365_v39, %v17794_v11  ;;  %v7894_v12 = vadd.f32 %v20366_v20, %v17864_v60  ;;  %v20368_v59 = vld [vmem:[#allocation44_spill] sm:$0xff]  ;;  %v20370_v34 = vld [vmem:[#allocation142_spill] sm:$0xff]  ;;  %v20371_v45 = vld [vmem:[#allocation141_spill] sm:$0xff] }
 0x66a   : > { %v7896_v52 = vadd.f32 %v20368_v59, %v17794_v11  ;;  %v20369_v53 = vld [vmem:[#allocation140_spill] sm:$0xff]  ;;  %v7898_v2 = vadd.f32 %v20370_v34, %v17864_v60  ;;  %v20372_v31 = vld [vmem:[#allocation143_spill] sm:$0xff]  ;;  %v20373_v26 = vld [vmem:[#allocation41_spill] sm:$0xff]  ;;  %s9582_s19 = sshll.u32 %s11176_s25, 13  ;;  %s8633_s10 = sshll.u32 %s18221_s7, 4  ;;  %s18475_s10 = int_to_ptr.vmem [resolvable:$true] %s8633_s10 }
 0x66b   : > { %v8085_v10 = vadd.f32 %v20367_v54, %v7892_v7  ;;  %v8087_v43 = vadd.f32 %v20369_v53, %v7894_v12  ;;  %v7902_v38 = vadd.f32 %v20373_v26, %v17794_v11  ;;  %v20374_v5 = vld [vmem:[#allocation145_spill] sm:$0xff]  ;;  %v20375_v16 = vld [vmem:[#allocation144_spill] sm:$0xff]  ;;  %v20377_v36 = vld [vmem:[#allocation146_spill] sm:$0xff]  ;;  %s18473_s27 = scalar_lea.hbm %s18525_s5, %s9582_s19  ;;  %s8614_s25 = scalar_lea.sflag [#allocation4], %s11290_s17 }
 0x66c   : > { %v8089_v58 = vadd.f32 %v20371_v45, %v7896_v52  ;;  %v8091_v47 = vadd.f32 %v20372_v31, %v7898_v2  ;;  %v7904_v21 = vadd.f32 %v20374_v5, %v17864_v60  ;;  %v20376_v25 = vld [vmem:[#allocation45_spill] sm:$0xff]  ;;  %v20378_v63 = vld [vmem:[#allocation148_spill] sm:$0xff]  ;;  %v20379_v32 = vld [vmem:[#allocation147_spill] sm:$0xff]  ;;  %s11026_s29 = scalar_lea.vmem %s18475_s10, 8192  ;;  %s11117_s20 = smov [#allocation10]  }
 0x66d   : > { %v8095_v29 = vadd.f32 %v20375_v16, %v7902_v38  ;;  %v7906_v55 = vadd.f32 %v20376_v25, %v17794_v11  ;;  %v7908_v57 = vadd.f32 %v20378_v63, %v17864_v60  ;;  %v20380_v17 = vld [vmem:[#allocation52_spill] sm:$0xff]  ;;  %v20381_v23 = vld [vmem:[#allocation149_spill] sm:$0xff]  ;;  %p11027_p12 = scmp.ne.s32.totalorder %s18475_s10, %s11026_s29  ;;  %s11030_s30 = sshll.u32 %s11117_s20, 4  ;;  %s11031_s30 = int_to_ptr.vmem [resolvable:$false] %s11030_s30 }
 0x66e   : > { %v8097_v24 = vadd.f32 %v20377_v36, %v7904_v21  ;;  %v7912_v27 = vadd.f32 %v20380_v17, %v17794_v11  ;;  %v20382_v12 = vld [vmem:[#allocation153_spill] sm:$0xff]  ;;  %v20392_v36 = vld [vmem:[#allocation71_spill] sm:$0xff]  ;;  %s11032_s9 = scalar_lea.vmem %s11031_s30, 16384  ;;  %p11033_p3 = scmp.lt.s32.totalorder %s18475_s10, %s11031_s30 }
 0x66f   : > { %v8099_v40 = vadd.f32 %v20379_v32, %v7906_v55  ;;  %v8101_v39 = vadd.f32 %v20381_v23, %v7908_v57  ;;  %v7914_v54 = vadd.f32 %v20382_v12, %v17864_v60  ;;  %v20390_v21 = vld [vmem:[#allocation73_spill] sm:$0xff]  ;;  %v20391_v55 = vld [vmem:[#allocation159_spill] sm:$0xff]  ;;  %v20395_v23 = vld [vmem:[#allocation62_spill] sm:$0xff]  ;;  %p11028_p0 = pnand %p11027_p12, %p20364_p6  ;;  %p11034_p7 = scmp.lt.s32.totalorder %s11032_s9, %s11026_s29 }
 0x670   : > { %v20393_v32 = vld [vmem:[#allocation25_spill] sm:$0xff] }
 0x671   : > { %p11029_p5 = pneg %p11028_p0  ;;  %p11035_p9 = por %p11034_p7, %p11033_p3 }
 0x673   : > { %p11036_p1 = pnand %p11035_p9, %p11029_p5 }
 0x675   : > { %v8277_v56 = vpop.f32.mrf.mxu0 }
 0x676   : > { %v8278_v19 = vadd.f32 %v8277_v56, %v8085_v10  ;;  %v20383_v56 = vld [vmem:[#allocation151_spill] sm:$0xff] }
 0x677   : > { %v8279_v44 = vpop.f32.mrf.mxu0  ;;  %v8105_v53 = vadd.f32 %v20383_v56, %v7912_v27 }
 0x678   : > { %v8470_v30 = vpop.f32.mrf.mxu1  ;;  %v8280_v0 = vadd.f32 %v8279_v44, %v8087_v43  ;;  %v20384_v43 = vld [vmem:[#allocation40_spill] sm:$0xff]  ;;  %v20385_v44 = vld [vmem:[#allocation154_spill] sm:$0xff] }
 0x679   : > { %v8471_v37 = vadd.f32 %v8470_v30, %v8278_v19  ;;  %v8281_v41 = vpop.f32.mrf.mxu0  ;;  %v7916_v34 = vadd.f32 %v20384_v43, %v17794_v11  ;;  %v8107_v45 = vadd.f32 %v20385_v44, %v7914_v54  ;;  %v20398_v44 = vld [vmem:[#allocation55_spill] sm:$0xff] }
 0x67a   : > { %v8472_v6 = vpop.f32.mrf.mxu1  ;;  %v8282_v61 = vadd.f32 %v8281_v41, %v8089_v58  ;;  %v20386_v58 = vld [vmem:[#allocation157_spill] sm:$0xff] }
 0x67b   : > { %8581 = vst [vmem:[%s18221_s7 + $0x100] sm:$0xff] %v8471_v37  ;;  %v8473_v9 = vadd.f32 %v8472_v6, %v8280_v0  ;;  %v8283_v3 = vpop.f32.mrf.mxu0  ;;  %v7918_v37 = vadd.f32 %v20386_v58, %v17864_v60 }
 0x67c   : > { %v8474_v18 = vpop.f32.mrf.mxu1  ;;  %v8284_v1 = vadd.f32 %v8283_v3, %v8091_v47  ;;  %v20387_v47 = vld [vmem:[#allocation156_spill] sm:$0xff] }
 0x67d   : > { %8582 = vst [vmem:[%s18221_s7 + $0x108] sm:$0xff] %v8473_v9  ;;  %v8475_v49 = vadd.f32 %v8474_v18, %v8282_v61  ;;  %v8109_v9 = vadd.f32 %v20387_v47, %v7916_v34 }
 0x67e   : > { %v8476_v8 = vpop.f32.mrf.mxu1 }
 0x67f   : > { %8583 = vst [vmem:[%s18221_s7 + $0x110] sm:$0xff] %v8475_v49  ;;  %v8477_v15 = vadd.f32 %v8476_v8, %v8284_v1  ;;  %v20388_v49 = vld [vmem:[#allocation158_spill] sm:$0xff]  ;;  %v20389_v8 = vld [vmem:[#allocation57_spill] sm:$0xff] }
 0x680   : > { %v8111_v1 = vadd.f32 %v20388_v49, %v7918_v37 }
 0x681   : > { %8584 = vst [vmem:[%s18221_s7 + $0x118] sm:$0xff] %v8477_v15  ;;  %v7922_v15 = vadd.f32 %v20389_v8, %v17794_v11 }
 0x68f   : > { %v8287_v50 = vpop.f32.mrf.mxu0 }
 0x690   : > { %v8288_v46 = vadd.f32 %v8287_v50, %v8095_v29 }
 0x691   : > { %v8289_v42 = vpop.f32.mrf.mxu0 }
 0x692   : > { %v8290_v13 = vadd.f32 %v8289_v42, %v8097_v24  ;;  %v7924_v42 = vadd.f32 %v20390_v21, %v17864_v60  ;;  %v7926_v24 = vadd.f32 %v20392_v36, %v17794_v11 }
 0x693   : > { %v8291_v28 = vpop.f32.mrf.mxu0 }
 0x694   : > { %v8292_v20 = vadd.f32 %v8291_v28, %v8099_v40  ;;  %v8115_v28 = vadd.f32 %v20391_v55, %v7922_v15  ;;  %v8117_v40 = vadd.f32 %v20393_v32, %v7924_v42  ;;  %v20407_v32 = vld [vmem:[#allocation164_spill] sm:$0xff] }
 0x695   : > { %v8293_v22 = vpop.f32.mrf.mxu0 }
 0x696   : > { %v8294_v52 = vadd.f32 %v8293_v22, %v8101_v39  ;;  %v8119_v39 = vadd.f32 %v20395_v23, %v7926_v24 }
 0x69a   : > { %v8480_v62 = vpop.f32.mrf.mxu1 }
 0x69b   : > { %v8481_v7 = vadd.f32 %v8480_v62, %v8288_v46 }
 0x69c   : > { %v8482_v10 = vpop.f32.mrf.mxu1 }
 0x69d   : > { %8585 = vst [vmem:[%s18221_s7 + $0x120] sm:$0xff] %v8481_v7  ;;  %v8483_v59 = vadd.f32 %v8482_v10, %v8290_v13  ;;  %v20394_v13 = vld [vmem:[#allocation39_spill] sm:$0xff]  ;;  %v20396_v10 = vld [vmem:[#allocation53_spill] sm:$0xff] }
 0x69e   : > { %v8484_v2 = vpop.f32.mrf.mxu1  ;;  %v7928_v17 = vadd.f32 %v20394_v13, %v17864_v60  ;;  %v20408_v13 = vld [vmem:[#allocation90_spill] sm:$0xff] }
 0x69f   : > { %8586 = vst [vmem:[%s18221_s7 + $0x128] sm:$0xff] %v8483_v59  ;;  %v8485_v19 = vadd.f32 %v8484_v2, %v8292_v20 }
 0x6a0   : > { %v8486_v0 = vpop.f32.mrf.mxu1  ;;  %v8121_v59 = vadd.f32 %v20396_v10, %v7928_v17  ;;  %v7946_v17 = vadd.f32 %v20408_v13, %v17794_v11 }
 0x6a1   : > { %v8297_v30 = vpop.f32.mrf.mxu0  ;;  %8587 = vst [vmem:[%s18221_s7 + $0x130] sm:$0xff] %v8485_v19  ;;  %v8487_v41 = vadd.f32 %v8486_v0, %v8294_v52  ;;  %v20399_v0 = vld [vmem:[#allocation68_spill] sm:$0xff] }
 0x6a2   : > { %v8298_v6 = vadd.f32 %v8297_v30, %v8105_v53  ;;  %v20397_v53 = vld [vmem:[#allocation56_spill] sm:$0xff] }
 0x6a3   : > { %v8299_v31 = vpop.f32.mrf.mxu0  ;;  %8588 = vst [vmem:[%s18221_s7 + $0x138] sm:$0xff] %v8487_v41  ;;  %v7932_v43 = vadd.f32 %v20397_v53, %v17794_v11  ;;  %v20400_v41 = vld [vmem:[#allocation161_spill] sm:$0xff] }
 0x6a4   : > { %v8300_v61 = vadd.f32 %v8299_v31, %v8107_v45  ;;  %v8490_v18 = vpop.f32.mrf.mxu1  ;;  %v7934_v45 = vadd.f32 %v20398_v44, %v17864_v60  ;;  %v7936_v31 = vadd.f32 %v20400_v41, %v17794_v11 }
 0x6a5   : > { %v8301_v3 = vpop.f32.mrf.mxu0  ;;  %v8491_v26 = vadd.f32 %v8490_v18, %v8298_v6  ;;  %v8125_v6 = vadd.f32 %v20399_v0, %v7932_v43  ;;  %v20412_v43 = vld [vmem:[#allocation92_spill] sm:$0xff] }
 0x6a6   : > { %v8302_v38 = vadd.f32 %v8301_v3, %v8109_v9  ;;  %v8492_v50 = vpop.f32.mrf.mxu1  ;;  %v20402_v3 = vld [vmem:[#allocation31_spill] sm:$0xff] }
 0x6a7   : > { %v8303_v5 = vpop.f32.mrf.mxu0  ;;  %8589 = vst [vmem:[%s18221_s7 + $0x140] sm:$0xff] %v8491_v26  ;;  %v8493_v16 = vadd.f32 %v8492_v50, %v8300_v61  ;;  %v20401_v61 = vld [vmem:[#allocation160_spill] sm:$0xff]  ;;  %v7938_v49 = vadd.f32 %v20402_v3, %v17864_v60  ;;  %v20403_v26 = vld [vmem:[#allocation162_spill] sm:$0xff]  ;;  %v20404_v50 = vld [vmem:[#allocation59_spill] sm:$0xff] }
 0x6a8   : > { %v8304_v29 = vadd.f32 %v8303_v5, %v8111_v1  ;;  %v8494_v25 = vpop.f32.mrf.mxu1  ;;  %v8127_v18 = vadd.f32 %v20401_v61, %v7934_v45  ;;  %v7942_v5 = vadd.f32 %v20404_v50, %v17794_v11  ;;  %v20413_v45 = vld [vmem:[#allocation168_spill] sm:$0xff] }
 0x6a9   : > { %8590 = vst [vmem:[%s18221_s7 + $0x148] sm:$0xff] %v8493_v16  ;;  %v8495_v63 = vadd.f32 %v8494_v25, %v8302_v38  ;;  %v8129_v38 = vadd.f32 %v20403_v26, %v7936_v31  ;;  %v20405_v25 = vld [vmem:[#allocation163_spill] sm:$0xff] }
 0x6aa   : > { %v8496_v57 = vpop.f32.mrf.mxu1  ;;  %v8307_v46 = vpop.f32.mrf.mxu0  ;;  %v8131_v55 = vadd.f32 %v20405_v25, %v7938_v49 }
 0x6ab   : > { %8591 = vst [vmem:[%s18221_s7 + $0x150] sm:$0xff] %v8495_v63  ;;  %v8497_v27 = vadd.f32 %v8496_v57, %v8304_v29  ;;  %v8308_v62 = vadd.f32 %v8307_v46, %v8115_v28  ;;  %v20406_v28 = vld [vmem:[#allocation91_spill] sm:$0xff] }
 0x6ac   : > { %v8309_v22 = vpop.f32.mrf.mxu0  ;;  %v7944_v36 = vadd.f32 %v20406_v28, %v17864_v60 }
 0x6ad   : > { %8592 = vst [vmem:[%s18221_s7 + $0x158] sm:$0xff] %v8497_v27  ;;  %v8500_v7 = vpop.f32.mrf.mxu1  ;;  %v8310_v20 = vadd.f32 %v8309_v22, %v8117_v40  ;;  %v8135_v40 = vadd.f32 %v20407_v32, %v7942_v5 }
 0x6ae   : > { %v8501_v12 = vadd.f32 %v8500_v7, %v8308_v62  ;;  %v8311_v54 = vpop.f32.mrf.mxu0 }
 0x6af   : > { %v8502_v52 = vpop.f32.mrf.mxu1  ;;  %v8312_v56 = vadd.f32 %v8311_v54, %v8119_v39  ;;  %v20409_v39 = vld [vmem:[#allocation165_spill] sm:$0xff] }
 0x6b0   : > { %8593 = vst [vmem:[%s18221_s7 + $0x160] sm:$0xff] %v8501_v12  ;;  %v8503_v34 = vadd.f32 %v8502_v52, %v8310_v20  ;;  %v8313_v2 = vpop.f32.mrf.mxu0  ;;  %v8137_v7 = vadd.f32 %v20409_v39, %v7944_v36  ;;  %v20410_v20 = vld [vmem:[#allocation167_spill] sm:$0xff] }
 0x6b1   : > { %v8504_v19 = vpop.f32.mrf.mxu1  ;;  %v8314_v30 = vadd.f32 %v8313_v2, %v8121_v59  ;;  %v7948_v12 = vadd.f32 %v20410_v20, %v17864_v60 }
 0x6b2   : > { %8594 = vst [vmem:[%s18221_s7 + $0x168] sm:$0xff] %v8503_v34  ;;  %v8505_v58 = vadd.f32 %v8504_v19, %v8312_v56  ;;  %v20411_v56 = vld [vmem:[#allocation166_spill] sm:$0xff]  ;;  %v7952_v34 = vadd.f32 %v20412_v43, %v17794_v11 }
 0x6b3   : > { %v8506_v37 = vpop.f32.mrf.mxu1  ;;  %v8139_v53 = vadd.f32 %v20411_v56, %v7946_v17 }
 0x6b4   : > { %8595 = vst [vmem:[%s18221_s7 + $0x170] sm:$0xff] %v8505_v58  ;;  %v8507_v47 = vadd.f32 %v8506_v37, %v8314_v30  ;;  %v8141_v58 = vadd.f32 %v20413_v45, %v7948_v12  ;;  %v20414_v37 = vld [vmem:[#allocation28_spill] sm:$0xff] }
 0x6b5   : > { %v8317_v9 = vpop.f32.mrf.mxu0  ;;  %v7954_v0 = vadd.f32 %v20414_v37, %v17864_v60 }
 0x6b6   : > { %8596 = vst [vmem:[%s18221_s7 + $0x178] sm:$0xff] %v8507_v47  ;;  %v8318_v1 = vadd.f32 %v8317_v9, %v8125_v6  ;;  %v20415_v9 = vld [vmem:[#allocation169_spill] sm:$0xff] }
 0x6b7   : > { %v8319_v15 = vpop.f32.mrf.mxu0  ;;  %v8145_v61 = vadd.f32 %v20415_v9, %v7952_v34 }
 0x6b8   : > { %v8510_v8 = vpop.f32.mrf.mxu1  ;;  %v8320_v42 = vadd.f32 %v8319_v15, %v8127_v18 }
 0x6b9   : > { %v8511_v21 = vadd.f32 %v8510_v8, %v8318_v1  ;;  %v8321_v29 = vpop.f32.mrf.mxu0  ;;  %v20416_v1 = vld [vmem:[#allocation170_spill] sm:$0xff] }
 0x6ba   : > { %v8512_v16 = vpop.f32.mrf.mxu1  ;;  %v8322_v63 = vadd.f32 %v8321_v29, %v8129_v38  ;;  %v8147_v8 = vadd.f32 %v20416_v1, %v7954_v0 }
 0x6bb   : > { %8597 = vst [vmem:[%s18221_s7 + $0x180] sm:$0xff] %v8511_v21  ;;  %v8513_v24 = vadd.f32 %v8512_v16, %v8320_v42  ;;  %v8323_v46 = vpop.f32.mrf.mxu0 }
 0x6bc   : > { %v8514_v57 = vpop.f32.mrf.mxu1  ;;  %v8324_v62 = vadd.f32 %v8323_v46, %v8131_v55 }
 0x6bd   : > { %8598 = vst [vmem:[%s18221_s7 + $0x188] sm:$0xff] %v8513_v24  ;;  %v8515_v27 = vadd.f32 %v8514_v57, %v8322_v63 }
 0x6be   : > { %v8516_v22 = vpop.f32.mrf.mxu1  ;;  %v8327_v23 = vpop.f32.mrf.mxu0 }
 0x6bf   : > { %8599 = vst [vmem:[%s18221_s7 + $0x190] sm:$0xff] %v8515_v27  ;;  %v8517_v54 = vadd.f32 %v8516_v22, %v8324_v62  ;;  %v8328_v10 = vadd.f32 %v8327_v23, %v8135_v40 }
 0x6c0   : > { %v8329_v52 = vpop.f32.mrf.mxu0 }
 0x6c1   : > { %v8520_v59 = vpop.f32.mrf.mxu1  ;;  %8600 = vst [vmem:[%s18221_s7 + $0x198] sm:$0xff] %v8517_v54  ;;  %v8330_v19 = vadd.f32 %v8329_v52, %v8137_v7 }
 0x6c2   : > { %v8521_v2 = vadd.f32 %v8520_v59, %v8328_v10  ;;  %v8331_v44 = vpop.f32.mrf.mxu0 }
 0x6c3   : > { %v8522_v30 = vpop.f32.mrf.mxu1  ;;  %v8332_v41 = vadd.f32 %v8331_v44, %v8139_v53 }
 0x6c4   : > { %8601 = vst [vmem:[%s18221_s7 + $0x1a0] sm:$0xff] %v8521_v2  ;;  %v8523_v6 = vadd.f32 %v8522_v30, %v8330_v19  ;;  %v8333_v47 = vpop.f32.mrf.mxu0 }
 0x6c5   : > { %v8524_v31 = vpop.f32.mrf.mxu1  ;;  %v8334_v18 = vadd.f32 %v8333_v47, %v8141_v58 }
 0x6c6   : > { %8602 = vst [vmem:[%s18221_s7 + $0x1a8] sm:$0xff] %v8523_v6  ;;  %v8525_v11 = vadd.f32 %v8524_v31, %v8332_v41 }
 0x6c7   : > { %v8526_v3 = vpop.f32.mrf.mxu1 }
 0x6c8   : > { %v8337_v49 = vpop.f32.mrf.mxu0  ;;  %8603 = vst [vmem:[%s18221_s7 + $0x1b0] sm:$0xff] %v8525_v11  ;;  %v8527_v15 = vadd.f32 %v8526_v3, %v8334_v18 }
 0x6c9   : > { %v8338_v60 = vadd.f32 %v8337_v49, %v8145_v61 }
 0x6ca   : > { %v8339_v38 = vpop.f32.mrf.mxu0  ;;  %8604 = vst [vmem:[%s18221_s7 + $0x1b8] sm:$0xff] %v8527_v15 }
 0x6cb   : > { %v8530_v26 = vpop.f32.mrf.mxu1  ;;  %v8340_v5 = vadd.f32 %v8339_v38, %v8147_v8 }
 0x6cc   : > { %v8531_v50 = vadd.f32 %v8530_v26, %v8338_v60  ;;  %v8341_v42 = vpop.f32.mrf.mxu0 }
 0x6cd   : > { %v8532_v21 = vpop.f32.mrf.mxu1  ;;  %v8342_v29 = vadd.f32 %v8341_v42, %v18178_v4 }
 0x6ce   : > { %8605 = vst [vmem:[%s18221_s7 + $0x1c0] sm:$0xff] %v8531_v50  ;;  %v8533_v16 = vadd.f32 %v8532_v21, %v8340_v5  ;;  %v8343_v55 = vpop.f32.mrf.mxu0 }
 0x6cf   : > { %v8534_v25 = vpop.f32.mrf.mxu1  ;;  %v8344_v36 = vadd.f32 %v8343_v55, %v18181_v48 }
 0x6d0   : > { %8606 = vst [vmem:[%s18221_s7 + $0x1c8] sm:$0xff] %v8533_v16  ;;  %v8535_v28 = vadd.f32 %v8534_v25, %v8342_v29 }
 0x6d1   : > { %v8536_v24 = vpop.f32.mrf.mxu1  ;;  %v8347_v63 = vpop.f32.mrf.mxu0 }
 0x6d2   : > { %8607 = vst [vmem:[%s18221_s7 + $0x1d0] sm:$0xff] %v8535_v28  ;;  %v8537_v57 = vadd.f32 %v8536_v24, %v8344_v36  ;;  %v8348_v46 = vadd.f32 %v8347_v63, %v18186_v14 }
 0x6d3   : > { %v8540_v32 = vpop.f32.mrf.mxu1  ;;  %v8349_v40 = vpop.f32.mrf.mxu0 }
 0x6d4   : > { %8608 = vst [vmem:[%s18221_s7 + $0x1d8] sm:$0xff] %v8537_v57  ;;  %v8541_v4 = vadd.f32 %v8540_v32, %v8348_v46  ;;  %v8350_v13 = vadd.f32 %v8349_v40, %v18189_v33 }
 0x6d5   : > { %v8542_v17 = vpop.f32.mrf.mxu1  ;;  %v8351_v27 = vpop.f32.mrf.mxu0 }
 0x6d6   : > { %8609 = vst [vmem:[%s18221_s7 + $0x1e0] sm:$0xff] %v8541_v4  ;;  %v8543_v48 = vadd.f32 %v8542_v17, %v8350_v13  ;;  %v8352_v62 = vadd.f32 %v8351_v27, %v18192_v35 }
 0x6d7   : > { %v8544_v22 = vpop.f32.mrf.mxu1  ;;  %v8353_v14 = vpop.f32.mrf.mxu0 }
 0x6d8   : > { %8610 = vst [vmem:[%s18221_s7 + $0x1e8] sm:$0xff] %v8543_v48  ;;  %v8545_v23 = vadd.f32 %v8544_v22, %v8352_v62  ;;  %v8354_v39 = vadd.f32 %v8353_v14, %v18199_v51 }
 0x6d9   : > { %v8546_v7 = vpop.f32.mrf.mxu1 }
 0x6da   : > { %8611 = vst [vmem:[%s18221_s7 + $0x1f0] sm:$0xff] %v8545_v23  ;;  %v8547_v33 = vadd.f32 %v8546_v7, %v8354_v39 }
 0x6dc   : > { %8612 = vst [vmem:[%s18221_s7 + $0x1f8] sm:$0xff] %v8547_v33 }
 0x6dd   : > { %11039 = shalt.err (!%p11036_p1)
}
 0x6de   : > { %s11040_s7 = scalar_lea.hbm %s18473_s27, 8192  ;;  %s11044_s12 = scalar_lea.hbm %s18525_s5, 16384 }
 0x6df   : > { %p11041_p8 = scmp.ne.s32.totalorder %s18473_s27, %s11040_s7  ;;  %p11045_p13 = scmp.lt.s32.totalorder %s18473_s27, %s18525_s5 }
 0x6e0   : > { %p11046_p2 = scmp.lt.s32.totalorder %s11044_s12, %s11040_s7 }
 0x6e1   : > { %p11042_p10 = pnand %p11041_p8, %p20364_p6 }
 0x6e2   : > { %p11047_p4 = por %p11046_p2, %p11045_p13 }
 0x6e3   : > { %p11043_p11 = pneg %p11042_p10 }
 0x6e5   : > { %p11048_p12 = pnand %p11047_p4, %p11043_p11 }
 0x6e7   : > { %11051 = shalt.err (!%p11048_p12)
}
 0x6e8   : > { %s11118_s14 = smov 256   ;;  %s11119_s8 = smov 16  }
 0x6e9   : > { %9599 = dma.vmem_to_hbm [thread:$0]  (%p20364_p6), %s18475_s10, 8192, %s18473_s27, %s8614_s25, %s11118_s14, %s11118_s14, %s11119_s8  }
 0x6ea PF: > { %s8665_s29 = sand.u32 1, %s11090_s21   ;;  %p20417_p0 = scmp.ne.s32.totalorder %s18887_s28, 0 }
 0x6eb   : > { %p20418_p5 = scmp.ge.s32.totalorder %s11102_s24, 2  ;;  %s8666_s20 = scalar_lea.sflag [#allocation4], %s8665_s29 }
 0x6ed   : > { %p9618_p3 = pnand %p20418_p5, %p20417_p0 }
 0x6ef   : > { %p9619_p7 = pneg %p9618_p3 }
 0x6f1   : > { %11081 = dma.done.wait (%p9619_p7), %s8666_s20, 8192  }
 0x6f2   : > { %11083 = vsyncadd (%p9619_p7), %s8666_s20, 4294959104  ;;  %s8675_s30 = scalar_lea.sflag [#allocation12], %s8665_s29 }
 0x6f3   : > { %11085 = dma.done.wait (%p9619_p7), %s8675_s30, 16384  }
 0x6f4   : > { %11087 = vsyncadd (%p9619_p7), %s8675_s30, 4294950912  ;;  %p25_p6 = scmp.ge.s32.totalorder %s11235_s11, 4   ;;  %s20419_s21 = smov %s11094_s22 }
 0x6f5   : > { %s20420_s22 = smov %s11098_s23  ;;  %s20421_s23 = smov %s11245_s15 }
 0x6f6   : > { %s20422_s24 = smov %s11235_s11  ;;  %27 = sbr.rel (!%p25_p6) target bundleno = 9 (0x9), region = 114 }
 0x6fb   :  { %8680 = vsyncpa [#allocation3], 1 }
 0x6fc   :  { %8682 = vsyncpa [#allocation3 + $0x1], 1 }
 0x6fd   :  { %8683 = vsyncpa [#allocation6], 1 }
 0x6fe   :  { %8684 = vsyncpa [#allocation9], 1 }
 0x6ff   :  { %8685 = vsyncpa [#allocation4], 1 }
 0x700   :  { %8687 = vsyncpa [#allocation4 + $0x1], 1 }
 0x701   :  { %8688 = vsyncpa [#allocation12], 1 }
 0x702   :  { %8690 = vsyncpa [#allocation12 + $0x1], 1 }

</bundles_post_ra>
